<compile_context>
chip_gen: v5e
topology: v5e:2x2
jax: 0.10.0
libtpu: 0.0.40
codegen_flags: <defaults>
</compile_context>

<pallas_src>
import functools
import math

import jax
import jax.numpy as jnp
from jax import lax
from jax.experimental import pallas as pl
from jax.experimental.pallas import tpu as pltpu

F32 = jnp.float32
BF16 = jnp.bfloat16
BN_EPS = 1e-5


def _round_up(x, m):
    return (x + m - 1) // m * m


# ----------------------------------------------------------------------------
# Pallas kernel 1: single-step fused GEMM  out = act((X @ W) * scale + shift)
#   - full K in one tile (no k grid axis, no accumulator scratch)
#   - bf16 operands, f32 accumulate / epilogue
# ----------------------------------------------------------------------------
def _gemm_kernel(x_ref, w_ref, ss_ref, o_ref, *, act):
    y = jnp.dot(x_ref[...], w_ref[...], preferred_element_type=jnp.float32)
    y = y * ss_ref[0:1, :] + ss_ref[1:2, :]
    if act == "relu":
        y = jnp.maximum(y, 0.0)
    o_ref[...] = y.astype(o_ref.dtype)


def pallas_matmul(x, w, scale_shift=None, act="none"):
    """x: (M, K), w: (K, N), scale_shift: (2, N) [row0=scale, row1=shift]."""
    M, K = x.shape
    K2, N = w.shape
    assert K == K2
    if scale_shift is None:
        scale_shift = jnp.stack(
            [jnp.ones((N,), F32), jnp.zeros((N,), F32)], axis=0)

    xb = x.astype(BF16)
    wb = w.astype(BF16)

    Kp = _round_up(K, 128)
    Np = _round_up(N, 128)
    if M >= 512:
        TM, Mp = 512, _round_up(M, 512)
    else:
        TM = _round_up(M, 16)
        Mp = TM
    TN = 256 if (Np % 256 == 0) else 128

    if (Mp, Kp) != (M, K):
        xb = jnp.pad(xb, ((0, Mp - M), (0, Kp - K)))
    if (Kp, Np) != (K, N):
        wb = jnp.pad(wb, ((0, Kp - K), (0, Np - N)))
    ss = scale_shift.astype(F32)
    if Np != N:
        ss = jnp.pad(ss, ((0, 0), (0, Np - N)))

    grid = (Mp // TM, Np // TN)
    out = pl.pallas_call(
        functools.partial(_gemm_kernel, act=act),
        out_shape=jax.ShapeDtypeStruct((Mp, Np), F32),
        grid=grid,
        in_specs=[
            pl.BlockSpec((TM, Kp), lambda i, j: (i, 0)),
            pl.BlockSpec((Kp, TN), lambda i, j: (0, j)),
            pl.BlockSpec((2, TN), lambda i, j: (0, j)),
        ],
        out_specs=pl.BlockSpec((TM, TN), lambda i, j: (i, j)),
        compiler_params=pltpu.CompilerParams(
            dimension_semantics=("parallel", "parallel")),
    )(xb, wb, ss)
    if (Mp, Np) != (M, N):
        out = out[:M, :N]
    return out


# ----------------------------------------------------------------------------
# Pallas kernel 2: fused Conv2d(3x3, pad=1) + folded BatchNorm + ReLU.
# Reads the zero-padded NHWC activation once per batch; the 9 (dy,dx) taps are
# shifted window loads accumulated in-register (no im2col in HBM).
# ----------------------------------------------------------------------------
def _conv3x3_kernel(x_ref, w_ref, ss_ref, o_ref, *, H, Wp, Cin, Cout):
    # x_ref: (H+2, Wp+2, Cin) f32 (zero-padded), w_ref: (9, Cin, Cout) bf16,
    # ss_ref: (2, Cout) f32 (scale, shift), o_ref: (H*Wp, Cout) f32
    acc = jnp.zeros((H * Wp, Cout), jnp.float32)
    for dy in range(3):
        for dx in range(3):
            tap = x_ref[dy:dy + H, dx:dx + Wp, :]          # (H, Wp, Cin)
            tap = tap.reshape(H * Wp, Cin).astype(BF16)
            acc = acc + jnp.dot(tap, w_ref[dy * 3 + dx],
                                preferred_element_type=jnp.float32)
    y = acc * ss_ref[0:1, :] + ss_ref[1:2, :]
    o_ref[...] = jnp.maximum(y, 0.0)


def conv3x3_bn_relu(x, w9, ss):
    """x: (B, H, W, Cin) NHWC f32; w9: (9, Cin, Cout) bf16; ss: (2, Cout) f32."""
    B, Hc, Wc, Cin = x.shape
    Cout = w9.shape[-1]
    Wp = _round_up(Wc, 8)   # width padded so in-kernel (H,Wp,Cin)->(H*Wp,Cin) is layout-clean
    xp = jnp.pad(x, ((0, 0), (1, 1), (1, 1 + (Wp - Wc)), (0, 0)))
    out = pl.pallas_call(
        functools.partial(_conv3x3_kernel, H=Hc, Wp=Wp, Cin=Cin, Cout=Cout),
        out_shape=jax.ShapeDtypeStruct((B, Hc * Wp, Cout), F32),
        grid=(B,),
        in_specs=[
            pl.BlockSpec((None, Hc + 2, Wp + 2, Cin), lambda b: (b, 0, 0, 0)),
            pl.BlockSpec((9, Cin, Cout), lambda b: (0, 0, 0)),
            pl.BlockSpec((2, Cout), lambda b: (0, 0)),
        ],
        out_specs=pl.BlockSpec((None, Hc * Wp, Cout), lambda b: (b, 0, 0)),
        compiler_params=pltpu.CompilerParams(
            dimension_semantics=("parallel",)),
    )(xp, w9, ss)
    out = out.reshape(B, Hc, Wp, Cout)
    if Wp != Wc:
        out = out[:, :, :Wc, :]
    return out


# ----------------------------------------------------------------------------
# Parameters (PyTorch layouts kept for the reference; kernel-ready tensors
# pre-transposed / pre-cast once here).
# ----------------------------------------------------------------------------
def make_deconv2d_block_params(key, in_channels, out_channels):
    ks = jax.random.split(key, 6)

    def uni(k, shape, fan_in):
        bound = 1.0 / math.sqrt(fan_in)
        return jax.random.uniform(k, shape, F32, -bound, bound)

    # PyTorch layouts
    wt = uni(ks[0], (in_channels, out_channels, 2, 2), in_channels * 4)   # ConvTranspose2d
    bt = uni(ks[1], (out_channels,), in_channels * 4)
    wc = uni(ks[2], (out_channels, out_channels, 3, 3), out_channels * 9)  # Conv2d OIHW
    bc = uni(ks[3], (out_channels,), out_channels * 9)
    gamma = 1.0 + 0.1 * jax.random.normal(ks[4], (out_channels,), F32)     # BatchNorm2d
    beta = 0.1 * jax.random.normal(ks[5], (out_channels,), F32)

    # --- kernel-ready (pre-transposed / pre-packed / bf16) ---
    wd_mat = jnp.transpose(wt, (0, 2, 3, 1)).reshape(
        in_channels, 4 * out_channels).astype(BF16)            # columns = (ky, kx, cout)
    ss_deconv = jnp.stack(
        [jnp.ones((4 * out_channels,), F32), jnp.tile(bt, 4)], axis=0)
    wc9 = jnp.transpose(wc, (2, 3, 1, 0)).reshape(
        9, out_channels, out_channels).astype(BF16)             # tap = dy*3+dx
    # eval-mode BN with freshly-initialised running stats (mean=0, var=1) folded:
    bn_scale = gamma / jnp.sqrt(1.0 + BN_EPS)
    ss_conv = jnp.stack([bn_scale, bn_scale * bc + beta], axis=0)

    return dict(wt=wt, bt=bt, wc=wc, bc=bc, gamma=gamma, beta=beta,
                wd_mat=wd_mat, ss_deconv=ss_deconv, wc9=wc9, ss_conv=ss_conv)


# ----------------------------------------------------------------------------
# Forward pass (public API: NCHW in / NCHW out, like PyTorch)
# ----------------------------------------------------------------------------
def deconv2d_block_forward(x_nchw, params):
    x = jnp.transpose(x_nchw, (0, 2, 3, 1)).astype(F32)      # NHWC
    B, H, W, Cin = x.shape
    Cout = params["ss_conv"].shape[1]

    # ConvTranspose2d(k=2, s=2, pad=0): one full-K Pallas GEMM + bias
    y = pallas_matmul(x.reshape(B * H * W, Cin), params["wd_mat"],
                      scale_shift=params["ss_deconv"], act="none")
    y = y.reshape(B, H, W, 2, 2, Cout)
    # sub-pixel interleave to (B, 2H, 2W, Cout)
    # TODO(synk): fold this interleave into the conv kernel (phase-planar layout)
    y = jnp.transpose(y, (0, 1, 3, 2, 4, 5)).reshape(B, 2 * H, 2 * W, Cout)

    # Conv2d(3x3, pad=1) + BatchNorm (eval, folded) + ReLU, fused in one kernel
    z = conv3x3_bn_relu(y, params["wc9"], params["ss_conv"])

    # Dropout: identity in eval mode.
    return jnp.transpose(z, (0, 3, 1, 2))                    # NCHW


# ----------------------------------------------------------------------------
# Pure-JAX f32 reference (follows the PyTorch definitions exactly)
# ----------------------------------------------------------------------------
def reference_forward(x_nchw, p):
    x = jnp.transpose(x_nchw, (0, 2, 3, 1)).astype(F32)
    B, H, W, Cin = x.shape
    Cout = p["wt"].shape[1]
    # ConvTranspose2d: out[2i+ky, 2j+kx, co] = sum_ci x[i,j,ci] * wt[ci,co,ky,kx] + bt
    up = jnp.einsum("bhwi,ioyx->bhywxo", x, p["wt"],
                    precision=lax.Precision.HIGHEST)
    up = up.reshape(B, 2 * H, 2 * W, Cout) + p["bt"][None, None, None, :]
    # Conv2d 3x3 pad 1
    w_hwio = jnp.transpose(p["wc"], (2, 3, 1, 0))
    conv = lax.conv_general_dilated(
        up, w_hwio, window_strides=(1, 1), padding=((1, 1), (1, 1)),
        dimension_numbers=("NHWC", "HWIO", "NHWC"),
        precision=lax.Precision.HIGHEST) + p["bc"][None, None, None, :]
    # BatchNorm2d eval with running_mean=0, running_var=1
    bn = conv / jnp.sqrt(1.0 + BN_EPS) * p["gamma"] + p["beta"]
    out = jnp.maximum(bn, 0.0)
    return jnp.transpose(out, (0, 3, 1, 2))


if __name__ == "__main__":
    B, Cin, Cout, H, W = 2, 64, 32, 16, 16

    key = jax.random.PRNGKey(0)
    k_in, k_par = jax.random.split(key)
    params = make_deconv2d_block_params(k_par, Cin, Cout)
    x = jax.random.normal(k_in, (B, Cin, H, W), F32)

    fwd = jax.jit(deconv2d_block_forward)
    out = jax.block_until_ready(fwd(x, params))

    assert out.shape == (B, Cout, 2 * H, 2 * W)
    assert bool(jnp.all(jnp.isfinite(out)))
    assert bool(jnp.all(out >= 0.0))          # ReLU output

    ref = jax.block_until_ready(reference_forward(x, params))
    err = jnp.max(jnp.abs(out - ref)) / (jnp.max(jnp.abs(ref)) + 1e-6)
    assert bool(err < 0.05), f"mismatch vs reference: {float(err)}"

    print("KERNEL_OK")
</pallas_src>

<mosaic_0001>
module attributes {stable_mosaic.version = 11 : i64} {
  func.func @_gemm_kernel(%arg0: i32, %arg1: i32, %arg2: memref<512x128xbf16, #tpu.memory_space<vmem>>, %arg3: memref<128x128xbf16, #tpu.memory_space<vmem>>, %arg4: memref<2x128xf32, #tpu.memory_space<vmem>>, %arg5: memref<512x128xf32, #tpu.memory_space<vmem>>) attributes {dimension_semantics = [#tpu.dimension_semantics<parallel>, #tpu.dimension_semantics<parallel>], iteration_bounds = array<i64: 1, 1>, scalar_prefetch = 0 : i64, scratch_operands = 0 : i64, tpu.core_type = #tpu.core_type<tc>, window_params = [{transform_indices = @transform_0, window_bounds = array<i64: 512, 128>}, {transform_indices = @transform_1, window_bounds = array<i64: 128, 128>}, {transform_indices = @transform_2, window_bounds = array<i64: 2, 128>}, {transform_indices = @transform_3, window_bounds = array<i64: 512, 128>}]} {
    %c0 = arith.constant 0 : index
    %c0_0 = arith.constant 0 : index
    %0 = vector.load %arg2[%c0, %c0_0] : memref<512x128xbf16, #tpu.memory_space<vmem>>, vector<512x128xbf16>
    %c0_1 = arith.constant 0 : index
    %c0_2 = arith.constant 0 : index
    %1 = vector.load %arg3[%c0_1, %c0_2] : memref<128x128xbf16, #tpu.memory_space<vmem>>, vector<128x128xbf16>
    %cst = arith.constant dense<0.000000e+00> : vector<512x128xf32>
    %2 = tpu.matmul %0, %1, %cst {dimension_numbers = #tpu.dot_dimension_numbers<[1], [0], [0], [1], [0, 0, 1, 1], [], []>} : vector<512x128xbf16>, vector<128x128xbf16>, vector<512x128xf32> -> vector<512x128xf32>
    %c0_3 = arith.constant 0 : index
    %c0_4 = arith.constant 0 : index
    %3 = vector.load %arg4[%c0_3, %c0_4] : memref<2x128xf32, #tpu.memory_space<vmem>>, vector<1x128xf32>
    %4 = vector.broadcast %3 : vector<1x128xf32> to vector<512x128xf32>
    %5 = arith.mulf %2, %4 : vector<512x128xf32>
    %c1 = arith.constant 1 : index
    %c0_5 = arith.constant 0 : index
    %6 = vector.load %arg4[%c1, %c0_5] : memref<2x128xf32, #tpu.memory_space<vmem>>, vector<1x128xf32>
    %7 = vector.broadcast %6 : vector<1x128xf32> to vector<512x128xf32>
    %8 = arith.addf %5, %7 : vector<512x128xf32>
    %c0_6 = arith.constant 0 : index
    %c0_7 = arith.constant 0 : index
    %9 = vector.load %arg5[%c0_6, %c0_7] : memref<512x128xf32, #tpu.memory_space<vmem>>, vector<512x128xf32>
    tpu.vector_store %arg5[%c0_6, %c0_7], %8 {strides = array<i32>} : memref<512x128xf32, #tpu.memory_space<vmem>>, vector<512x128xf32>,
    return
  }
  func.func @transform_0(%arg0: i32, %arg1: i32) -> (i32, i32) {
    %c0_i32 = arith.constant 0 : i32
    %c0_i32_0 = arith.constant 0 : i32
    return %arg0, %c0_i32 : i32, i32
  }
  func.func @transform_1(%arg0: i32, %arg1: i32) -> (i32, i32) {
    %c0_i32 = arith.constant 0 : i32
    %c0_i32_0 = arith.constant 0 : i32
    return %c0_i32, %arg1 : i32, i32
  }
  func.func @transform_2(%arg0: i32, %arg1: i32) -> (i32, i32) {
    %c0_i32 = arith.constant 0 : i32
    %c0_i32_0 = arith.constant 0 : i32
    return %c0_i32, %arg1 : i32, i32
  }
  func.func @transform_3(%arg0: i32, %arg1: i32) -> (i32, i32) {
    %c0_i32 = arith.constant 0 : i32
    return %arg0, %arg1 : i32, i32
  }
}

module attributes {stable_mosaic.version = 11 : i64} {
  func.func @_conv3x3_kernel(%arg0: i32, %arg1: memref<1x34x34x32xf32, #tpu.memory_space<vmem>>, %arg2: memref<9x32x32xbf16, #tpu.memory_space<vmem>>, %arg3: memref<2x32xf32, #tpu.memory_space<vmem>>, %arg4: memref<1x1024x32xf32, #tpu.memory_space<vmem>>) attributes {dimension_semantics = [#tpu.dimension_semantics<parallel>], iteration_bounds = array<i64: 2>, scalar_prefetch = 0 : i64, scratch_operands = 0 : i64, tpu.core_type = #tpu.core_type<tc>, window_params = [{transform_indices = @transform_0, window_bounds = array<i64: 1, 34, 34, 32>}, {pipeline_mode = #tpu.pipeline_mode<synchronous>, transform_indices = @transform_1, window_bounds = array<i64: 9, 32, 32>}, {pipeline_mode = #tpu.pipeline_mode<synchronous>, transform_indices = @transform_2, window_bounds = array<i64: 2, 32>}, {transform_indices = @transform_3, window_bounds = array<i64: 1, 1024, 32>}]} {
    %cst = arith.constant 0.000000e+00 : f32
    %0 = vector.broadcast %cst : f32 to vector<1024x32xf32>
    %c0 = arith.constant 0 : index
    %c0_0 = arith.constant 0 : index
    %c0_1 = arith.constant 0 : index
    %c0_2 = arith.constant 0 : index
    %1 = vector.load %arg1[%c0, %c0_0, %c0_1, %c0_2] : memref<1x34x34x32xf32, #tpu.memory_space<vmem>>, vector<1x32x32x32xf32>
    %2 = vector.shape_cast %1 : vector<1x32x32x32xf32> to vector<32x32x32xf32>
    %3 = vector.shape_cast %2 : vector<32x32x32xf32> to vector<1024x32xf32>
    %4 = arith.truncf %3 : vector<1024x32xf32> to vector<1024x32xbf16>
    %c0_3 = arith.constant 0 : index
    %c0_4 = arith.constant 0 : index
    %c0_5 = arith.constant 0 : index
    %5 = vector.load %arg2[%c0_3, %c0_4, %c0_5] : memref<9x32x32xbf16, #tpu.memory_space<vmem>>, vector<1x32x32xbf16>
    %6 = vector.shape_cast %5 : vector<1x32x32xbf16> to vector<32x32xbf16>
    %cst_6 = arith.constant dense<0.000000e+00> : vector<1024x32xf32>
    %7 = tpu.matmul %4, %6, %cst_6 {dimension_numbers = #tpu.dot_dimension_numbers<[1], [0], [0], [1], [0, 0, 1, 1], [], []>} : vector<1024x32xbf16>, vector<32x32xbf16>, vector<1024x32xf32> -> vector<1024x32xf32>
    %8 = arith.addf %0, %7 : vector<1024x32xf32>
    %c0_7 = arith.constant 0 : index
    %c0_8 = arith.constant 0 : index
    %c1 = arith.constant 1 : index
    %c0_9 = arith.constant 0 : index
    %9 = vector.load %arg1[%c0_7, %c0_8, %c1, %c0_9] : memref<1x34x34x32xf32, #tpu.memory_space<vmem>>, vector<1x32x32x32xf32>
    %10 = vector.shape_cast %9 : vector<1x32x32x32xf32> to vector<32x32x32xf32>
    %11 = vector.shape_cast %10 : vector<32x32x32xf32> to vector<1024x32xf32>
    %12 = arith.truncf %11 : vector<1024x32xf32> to vector<1024x32xbf16>
    %c1_10 = arith.constant 1 : index
    %c0_11 = arith.constant 0 : index
    %c0_12 = arith.constant 0 : index
    %13 = vector.load %arg2[%c1_10, %c0_11, %c0_12] : memref<9x32x32xbf16, #tpu.memory_space<vmem>>, vector<1x32x32xbf16>
    %14 = vector.shape_cast %13 : vector<1x32x32xbf16> to vector<32x32xbf16>
    %cst_13 = arith.constant dense<0.000000e+00> : vector<1024x32xf32>
    %15 = tpu.matmul %12, %14, %cst_13 {dimension_numbers = #tpu.dot_dimension_numbers<[1], [0], [0], [1], [0, 0, 1, 1], [], []>} : vector<1024x32xbf16>, vector<32x32xbf16>, vector<1024x32xf32> -> vector<1024x32xf32>
    %16 = arith.addf %8, %15 : vector<1024x32xf32>
    %c0_14 = arith.constant 0 : index
    %c0_15 = arith.constant 0 : index
    %c2 = arith.constant 2 : index
    %c0_16 = arith.constant 0 : index
    %17 = vector.load %arg1[%c0_14, %c0_15, %c2, %c0_16] : memref<1x34x34x32xf32, #tpu.memory_space<vmem>>, vector<1x32x32x32xf32>
    %18 = vector.shape_cast %17 : vector<1x32x32x32xf32> to vector<32x32x32xf32>
    %19 = vector.shape_cast %18 : vector<32x32x32xf32> to vector<1024x32xf32>
    %20 = arith.truncf %19 : vector<1024x32xf32> to vector<1024x32xbf16>
    %c2_17 = arith.constant 2 : index
    %c0_18 = arith.constant 0 : index
    %c0_19 = arith.constant 0 : index
    %21 = vector.load %arg2[%c2_17, %c0_18, %c0_19] : memref<9x32x32xbf16, #tpu.memory_space<vmem>>, vector<1x32x32xbf16>
    %22 = vector.shape_cast %21 : vector<1x32x32xbf16> to vector<32x32xbf16>
    %cst_20 = arith.constant dense<0.000000e+00> : vector<1024x32xf32>
    %23 = tpu.matmul %20, %22, %cst_20 {dimension_numbers = #tpu.dot_dimension_numbers<[1], [0], [0], [1], [0, 0, 1, 1], [], []>} : vector<1024x32xbf16>, vector<32x32xbf16>, vector<1024x32xf32> -> vector<1024x32xf32>
    %24 = arith.addf %16, %23 : vector<1024x32xf32>
    %c0_21 = arith.constant 0 : index
    %c1_22 = arith.constant 1 : index
    %c0_23 = arith.constant 0 : index
    %c0_24 = arith.constant 0 : index
    %25 = vector.load %arg1[%c0_21, %c1_22, %c0_23, %c0_24] : memref<1x34x34x32xf32, #tpu.memory_space<vmem>>, vector<1x32x32x32xf32>
    %26 = vector.shape_cast %25 : vector<1x32x32x32xf32> to vector<32x32x32xf32>
    %27 = vector.shape_cast %26 : vector<32x32x32xf32> to vector<1024x32xf32>
    %28 = arith.truncf %27 : vector<1024x32xf32> to vector<1024x32xbf16>
    %c3 = arith.constant 3 : index
    %c0_25 = arith.constant 0 : index
    %c0_26 = arith.constant 0 : index
    %29 = vector.load %arg2[%c3, %c0_25, %c0_26] : memref<9x32x32xbf16, #tpu.memory_space<vmem>>, vector<1x32x32xbf16>
    %30 = vector.shape_cast %29 : vector<1x32x32xbf16> to vector<32x32xbf16>
    %cst_27 = arith.constant dense<0.000000e+00> : vector<1024x32xf32>
    %31 = tpu.matmul %28, %30, %cst_27 {dimension_numbers = #tpu.dot_dimension_numbers<[1], [0], [0], [1], [0, 0, 1, 1], [], []>} : vector<1024x32xbf16>, vector<32x32xbf16>, vector<1024x32xf32> -> vector<1024x32xf32>
    %32 = arith.addf %24, %31 : vector<1024x32xf32>
    %c0_28 = arith.constant 0 : index
    %c1_29 = arith.constant 1 : index
    %c1_30 = arith.constant 1 : index
    %c0_31 = arith.constant 0 : index
    %33 = vector.load %arg1[%c0_28, %c1_29, %c1_30, %c0_31] : memref<1x34x34x32xf32, #tpu.memory_space<vmem>>, vector<1x32x32x32xf32>
    %34 = vector.shape_cast %33 : vector<1x32x32x32xf32> to vector<32x32x32xf32>
    %35 = vector.shape_cast %34 : vector<32x32x32xf32> to vector<1024x32xf32>
    %36 = arith.truncf %35 : vector<1024x32xf32> to vector<1024x32xbf16>
    %c4 = arith.constant 4 : index
    %c0_32 = arith.constant 0 : index
    %c0_33 = arith.constant 0 : index
    %37 = vector.load %arg2[%c4, %c0_32, %c0_33] : memref<9x32x32xbf16, #tpu.memory_space<vmem>>, vector<1x32x32xbf16>
    %38 = vector.shape_cast %37 : vector<1x32x32xbf16> to vector<32x32xbf16>
    %cst_34 = arith.constant dense<0.000000e+00> : vector<1024x32xf32>
    %39 = tpu.matmul %36, %38, %cst_34 {dimension_numbers = #tpu.dot_dimension_numbers<[1], [0], [0], [1], [0, 0, 1, 1], [], []>} : vector<1024x32xbf16>, vector<32x32xbf16>, vector<1024x32xf32> -> vector<1024x32xf32>
    %40 = arith.addf %32, %39 : vector<1024x32xf32>
    %c0_35 = arith.constant 0 : index
    %c1_36 = arith.constant 1 : index
    %c2_37 = arith.constant 2 : index
    %c0_38 = arith.constant 0 : index
    %41 = vector.load %arg1[%c0_35, %c1_36, %c2_37, %c0_38] : memref<1x34x34x32xf32, #tpu.memory_space<vmem>>, vector<1x32x32x32xf32>
    %42 = vector.shape_cast %41 : vector<1x32x32x32xf32> to vector<32x32x32xf32>
    %43 = vector.shape_cast %42 : vector<32x32x32xf32> to vector<1024x32xf32>
    %44 = arith.truncf %43 : vector<1024x32xf32> to vector<1024x32xbf16>
    %c5 = arith.constant 5 : index
    %c0_39 = arith.constant 0 : index
    %c0_40 = arith.constant 0 : index
    %45 = vector.load %arg2[%c5, %c0_39, %c0_40] : memref<9x32x32xbf16, #tpu.memory_space<vmem>>, vector<1x32x32xbf16>
    %46 = vector.shape_cast %45 : vector<1x32x32xbf16> to vector<32x32xbf16>
    %cst_41 = arith.constant dense<0.000000e+00> : vector<1024x32xf32>
    %47 = tpu.matmul %44, %46, %cst_41 {dimension_numbers = #tpu.dot_dimension_numbers<[1], [0], [0], [1], [0, 0, 1, 1], [], []>} : vector<1024x32xbf16>, vector<32x32xbf16>, vector<1024x32xf32> -> vector<1024x32xf32>
    %48 = arith.addf %40, %47 : vector<1024x32xf32>
    %c0_42 = arith.constant 0 : index
    %c2_43 = arith.constant 2 : index
    %c0_44 = arith.constant 0 : index
    %c0_45 = arith.constant 0 : index
    %49 = vector.load %arg1[%c0_42, %c2_43, %c0_44, %c0_45] : memref<1x34x34x32xf32, #tpu.memory_space<vmem>>, vector<1x32x32x32xf32>
    %50 = vector.shape_cast %49 : vector<1x32x32x32xf32> to vector<32x32x32xf32>
    %51 = vector.shape_cast %50 : vector<32x32x32xf32> to vector<1024x32xf32>
    %52 = arith.truncf %51 : vector<1024x32xf32> to vector<1024x32xbf16>
    %c6 = arith.constant 6 : index
    %c0_46 = arith.constant 0 : index
    %c0_47 = arith.constant 0 : index
    %53 = vector.load %arg2[%c6, %c0_46, %c0_47] : memref<9x32x32xbf16, #tpu.memory_space<vmem>>, vector<1x32x32xbf16>
    %54 = vector.shape_cast %53 : vector<1x32x32xbf16> to vector<32x32xbf16>
    %cst_48 = arith.constant dense<0.000000e+00> : vector<1024x32xf32>
    %55 = tpu.matmul %52, %54, %cst_48 {dimension_numbers = #tpu.dot_dimension_numbers<[1], [0], [0], [1], [0, 0, 1, 1], [], []>} : vector<1024x32xbf16>, vector<32x32xbf16>, vector<1024x32xf32> -> vector<1024x32xf32>
    %56 = arith.addf %48, %55 : vector<1024x32xf32>
    %c0_49 = arith.constant 0 : index
    %c2_50 = arith.constant 2 : index
    %c1_51 = arith.constant 1 : index
    %c0_52 = arith.constant 0 : index
    %57 = vector.load %arg1[%c0_49, %c2_50, %c1_51, %c0_52] : memref<1x34x34x32xf32, #tpu.memory_space<vmem>>, vector<1x32x32x32xf32>
    %58 = vector.shape_cast %57 : vector<1x32x32x32xf32> to vector<32x32x32xf32>
    %59 = vector.shape_cast %58 : vector<32x32x32xf32> to vector<1024x32xf32>
    %60 = arith.truncf %59 : vector<1024x32xf32> to vector<1024x32xbf16>
    %c7 = arith.constant 7 : index
    %c0_53 = arith.constant 0 : index
    %c0_54 = arith.constant 0 : index
    %61 = vector.load %arg2[%c7, %c0_53, %c0_54] : memref<9x32x32xbf16, #tpu.memory_space<vmem>>, vector<1x32x32xbf16>
    %62 = vector.shape_cast %61 : vector<1x32x32xbf16> to vector<32x32xbf16>
    %cst_55 = arith.constant dense<0.000000e+00> : vector<1024x32xf32>
    %63 = tpu.matmul %60, %62, %cst_55 {dimension_numbers = #tpu.dot_dimension_numbers<[1], [0], [0], [1], [0, 0, 1, 1], [], []>} : vector<1024x32xbf16>, vector<32x32xbf16>, vector<1024x32xf32> -> vector<1024x32xf32>
    %64 = arith.addf %56, %63 : vector<1024x32xf32>
    %c0_56 = arith.constant 0 : index
    %c2_57 = arith.constant 2 : index
    %c2_58 = arith.constant 2 : index
    %c0_59 = arith.constant 0 : index
    %65 = vector.load %arg1[%c0_56, %c2_57, %c2_58, %c0_59] : memref<1x34x34x32xf32, #tpu.memory_space<vmem>>, vector<1x32x32x32xf32>
    %66 = vector.shape_cast %65 : vector<1x32x32x32xf32> to vector<32x32x32xf32>
    %67 = vector.shape_cast %66 : vector<32x32x32xf32> to vector<1024x32xf32>
    %68 = arith.truncf %67 : vector<1024x32xf32> to vector<1024x32xbf16>
    %c8 = arith.constant 8 : index
    %c0_60 = arith.constant 0 : index
    %c0_61 = arith.constant 0 : index
    %69 = vector.load %arg2[%c8, %c0_60, %c0_61] : memref<9x32x32xbf16, #tpu.memory_space<vmem>>, vector<1x32x32xbf16>
    %70 = vector.shape_cast %69 : vector<1x32x32xbf16> to vector<32x32xbf16>
    %cst_62 = arith.constant dense<0.000000e+00> : vector<1024x32xf32>
    %71 = tpu.matmul %68, %70, %cst_62 {dimension_numbers = #tpu.dot_dimension_numbers<[1], [0], [0], [1], [0, 0, 1, 1], [], []>} : vector<1024x32xbf16>, vector<32x32xbf16>, vector<1024x32xf32> -> vector<1024x32xf32>
    %72 = arith.addf %64, %71 : vector<1024x32xf32>
    %c0_63 = arith.constant 0 : index
    %c0_64 = arith.constant 0 : index
    %73 = vector.load %arg3[%c0_63, %c0_64] : memref<2x32xf32, #tpu.memory_space<vmem>>, vector<1x32xf32>
    %74 = vector.broadcast %73 : vector<1x32xf32> to vector<1024x32xf32>
    %75 = arith.mulf %72, %74 : vector<1024x32xf32>
    %c1_65 = arith.constant 1 : index
    %c0_66 = arith.constant 0 : index
    %76 = vector.load %arg3[%c1_65, %c0_66] : memref<2x32xf32, #tpu.memory_space<vmem>>, vector<1x32xf32>
    %77 = vector.broadcast %76 : vector<1x32xf32> to vector<1024x32xf32>
    %78 = arith.addf %75, %77 : vector<1024x32xf32>
    %cst_67 = arith.constant 0.000000e+00 : f32
    %79 = vector.broadcast %cst_67 : f32 to vector<1024x32xf32>
    %80 = arith.maximumf %78, %79 : vector<1024x32xf32>
    %c0_68 = arith.constant 0 : index
    %c0_69 = arith.constant 0 : index
    %c0_70 = arith.constant 0 : index
    %81 = vector.load %arg4[%c0_68, %c0_69, %c0_70] : memref<1x1024x32xf32, #tpu.memory_space<vmem>>, vector<1x1024x32xf32>
    %82 = vector.shape_cast %81 : vector<1x1024x32xf32> to vector<1024x32xf32>
    %83 = vector.shape_cast %80 : vector<1024x32xf32> to vector<1x1024x32xf32>
    tpu.vector_store %arg4[%c0_68, %c0_69, %c0_70], %83 {strides = array<i32>} : memref<1x1024x32xf32, #tpu.memory_space<vmem>>, vector<1x1024x32xf32>,
    return
  }
  func.func @transform_0(%arg0: i32) -> (i32, i32, i32, i32) {
    %c0_i32 = arith.constant 0 : i32
    %c0_i32_0 = arith.constant 0 : i32
    %c0_i32_1 = arith.constant 0 : i32
    %c0_i32_2 = arith.constant 0 : i32
    return %arg0, %c0_i32, %c0_i32_0, %c0_i32_1 : i32, i32, i32, i32
  }
  func.func @transform_1(%arg0: i32) -> (i32, i32, i32) {
    %c0_i32 = arith.constant 0 : i32
    %c0_i32_0 = arith.constant 0 : i32
    %c0_i32_1 = arith.constant 0 : i32
    %c0_i32_2 = arith.constant 0 : i32
    return %c0_i32, %c0_i32_0, %c0_i32_1 : i32, i32, i32
  }
  func.func @transform_2(%arg0: i32) -> (i32, i32) {
    %c0_i32 = arith.constant 0 : i32
    %c0_i32_0 = arith.constant 0 : i32
    %c0_i32_1 = arith.constant 0 : i32
    return %c0_i32, %c0_i32_0 : i32, i32
  }
  func.func @transform_3(%arg0: i32) -> (i32, i32, i32) {
    %c0_i32 = arith.constant 0 : i32
    %c0_i32_0 = arith.constant 0 : i32
    %c0_i32_1 = arith.constant 0 : i32
    return %arg0, %c0_i32, %c0_i32_0 : i32, i32, i32
  }
}

</mosaic_0001>

<bundles_post_ra>
// kernel: deconv2d_block_forward.2
= control target key start
LH: loop header
LB: loop body
LE: loop exit
PB: predicated region body
PF: predicated region fallthrough
CT: control target
= control target key end

     0   :  { %8 = vsyncpa [#allocation3], 0  ;;  %s971_s15 = smov [#allocation2]   ;;  %s1439_s0 = inlined_call_operand.vmem [shape: bf16[512,128], index: 0, kind: input, shape index: {}]   ;;  %s1440_s1 = inlined_call_operand.vmem [shape: bf16[128,128], index: 1, kind: input, shape index: {}]   ;;  %s1441_s2 = inlined_call_operand.hbm [shape: f32[2,128], index: 2, kind: input, shape index: {}]   ;;  %s1442_s3 = inlined_call_operand.vmem [shape: f32[512,128], index: 3, kind: output, shape index: {}]  }
   0x1   :  { %s18_s14 = sshll.u32 %s1441_s2, 4  ;;  %s20_s16 = sshll.u32 %s971_s15, 4  ;;  %s19_s14 = int_to_ptr.hbm [resolvable:$true] %s18_s14  ;;  %s21_s16 = int_to_ptr.vmem [resolvable:$true] %s20_s16 }
   0x2   :  { %23 = dma.hbm_to_vmem [thread:$0]  %s19_s14, 32, %s21_s16, [#allocation3]  }
   0x3   :  { %969 = dma.done.wait [#allocation3], 32  }
   0x4   :  { %970 = vsyncadd [#allocation3], 4294967264  ;;  %v917_v0 = vld [vmem:[%s1440_s1 + $0x38] sm:$0xff]  ;;  %v916_v1 = vld [vmem:[%s1440_s1 + $0x30] sm:$0xff] }
   0x5   :  { %348 = vmatpush.bf16.msra.mxu0 %v917_v0  ;;  %918 = vmatpush.bf16.msra.mxu1 %v917_v0  ;;  %v915_v2 = vld [vmem:[%s1440_s1 + $0x28] sm:$0xff]  ;;  %v914_v3 = vld [vmem:[%s1440_s1 + $0x20] sm:$0xff]  ;;  %v913_v4 = vld [vmem:[%s1440_s1 + $0x18] sm:$0xff] }
   0x6   :  { %919 = vmatpush.bf16.msra.mxu2 %v917_v0  ;;  %920 = vmatpush.bf16.msra.mxu3 %v917_v0  ;;  %v912_v5 = vld [vmem:[%s1440_s1 + $0x10] sm:$0xff]  ;;  %v911_v6 = vld [vmem:[%s1440_s1 + $0x8] sm:$0xff]  ;;  %v910_v7 = vld [vmem:[%s1440_s1] sm:$0xff] }
   0x7   :  { %v878_v8 = vld [vmem:[%s1439_s0] sm:$0xff]  ;;  %v879_v12 = vld [vmem:[%s1439_s0 + $0x8] sm:$0xff]  ;;  %v880_v16 = vld [vmem:[%s1439_s0 + $0x10] sm:$0xff] }
   0x8   :  { %v886_v9 = vld [vmem:[%s1439_s0 + $0x40] sm:$0xff]  ;;  %v887_v13 = vld [vmem:[%s1439_s0 + $0x48] sm:$0xff]  ;;  %v888_v17 = vld [vmem:[%s1439_s0 + $0x50] sm:$0xff] }
   0x9   :  { %349 = vmatpush.bf16.msra.mxu0 %v916_v1  ;;  %921 = vmatpush.bf16.msra.mxu1 %v916_v1  ;;  %v894_v10 = vld [vmem:[%s1439_s0 + $0x80] sm:$0xff]  ;;  %v895_v14 = vld [vmem:[%s1439_s0 + $0x88] sm:$0xff]  ;;  %v896_v18 = vld [vmem:[%s1439_s0 + $0x90] sm:$0xff] }
   0xa   :  { %922 = vmatpush.bf16.msra.mxu2 %v916_v1  ;;  %923 = vmatpush.bf16.msra.mxu3 %v916_v1  ;;  %v902_v11 = vld [vmem:[%s1439_s0 + $0xc0] sm:$0xff]  ;;  %v903_v15 = vld [vmem:[%s1439_s0 + $0xc8] sm:$0xff]  ;;  %v904_v19 = vld [vmem:[%s1439_s0 + $0xd0] sm:$0xff] }
   0xb   :  { %v881_v20 = vld [vmem:[%s1439_s0 + $0x18] sm:$0xff]  ;;  %v882_v24 = vld [vmem:[%s1439_s0 + $0x20] sm:$0xff]  ;;  %v883_v28 = vld [vmem:[%s1439_s0 + $0x28] sm:$0xff] }
   0xc   :  { %v889_v21 = vld [vmem:[%s1439_s0 + $0x58] sm:$0xff]  ;;  %v890_v25 = vld [vmem:[%s1439_s0 + $0x60] sm:$0xff]  ;;  %v891_v29 = vld [vmem:[%s1439_s0 + $0x68] sm:$0xff] }
   0xd   :  { %350 = vmatpush.bf16.msra.mxu0 %v915_v2  ;;  %924 = vmatpush.bf16.msra.mxu1 %v915_v2  ;;  %v897_v22 = vld [vmem:[%s1439_s0 + $0x98] sm:$0xff]  ;;  %v898_v26 = vld [vmem:[%s1439_s0 + $0xa0] sm:$0xff]  ;;  %v899_v30 = vld [vmem:[%s1439_s0 + $0xa8] sm:$0xff] }
   0xe   :  { %925 = vmatpush.bf16.msra.mxu2 %v915_v2  ;;  %926 = vmatpush.bf16.msra.mxu3 %v915_v2  ;;  %v905_v23 = vld [vmem:[%s1439_s0 + $0xd8] sm:$0xff]  ;;  %v906_v27 = vld [vmem:[%s1439_s0 + $0xe0] sm:$0xff]  ;;  %v907_v31 = vld [vmem:[%s1439_s0 + $0xe8] sm:$0xff] }
   0xf   :  { %v884_v32 = vld [vmem:[%s1439_s0 + $0x30] sm:$0xff]  ;;  %v885_v36 = vld [vmem:[%s1439_s0 + $0x38] sm:$0xff]  ;;  %v1115_v40 = vld [vmem:[#allocation2] ss:$0 sm:$0xff] }
  0x10   :  { %v892_v33 = vld [vmem:[%s1439_s0 + $0x70] sm:$0xff]  ;;  %v893_v37 = vld [vmem:[%s1439_s0 + $0x78] sm:$0xff]  ;;  %v1117_v41 = vld [vmem:[#allocation2 + $0x1] ss:$0 sm:$0xff] }
  0x11   :  { %351 = vmatpush.bf16.msra.mxu0 %v914_v3  ;;  %927 = vmatpush.bf16.msra.mxu1 %v914_v3  ;;  %v900_v34 = vld [vmem:[%s1439_s0 + $0xb0] sm:$0xff]  ;;  %v901_v38 = vld [vmem:[%s1439_s0 + $0xb8] sm:$0xff] }
  0x12   :  { %928 = vmatpush.bf16.msra.mxu2 %v914_v3  ;;  %929 = vmatpush.bf16.msra.mxu3 %v914_v3  ;;  %v908_v35 = vld [vmem:[%s1439_s0 + $0xf0] sm:$0xff]  ;;  %v909_v39 = vld [vmem:[%s1439_s0 + $0xf8] sm:$0xff] }
  0x15   :  { %352 = vmatpush.bf16.msra.mxu0 %v913_v4  ;;  %930 = vmatpush.bf16.msra.mxu1 %v913_v4 }
  0x16   :  { %931 = vmatpush.bf16.msra.mxu2 %v913_v4  ;;  %932 = vmatpush.bf16.msra.mxu3 %v913_v4 }
  0x19   :  { %353 = vmatpush.bf16.msra.mxu0 %v912_v5  ;;  %933 = vmatpush.bf16.msra.mxu1 %v912_v5 }
  0x1a   :  { %934 = vmatpush.bf16.msra.mxu2 %v912_v5  ;;  %935 = vmatpush.bf16.msra.mxu3 %v912_v5 }
  0x1d   :  { %354 = vmatpush.bf16.msra.mxu0 %v911_v6  ;;  %936 = vmatpush.bf16.msra.mxu1 %v911_v6 }
  0x1e   :  { %937 = vmatpush.bf16.msra.mxu2 %v911_v6  ;;  %938 = vmatpush.bf16.msra.mxu3 %v911_v6 }
  0x21   :  { %355 = vmatpush.bf16.msra.mxu0 %v910_v7  ;;  %939 = vmatpush.bf16.msra.mxu1 %v910_v7 }
  0x22   :  { %940 = vmatpush.bf16.msra.mxu2 %v910_v7  ;;  %941 = vmatpush.bf16.msra.mxu3 %v910_v7 }
  0x24   :  { %356 = vmatmul.bf16.vlgmr.msra.gmra.mxu0 %v878_v8  ;;  %396 = vmatmul.bf16.vlgmr.msra.gmra.mxu1 %v886_v9 }
  0x25   :  { %436 = vmatmul.bf16.vlgmr.msra.gmra.mxu2 %v894_v10  ;;  %476 = vmatmul.bf16.vlgmr.msra.gmra.mxu3 %v902_v11 }
  0x34   :  { %361 = vmatmul.bf16.gmra.mxu0 %v879_v12  ;;  %401 = vmatmul.bf16.gmra.mxu1 %v887_v13 }
  0x35   :  { %441 = vmatmul.bf16.gmra.mxu2 %v895_v14  ;;  %481 = vmatmul.bf16.gmra.mxu3 %v903_v15 }
  0x44   :  { %366 = vmatmul.bf16.gmra.mxu0 %v880_v16  ;;  %406 = vmatmul.bf16.gmra.mxu1 %v888_v17 }
  0x45   :  { %446 = vmatmul.bf16.gmra.mxu2 %v896_v18  ;;  %486 = vmatmul.bf16.gmra.mxu3 %v904_v19 }
  0x54   :  { %371 = vmatmul.bf16.gmra.mxu0 %v881_v20  ;;  %411 = vmatmul.bf16.gmra.mxu1 %v889_v21 }
  0x55   :  { %451 = vmatmul.bf16.gmra.mxu2 %v897_v22  ;;  %491 = vmatmul.bf16.gmra.mxu3 %v905_v23 }
  0x64   :  { %376 = vmatmul.bf16.gmra.mxu0 %v882_v24  ;;  %416 = vmatmul.bf16.gmra.mxu1 %v890_v25 }
  0x65   :  { %456 = vmatmul.bf16.gmra.mxu2 %v898_v26  ;;  %496 = vmatmul.bf16.gmra.mxu3 %v906_v27 }
  0x74   :  { %381 = vmatmul.bf16.gmra.mxu0 %v883_v28  ;;  %421 = vmatmul.bf16.gmra.mxu1 %v891_v29 }
  0x75   :  { %461 = vmatmul.bf16.gmra.mxu2 %v899_v30  ;;  %501 = vmatmul.bf16.gmra.mxu3 %v907_v31 }
  0x84   :  { %386 = vmatmul.bf16.gmra.mxu0 %v884_v32  ;;  %426 = vmatmul.bf16.gmra.mxu1 %v892_v33 }
  0x85   :  { %466 = vmatmul.bf16.gmra.mxu2 %v900_v34  ;;  %506 = vmatmul.bf16.gmra.mxu3 %v908_v35 }
  0x94   :  { %391 = vmatmul.bf16.gmra.mxu0 %v885_v36  ;;  %431 = vmatmul.bf16.gmra.mxu1 %v893_v37 }
  0x95   :  { %471 = vmatmul.bf16.gmra.mxu2 %v901_v38  ;;  %511 = vmatmul.bf16.gmra.mxu3 %v909_v39 }
  0xa1   :  { %v357_v42 = vpop.f32.mrf.mxu0  ;;  %v397_v43 = vpop.f32.mrf.mxu1 }
  0xa2   :  { %v519_v44 = vmul.f32 %v1115_v40, %v357_v42  ;;  %v535_v45 = vmul.f32 %v1115_v40, %v397_v43 }
  0xa4   :  { %v585_v46 = vadd.f32 %v1117_v41, %v519_v44  ;;  %v601_v47 = vadd.f32 %v1117_v41, %v535_v45 }
  0xa6   :  { %649 = vst [vmem:[%s1442_s3] sm:$0xff] %v585_v46 }
  0xa7   :  { %665 = vst [vmem:[%s1442_s3 + $0x80] sm:$0xff] %v601_v47 }
  0xa8   :  { %v437_v48 = vpop.f32.mrf.mxu2  ;;  %v477_v49 = vpop.f32.mrf.mxu3 }
  0xa9   :  { %v551_v50 = vmul.f32 %v1115_v40, %v437_v48  ;;  %v567_v51 = vmul.f32 %v1115_v40, %v477_v49  ;;  %v359_v52 = vpop.f32.mrf.mxu0  ;;  %v399_v53 = vpop.f32.mrf.mxu1 }
  0xaa   :  { %v520_v54 = vmul.f32 %v1115_v40, %v359_v52  ;;  %v536_v55 = vmul.f32 %v1115_v40, %v399_v53 }
  0xab   :  { %v617_v56 = vadd.f32 %v1117_v41, %v551_v50  ;;  %v633_v57 = vadd.f32 %v1117_v41, %v567_v51 }
  0xac   :  { %v586_v58 = vadd.f32 %v1117_v41, %v520_v54  ;;  %v602_v59 = vadd.f32 %v1117_v41, %v536_v55 }
  0xad   :  { %681 = vst [vmem:[%s1442_s3 + $0x100] sm:$0xff] %v617_v56 }
  0xae   :  { %697 = vst [vmem:[%s1442_s3 + $0x180] sm:$0xff] %v633_v57 }
  0xaf   :  { %650 = vst [vmem:[%s1442_s3 + $0x8] sm:$0xff] %v586_v58 }
  0xb0   :  { %666 = vst [vmem:[%s1442_s3 + $0x88] sm:$0xff] %v602_v59  ;;  %v439_v60 = vpop.f32.mrf.mxu2  ;;  %v479_v61 = vpop.f32.mrf.mxu3 }
  0xb1   :  { %v552_v62 = vmul.f32 %v1115_v40, %v439_v60  ;;  %v568_v63 = vmul.f32 %v1115_v40, %v479_v61  ;;  %v362_v0 = vpop.f32.mrf.mxu0  ;;  %v402_v1 = vpop.f32.mrf.mxu1 }
  0xb2   :  { %v521_v2 = vmul.f32 %v1115_v40, %v362_v0  ;;  %v537_v3 = vmul.f32 %v1115_v40, %v402_v1 }
  0xb3   :  { %v618_v4 = vadd.f32 %v1117_v41, %v552_v62  ;;  %v634_v5 = vadd.f32 %v1117_v41, %v568_v63 }
  0xb4   :  { %v587_v6 = vadd.f32 %v1117_v41, %v521_v2  ;;  %v603_v7 = vadd.f32 %v1117_v41, %v537_v3 }
  0xb5   :  { %682 = vst [vmem:[%s1442_s3 + $0x108] sm:$0xff] %v618_v4 }
  0xb6   :  { %698 = vst [vmem:[%s1442_s3 + $0x188] sm:$0xff] %v634_v5 }
  0xb7   :  { %651 = vst [vmem:[%s1442_s3 + $0x10] sm:$0xff] %v587_v6 }
  0xb8   :  { %667 = vst [vmem:[%s1442_s3 + $0x90] sm:$0xff] %v603_v7  ;;  %v442_v8 = vpop.f32.mrf.mxu2  ;;  %v482_v9 = vpop.f32.mrf.mxu3 }
  0xb9   :  { %v553_v10 = vmul.f32 %v1115_v40, %v442_v8  ;;  %v569_v11 = vmul.f32 %v1115_v40, %v482_v9  ;;  %v364_v12 = vpop.f32.mrf.mxu0  ;;  %v404_v13 = vpop.f32.mrf.mxu1 }
  0xba   :  { %v522_v14 = vmul.f32 %v1115_v40, %v364_v12  ;;  %v538_v15 = vmul.f32 %v1115_v40, %v404_v13 }
  0xbb   :  { %v619_v16 = vadd.f32 %v1117_v41, %v553_v10  ;;  %v635_v17 = vadd.f32 %v1117_v41, %v569_v11 }
  0xbc   :  { %v588_v18 = vadd.f32 %v1117_v41, %v522_v14  ;;  %v604_v19 = vadd.f32 %v1117_v41, %v538_v15 }
  0xbd   :  { %683 = vst [vmem:[%s1442_s3 + $0x110] sm:$0xff] %v619_v16 }
  0xbe   :  { %699 = vst [vmem:[%s1442_s3 + $0x190] sm:$0xff] %v635_v17 }
  0xbf   :  { %652 = vst [vmem:[%s1442_s3 + $0x18] sm:$0xff] %v588_v18 }
  0xc0   :  { %668 = vst [vmem:[%s1442_s3 + $0x98] sm:$0xff] %v604_v19  ;;  %v444_v20 = vpop.f32.mrf.mxu2  ;;  %v484_v21 = vpop.f32.mrf.mxu3 }
  0xc1   :  { %v554_v22 = vmul.f32 %v1115_v40, %v444_v20  ;;  %v570_v23 = vmul.f32 %v1115_v40, %v484_v21  ;;  %v367_v24 = vpop.f32.mrf.mxu0  ;;  %v407_v25 = vpop.f32.mrf.mxu1 }
  0xc2   :  { %v523_v26 = vmul.f32 %v1115_v40, %v367_v24  ;;  %v539_v27 = vmul.f32 %v1115_v40, %v407_v25 }
  0xc3   :  { %v620_v28 = vadd.f32 %v1117_v41, %v554_v22  ;;  %v636_v29 = vadd.f32 %v1117_v41, %v570_v23 }
  0xc4   :  { %v589_v30 = vadd.f32 %v1117_v41, %v523_v26  ;;  %v605_v31 = vadd.f32 %v1117_v41, %v539_v27 }
  0xc5   :  { %684 = vst [vmem:[%s1442_s3 + $0x118] sm:$0xff] %v620_v28 }
  0xc6   :  { %700 = vst [vmem:[%s1442_s3 + $0x198] sm:$0xff] %v636_v29 }
  0xc7   :  { %653 = vst [vmem:[%s1442_s3 + $0x20] sm:$0xff] %v589_v30 }
  0xc8   :  { %669 = vst [vmem:[%s1442_s3 + $0xa0] sm:$0xff] %v605_v31  ;;  %v447_v32 = vpop.f32.mrf.mxu2  ;;  %v487_v33 = vpop.f32.mrf.mxu3 }
  0xc9   :  { %v555_v34 = vmul.f32 %v1115_v40, %v447_v32  ;;  %v571_v35 = vmul.f32 %v1115_v40, %v487_v33  ;;  %v369_v36 = vpop.f32.mrf.mxu0  ;;  %v409_v37 = vpop.f32.mrf.mxu1 }
  0xca   :  { %v524_v38 = vmul.f32 %v1115_v40, %v369_v36  ;;  %v540_v39 = vmul.f32 %v1115_v40, %v409_v37 }
  0xcb   :  { %v621_v42 = vadd.f32 %v1117_v41, %v555_v34  ;;  %v637_v43 = vadd.f32 %v1117_v41, %v571_v35 }
  0xcc   :  { %v590_v44 = vadd.f32 %v1117_v41, %v524_v38  ;;  %v606_v45 = vadd.f32 %v1117_v41, %v540_v39 }
  0xcd   :  { %685 = vst [vmem:[%s1442_s3 + $0x120] sm:$0xff] %v621_v42 }
  0xce   :  { %701 = vst [vmem:[%s1442_s3 + $0x1a0] sm:$0xff] %v637_v43 }
  0xcf   :  { %654 = vst [vmem:[%s1442_s3 + $0x28] sm:$0xff] %v590_v44 }
  0xd0   :  { %670 = vst [vmem:[%s1442_s3 + $0xa8] sm:$0xff] %v606_v45  ;;  %v449_v46 = vpop.f32.mrf.mxu2  ;;  %v489_v47 = vpop.f32.mrf.mxu3 }
  0xd1   :  { %v556_v48 = vmul.f32 %v1115_v40, %v449_v46  ;;  %v572_v49 = vmul.f32 %v1115_v40, %v489_v47  ;;  %v372_v50 = vpop.f32.mrf.mxu0  ;;  %v412_v51 = vpop.f32.mrf.mxu1 }
  0xd2   :  { %v525_v52 = vmul.f32 %v1115_v40, %v372_v50  ;;  %v541_v53 = vmul.f32 %v1115_v40, %v412_v51 }
  0xd3   :  { %v622_v54 = vadd.f32 %v1117_v41, %v556_v48  ;;  %v638_v55 = vadd.f32 %v1117_v41, %v572_v49 }
  0xd4   :  { %v591_v56 = vadd.f32 %v1117_v41, %v525_v52  ;;  %v607_v57 = vadd.f32 %v1117_v41, %v541_v53 }
  0xd5   :  { %686 = vst [vmem:[%s1442_s3 + $0x128] sm:$0xff] %v622_v54 }
  0xd6   :  { %702 = vst [vmem:[%s1442_s3 + $0x1a8] sm:$0xff] %v638_v55 }
  0xd7   :  { %655 = vst [vmem:[%s1442_s3 + $0x30] sm:$0xff] %v591_v56 }
  0xd8   :  { %671 = vst [vmem:[%s1442_s3 + $0xb0] sm:$0xff] %v607_v57  ;;  %v452_v58 = vpop.f32.mrf.mxu2  ;;  %v492_v59 = vpop.f32.mrf.mxu3 }
  0xd9   :  { %v557_v60 = vmul.f32 %v1115_v40, %v452_v58  ;;  %v573_v61 = vmul.f32 %v1115_v40, %v492_v59  ;;  %v374_v62 = vpop.f32.mrf.mxu0  ;;  %v414_v63 = vpop.f32.mrf.mxu1 }
  0xda   :  { %v526_v0 = vmul.f32 %v1115_v40, %v374_v62  ;;  %v542_v1 = vmul.f32 %v1115_v40, %v414_v63 }
  0xdb   :  { %v623_v2 = vadd.f32 %v1117_v41, %v557_v60  ;;  %v639_v3 = vadd.f32 %v1117_v41, %v573_v61 }
  0xdc   :  { %v592_v4 = vadd.f32 %v1117_v41, %v526_v0  ;;  %v608_v5 = vadd.f32 %v1117_v41, %v542_v1 }
  0xdd   :  { %687 = vst [vmem:[%s1442_s3 + $0x130] sm:$0xff] %v623_v2 }
  0xde   :  { %703 = vst [vmem:[%s1442_s3 + $0x1b0] sm:$0xff] %v639_v3 }
  0xdf   :  { %656 = vst [vmem:[%s1442_s3 + $0x38] sm:$0xff] %v592_v4 }
  0xe0   :  { %672 = vst [vmem:[%s1442_s3 + $0xb8] sm:$0xff] %v608_v5  ;;  %v454_v6 = vpop.f32.mrf.mxu2  ;;  %v494_v7 = vpop.f32.mrf.mxu3 }
  0xe1   :  { %v558_v8 = vmul.f32 %v1115_v40, %v454_v6  ;;  %v574_v9 = vmul.f32 %v1115_v40, %v494_v7  ;;  %v377_v10 = vpop.f32.mrf.mxu0  ;;  %v417_v11 = vpop.f32.mrf.mxu1 }
  0xe2   :  { %v527_v12 = vmul.f32 %v1115_v40, %v377_v10  ;;  %v543_v13 = vmul.f32 %v1115_v40, %v417_v11 }
  0xe3   :  { %v624_v14 = vadd.f32 %v1117_v41, %v558_v8  ;;  %v640_v15 = vadd.f32 %v1117_v41, %v574_v9 }
  0xe4   :  { %v593_v16 = vadd.f32 %v1117_v41, %v527_v12  ;;  %v609_v17 = vadd.f32 %v1117_v41, %v543_v13 }
  0xe5   :  { %688 = vst [vmem:[%s1442_s3 + $0x138] sm:$0xff] %v624_v14 }
  0xe6   :  { %704 = vst [vmem:[%s1442_s3 + $0x1b8] sm:$0xff] %v640_v15 }
  0xe7   :  { %657 = vst [vmem:[%s1442_s3 + $0x40] sm:$0xff] %v593_v16 }
  0xe8   :  { %673 = vst [vmem:[%s1442_s3 + $0xc0] sm:$0xff] %v609_v17  ;;  %v457_v18 = vpop.f32.mrf.mxu2  ;;  %v497_v19 = vpop.f32.mrf.mxu3 }
  0xe9   :  { %v559_v20 = vmul.f32 %v1115_v40, %v457_v18  ;;  %v575_v21 = vmul.f32 %v1115_v40, %v497_v19  ;;  %v379_v22 = vpop.f32.mrf.mxu0  ;;  %v419_v23 = vpop.f32.mrf.mxu1 }
  0xea   :  { %v528_v24 = vmul.f32 %v1115_v40, %v379_v22  ;;  %v544_v25 = vmul.f32 %v1115_v40, %v419_v23 }
  0xeb   :  { %v625_v26 = vadd.f32 %v1117_v41, %v559_v20  ;;  %v641_v27 = vadd.f32 %v1117_v41, %v575_v21 }
  0xec   :  { %v594_v28 = vadd.f32 %v1117_v41, %v528_v24  ;;  %v610_v29 = vadd.f32 %v1117_v41, %v544_v25 }
  0xed   :  { %689 = vst [vmem:[%s1442_s3 + $0x140] sm:$0xff] %v625_v26 }
  0xee   :  { %705 = vst [vmem:[%s1442_s3 + $0x1c0] sm:$0xff] %v641_v27 }
  0xef   :  { %658 = vst [vmem:[%s1442_s3 + $0x48] sm:$0xff] %v594_v28 }
  0xf0   :  { %674 = vst [vmem:[%s1442_s3 + $0xc8] sm:$0xff] %v610_v29  ;;  %v459_v30 = vpop.f32.mrf.mxu2  ;;  %v499_v31 = vpop.f32.mrf.mxu3 }
  0xf1   :  { %v560_v32 = vmul.f32 %v1115_v40, %v459_v30  ;;  %v576_v33 = vmul.f32 %v1115_v40, %v499_v31  ;;  %v382_v34 = vpop.f32.mrf.mxu0  ;;  %v422_v35 = vpop.f32.mrf.mxu1 }
  0xf2   :  { %v529_v36 = vmul.f32 %v1115_v40, %v382_v34  ;;  %v545_v37 = vmul.f32 %v1115_v40, %v422_v35 }
  0xf3   :  { %v626_v38 = vadd.f32 %v1117_v41, %v560_v32  ;;  %v642_v39 = vadd.f32 %v1117_v41, %v576_v33 }
  0xf4   :  { %v595_v42 = vadd.f32 %v1117_v41, %v529_v36  ;;  %v611_v43 = vadd.f32 %v1117_v41, %v545_v37 }
  0xf5   :  { %690 = vst [vmem:[%s1442_s3 + $0x148] sm:$0xff] %v626_v38 }
  0xf6   :  { %706 = vst [vmem:[%s1442_s3 + $0x1c8] sm:$0xff] %v642_v39 }
  0xf7   :  { %659 = vst [vmem:[%s1442_s3 + $0x50] sm:$0xff] %v595_v42 }
  0xf8   :  { %675 = vst [vmem:[%s1442_s3 + $0xd0] sm:$0xff] %v611_v43  ;;  %v462_v44 = vpop.f32.mrf.mxu2  ;;  %v502_v45 = vpop.f32.mrf.mxu3 }
  0xf9   :  { %v561_v46 = vmul.f32 %v1115_v40, %v462_v44  ;;  %v577_v47 = vmul.f32 %v1115_v40, %v502_v45  ;;  %v384_v48 = vpop.f32.mrf.mxu0  ;;  %v424_v49 = vpop.f32.mrf.mxu1 }
  0xfa   :  { %v530_v50 = vmul.f32 %v1115_v40, %v384_v48  ;;  %v546_v51 = vmul.f32 %v1115_v40, %v424_v49 }
  0xfb   :  { %v627_v52 = vadd.f32 %v1117_v41, %v561_v46  ;;  %v643_v53 = vadd.f32 %v1117_v41, %v577_v47 }
  0xfc   :  { %v596_v54 = vadd.f32 %v1117_v41, %v530_v50  ;;  %v612_v55 = vadd.f32 %v1117_v41, %v546_v51 }
  0xfd   :  { %691 = vst [vmem:[%s1442_s3 + $0x150] sm:$0xff] %v627_v52 }
  0xfe   :  { %707 = vst [vmem:[%s1442_s3 + $0x1d0] sm:$0xff] %v643_v53 }
  0xff   :  { %660 = vst [vmem:[%s1442_s3 + $0x58] sm:$0xff] %v596_v54 }
 0x100   :  { %676 = vst [vmem:[%s1442_s3 + $0xd8] sm:$0xff] %v612_v55  ;;  %v464_v56 = vpop.f32.mrf.mxu2  ;;  %v504_v57 = vpop.f32.mrf.mxu3 }
 0x101   :  { %v562_v58 = vmul.f32 %v1115_v40, %v464_v56  ;;  %v578_v59 = vmul.f32 %v1115_v40, %v504_v57  ;;  %v387_v60 = vpop.f32.mrf.mxu0  ;;  %v427_v61 = vpop.f32.mrf.mxu1 }
 0x102   :  { %v531_v62 = vmul.f32 %v1115_v40, %v387_v60  ;;  %v547_v63 = vmul.f32 %v1115_v40, %v427_v61 }
 0x103   :  { %v628_v0 = vadd.f32 %v1117_v41, %v562_v58  ;;  %v644_v1 = vadd.f32 %v1117_v41, %v578_v59 }
 0x104   :  { %v597_v2 = vadd.f32 %v1117_v41, %v531_v62  ;;  %v613_v3 = vadd.f32 %v1117_v41, %v547_v63 }
 0x105   :  { %692 = vst [vmem:[%s1442_s3 + $0x158] sm:$0xff] %v628_v0 }
 0x106   :  { %708 = vst [vmem:[%s1442_s3 + $0x1d8] sm:$0xff] %v644_v1 }
 0x107   :  { %661 = vst [vmem:[%s1442_s3 + $0x60] sm:$0xff] %v597_v2 }
 0x108   :  { %677 = vst [vmem:[%s1442_s3 + $0xe0] sm:$0xff] %v613_v3  ;;  %v467_v4 = vpop.f32.mrf.mxu2  ;;  %v507_v5 = vpop.f32.mrf.mxu3 }
 0x109   :  { %v563_v6 = vmul.f32 %v1115_v40, %v467_v4  ;;  %v579_v7 = vmul.f32 %v1115_v40, %v507_v5  ;;  %v389_v8 = vpop.f32.mrf.mxu0  ;;  %v429_v9 = vpop.f32.mrf.mxu1 }
 0x10a   :  { %v532_v10 = vmul.f32 %v1115_v40, %v389_v8  ;;  %v548_v11 = vmul.f32 %v1115_v40, %v429_v9 }
 0x10b   :  { %v629_v12 = vadd.f32 %v1117_v41, %v563_v6  ;;  %v645_v13 = vadd.f32 %v1117_v41, %v579_v7 }
 0x10c   :  { %v598_v14 = vadd.f32 %v1117_v41, %v532_v10  ;;  %v614_v15 = vadd.f32 %v1117_v41, %v548_v11 }
 0x10d   :  { %693 = vst [vmem:[%s1442_s3 + $0x160] sm:$0xff] %v629_v12 }
 0x10e   :  { %709 = vst [vmem:[%s1442_s3 + $0x1e0] sm:$0xff] %v645_v13 }
 0x10f   :  { %662 = vst [vmem:[%s1442_s3 + $0x68] sm:$0xff] %v598_v14 }
 0x110   :  { %678 = vst [vmem:[%s1442_s3 + $0xe8] sm:$0xff] %v614_v15  ;;  %v469_v16 = vpop.f32.mrf.mxu2  ;;  %v509_v17 = vpop.f32.mrf.mxu3 }
 0x111   :  { %v564_v18 = vmul.f32 %v1115_v40, %v469_v16  ;;  %v580_v19 = vmul.f32 %v1115_v40, %v509_v17  ;;  %v392_v20 = vpop.f32.mrf.mxu0  ;;  %v432_v21 = vpop.f32.mrf.mxu1 }
 0x112   :  { %v533_v22 = vmul.f32 %v1115_v40, %v392_v20  ;;  %v549_v23 = vmul.f32 %v1115_v40, %v432_v21 }
 0x113   :  { %v630_v24 = vadd.f32 %v1117_v41, %v564_v18  ;;  %v646_v25 = vadd.f32 %v1117_v41, %v580_v19 }
 0x114   :  { %v599_v26 = vadd.f32 %v1117_v41, %v533_v22  ;;  %v615_v27 = vadd.f32 %v1117_v41, %v549_v23 }
 0x115   :  { %694 = vst [vmem:[%s1442_s3 + $0x168] sm:$0xff] %v630_v24 }
 0x116   :  { %710 = vst [vmem:[%s1442_s3 + $0x1e8] sm:$0xff] %v646_v25 }
 0x117   :  { %663 = vst [vmem:[%s1442_s3 + $0x70] sm:$0xff] %v599_v26 }
 0x118   :  { %679 = vst [vmem:[%s1442_s3 + $0xf0] sm:$0xff] %v615_v27  ;;  %v472_v28 = vpop.f32.mrf.mxu2  ;;  %v512_v29 = vpop.f32.mrf.mxu3 }
 0x119   :  { %v565_v30 = vmul.f32 %v1115_v40, %v472_v28  ;;  %v581_v31 = vmul.f32 %v1115_v40, %v512_v29  ;;  %v394_v32 = vpop.f32.mrf.mxu0  ;;  %v434_v33 = vpop.f32.mrf.mxu1 }
 0x11a   :  { %v534_v34 = vmul.f32 %v1115_v40, %v394_v32  ;;  %v550_v35 = vmul.f32 %v1115_v40, %v434_v33 }
 0x11b   :  { %v631_v36 = vadd.f32 %v1117_v41, %v565_v30  ;;  %v647_v37 = vadd.f32 %v1117_v41, %v581_v31 }
 0x11c   :  { %v600_v38 = vadd.f32 %v1117_v41, %v534_v34  ;;  %v616_v39 = vadd.f32 %v1117_v41, %v550_v35 }
 0x11d   :  { %695 = vst [vmem:[%s1442_s3 + $0x170] sm:$0xff] %v631_v36 }
 0x11e   :  { %711 = vst [vmem:[%s1442_s3 + $0x1f0] sm:$0xff] %v647_v37 }
 0x11f   :  { %664 = vst [vmem:[%s1442_s3 + $0x78] sm:$0xff] %v600_v38 }
 0x120   :  { %680 = vst [vmem:[%s1442_s3 + $0xf8] sm:$0xff] %v616_v39  ;;  %v474_v42 = vpop.f32.mrf.mxu2  ;;  %v514_v43 = vpop.f32.mrf.mxu3 }
 0x121   :  { %v566_v44 = vmul.f32 %v1115_v40, %v474_v42  ;;  %v582_v45 = vmul.f32 %v1115_v40, %v514_v43 }
 0x123   :  { %v632_v46 = vadd.f32 %v1117_v41, %v566_v44  ;;  %v648_v47 = vadd.f32 %v1117_v41, %v582_v45 }
 0x125   :  { %696 = vst [vmem:[%s1442_s3 + $0x178] sm:$0xff] %v632_v46 }
 0x126   :  { %712 = vst [vmem:[%s1442_s3 + $0x1f8] sm:$0xff] %v648_v47 }
 0x127   :  { %717 = vsyncpa [#allocation3], 1 }

// kernel: deconv2d_block_forward.3
= control target key start
LH: loop header
LB: loop body
LE: loop exit
PB: predicated region body
PF: predicated region fallthrough
CT: control target
= control target key end

     0   :  { %s9741_s12 = smov 0   ;;  %s12890_s0 = inlined_call_operand.vmem [shape: f32[2,34,34,32], index: 0, kind: input, shape index: {}]   ;;  %s12891_s1 = inlined_call_operand.vmem [shape: bf16[9,32,32], index: 1, kind: input, shape index: {}]   ;;  %s12892_s2 = inlined_call_operand.vmem [shape: f32[2,32], index: 2, kind: input, shape index: {}]   ;;  %s12893_s3 = inlined_call_operand.vmem [shape: f32[2,1024,32], index: 3, kind: output, shape index: {}]  }
   0x1 LB: > { %s8211_s13 = sadd.s32 4294967295, %s9719_s12   ;;  %p8215_p0 = scmp.ge.s32.totalorder %s9719_s12, 1  ;;  %s9719_s12 = sphi %s9741_s12, %s13_s12  }
   0x2   : > { %p137_p1 = scmp.lt.s32.totalorder %s9719_s12, 3 }
   0x4   : > { %p138_p2 = pnand %p8215_p0, %p137_p1 }
   0x6   : > { %141 = sbr.rel (%p138_p2) target bundleno = 2463 (0x99f), region = 32 }
   0xb   : > { %v9673_v0 = vld [vmem:[%s12891_s1 + $0x18] sm:$0xff]  ;;  %p161_p3 = scmp.lt.s32.totalorder %s8211_s13, 1  ;;  %v9672_v1 = vld [vmem:[%s12891_s1 + $0x10] sm:$0xff]  ;;  %v9675_v2 = vld [vmem:[%s12891_s1 + $0x28] sm:$0xff]  ;;  %vm577_vm0 = vcmask 261120  }
   0xc   : > { %9688 = vmatpush.bf16.msra.mxu1 %v9673_v0  ;;  %9689 = vmatpush.bf16.msra.mxu2 %v9673_v0  ;;  %v9677_v3 = vld [vmem:[%s12891_s1 + $0x38] sm:$0xff]  ;;  %v9671_v4 = vld [vmem:[%s12891_s1 + $0x8] sm:$0xff] }
   0xd   : > { %s13251_s13 = smov (!%p161_p3, %s8211_s13), 1  ;;  %9690 = vmatpush.bf16.msra.mxu3 %v9673_v0  ;;  %776 = vmatpush.bf16.msra.mxu0 %v9673_v0  ;;  %v9679_v5 = vld [vmem:[%s12891_s1 + $0x48] sm:$0xff] }
   0xe   : > { %s9694_s18 = smul.u32 1360, %s13251_s13  ;;  %s9669_s7 = sshll.u32 %s13251_s13, 10 }
   0xf   : > { %s11451_s10 = scalar_lea.vmem %s12893_s3, %s9669_s7 }
  0x10   : > { %9691 = vmatpush.bf16.msra.mxu1 %v9672_v1  ;;  %9692 = vmatpush.bf16.msra.mxu2 %v9672_v1  ;;  %s9773_s29 = scalar_lea.vmem %s12890_s0, %s9694_s18 }
  0x11   : > { %9693 = vmatpush.bf16.msra.mxu3 %v9672_v1  ;;  %777 = vmatpush.bf16.msra.mxu0 %v9672_v1  ;;  %v400_v6 = vld [vmem:[%s9773_s29 + $0x141] sm:$0xff]  ;;  %v401_v7 = vld [vmem:[%s9773_s29 + $0x149] sm:$0xff]  ;;  %v402_v18 = vld [vmem:[%s9773_s29 + $0x151] sm:$0xff] }
  0x12   : > { %v432_v8 = vld [vmem:[%s9773_s29 + $0x281] sm:$0xff]  ;;  %v512_v9 = vpack.c.bf16 %v401_v7, %v400_v6  ;;  %v433_v10 = vld [vmem:[%s9773_s29 + $0x289] sm:$0xff]  ;;  %v403_v19 = vld [vmem:[%s9773_s29 + $0x159] sm:$0xff] }
  0x13   : > { %v464_v11 = vld [vmem:[%s9773_s29 + $0x3c1] sm:$0xff]  ;;  %v465_v12 = vld [vmem:[%s9773_s29 + $0x3c9] sm:$0xff]  ;;  %v528_v13 = vpack.c.bf16 %v433_v10, %v432_v8  ;;  %v434_v20 = vld [vmem:[%s9773_s29 + $0x291] sm:$0xff]  ;;  %v513_v26 = vpack.c.bf16 %v403_v19, %v402_v18 }
  0x14   : > { %2039 = vmatpush.bf16.msrb.mxu2 %v9675_v2  ;;  %v544_v14 = vpack.c.bf16 %v465_v12, %v464_v11  ;;  %v368_v15 = vld [vmem:[%s9773_s29 + $0x1] sm:$0xff]  ;;  %v369_v16 = vld [vmem:[%s9773_s29 + $0x9] sm:$0xff]  ;;  %1309 = vmatpush.bf16.msrb.mxu1 %v9671_v4  ;;  %v435_v21 = vld [vmem:[%s9773_s29 + $0x299] sm:$0xff] }
  0x15   : > { %2898 = vmatpush.bf16.msrb.mxu3 %v9677_v3  ;;  %3756 = vmatpush.bf16.msrb.mxu0 %v9679_v5  ;;  %v496_v17 = vpack.c.bf16 %v369_v16, %v368_v15  ;;  %v466_v22 = vld [vmem:[%s9773_s29 + $0x3d1] sm:$0xff]  ;;  %v467_v23 = vld [vmem:[%s9773_s29 + $0x3d9] sm:$0xff]  ;;  %v529_v27 = vpack.c.bf16 %v435_v21, %v434_v20  ;;  %v404_v30 = vld [vmem:[%s9773_s29 + $0x169] sm:$0xff] }
  0x16   : > { %8247 = vmatmul.msk.bf16.vlgmr.msra.gmra.mxu1 %vm577_vm0, %v512_v9  ;;  %8263 = vmatmul.msk.bf16.vlgmr.msra.gmra.mxu2 %vm577_vm0, %v528_v13  ;;  %v370_v24 = vld [vmem:[%s9773_s29 + $0x11] sm:$0xff]  ;;  %v371_v25 = vld [vmem:[%s9773_s29 + $0x19] sm:$0xff]  ;;  %v545_v28 = vpack.c.bf16 %v467_v23, %v466_v22  ;;  %v436_v32 = vld [vmem:[%s9773_s29 + $0x2a9] sm:$0xff] }
  0x17   : > { %8279 = vmatmul.msk.bf16.vlgmr.msra.gmra.mxu3 %vm577_vm0, %v544_v14  ;;  %8231 = vmatmul.msk.bf16.vlgmr.msra.gmra.mxu0 %vm577_vm0, %v496_v17  ;;  %v497_v29 = vpack.c.bf16 %v371_v25, %v370_v24  ;;  %v405_v31 = vld [vmem:[%s9773_s29 + $0x171] sm:$0xff]  ;;  %v468_v34 = vld [vmem:[%s9773_s29 + $0x3e9] sm:$0xff]  ;;  %v406_v42 = vld [vmem:[%s9773_s29 + $0x179] sm:$0xff] }
  0x18   : > { %v437_v33 = vld [vmem:[%s9773_s29 + $0x2b1] sm:$0xff]  ;;  %v372_v36 = vld [vmem:[%s9773_s29 + $0x29] sm:$0xff]  ;;  %v514_v38 = vpack.c.bf16 %v405_v31, %v404_v30  ;;  %v407_v43 = vld [vmem:[%s9773_s29 + $0x181] sm:$0xff] }
  0x19   : > { %v469_v35 = vld [vmem:[%s9773_s29 + $0x3f1] sm:$0xff]  ;;  %v530_v39 = vpack.c.bf16 %v437_v33, %v436_v32  ;;  %v438_v44 = vld [vmem:[%s9773_s29 + $0x2b9] sm:$0xff]  ;;  %v439_v45 = vld [vmem:[%s9773_s29 + $0x2c1] sm:$0xff]  ;;  %v515_v50 = vpack.c.bf16 %v407_v43, %v406_v42 }
  0x1a   : > { %v373_v37 = vld [vmem:[%s9773_s29 + $0x31] sm:$0xff]  ;;  %v546_v40 = vpack.c.bf16 %v469_v35, %v468_v34  ;;  %v470_v46 = vld [vmem:[%s9773_s29 + $0x3f9] sm:$0xff]  ;;  %v471_v47 = vld [vmem:[%s9773_s29 + $0x401] sm:$0xff]  ;;  %v531_v51 = vpack.c.bf16 %v439_v45, %v438_v44 }
  0x1b   : > { %v9807_v41 = vpack.c.bf16 %v373_v37, %v372_v36  ;;  %v374_v48 = vld [vmem:[%s9773_s29 + $0x39] sm:$0xff]  ;;  %v375_v49 = vld [vmem:[%s9773_s29 + $0x41] sm:$0xff]  ;;  %v547_v52 = vpack.c.bf16 %v471_v47, %v470_v46  ;;  %v408_v54 = vld [vmem:[%s9773_s29 + $0x191] sm:$0xff] }
  0x1c   : > { %v9822_v53 = vpack.c.bf16 %v375_v49, %v374_v48  ;;  %v409_v55 = vld [vmem:[%s9773_s29 + $0x199] sm:$0xff]  ;;  %v440_v56 = vld [vmem:[%s9773_s29 + $0x2d1] sm:$0xff]  ;;  %v410_v2 = vld [vmem:[%s9773_s29 + $0x1a1] sm:$0xff] }
  0x1d   : > { %v441_v57 = vld [vmem:[%s9773_s29 + $0x2d9] sm:$0xff]  ;;  %v472_v58 = vld [vmem:[%s9773_s29 + $0x411] sm:$0xff]  ;;  %v516_v62 = vpack.c.bf16 %v409_v55, %v408_v54  ;;  %v411_v3 = vld [vmem:[%s9773_s29 + $0x1a9] sm:$0xff] }
  0x1e   : > { %v473_v59 = vld [vmem:[%s9773_s29 + $0x419] sm:$0xff]  ;;  %v376_v60 = vld [vmem:[%s9773_s29 + $0x51] sm:$0xff]  ;;  %v532_v63 = vpack.c.bf16 %v441_v57, %v440_v56  ;;  %v442_v4 = vld [vmem:[%s9773_s29 + $0x2e1] sm:$0xff]  ;;  %v517_v10 = vpack.c.bf16 %v411_v3, %v410_v2 }
  0x1f   : > { %v377_v61 = vld [vmem:[%s9773_s29 + $0x59] sm:$0xff]  ;;  %v548_v0 = vpack.c.bf16 %v473_v59, %v472_v58  ;;  %v443_v5 = vld [vmem:[%s9773_s29 + $0x2e9] sm:$0xff]  ;;  %v474_v6 = vld [vmem:[%s9773_s29 + $0x421] sm:$0xff] }
  0x20   : > { %v9837_v1 = vpack.c.bf16 %v377_v61, %v376_v60  ;;  %v475_v7 = vld [vmem:[%s9773_s29 + $0x429] sm:$0xff]  ;;  %v378_v8 = vld [vmem:[%s9773_s29 + $0x61] sm:$0xff]  ;;  %v533_v11 = vpack.c.bf16 %v443_v5, %v442_v4  ;;  %v412_v14 = vld [vmem:[%s9773_s29 + $0x1b9] sm:$0xff] }
  0x21   : > { %v379_v9 = vld [vmem:[%s9773_s29 + $0x69] sm:$0xff]  ;;  %v549_v12 = vpack.c.bf16 %v475_v7, %v474_v6  ;;  %v413_v15 = vld [vmem:[%s9773_s29 + $0x1c1] sm:$0xff]  ;;  %v444_v16 = vld [vmem:[%s9773_s29 + $0x2f9] sm:$0xff] }
  0x22   : > { %v9852_v13 = vpack.c.bf16 %v379_v9, %v378_v8  ;;  %v445_v17 = vld [vmem:[%s9773_s29 + $0x301] sm:$0xff]  ;;  %v476_v18 = vld [vmem:[%s9773_s29 + $0x439] sm:$0xff]  ;;  %v518_v22 = vpack.c.bf16 %v413_v15, %v412_v14  ;;  %v414_v30 = vld [vmem:[%s9773_s29 + $0x1c9] sm:$0xff] }
  0x23   : > { %v477_v19 = vld [vmem:[%s9773_s29 + $0x441] sm:$0xff]  ;;  %v380_v20 = vld [vmem:[%s9773_s29 + $0x79] sm:$0xff]  ;;  %v534_v23 = vpack.c.bf16 %v445_v17, %v444_v16  ;;  %v415_v31 = vld [vmem:[%s9773_s29 + $0x1d1] sm:$0xff] }
  0x24   : > { %v381_v21 = vld [vmem:[%s9773_s29 + $0x81] sm:$0xff]  ;;  %v550_v24 = vpack.c.bf16 %v477_v19, %v476_v18  ;;  %v446_v32 = vld [vmem:[%s9773_s29 + $0x309] sm:$0xff]  ;;  %v447_v33 = vld [vmem:[%s9773_s29 + $0x311] sm:$0xff] }
  0x25   : > { %v9867_v25 = vpack.c.bf16 %v381_v21, %v380_v20  ;;  %v478_v34 = vld [vmem:[%s9773_s29 + $0x449] sm:$0xff]  ;;  %v479_v35 = vld [vmem:[%s9773_s29 + $0x451] sm:$0xff]  ;;  %v416_v43 = vld [vmem:[%s9773_s29 + $0x1e1] sm:$0xff] }
  0x26   : > { %8248 = vmatmul.msk.bf16.gmra.mxu1 %vm577_vm0, %v513_v26  ;;  %8264 = vmatmul.msk.bf16.gmra.mxu2 %vm577_vm0, %v529_v27  ;;  %v9674_v26 = vld [vmem:[%s12891_s1 + $0x20] sm:$0xff]  ;;  %v9676_v27 = vld [vmem:[%s12891_s1 + $0x30] sm:$0xff] }
  0x27   : > { %8280 = vmatmul.msk.bf16.gmra.mxu3 %vm577_vm0, %v545_v28  ;;  %8232 = vmatmul.msk.bf16.gmra.mxu0 %vm577_vm0, %v497_v29  ;;  %v9670_v28 = vld [vmem:[%s12891_s1] sm:$0xff]  ;;  %v382_v36 = vld [vmem:[%s9773_s29 + $0x89] sm:$0xff]  ;;  %v383_v37 = vld [vmem:[%s9773_s29 + $0x91] sm:$0xff] }
  0x28   : > { %2040 = vmatpush.bf16.msrb.mxu2 %v9674_v26  ;;  %2899 = vmatpush.bf16.msrb.mxu3 %v9676_v27  ;;  %v9678_v29 = vld [vmem:[%s12891_s1 + $0x40] sm:$0xff]  ;;  %v9894_v42 = vpack.c.bf16 %v383_v37, %v382_v36  ;;  %v417_v44 = vld [vmem:[%s9773_s29 + $0x1e9] sm:$0xff]  ;;  %v482_v3 = vld [vmem:[%s9773_s29 + $0x471] sm:$0xff] }
  0x29   : > { %1310 = vmatpush.bf16.msrb.mxu1 %v9670_v28  ;;  %3757 = vmatpush.bf16.msrb.mxu0 %v9678_v29  ;;  %v448_v45 = vld [vmem:[%s9773_s29 + $0x321] sm:$0xff]  ;;  %v449_v46 = vld [vmem:[%s9773_s29 + $0x329] sm:$0xff]  ;;  %v451_v2 = vld [vmem:[%s9773_s29 + $0x339] sm:$0xff] }
  0x2a   : > { %v480_v47 = vld [vmem:[%s9773_s29 + $0x461] sm:$0xff]  ;;  %v481_v48 = vld [vmem:[%s9773_s29 + $0x469] sm:$0xff]  ;;  %v536_v54 = vpack.c.bf16 %v449_v46, %v448_v45  ;;  %v483_v4 = vld [vmem:[%s9773_s29 + $0x479] sm:$0xff] }
  0x2b   : > { %v384_v49 = vld [vmem:[%s9773_s29 + $0xa1] sm:$0xff]  ;;  %v552_v55 = vpack.c.bf16 %v481_v48, %v480_v47  ;;  %v386_v5 = vld [vmem:[%s9773_s29 + $0xb1] sm:$0xff]  ;;  %v387_v6 = vld [vmem:[%s9773_s29 + $0xb9] sm:$0xff] }
  0x2c   : > { %v9942_v14 = vpack.c.bf16 %v387_v6, %v386_v5  ;;  %v420_v20 = vld [vmem:[%s9773_s29 + $0x209] sm:$0xff]  ;;  %v421_v21 = vld [vmem:[%s9773_s29 + $0x211] sm:$0xff]  ;;  %v454_v45 = vld [vmem:[%s9773_s29 + $0x359] sm:$0xff] }
  0x2d   : > { %v485_v26 = vld [vmem:[%s9773_s29 + $0x491] sm:$0xff]  ;;  %v388_v27 = vld [vmem:[%s9773_s29 + $0xc9] sm:$0xff]  ;;  %v455_v46 = vld [vmem:[%s9773_s29 + $0x361] sm:$0xff] }
  0x2e   : > { %v389_v28 = vld [vmem:[%s9773_s29 + $0xd1] sm:$0xff]  ;;  %v486_v47 = vld [vmem:[%s9773_s29 + $0x499] sm:$0xff]  ;;  %v487_v48 = vld [vmem:[%s9773_s29 + $0x4a1] sm:$0xff] }
  0x36   : > { %8249 = vmatmul.msk.bf16.gmra.mxu1 %vm577_vm0, %v514_v38  ;;  %8265 = vmatmul.msk.bf16.gmra.mxu2 %vm577_vm0, %v530_v39  ;;  %v519_v38 = vpack.c.bf16 %v415_v31, %v414_v30  ;;  %v535_v39 = vpack.c.bf16 %v447_v33, %v446_v32  ;;  %v522_v31 = vpack.c.bf16 %v421_v21, %v420_v20  ;;  %v456_v20 = vld [vmem:[%s9773_s29 + $0x371] sm:$0xff]  ;;  %v457_v21 = vld [vmem:[%s9773_s29 + $0x379] sm:$0xff] }
  0x37   : > { %8281 = vmatmul.msk.bf16.gmra.mxu3 %vm577_vm0, %v546_v40  ;;  %8233 = vmatmul.msk.bf16.gmra.mxu0 %vm577_vm0, %v9807_v41  ;;  %v551_v40 = vpack.c.bf16 %v479_v35, %v478_v34  ;;  %v9973_v35 = vpack.c.bf16 %v389_v28, %v388_v27 }
  0x46   : > { %8250 = vmatmul.msk.bf16.gmra.mxu1 %vm577_vm0, %v515_v50  ;;  %8266 = vmatmul.msk.bf16.gmra.mxu2 %vm577_vm0, %v531_v51  ;;  %v385_v50 = vld [vmem:[%s9773_s29 + $0xa9] sm:$0xff]  ;;  %v520_v51 = vpack.c.bf16 %v417_v44, %v416_v43  ;;  %v422_v43 = vld [vmem:[%s9773_s29 + $0x219] sm:$0xff]  ;;  %v423_v44 = vld [vmem:[%s9773_s29 + $0x221] sm:$0xff] }
  0x47   : > { %8282 = vmatmul.msk.bf16.gmra.mxu3 %vm577_vm0, %v547_v52  ;;  %8234 = vmatmul.msk.bf16.gmra.mxu0 %vm577_vm0, %v9822_v53  ;;  %v9911_v56 = vpack.c.bf16 %v385_v50, %v384_v49  ;;  %v390_v49 = vld [vmem:[%s9773_s29 + $0xd9] sm:$0xff]  ;;  %v391_v50 = vld [vmem:[%s9773_s29 + $0xe1] sm:$0xff] }
  0x56   : > { %8251 = vmatmul.msk.bf16.gmra.mxu1 %vm577_vm0, %v516_v62  ;;  %8267 = vmatmul.msk.bf16.gmra.mxu2 %vm577_vm0, %v532_v63  ;;  %v418_v62 = vld [vmem:[%s9773_s29 + $0x1f1] sm:$0xff]  ;;  %v419_v63 = vld [vmem:[%s9773_s29 + $0x1f9] sm:$0xff] }
  0x57   : > { %8283 = vmatmul.msk.bf16.gmra.mxu3 %vm577_vm0, %v548_v0  ;;  %8235 = vmatmul.msk.bf16.gmra.mxu0 %vm577_vm0, %v9837_v1  ;;  %v450_v0 = vld [vmem:[%s9773_s29 + $0x331] sm:$0xff]  ;;  %v521_v9 = vpack.c.bf16 %v419_v63, %v418_v62  ;;  %v539_v63 = vpack.c.bf16 %v455_v46, %v454_v45 }
  0x66   : > { %8252 = vmatmul.msk.bf16.gmra.mxu1 %vm577_vm0, %v517_v10  ;;  %8268 = vmatmul.msk.bf16.gmra.mxu2 %vm577_vm0, %v533_v11  ;;  %v537_v11 = vpack.c.bf16 %v451_v2, %v450_v0  ;;  %v555_v0 = vpack.c.bf16 %v487_v48, %v486_v47  ;;  %v10004_v2 = vpack.c.bf16 %v391_v50, %v390_v49  ;;  %v426_v50 = vld [vmem:[%s9773_s29 + $0x241] sm:$0xff] }
  0x67   : > { %8284 = vmatmul.msk.bf16.gmra.mxu3 %vm577_vm0, %v549_v12  ;;  %8236 = vmatmul.msk.bf16.gmra.mxu0 %vm577_vm0, %v9852_v13  ;;  %v553_v12 = vpack.c.bf16 %v483_v4, %v482_v3 }
  0x76   : > { %8253 = vmatmul.msk.bf16.gmra.mxu1 %vm577_vm0, %v518_v22  ;;  %8269 = vmatmul.msk.bf16.gmra.mxu2 %vm577_vm0, %v534_v23  ;;  %v452_v22 = vld [vmem:[%s9773_s29 + $0x349] sm:$0xff]  ;;  %v453_v23 = vld [vmem:[%s9773_s29 + $0x351] sm:$0xff] }
  0x77   : > { %8285 = vmatmul.msk.bf16.gmra.mxu3 %vm577_vm0, %v550_v24  ;;  %8237 = vmatmul.msk.bf16.gmra.mxu0 %vm577_vm0, %v9867_v25  ;;  %v484_v24 = vld [vmem:[%s9773_s29 + $0x489] sm:$0xff]  ;;  %v538_v33 = vpack.c.bf16 %v453_v23, %v452_v22  ;;  %v488_v22 = vld [vmem:[%s9773_s29 + $0x4b1] sm:$0xff]  ;;  %v489_v23 = vld [vmem:[%s9773_s29 + $0x4b9] sm:$0xff] }
  0x78   : > { %v554_v34 = vpack.c.bf16 %v485_v26, %v484_v24  ;;  %v392_v24 = vld [vmem:[%s9773_s29 + $0xf1] sm:$0xff]  ;;  %v393_v26 = vld [vmem:[%s9773_s29 + $0xf9] sm:$0xff] }
  0x86   : > { %8254 = vmatmul.msk.bf16.gmra.mxu1 %vm577_vm0, %v519_v38  ;;  %8270 = vmatmul.msk.bf16.gmra.mxu2 %vm577_vm0, %v535_v39 }
  0x87   : > { %8286 = vmatmul.msk.bf16.gmra.mxu3 %vm577_vm0, %v551_v40  ;;  %8238 = vmatmul.msk.bf16.gmra.mxu0 %vm577_vm0, %v9894_v42 }
  0x93   : > { %v9909_v52 = vpop.f32.mrf.mxu1 }
  0x94   : > { %v9913_v57 = vpop.f32.mrf.mxu0 }
  0x96   : > { %8255 = vmatmul.msk.bf16.gmra.mxu1 %vm577_vm0, %v520_v51  ;;  %8271 = vmatmul.msk.bf16.gmra.mxu2 %vm577_vm0, %v536_v54 }
  0x97   : > { %8287 = vmatmul.msk.bf16.gmra.mxu3 %vm577_vm0, %v552_v55  ;;  %8239 = vmatmul.msk.bf16.gmra.mxu0 %vm577_vm0, %v9911_v56  ;;  %v523_v55 = vpack.c.bf16 %v423_v44, %v422_v43  ;;  %v556_v43 = vpack.c.bf16 %v489_v23, %v488_v22  ;;  %v10035_v44 = vpack.c.bf16 %v393_v26, %v392_v24 }
  0x99   : > { %v9920_v58 = vpop.f32.mrf.mxu2 }
  0x9a   : > { %12894 = vst [vmem:[#allocation2_spill] sm:$0xff] %v9920_v58  ;;  %v9922_v59 = vpop.f32.mrf.mxu3 }
  0x9b   : > { %12895 = vst [vmem:[#allocation3_spill] sm:$0xff] %v9922_v59  ;;  %v9924_v60 = vpop.f32.mrf.mxu1  ;;  %v399_v59 = vld [vmem:[%s9773_s29 + $0x131] sm:$0xff] }
  0x9c   : > { %v9926_v61 = vpop.f32.mrf.mxu0 }
  0xa1   : > { %v9936_v7 = vpop.f32.mrf.mxu2 }
  0xa2   : > { %12896 = vst [vmem:[#allocation4_spill] sm:$0xff] %v9936_v7  ;;  %v9938_v8 = vpop.f32.mrf.mxu3 }
  0xa3   : > { %12897 = vst [vmem:[#allocation5_spill] sm:$0xff] %v9938_v8  ;;  %v9940_v10 = vpop.f32.mrf.mxu1 }
  0xa4   : > { %v9944_v15 = vpop.f32.mrf.mxu0 }
  0xa6   : > { %8256 = vmatmul.msk.bf16.gmra.mxu1 %vm577_vm0, %v521_v9  ;;  %8272 = vmatmul.msk.bf16.gmra.mxu2 %vm577_vm0, %v537_v11  ;;  %v424_v11 = vld [vmem:[%s9773_s29 + $0x231] sm:$0xff] }
  0xa7   : > { %8288 = vmatmul.msk.bf16.gmra.mxu3 %vm577_vm0, %v553_v12  ;;  %8240 = vmatmul.msk.bf16.gmra.mxu0 %vm577_vm0, %v9942_v14  ;;  %v425_v12 = vld [vmem:[%s9773_s29 + $0x239] sm:$0xff] }
  0xa9   : > { %v9951_v16 = vpop.f32.mrf.mxu2 }
  0xaa   : > { %12898 = vst [vmem:[#allocation6_spill] sm:$0xff] %v9951_v16  ;;  %v9953_v17 = vpop.f32.mrf.mxu3 }
  0xab   : > { %12899 = vst [vmem:[#allocation7_spill] sm:$0xff] %v9953_v17  ;;  %v9955_v18 = vpop.f32.mrf.mxu1 }
  0xac   : > { %v9957_v19 = vpop.f32.mrf.mxu0 }
  0xb1   : > { %v9967_v29 = vpop.f32.mrf.mxu2 }
  0xb2   : > { %12900 = vst [vmem:[#allocation8_spill] sm:$0xff] %v9967_v29  ;;  %v9969_v30 = vpop.f32.mrf.mxu3 }
  0xb3   : > { %12901 = vst [vmem:[#allocation9_spill] sm:$0xff] %v9969_v30  ;;  %v9971_v32 = vpop.f32.mrf.mxu1 }
  0xb4   : > { %v9975_v36 = vpop.f32.mrf.mxu0 }
  0xb6   : > { %8257 = vmatmul.msk.bf16.gmra.mxu1 %vm577_vm0, %v522_v31  ;;  %8273 = vmatmul.msk.bf16.gmra.mxu2 %vm577_vm0, %v538_v33  ;;  %v524_v31 = vpack.c.bf16 %v425_v12, %v424_v11  ;;  %v490_v11 = vld [vmem:[%s9773_s29 + $0x4c1] sm:$0xff]  ;;  %v491_v12 = vld [vmem:[%s9773_s29 + $0x4c9] sm:$0xff] }
  0xb7   : > { %8289 = vmatmul.msk.bf16.gmra.mxu3 %vm577_vm0, %v554_v34  ;;  %8241 = vmatmul.msk.bf16.gmra.mxu0 %vm577_vm0, %v9973_v35  ;;  %v540_v34 = vpack.c.bf16 %v457_v21, %v456_v20  ;;  %v394_v20 = vld [vmem:[%s9773_s29 + $0x101] sm:$0xff]  ;;  %v395_v21 = vld [vmem:[%s9773_s29 + $0x109] sm:$0xff] }
  0xb9   : > { %v9982_v37 = vpop.f32.mrf.mxu2 }
  0xba   : > { %12902 = vst [vmem:[#allocation10_spill] sm:$0xff] %v9982_v37  ;;  %v9984_v38 = vpop.f32.mrf.mxu3  ;;  %v8446_v37 = vld [vmem:[%s9773_s29 + $0x40] sm:$0xff] }
  0xbb   : > { %12903 = vst [vmem:[#allocation11_spill] sm:$0xff] %v9984_v38  ;;  %v9986_v39 = vpop.f32.mrf.mxu1 }
  0xbc   : > { %12904 = vst [vmem:[#allocation12_spill] sm:$0xff] %v9986_v39  ;;  %v9988_v40 = vpop.f32.mrf.mxu0 }
  0xc1   : > { %v9998_v51 = vpop.f32.mrf.mxu2 }
  0xc2   : > { %12905 = vst [vmem:[#allocation13_spill] sm:$0xff] %v9998_v51  ;;  %v10000_v54 = vpop.f32.mrf.mxu3 }
  0xc3   : > { %12906 = vst [vmem:[#allocation14_spill] sm:$0xff] %v10000_v54  ;;  %v10002_v62 = vpop.f32.mrf.mxu1 }
  0xc4   : > { %12907 = vst [vmem:[#allocation15_spill] sm:$0xff] %v10002_v62  ;;  %v10006_v3 = vpop.f32.mrf.mxu0 }
  0xc6   : > { %8258 = vmatmul.msk.bf16.gmra.mxu1 %vm577_vm0, %v523_v55  ;;  %8274 = vmatmul.msk.bf16.gmra.mxu2 %vm577_vm0, %v539_v63  ;;  %v427_v55 = vld [vmem:[%s9773_s29 + $0x249] sm:$0xff]  ;;  %v458_v63 = vld [vmem:[%s9773_s29 + $0x381] sm:$0xff] }
  0xc7   : > { %8290 = vmatmul.msk.bf16.gmra.mxu3 %vm577_vm0, %v555_v0  ;;  %8242 = vmatmul.msk.bf16.gmra.mxu0 %vm577_vm0, %v10004_v2  ;;  %v459_v0 = vld [vmem:[%s9773_s29 + $0x389] sm:$0xff]  ;;  %v525_v24 = vpack.c.bf16 %v427_v55, %v426_v50 }
  0xc9   : > { %v10013_v4 = vpop.f32.mrf.mxu2 }
  0xca   : > { %12908 = vst [vmem:[#allocation16_spill] sm:$0xff] %v10013_v4  ;;  %v10015_v5 = vpop.f32.mrf.mxu3 }
  0xcb   : > { %12909 = vst [vmem:[#allocation17_spill] sm:$0xff] %v10015_v5  ;;  %v10017_v6 = vpop.f32.mrf.mxu1 }
  0xcc   : > { %12910 = vst [vmem:[#allocation18_spill] sm:$0xff] %v10017_v6  ;;  %v10019_v9 = vpop.f32.mrf.mxu0 }
  0xd1   : > { %v10029_v27 = vpop.f32.mrf.mxu2 }
  0xd2   : > { %12911 = vst [vmem:[#allocation19_spill] sm:$0xff] %v10029_v27  ;;  %v10031_v28 = vpop.f32.mrf.mxu3 }
  0xd3   : > { %12912 = vst [vmem:[#allocation20_spill] sm:$0xff] %v10031_v28  ;;  %v10033_v33 = vpop.f32.mrf.mxu1  ;;  %v397_v28 = vld [vmem:[%s9773_s29 + $0x121] sm:$0xff] }
  0xd4   : > { %12913 = vst [vmem:[#allocation21_spill] sm:$0xff] %v10033_v33  ;;  %v10037_v45 = vpop.f32.mrf.mxu0 }
  0xd6   : > { %8259 = vmatmul.msk.bf16.gmra.mxu1 %vm577_vm0, %v524_v31  ;;  %8275 = vmatmul.msk.bf16.gmra.mxu2 %vm577_vm0, %v540_v34  ;;  %v541_v31 = vpack.c.bf16 %v459_v0, %v458_v63  ;;  %v557_v34 = vpack.c.bf16 %v491_v12, %v490_v11  ;;  %v428_v11 = vld [vmem:[%s9773_s29 + $0x259] sm:$0xff]  ;;  %v429_v12 = vld [vmem:[%s9773_s29 + $0x261] sm:$0xff] }
  0xd7   : > { %8291 = vmatmul.msk.bf16.gmra.mxu3 %vm577_vm0, %v556_v43  ;;  %8243 = vmatmul.msk.bf16.gmra.mxu0 %vm577_vm0, %v10035_v44  ;;  %v10066_v43 = vpack.c.bf16 %v395_v21, %v394_v20  ;;  %v460_v20 = vld [vmem:[%s9773_s29 + $0x399] sm:$0xff]  ;;  %v461_v21 = vld [vmem:[%s9773_s29 + $0x3a1] sm:$0xff]  ;;  %v526_v54 = vpack.c.bf16 %v429_v12, %v428_v11 }
  0xd8   : > { %v9683_v11 = vld [vmem:[%s12891_s1 + $0x68] sm:$0xff] }
  0xd9   : > { %v10044_v46 = vpop.f32.mrf.mxu2  ;;  %5473 = vmatpush.bf16.msra.mxu2 %v9683_v11  ;;  %v463_v11 = vld [vmem:[%s9773_s29 + $0x3b1] sm:$0xff] }
  0xda   : > { %12914 = vst [vmem:[#allocation22_spill] sm:$0xff] %v10044_v46  ;;  %v10046_v47 = vpop.f32.mrf.mxu3 }
  0xdb   : > { %12915 = vst [vmem:[#allocation23_spill] sm:$0xff] %v10046_v47  ;;  %v10048_v48 = vpop.f32.mrf.mxu1 }
  0xdc   : > { %12916 = vst [vmem:[#allocation24_spill] sm:$0xff] %v10048_v48  ;;  %v10050_v49 = vpop.f32.mrf.mxu0  ;;  %v8462_v48 = vld [vmem:[%s9773_s29 + $0xe0] sm:$0xff] }
  0xe1   : > { %v10060_v22 = vpop.f32.mrf.mxu2 }
  0xe2   : > { %12917 = vst [vmem:[#allocation25_spill] sm:$0xff] %v10060_v22  ;;  %v10062_v23 = vpop.f32.mrf.mxu3 }
  0xe3   : > { %12918 = vst [vmem:[#allocation26_spill] sm:$0xff] %v10062_v23  ;;  %v10064_v26 = vpop.f32.mrf.mxu1  ;;  %v493_v23 = vld [vmem:[%s9773_s29 + $0x4e1] sm:$0xff] }
  0xe4   : > { %12919 = vst [vmem:[#allocation27_spill] sm:$0xff] %v10064_v26  ;;  %v10068_v47 = vpop.f32.mrf.mxu0  ;;  %v1651_v26 = vld [vmem:[%s9773_s29 + $0xba] sm:$0xff] }
  0xe6   : > { %8260 = vmatmul.msk.bf16.gmra.mxu1 %vm577_vm0, %v525_v24  ;;  %8276 = vmatmul.msk.bf16.gmra.mxu2 %vm577_vm0, %v541_v31  ;;  %v492_v24 = vld [vmem:[%s9773_s29 + $0x4d9] sm:$0xff] }
  0xe7   : > { %8292 = vmatmul.msk.bf16.gmra.mxu3 %vm577_vm0, %v557_v34  ;;  %8244 = vmatmul.msk.bf16.gmra.mxu0 %vm577_vm0, %v10066_v43  ;;  %v396_v31 = vld [vmem:[%s9773_s29 + $0x119] sm:$0xff]  ;;  %v558_v30 = vpack.c.bf16 %v493_v23, %v492_v24  ;;  %v431_v24 = vld [vmem:[%s9773_s29 + $0x271] sm:$0xff] }
  0xe8   : > { %v10097_v17 = vpack.c.bf16 %v397_v28, %v396_v31  ;;  %v9685_v28 = vld [vmem:[%s12891_s1 + $0x78] sm:$0xff]  ;;  %v462_v31 = vld [vmem:[%s9773_s29 + $0x3a9] sm:$0xff] }
  0xe9   : > { %v10075_v50 = vpop.f32.mrf.mxu2  ;;  %6331 = vmatpush.bf16.msra.mxu3 %v9685_v28  ;;  %v9681_v23 = vld [vmem:[%s12891_s1 + $0x58] sm:$0xff]  ;;  %v543_v22 = vpack.c.bf16 %v463_v11, %v462_v31  ;;  %v1632_v11 = vld [vmem:[%s9773_s29 + $0x2] sm:$0xff] }
  0xea   : > { %12920 = vst [vmem:[#allocation28_spill] sm:$0xff] %v10075_v50  ;;  %v10077_v55 = vpop.f32.mrf.mxu3  ;;  %4614 = vmatpush.bf16.msra.mxu1 %v9681_v23  ;;  %v495_v28 = vld [vmem:[%s9773_s29 + $0x4f1] sm:$0xff] }
  0xeb   : > { %12921 = vst [vmem:[#allocation29_spill] sm:$0xff] %v10077_v55  ;;  %v10079_v63 = vpop.f32.mrf.mxu1  ;;  %v542_v55 = vpack.c.bf16 %v461_v21, %v460_v20  ;;  %v9687_v20 = vld [vmem:[%s12891_s1 + $0x88] sm:$0xff] }
  0xec   : > { %12922 = vst [vmem:[#allocation30_spill] sm:$0xff] %v10079_v63  ;;  %v10081_v0 = vpop.f32.mrf.mxu0  ;;  %v430_v21 = vld [vmem:[%s9773_s29 + $0x269] sm:$0xff]  ;;  %7189 = vmatpush.bf16.msra.mxu0 %v9687_v20 }
  0xed   : > { %v527_v23 = vpack.c.bf16 %v431_v24, %v430_v21 }
  0xf1   : > { %v10091_v34 = vpop.f32.mrf.mxu2 }
  0xf2   : > { %12923 = vst [vmem:[#allocation31_spill] sm:$0xff] %v10091_v34  ;;  %v10093_v5 = vpop.f32.mrf.mxu3 }
  0xf3   : > { %12924 = vst [vmem:[#allocation32_spill] sm:$0xff] %v10093_v5  ;;  %v10095_v38 = vpop.f32.mrf.mxu1  ;;  %v398_v5 = vld [vmem:[%s9773_s29 + $0x129] sm:$0xff] }
  0xf4   : > { %12925 = vst [vmem:[#allocation33_spill] sm:$0xff] %v10095_v38  ;;  %v10099_v8 = vpop.f32.mrf.mxu0  ;;  %v10140_v20 = vpack.c.bf16 %v399_v59, %v398_v5  ;;  %v172_v59 = vld [vmem:[%s9773_s29] sm:$0xff]  ;;  %v173_v5 = vld [vmem:[%s9773_s29 + $0x8] sm:$0xff] }
  0xf6   : > { %8261 = vmatmul.msk.bf16.gmra.mxu1 %vm577_vm0, %v526_v54  ;;  %8277 = vmatmul.msk.bf16.gmra.mxu2 %vm577_vm0, %v542_v55 }
  0xf7   : > { %8293 = vmatmul.msk.bf16.gmra.mxu3 %vm577_vm0, %v558_v30  ;;  %8245 = vmatmul.msk.bf16.gmra.mxu0 %vm577_vm0, %v10097_v17 }
  0xf9   : > { %v10112_v54 = vpop.f32.mrf.mxu2 }
  0xfa   : > { %12926 = vst [vmem:[#allocation34_spill] sm:$0xff] %v10112_v54  ;;  %v10114_v30 = vpop.f32.mrf.mxu3 }
  0xfb   : > { %12927 = vst [vmem:[#allocation35_spill] sm:$0xff] %v10114_v30  ;;  %v10119_v55 = vpop.f32.mrf.mxu1  ;;  %v494_v30 = vld [vmem:[%s9773_s29 + $0x4e9] sm:$0xff] }
  0xfc   : > { %12928 = vst [vmem:[#allocation36_spill] sm:$0xff] %v10119_v55  ;;  %v10121_v12 = vpop.f32.mrf.mxu0  ;;  %v559_v46 = vpack.c.bf16 %v495_v28, %v494_v30  ;;  %v1633_v28 = vld [vmem:[%s9773_s29 + $0xa] sm:$0xff] }
 0x101   : > { %v10134_v54 = vpop.f32.mrf.mxu2 }
 0x102   : > { %12929 = vst [vmem:[#allocation37_spill] sm:$0xff] %v10134_v54  ;;  %v10136_v34 = vpop.f32.mrf.mxu3  ;;  %v1760_v54 = vpack.c.bf16 %v1633_v28, %v1632_v11  ;;  %v175_v28 = vld [vmem:[%s9773_s29 + $0x18] sm:$0xff] }
 0x103   : > { %12930 = vst [vmem:[#allocation38_spill] sm:$0xff] %v10136_v34  ;;  %v10138_v50 = vpop.f32.mrf.mxu1  ;;  %v8444_v34 = vld [vmem:[%s9773_s29 + $0x30] sm:$0xff] }
 0x104   : > { %12931 = vst [vmem:[#allocation39_spill] sm:$0xff] %v10138_v50  ;;  %v10142_v27 = vpop.f32.mrf.mxu0 }
 0x106   : > { %8262 = vmatmul.msk.bf16.gmra.mxu1 %vm577_vm0, %v527_v23  ;;  %8278 = vmatmul.msk.bf16.gmra.mxu2 %vm577_vm0, %v543_v22  ;;  %v8443_v23 = vld [vmem:[%s9773_s29 + $0x28] sm:$0xff] }
 0x107   : > { %8294 = vmatmul.msk.bf16.gmra.mxu3 %vm577_vm0, %v559_v46  ;;  %8246 = vmatmul.msk.bf16.gmra.mxu0 %vm577_vm0, %v10140_v20  ;;  %v2619_v4 = vpack.c.bf16 %v8444_v34, %v8443_v23  ;;  %v174_v34 = vld [vmem:[%s9773_s29 + $0x10] sm:$0xff] }
 0x108   : > { %v1634_v23 = vld [vmem:[%s9773_s29 + $0x12] sm:$0xff] }
 0x109   : > { %v10149_v21 = vpop.f32.mrf.mxu2 }
 0x10a   : > { %12932 = vst [vmem:[#allocation40_spill] sm:$0xff] %v10149_v21  ;;  %v10151_v24 = vpop.f32.mrf.mxu3  ;;  %v300_v21 = vpack.c.bf16 %v173_v5, %v172_v59 }
 0x10b   : > { %12933 = vst [vmem:[#allocation41_spill] sm:$0xff] %v10151_v24  ;;  %v10153_v31 = vpop.f32.mrf.mxu1 }
 0x10c   : > { %12934 = vst [vmem:[#allocation42_spill] sm:$0xff] %v10153_v31  ;;  %v10155_v30 = vpop.f32.mrf.mxu0 }
 0x111   : > { %v10163_v22 = vpop.f32.mrf.mxu2 }
 0x112   : > { %12935 = vst [vmem:[#allocation43_spill] sm:$0xff] %v10163_v22  ;;  %v10165_v46 = vpop.f32.mrf.mxu3  ;;  %v1635_v22 = vld [vmem:[%s9773_s29 + $0x1a] sm:$0xff] }
 0x113   : > { %12936 = vst [vmem:[#allocation44_spill] sm:$0xff] %v10165_v46  ;;  %v10167_v24 = vpop.f32.mrf.mxu1 }
 0x114   : > { %12937 = vst [vmem:[#allocation45_spill] sm:$0xff] %v10167_v24  ;;  %v10169_v51 = vpop.f32.mrf.mxu0 }
 0x116   : > { %8303 = vmatmul.msk.bf16.vlgmr.msrb.gmra.mxu1 %vm577_vm0, %v300_v21  ;;  %8379 = vmatmul.msk.bf16.vlgmr.msrb.gmra.mxu2 %vm577_vm0, %v1760_v54  ;;  %v8445_v21 = vld [vmem:[%s9773_s29 + $0x38] sm:$0xff] }
 0x117   : > { %8583 = vmatmul.msk.bf16.vlgmr.msrb.gmra.mxu3 %vm577_vm0, %v2619_v4  ;;  %8787 = vmatmul.msk.bf16.vlgmr.msrb.gmra.mxu0 %vm577_vm0, %v9807_v41  ;;  %v301_v41 = vpack.c.bf16 %v175_v28, %v174_v34  ;;  %v2620_v16 = vpack.c.bf16 %v8446_v37, %v8445_v21  ;;  %v1636_v37 = vld [vmem:[%s9773_s29 + $0x2a] sm:$0xff]  ;;  %v8448_v21 = vld [vmem:[%s9773_s29 + $0x58] sm:$0xff] }
 0x119   : > { %v10176_v46 = vpop.f32.mrf.mxu2 }
 0x11a   : > { %12938 = vst [vmem:[#allocation46_spill] sm:$0xff] %v10176_v46  ;;  %v10178_v59 = vpop.f32.mrf.mxu3  ;;  %v1761_v46 = vpack.c.bf16 %v1635_v22, %v1634_v23  ;;  %v1637_v22 = vld [vmem:[%s9773_s29 + $0x32] sm:$0xff] }
 0x11b   : > { %12939 = vst [vmem:[#allocation47_spill] sm:$0xff] %v10178_v59  ;;  %v10180_v5 = vpop.f32.mrf.mxu1  ;;  %v8447_v23 = vld [vmem:[%s9773_s29 + $0x50] sm:$0xff] }
 0x11c   : > { %12940 = vst [vmem:[#allocation48_spill] sm:$0xff] %v10180_v5  ;;  %v10182_v11 = vpop.f32.mrf.mxu0 }
 0x121   : > { %v10190_v54 = vpop.f32.mrf.mxu2 }
 0x122   : > { %12941 = vst [vmem:[#allocation49_spill] sm:$0xff] %v10190_v54  ;;  %v10192_v29 = vpop.f32.mrf.mxu3 }
 0x123   : > { %12942 = vst [vmem:[#allocation50_spill] sm:$0xff] %v10192_v29  ;;  %v10194_v59 = vpop.f32.mrf.mxu1 }
 0x124   : > { %12943 = vst [vmem:[#allocation51_spill] sm:$0xff] %v10194_v59  ;;  %v10196_v7 = vpop.f32.mrf.mxu0 }
 0x126   : > { %8304 = vmatmul.msk.bf16.gmra.mxu1 %vm577_vm0, %v301_v41  ;;  %8380 = vmatmul.msk.bf16.gmra.mxu2 %vm577_vm0, %v1761_v46 }
 0x127   : > { %8584 = vmatmul.msk.bf16.gmra.mxu3 %vm577_vm0, %v2620_v16  ;;  %8788 = vmatmul.msk.bf16.gmra.mxu0 %vm577_vm0, %v9822_v53 }
 0x129   : > { %v10203_v54 = vpop.f32.mrf.mxu2 }
 0x12a   : > { %12944 = vst [vmem:[#allocation52_spill] sm:$0xff] %v10203_v54  ;;  %v10205_v29 = vpop.f32.mrf.mxu3  ;;  %v1762_v54 = vpack.c.bf16 %v1637_v22, %v1636_v37  ;;  %v1638_v37 = vld [vmem:[%s9773_s29 + $0x3a] sm:$0xff]  ;;  %v1639_v22 = vld [vmem:[%s9773_s29 + $0x42] sm:$0xff] }
 0x12b   : > { %12945 = vst [vmem:[#allocation53_spill] sm:$0xff] %v10205_v29  ;;  %v10207_v34 = vpop.f32.mrf.mxu1  ;;  %v2621_v29 = vpack.c.bf16 %v8448_v21, %v8447_v23  ;;  %v8449_v23 = vld [vmem:[%s9773_s29 + $0x60] sm:$0xff] }
 0x12c   : > { %12946 = vst [vmem:[#allocation54_spill] sm:$0xff] %v10207_v34  ;;  %v10209_v28 = vpop.f32.mrf.mxu0 }
 0x131   : > { %v10215_v46 = vpop.f32.mrf.mxu2 }
 0x132   : > { %12947 = vst [vmem:[#allocation55_spill] sm:$0xff] %v10215_v46  ;;  %v10217_v41 = vpop.f32.mrf.mxu3 }
 0x133   : > { %12948 = vst [vmem:[#allocation56_spill] sm:$0xff] %v10217_v41  ;;  %v10219_v53 = vpop.f32.mrf.mxu1 }
 0x134   : > { %12949 = vst [vmem:[#allocation57_spill] sm:$0xff] %v10219_v53  ;;  %v10221_v58 = vpop.f32.mrf.mxu0 }
 0x136   : > { %8305 = vmatmul.msk.bf16.gmra.mxu1 %vm577_vm0, %v2619_v4  ;;  %8381 = vmatmul.msk.bf16.gmra.mxu2 %vm577_vm0, %v1762_v54  ;;  %v8450_v4 = vld [vmem:[%s9773_s29 + $0x68] sm:$0xff] }
 0x137   : > { %8585 = vmatmul.msk.bf16.gmra.mxu3 %vm577_vm0, %v2621_v29  ;;  %8789 = vmatmul.msk.bf16.gmra.mxu0 %vm577_vm0, %v9837_v1 }
 0x139   : > { %v10228_v46 = vpop.f32.mrf.mxu2 }
 0x13a   : > { %12950 = vst [vmem:[#allocation58_spill] sm:$0xff] %v10228_v46  ;;  %v10230_v34 = vpop.f32.mrf.mxu3  ;;  %v1763_v46 = vpack.c.bf16 %v1639_v22, %v1638_v37  ;;  %v1640_v37 = vld [vmem:[%s9773_s29 + $0x52] sm:$0xff]  ;;  %v1641_v22 = vld [vmem:[%s9773_s29 + $0x5a] sm:$0xff] }
 0x13b   : > { %12951 = vst [vmem:[#allocation59_spill] sm:$0xff] %v10230_v34  ;;  %v10232_v41 = vpop.f32.mrf.mxu1  ;;  %v2622_v34 = vpack.c.bf16 %v8450_v4, %v8449_v23  ;;  %v8451_v23 = vld [vmem:[%s9773_s29 + $0x78] sm:$0xff] }
 0x13c   : > { %12952 = vst [vmem:[#allocation60_spill] sm:$0xff] %v10232_v41  ;;  %v10234_v53 = vpop.f32.mrf.mxu0 }
 0x141   : > { %v10240_v54 = vpop.f32.mrf.mxu2 }
 0x142   : > { %12953 = vst [vmem:[#allocation61_spill] sm:$0xff] %v10240_v54  ;;  %v10242_v21 = vpop.f32.mrf.mxu3 }
 0x143   : > { %12954 = vst [vmem:[#allocation62_spill] sm:$0xff] %v10242_v21  ;;  %v10244_v1 = vpop.f32.mrf.mxu1 }
 0x144   : > { %12955 = vst [vmem:[#allocation63_spill] sm:$0xff] %v10244_v1  ;;  %v10246_v59 = vpop.f32.mrf.mxu0 }
 0x146   : > { %8306 = vmatmul.msk.bf16.gmra.mxu1 %vm577_vm0, %v2620_v16  ;;  %8382 = vmatmul.msk.bf16.gmra.mxu2 %vm577_vm0, %v1763_v46  ;;  %v8452_v16 = vld [vmem:[%s9773_s29 + $0x80] sm:$0xff] }
 0x147   : > { %8586 = vmatmul.msk.bf16.gmra.mxu3 %vm577_vm0, %v2622_v34  ;;  %8790 = vmatmul.msk.bf16.gmra.mxu0 %vm577_vm0, %v9852_v13 }
 0x149   : > { %v10253_v54 = vpop.f32.mrf.mxu2 }
 0x14a   : > { %12956 = vst [vmem:[#allocation64_spill] sm:$0xff] %v10253_v54  ;;  %v10255_v41 = vpop.f32.mrf.mxu3  ;;  %v1764_v54 = vpack.c.bf16 %v1641_v22, %v1640_v37  ;;  %v1642_v37 = vld [vmem:[%s9773_s29 + $0x62] sm:$0xff]  ;;  %v1643_v22 = vld [vmem:[%s9773_s29 + $0x6a] sm:$0xff] }
 0x14b   : > { %12957 = vst [vmem:[#allocation65_spill] sm:$0xff] %v10255_v41  ;;  %v10257_v21 = vpop.f32.mrf.mxu1  ;;  %v2623_v41 = vpack.c.bf16 %v8452_v16, %v8451_v23  ;;  %v8453_v23 = vld [vmem:[%s9773_s29 + $0x88] sm:$0xff] }
 0x14c   : > { %12958 = vst [vmem:[#allocation66_spill] sm:$0xff] %v10257_v21  ;;  %v10259_v1 = vpop.f32.mrf.mxu0 }
 0x151   : > { %v10265_v46 = vpop.f32.mrf.mxu2 }
 0x152   : > { %12959 = vst [vmem:[#allocation67_spill] sm:$0xff] %v10265_v46  ;;  %v10267_v4 = vpop.f32.mrf.mxu3 }
 0x153   : > { %12960 = vst [vmem:[#allocation68_spill] sm:$0xff] %v10267_v4  ;;  %v10269_v13 = vpop.f32.mrf.mxu1 }
 0x154   : > { %12961 = vst [vmem:[#allocation69_spill] sm:$0xff] %v10269_v13  ;;  %v10271_v5 = vpop.f32.mrf.mxu0 }
 0x156   : > { %8307 = vmatmul.msk.bf16.gmra.mxu1 %vm577_vm0, %v2621_v29  ;;  %8383 = vmatmul.msk.bf16.gmra.mxu2 %vm577_vm0, %v1764_v54  ;;  %v8454_v29 = vld [vmem:[%s9773_s29 + $0x90] sm:$0xff] }
 0x157   : > { %8587 = vmatmul.msk.bf16.gmra.mxu3 %vm577_vm0, %v2623_v41  ;;  %8791 = vmatmul.msk.bf16.gmra.mxu0 %vm577_vm0, %v9867_v25 }
 0x159   : > { %v10278_v46 = vpop.f32.mrf.mxu2 }
 0x15a   : > { %12962 = vst [vmem:[#allocation70_spill] sm:$0xff] %v10278_v46  ;;  %v10280_v21 = vpop.f32.mrf.mxu3  ;;  %v1765_v46 = vpack.c.bf16 %v1643_v22, %v1642_v37  ;;  %v1644_v37 = vld [vmem:[%s9773_s29 + $0x7a] sm:$0xff]  ;;  %v1645_v22 = vld [vmem:[%s9773_s29 + $0x82] sm:$0xff] }
 0x15b   : > { %12963 = vst [vmem:[#allocation71_spill] sm:$0xff] %v10280_v21  ;;  %v10282_v4 = vpop.f32.mrf.mxu1  ;;  %v2624_v21 = vpack.c.bf16 %v8454_v29, %v8453_v23  ;;  %v8455_v23 = vld [vmem:[%s9773_s29 + $0xa0] sm:$0xff] }
 0x15c   : > { %12964 = vst [vmem:[#allocation72_spill] sm:$0xff] %v10282_v4  ;;  %v10284_v13 = vpop.f32.mrf.mxu0 }
 0x161   : > { %v10290_v54 = vpop.f32.mrf.mxu2 }
 0x162   : > { %12965 = vst [vmem:[#allocation73_spill] sm:$0xff] %v10290_v54  ;;  %v10292_v16 = vpop.f32.mrf.mxu3 }
 0x163   : > { %12966 = vst [vmem:[#allocation74_spill] sm:$0xff] %v10292_v16  ;;  %v10294_v25 = vpop.f32.mrf.mxu1 }
 0x164   : > { %12967 = vst [vmem:[#allocation75_spill] sm:$0xff] %v10294_v25  ;;  %v10296_v24 = vpop.f32.mrf.mxu0 }
 0x166   : > { %8308 = vmatmul.msk.bf16.gmra.mxu1 %vm577_vm0, %v2622_v34  ;;  %8384 = vmatmul.msk.bf16.gmra.mxu2 %vm577_vm0, %v1765_v46  ;;  %v8456_v34 = vld [vmem:[%s9773_s29 + $0xa8] sm:$0xff] }
 0x167   : > { %8588 = vmatmul.msk.bf16.gmra.mxu3 %vm577_vm0, %v2624_v21  ;;  %8792 = vmatmul.msk.bf16.gmra.mxu0 %vm577_vm0, %v9894_v42 }
 0x169   : > { %v10303_v54 = vpop.f32.mrf.mxu2 }
 0x16a   : > { %12968 = vst [vmem:[#allocation76_spill] sm:$0xff] %v10303_v54  ;;  %v10305_v4 = vpop.f32.mrf.mxu3  ;;  %v1766_v54 = vpack.c.bf16 %v1645_v22, %v1644_v37  ;;  %v1646_v37 = vld [vmem:[%s9773_s29 + $0x8a] sm:$0xff]  ;;  %v1647_v22 = vld [vmem:[%s9773_s29 + $0x92] sm:$0xff] }
 0x16b   : > { %12969 = vst [vmem:[#allocation77_spill] sm:$0xff] %v10305_v4  ;;  %v10307_v16 = vpop.f32.mrf.mxu1  ;;  %v2625_v4 = vpack.c.bf16 %v8456_v34, %v8455_v23  ;;  %v8457_v23 = vld [vmem:[%s9773_s29 + $0xb0] sm:$0xff] }
 0x16c   : > { %12970 = vst [vmem:[#allocation78_spill] sm:$0xff] %v10307_v16  ;;  %v10309_v25 = vpop.f32.mrf.mxu0 }
 0x171   : > { %v10315_v46 = vpop.f32.mrf.mxu2 }
 0x172   : > { %12971 = vst [vmem:[#allocation79_spill] sm:$0xff] %v10315_v46  ;;  %v10317_v29 = vpop.f32.mrf.mxu3 }
 0x173   : > { %12972 = vst [vmem:[#allocation80_spill] sm:$0xff] %v10317_v29  ;;  %v10319_v42 = vpop.f32.mrf.mxu1 }
 0x174   : > { %12973 = vst [vmem:[#allocation81_spill] sm:$0xff] %v10319_v42  ;;  %v10321_v31 = vpop.f32.mrf.mxu0 }
 0x176   : > { %8309 = vmatmul.msk.bf16.gmra.mxu1 %vm577_vm0, %v2623_v41  ;;  %8385 = vmatmul.msk.bf16.gmra.mxu2 %vm577_vm0, %v1766_v54  ;;  %v8458_v41 = vld [vmem:[%s9773_s29 + $0xb8] sm:$0xff] }
 0x177   : > { %8589 = vmatmul.msk.bf16.gmra.mxu3 %vm577_vm0, %v2625_v4  ;;  %8793 = vmatmul.msk.bf16.gmra.mxu0 %vm577_vm0, %v9911_v56 }
 0x179   : > { %v10328_v46 = vpop.f32.mrf.mxu2 }
 0x17a   : > { %12974 = vst [vmem:[#allocation82_spill] sm:$0xff] %v10328_v46  ;;  %v10330_v16 = vpop.f32.mrf.mxu3  ;;  %v1767_v46 = vpack.c.bf16 %v1647_v22, %v1646_v37  ;;  %v1648_v37 = vld [vmem:[%s9773_s29 + $0xa2] sm:$0xff]  ;;  %v1649_v22 = vld [vmem:[%s9773_s29 + $0xaa] sm:$0xff] }
 0x17b   : > { %12975 = vst [vmem:[#allocation83_spill] sm:$0xff] %v10330_v16  ;;  %v10332_v29 = vpop.f32.mrf.mxu1  ;;  %v2626_v16 = vpack.c.bf16 %v8458_v41, %v8457_v23  ;;  %v8459_v23 = vld [vmem:[%s9773_s29 + $0xc8] sm:$0xff]  ;;  %v8460_v41 = vld [vmem:[%s9773_s29 + $0xd0] sm:$0xff]  ;;  %v1768_v38 = vpack.c.bf16 %v1649_v22, %v1648_v37 }
 0x17c   : > { %12976 = vst [vmem:[#allocation84_spill] sm:$0xff] %v10332_v29  ;;  %v10334_v42 = vpop.f32.mrf.mxu0 }
 0x181   : > { %v10340_v54 = vpop.f32.mrf.mxu2 }
 0x182   : > { %12977 = vst [vmem:[#allocation85_spill] sm:$0xff] %v10340_v54  ;;  %v10342_v34 = vpop.f32.mrf.mxu3 }
 0x183   : > { %12978 = vst [vmem:[#allocation86_spill] sm:$0xff] %v10342_v34  ;;  %v10344_v56 = vpop.f32.mrf.mxu1 }
 0x184   : > { %12979 = vst [vmem:[#allocation87_spill] sm:$0xff] %v10344_v56  ;;  %v10346_v50 = vpop.f32.mrf.mxu0 }
 0x186   : > { %8310 = vmatmul.msk.bf16.gmra.mxu1 %vm577_vm0, %v2624_v21  ;;  %8386 = vmatmul.msk.bf16.gmra.mxu2 %vm577_vm0, %v1767_v46 }
 0x187   : > { %8590 = vmatmul.msk.bf16.gmra.mxu3 %vm577_vm0, %v2626_v16  ;;  %8794 = vmatmul.msk.bf16.gmra.mxu0 %vm577_vm0, %v9942_v14  ;;  %v2627_v14 = vpack.c.bf16 %v8460_v41, %v8459_v23  ;;  %v1650_v41 = vld [vmem:[%s9773_s29 + $0xb2] sm:$0xff] }
 0x188   : > { %v1769_v39 = vpack.c.bf16 %v1651_v26, %v1650_v41 }
 0x189   : > { %v10353_v54 = vpop.f32.mrf.mxu2 }
 0x18a   : > { %12980 = vst [vmem:[#allocation88_spill] sm:$0xff] %v10353_v54  ;;  %v10355_v29 = vpop.f32.mrf.mxu3 }
 0x18b   : > { %12981 = vst [vmem:[#allocation89_spill] sm:$0xff] %v10355_v29  ;;  %v10357_v34 = vpop.f32.mrf.mxu1 }
 0x18c   : > { %12982 = vst [vmem:[#allocation90_spill] sm:$0xff] %v10357_v34  ;;  %v10359_v56 = vpop.f32.mrf.mxu0 }
 0x191   : > { %v10365_v21 = vpop.f32.mrf.mxu2 }
 0x192   : > { %12983 = vst [vmem:[#allocation91_spill] sm:$0xff] %v10365_v21  ;;  %v10367_v46 = vpop.f32.mrf.mxu3 }
 0x193   : > { %12984 = vst [vmem:[#allocation92_spill] sm:$0xff] %v10367_v46  ;;  %v1312_v55 = vpop.f32.mrf.mxu1 }
 0x194   : > { %v3759_v54 = vpop.f32.mrf.mxu0  ;;  %v1313_v29 = vadd.f32 %v1312_v55, %v9913_v57 }
 0x196   : > { %8311 = vmatmul.msk.bf16.gmra.mxu1 %vm577_vm0, %v2625_v4  ;;  %8387 = vmatmul.msk.bf16.gmra.mxu2 %vm577_vm0, %v1768_v38  ;;  %v8461_v4 = vld [vmem:[%s9773_s29 + $0xd8] sm:$0xff] }
 0x197   : > { %8591 = vmatmul.msk.bf16.gmra.mxu3 %vm577_vm0, %v2627_v14  ;;  %8795 = vmatmul.msk.bf16.gmra.mxu0 %vm577_vm0, %v9973_v35  ;;  %v2628_v57 = vpack.c.bf16 %v8462_v48, %v8461_v4 }
 0x199   : > { %v2042_v46 = vpop.f32.mrf.mxu2 }
 0x19a   : > { %v2901_v21 = vpop.f32.mrf.mxu3  ;;  %v2362_v34 = vadd.f32 %v2042_v46, %v1313_v29  ;;  %v1653_v46 = vld [vmem:[%s9773_s29 + $0xd2] sm:$0xff] }
 0x19b   : > { %v1314_v37 = vpop.f32.mrf.mxu1 }
 0x19c   : > { %v3221_v22 = vadd.f32 %v2901_v21, %v2362_v34  ;;  %v3761_v23 = vpop.f32.mrf.mxu0  ;;  %v1315_v38 = vadd.f32 %v1314_v37, %v9926_v61  ;;  %v1652_v21 = vld [vmem:[%s9773_s29 + $0xca] sm:$0xff]  ;;  %v8464_v37 = vld [vmem:[%s9773_s29 + $0xf8] sm:$0xff] }
 0x19e   : > { %v10376_v63 = vadd.f32 %v3759_v54, %v3221_v22 }
 0x1a1   : > { %v2044_v33 = vpop.f32.mrf.mxu2 }
 0x1a2   : > { %v2903_v6 = vpop.f32.mrf.mxu3  ;;  %v2363_v62 = vadd.f32 %v2044_v33, %v1315_v38  ;;  %v1770_v38 = vpack.c.bf16 %v1653_v46, %v1652_v21  ;;  %v1654_v21 = vld [vmem:[%s9773_s29 + $0xda] sm:$0xff]  ;;  %v1655_v46 = vld [vmem:[%s9773_s29 + $0xe2] sm:$0xff] }
 0x1a3   : > { %v1317_v35 = vpop.f32.mrf.mxu1 }
 0x1a4   : > { %v3222_v55 = vadd.f32 %v2903_v6, %v2363_v62  ;;  %v3764_v29 = vpop.f32.mrf.mxu0  ;;  %v1318_v61 = vadd.f32 %v1317_v35, %v9944_v15 }
 0x1a6   : > { %8312 = vmatmul.msk.bf16.gmra.mxu1 %vm577_vm0, %v2626_v16  ;;  %8388 = vmatmul.msk.bf16.gmra.mxu2 %vm577_vm0, %v1769_v39  ;;  %v10385_v54 = vadd.f32 %v3761_v23, %v3222_v55  ;;  %v8463_v39 = vld [vmem:[%s9773_s29 + $0xf0] sm:$0xff] }
 0x1a7   : > { %8592 = vmatmul.msk.bf16.gmra.mxu3 %vm577_vm0, %v2628_v57  ;;  %8796 = vmatmul.msk.bf16.gmra.mxu0 %vm577_vm0, %v10004_v2  ;;  %v2629_v15 = vpack.c.bf16 %v8464_v37, %v8463_v39  ;;  %v8465_v39 = vld [vmem:[%s9773_s29 + $0x100] sm:$0xff]  ;;  %v8466_v37 = vld [vmem:[%s9773_s29 + $0x108] sm:$0xff] }
 0x1a9   : > { %v2047_v33 = vpop.f32.mrf.mxu2 }
 0x1aa   : > { %v2906_v48 = vpop.f32.mrf.mxu3  ;;  %v2364_v62 = vadd.f32 %v2047_v33, %v1318_v61 }
 0x1ab   : > { %v1319_v6 = vpop.f32.mrf.mxu1 }
 0x1ac   : > { %v3223_v26 = vadd.f32 %v2906_v48, %v2364_v62  ;;  %v3766_v34 = vpop.f32.mrf.mxu0  ;;  %v1320_v22 = vadd.f32 %v1319_v6, %v9957_v19 }
 0x1ae   : > { %v10391_v16 = vadd.f32 %v3764_v29, %v3223_v26 }
 0x1b1   : > { %v2049_v23 = vpop.f32.mrf.mxu2 }
 0x1b2   : > { %v2908_v41 = vpop.f32.mrf.mxu3  ;;  %v2365_v4 = vadd.f32 %v2049_v23, %v1320_v22 }
 0x1b3   : > { %v1322_v2 = vpop.f32.mrf.mxu1 }
 0x1b4   : > { %v3224_v35 = vadd.f32 %v2908_v41, %v2365_v4  ;;  %v3769_v55 = vpop.f32.mrf.mxu0  ;;  %v1323_v19 = vadd.f32 %v1322_v2, %v9975_v36  ;;  %v1771_v4 = vpack.c.bf16 %v1655_v46, %v1654_v21  ;;  %v2630_v36 = vpack.c.bf16 %v8466_v37, %v8465_v39  ;;  %v1657_v21 = vld [vmem:[%s9773_s29 + $0xfa] sm:$0xff] }
 0x1b5   : > { %v8467_v46 = vld [vmem:[%s9773_s29 + $0x118] sm:$0xff]  ;;  %v8468_v39 = vld [vmem:[%s9773_s29 + $0x120] sm:$0xff] }
 0x1b6   : > { %8313 = vmatmul.msk.bf16.gmra.mxu1 %vm577_vm0, %v2627_v14  ;;  %8389 = vmatmul.msk.bf16.gmra.mxu2 %vm577_vm0, %v1770_v38  ;;  %v10400_v29 = vadd.f32 %v3766_v34, %v3224_v35 }
 0x1b7   : > { %8593 = vmatmul.msk.bf16.gmra.mxu3 %vm577_vm0, %v2629_v15  ;;  %8797 = vmatmul.msk.bf16.gmra.mxu0 %vm577_vm0, %v10035_v44 }
 0x1b9   : > { %v2052_v61 = vpop.f32.mrf.mxu2 }
 0x1ba   : > { %v2911_v33 = vpop.f32.mrf.mxu3  ;;  %v2366_v48 = vadd.f32 %v2052_v61, %v1323_v19 }
 0x1bb   : > { %v1324_v62 = vpop.f32.mrf.mxu1 }
 0x1bc   : > { %v3225_v6 = vadd.f32 %v2911_v33, %v2366_v48  ;;  %v3771_v26 = vpop.f32.mrf.mxu0  ;;  %v1325_v34 = vadd.f32 %v1324_v62, %v9988_v40 }
 0x1be   : > { %v10406_v14 = vadd.f32 %v3769_v55, %v3225_v6  ;;  %v1656_v6 = vld [vmem:[%s9773_s29 + $0xf2] sm:$0xff] }
 0x1c1   : > { %v2054_v22 = vpop.f32.mrf.mxu2 }
 0x1c2   : > { %v2913_v23 = vpop.f32.mrf.mxu3  ;;  %v2367_v41 = vadd.f32 %v2054_v22, %v1325_v34 }
 0x1c3   : > { %v1327_v44 = vpop.f32.mrf.mxu1 }
 0x1c4   : > { %v3226_v2 = vadd.f32 %v2913_v23, %v2367_v41  ;;  %v3774_v38 = vpop.f32.mrf.mxu0  ;;  %v1328_v40 = vadd.f32 %v1327_v44, %v10006_v3  ;;  %v1772_v23 = vpack.c.bf16 %v1657_v21, %v1656_v6  ;;  %v2631_v3 = vpack.c.bf16 %v8468_v39, %v8467_v46  ;;  %v8469_v6 = vld [vmem:[%s9773_s29 + $0x128] sm:$0xff]  ;;  %v8470_v21 = vld [vmem:[%s9773_s29 + $0x130] sm:$0xff] }
 0x1c6   : > { %8314 = vmatmul.msk.bf16.gmra.mxu1 %vm577_vm0, %v2628_v57  ;;  %8390 = vmatmul.msk.bf16.gmra.mxu2 %vm577_vm0, %v1771_v4  ;;  %v10415_v35 = vadd.f32 %v3771_v26, %v3226_v2 }
 0x1c7   : > { %8594 = vmatmul.msk.bf16.gmra.mxu3 %vm577_vm0, %v2630_v36  ;;  %8798 = vmatmul.msk.bf16.gmra.mxu0 %vm577_vm0, %v10066_v43 }
 0x1c9   : > { %v2057_v55 = vpop.f32.mrf.mxu2 }
 0x1ca   : > { %v2916_v19 = vpop.f32.mrf.mxu3  ;;  %v2368_v61 = vadd.f32 %v2057_v55, %v1328_v40 }
 0x1cb   : > { %v1329_v33 = vpop.f32.mrf.mxu1 }
 0x1cc   : > { %v3227_v48 = vadd.f32 %v2916_v19, %v2368_v61  ;;  %v3776_v62 = vpop.f32.mrf.mxu0  ;;  %v1330_v26 = vadd.f32 %v1329_v33, %v10019_v9  ;;  %v1658_v33 = vld [vmem:[%s9773_s29 + $0x102] sm:$0xff] }
 0x1ce   : > { %v10421_v57 = vadd.f32 %v3774_v38, %v3227_v48  ;;  %v1659_v48 = vld [vmem:[%s9773_s29 + $0x10a] sm:$0xff] }
 0x1d1   : > { %v2059_v37 = vpop.f32.mrf.mxu2 }
 0x1d2   : > { %v2918_v34 = vpop.f32.mrf.mxu3  ;;  %v2369_v22 = vadd.f32 %v2059_v37, %v1330_v26  ;;  %v1773_v37 = vpack.c.bf16 %v1659_v48, %v1658_v33  ;;  %v8472_v33 = vld [vmem:[%s9773_s29 + $0x148] sm:$0xff] }
 0x1d3   : > { %v1332_v43 = vpop.f32.mrf.mxu1  ;;  %v8675_v48 = vld [vmem:[%s9773_s29 + $0x141] sm:$0xff] }
 0x1d4   : > { %v3228_v41 = vadd.f32 %v2918_v34, %v2369_v22  ;;  %v3779_v44 = vpop.f32.mrf.mxu0  ;;  %v1333_v9 = vadd.f32 %v1332_v43, %v10037_v45  ;;  %v2632_v45 = vpack.c.bf16 %v8470_v21, %v8469_v6  ;;  %v8676_v6 = vld [vmem:[%s9773_s29 + $0x149] sm:$0xff] }
 0x1d6   : > { %8315 = vmatmul.msk.bf16.gmra.mxu1 %vm577_vm0, %v2629_v15  ;;  %8391 = vmatmul.msk.bf16.gmra.mxu2 %vm577_vm0, %v1772_v23  ;;  %v10430_v4 = vadd.f32 %v3776_v62, %v3228_v41 }
 0x1d7   : > { %8595 = vmatmul.msk.bf16.gmra.mxu3 %vm577_vm0, %v2631_v3  ;;  %8799 = vmatmul.msk.bf16.gmra.mxu0 %vm577_vm0, %v10097_v17 }
 0x1d9   : > { %v2062_v2 = vpop.f32.mrf.mxu2 }
 0x1da   : > { %v2921_v38 = vpop.f32.mrf.mxu3  ;;  %v2370_v40 = vadd.f32 %v2062_v2, %v1333_v9 }
 0x1db   : > { %v1334_v55 = vpop.f32.mrf.mxu1 }
 0x1dc   : > { %v3229_v19 = vadd.f32 %v2921_v38, %v2370_v40  ;;  %v3781_v61 = vpop.f32.mrf.mxu0  ;;  %v1335_v62 = vadd.f32 %v1334_v55, %v10050_v49  ;;  %v1660_v38 = vld [vmem:[%s9773_s29 + $0x11a] sm:$0xff]  ;;  %v1661_v55 = vld [vmem:[%s9773_s29 + $0x122] sm:$0xff] }
 0x1de   : > { %v10436_v15 = vadd.f32 %v3779_v44, %v3229_v19  ;;  %v8471_v19 = vld [vmem:[%s9773_s29 + $0x140] sm:$0xff] }
 0x1e1   : > { %v2064_v46 = vpop.f32.mrf.mxu2 }
 0x1e2   : > { %v2923_v39 = vpop.f32.mrf.mxu3  ;;  %v2371_v26 = vadd.f32 %v2064_v46, %v1335_v62  ;;  %v1774_v46 = vpack.c.bf16 %v1661_v55, %v1660_v38  ;;  %v1663_v38 = vld [vmem:[%s9773_s29 + $0x132] sm:$0xff] }
 0x1e3   : > { %v1337_v17 = vpop.f32.mrf.mxu1  ;;  %v8473_v55 = vld [vmem:[%s9773_s29 + $0x150] sm:$0xff] }
 0x1e4   : > { %v3230_v34 = vadd.f32 %v2923_v39, %v2371_v26  ;;  %v3784_v22 = vpop.f32.mrf.mxu0  ;;  %v1338_v43 = vadd.f32 %v1337_v17, %v10068_v47  ;;  %v2633_v39 = vpack.c.bf16 %v8472_v33, %v8471_v19  ;;  %v3491_v26 = vpack.c.bf16 %v8676_v6, %v8675_v48  ;;  %v8474_v19 = vld [vmem:[%s9773_s29 + $0x158] sm:$0xff] }
 0x1e5   : > { %v8677_v33 = vld [vmem:[%s9773_s29 + $0x151] sm:$0xff] }
 0x1e6   : > { %8316 = vmatmul.msk.bf16.gmra.mxu1 %vm577_vm0, %v2630_v36  ;;  %8392 = vmatmul.msk.bf16.gmra.mxu2 %vm577_vm0, %v1773_v37  ;;  %v10445_v49 = vadd.f32 %v3781_v61, %v3230_v34 }
 0x1e7   : > { %8596 = vmatmul.msk.bf16.gmra.mxu3 %vm577_vm0, %v2632_v45  ;;  %8800 = vmatmul.msk.bf16.gmra.mxu0 %vm577_vm0, %v10140_v20 }
 0x1e9   : > { %v2067_v23 = vpop.f32.mrf.mxu2 }
 0x1ea   : > { %v2926_v41 = vpop.f32.mrf.mxu3  ;;  %v2372_v44 = vadd.f32 %v2067_v23, %v1338_v43 }
 0x1eb   : > { %v1339_v9 = vpop.f32.mrf.mxu1 }
 0x1ec   : > { %v3231_v2 = vadd.f32 %v2926_v41, %v2372_v44  ;;  %v3786_v36 = vpop.f32.mrf.mxu0  ;;  %v1340_v61 = vadd.f32 %v1339_v9, %v10081_v0 }
 0x1ee   : > { %v10451_v40 = vadd.f32 %v3784_v22, %v3231_v2 }
 0x1f1   : > { %v2069_v21 = vpop.f32.mrf.mxu2 }
 0x1f2   : > { %v2928_v20 = vpop.f32.mrf.mxu3  ;;  %v2373_v62 = vadd.f32 %v2069_v21, %v1340_v61  ;;  %v8678_v61 = vld [vmem:[%s9773_s29 + $0x159] sm:$0xff] }
 0x1f3   : > { %v1342_v47 = vpop.f32.mrf.mxu1 }
 0x1f4   : > { %v3232_v17 = vadd.f32 %v2928_v20, %v2373_v62  ;;  %v3789_v37 = vpop.f32.mrf.mxu0  ;;  %v1343_v34 = vadd.f32 %v1342_v47, %v10099_v8  ;;  %v2634_v62 = vpack.c.bf16 %v8474_v19, %v8473_v55  ;;  %v3492_v47 = vpack.c.bf16 %v8678_v61, %v8677_v33  ;;  %v8476_v55 = vld [vmem:[%s9773_s29 + $0x170] sm:$0xff] }
 0x1f5   : > { %v8679_v19 = vld [vmem:[%s9773_s29 + $0x169] sm:$0xff] }
 0x1f6   : > { %8317 = vmatmul.msk.bf16.gmra.mxu1 %vm577_vm0, %v2631_v3  ;;  %8393 = vmatmul.msk.bf16.gmra.mxu2 %vm577_vm0, %v1774_v46  ;;  %v10462_v0 = vadd.f32 %v3786_v36, %v3232_v17  ;;  %v1662_v3 = vld [vmem:[%s9773_s29 + $0x12a] sm:$0xff] }
 0x1f7   : > { %8597 = vmatmul.msk.bf16.gmra.mxu3 %vm577_vm0, %v2633_v39  ;;  %8801 = vmatmul.msk.bf16.gmra.mxu0 %vm577_vm0, %v3491_v26  ;;  %v1775_v20 = vpack.c.bf16 %v1663_v38, %v1662_v3  ;;  %v1665_v3 = vld [vmem:[%s9773_s29 + $0x14a] sm:$0xff] }
 0x1f8   : > { %v8475_v38 = vld [vmem:[%s9773_s29 + $0x168] sm:$0xff] }
 0x1f9   : > { %v2072_v22 = vpop.f32.mrf.mxu2 }
 0x1fa   : > { %v2931_v43 = vpop.f32.mrf.mxu3  ;;  %v2374_v23 = vadd.f32 %v2072_v22, %v1343_v34 }
 0x1fb   : > { %v1344_v41 = vpop.f32.mrf.mxu1 }
 0x1fc   : > { %v3233_v44 = vadd.f32 %v2931_v43, %v2374_v23  ;;  %v3791_v9 = vpop.f32.mrf.mxu0  ;;  %v1345_v36 = vadd.f32 %v1344_v41, %v10121_v12 }
 0x1fe   : > { %v10467_v2 = vadd.f32 %v3789_v37, %v3233_v44 }
 0x201   : > { %v2074_v48 = vpop.f32.mrf.mxu2 }
 0x202   : > { %v2933_v6 = vpop.f32.mrf.mxu3  ;;  %v2375_v21 = vadd.f32 %v2074_v48, %v1345_v36  ;;  %v8680_v36 = vld [vmem:[%s9773_s29 + $0x171] sm:$0xff] }
 0x203   : > { %v1347_v8 = vpop.f32.mrf.mxu1 }
 0x204   : > { %v3234_v46 = vadd.f32 %v2933_v6, %v2375_v21  ;;  %v3794_v26 = vpop.f32.mrf.mxu0  ;;  %v1348_v17 = vadd.f32 %v1347_v8, %v10142_v27  ;;  %v2635_v21 = vpack.c.bf16 %v8476_v55, %v8475_v38  ;;  %v3493_v8 = vpack.c.bf16 %v8680_v36, %v8679_v19  ;;  %v8478_v38 = vld [vmem:[%s9773_s29 + $0x180] sm:$0xff] }
 0x205   : > { %v8681_v55 = vld [vmem:[%s9773_s29 + $0x179] sm:$0xff] }
 0x206   : > { %8318 = vmatmul.msk.bf16.gmra.mxu1 %vm577_vm0, %v2632_v45  ;;  %8394 = vmatmul.msk.bf16.gmra.mxu2 %vm577_vm0, %v1775_v20  ;;  %v10478_v12 = vadd.f32 %v3791_v9, %v3234_v46  ;;  %v1664_v45 = vld [vmem:[%s9773_s29 + $0x142] sm:$0xff] }
 0x207   : > { %8598 = vmatmul.msk.bf16.gmra.mxu3 %vm577_vm0, %v2634_v62  ;;  %8802 = vmatmul.msk.bf16.gmra.mxu0 %vm577_vm0, %v3492_v47  ;;  %v1776_v6 = vpack.c.bf16 %v1665_v3, %v1664_v45  ;;  %v1667_v45 = vld [vmem:[%s9773_s29 + $0x15a] sm:$0xff] }
 0x208   : > { %v8477_v3 = vld [vmem:[%s9773_s29 + $0x178] sm:$0xff] }
 0x209   : > { %v2077_v37 = vpop.f32.mrf.mxu2 }
 0x20a   : > { %v2936_v34 = vpop.f32.mrf.mxu3  ;;  %v2376_v22 = vadd.f32 %v2077_v37, %v1348_v17 }
 0x20b   : > { %v1349_v43 = vpop.f32.mrf.mxu1 }
 0x20c   : > { %v3235_v23 = vadd.f32 %v2936_v34, %v2376_v22  ;;  %v3796_v41 = vpop.f32.mrf.mxu0  ;;  %v1350_v9 = vadd.f32 %v1349_v43, %v10155_v30 }
 0x20e   : > { %v10483_v44 = vadd.f32 %v3794_v26, %v3235_v23 }
 0x211   : > { %v2079_v33 = vpop.f32.mrf.mxu2 }
 0x212   : > { %v2938_v61 = vpop.f32.mrf.mxu3  ;;  %v2377_v48 = vadd.f32 %v2079_v33, %v1350_v9  ;;  %v8682_v9 = vld [vmem:[%s9773_s29 + $0x181] sm:$0xff] }
 0x213   : > { %v1352_v27 = vpop.f32.mrf.mxu1 }
 0x214   : > { %v3236_v20 = vadd.f32 %v2938_v61, %v2377_v48  ;;  %v3799_v47 = vpop.f32.mrf.mxu0  ;;  %v1353_v46 = vadd.f32 %v1352_v27, %v10169_v51  ;;  %v2636_v48 = vpack.c.bf16 %v8478_v38, %v8477_v3  ;;  %v3494_v27 = vpack.c.bf16 %v8682_v9, %v8681_v55  ;;  %v8480_v3 = vld [vmem:[%s9773_s29 + $0x198] sm:$0xff] }
 0x215   : > { %v8683_v38 = vld [vmem:[%s9773_s29 + $0x191] sm:$0xff] }
 0x216   : > { %8319 = vmatmul.msk.bf16.gmra.mxu1 %vm577_vm0, %v2633_v39  ;;  %8395 = vmatmul.msk.bf16.gmra.mxu2 %vm577_vm0, %v1776_v6  ;;  %v10494_v30 = vadd.f32 %v3796_v41, %v3236_v20  ;;  %v1666_v39 = vld [vmem:[%s9773_s29 + $0x152] sm:$0xff] }
 0x217   : > { %8599 = vmatmul.msk.bf16.gmra.mxu3 %vm577_vm0, %v2635_v21  ;;  %8803 = vmatmul.msk.bf16.gmra.mxu0 %vm577_vm0, %v3493_v8  ;;  %v1777_v61 = vpack.c.bf16 %v1667_v45, %v1666_v39  ;;  %v1669_v39 = vld [vmem:[%s9773_s29 + $0x172] sm:$0xff] }
 0x218   : > { %v8479_v45 = vld [vmem:[%s9773_s29 + $0x190] sm:$0xff] }
 0x219   : > { %v2082_v26 = vpop.f32.mrf.mxu2 }
 0x21a   : > { %v2941_v17 = vpop.f32.mrf.mxu3  ;;  %v2378_v37 = vadd.f32 %v2082_v26, %v1353_v46 }
 0x21b   : > { %v1354_v34 = vpop.f32.mrf.mxu1 }
 0x21c   : > { %v3237_v22 = vadd.f32 %v2941_v17, %v2378_v37  ;;  %v3801_v43 = vpop.f32.mrf.mxu0  ;;  %v1355_v41 = vadd.f32 %v1354_v34, %v10182_v11 }
 0x21e   : > { %v10499_v23 = vadd.f32 %v3799_v47, %v3237_v22 }
 0x221   : > { %v2084_v19 = vpop.f32.mrf.mxu2 }
 0x222   : > { %v2943_v36 = vpop.f32.mrf.mxu3  ;;  %v2379_v33 = vadd.f32 %v2084_v19, %v1355_v41  ;;  %v8684_v41 = vld [vmem:[%s9773_s29 + $0x199] sm:$0xff] }
 0x223   : > { %v1357_v51 = vpop.f32.mrf.mxu1 }
 0x224   : > { %v3238_v6 = vadd.f32 %v2943_v36, %v2379_v33  ;;  %v3804_v8 = vpop.f32.mrf.mxu0  ;;  %v1358_v20 = vadd.f32 %v1357_v51, %v10196_v7  ;;  %v2637_v33 = vpack.c.bf16 %v8480_v3, %v8479_v45  ;;  %v3495_v51 = vpack.c.bf16 %v8684_v41, %v8683_v38  ;;  %v8482_v45 = vld [vmem:[%s9773_s29 + $0x1a8] sm:$0xff] }
 0x225   : > { %v8685_v3 = vld [vmem:[%s9773_s29 + $0x1a1] sm:$0xff] }
 0x226   : > { %8320 = vmatmul.msk.bf16.gmra.mxu1 %vm577_vm0, %v2634_v62  ;;  %8396 = vmatmul.msk.bf16.gmra.mxu2 %vm577_vm0, %v1777_v61  ;;  %v10510_v11 = vadd.f32 %v3801_v43, %v3238_v6  ;;  %v1668_v62 = vld [vmem:[%s9773_s29 + $0x16a] sm:$0xff] }
 0x227   : > { %8600 = vmatmul.msk.bf16.gmra.mxu3 %vm577_vm0, %v2636_v48  ;;  %8804 = vmatmul.msk.bf16.gmra.mxu0 %vm577_vm0, %v3494_v27  ;;  %v1778_v36 = vpack.c.bf16 %v1669_v39, %v1668_v62  ;;  %v1671_v62 = vld [vmem:[%s9773_s29 + $0x182] sm:$0xff] }
 0x228   : > { %v8481_v39 = vld [vmem:[%s9773_s29 + $0x1a0] sm:$0xff] }
 0x229   : > { %v2087_v47 = vpop.f32.mrf.mxu2 }
 0x22a   : > { %v2946_v46 = vpop.f32.mrf.mxu3  ;;  %v2380_v26 = vadd.f32 %v2087_v47, %v1358_v20 }
 0x22b   : > { %v1359_v17 = vpop.f32.mrf.mxu1 }
 0x22c   : > { %v3239_v37 = vadd.f32 %v2946_v46, %v2380_v26  ;;  %v3806_v34 = vpop.f32.mrf.mxu0  ;;  %v1360_v43 = vadd.f32 %v1359_v17, %v10209_v28 }
 0x22e   : > { %v10515_v22 = vadd.f32 %v3804_v8, %v3239_v37 }
 0x231   : > { %v2089_v55 = vpop.f32.mrf.mxu2 }
 0x232   : > { %v2948_v9 = vpop.f32.mrf.mxu3  ;;  %v2381_v19 = vadd.f32 %v2089_v55, %v1360_v43  ;;  %v8686_v43 = vld [vmem:[%s9773_s29 + $0x1a9] sm:$0xff] }
 0x233   : > { %v1362_v7 = vpop.f32.mrf.mxu1 }
 0x234   : > { %v3240_v61 = vadd.f32 %v2948_v9, %v2381_v19  ;;  %v3809_v27 = vpop.f32.mrf.mxu0  ;;  %v1363_v6 = vadd.f32 %v1362_v7, %v10221_v58  ;;  %v2638_v19 = vpack.c.bf16 %v8482_v45, %v8481_v39  ;;  %v3496_v7 = vpack.c.bf16 %v8686_v43, %v8685_v3  ;;  %v8484_v39 = vld [vmem:[%s9773_s29 + $0x1c0] sm:$0xff] }
 0x235   : > { %v8687_v45 = vld [vmem:[%s9773_s29 + $0x1b9] sm:$0xff] }
 0x236   : > { %8321 = vmatmul.msk.bf16.gmra.mxu1 %vm577_vm0, %v2635_v21  ;;  %8397 = vmatmul.msk.bf16.gmra.mxu2 %vm577_vm0, %v1778_v36  ;;  %v10526_v28 = vadd.f32 %v3806_v34, %v3240_v61  ;;  %v1670_v21 = vld [vmem:[%s9773_s29 + $0x17a] sm:$0xff] }
 0x237   : > { %8601 = vmatmul.msk.bf16.gmra.mxu3 %vm577_vm0, %v2637_v33  ;;  %8805 = vmatmul.msk.bf16.gmra.mxu0 %vm577_vm0, %v3495_v51  ;;  %v1779_v9 = vpack.c.bf16 %v1671_v62, %v1670_v21  ;;  %v1673_v21 = vld [vmem:[%s9773_s29 + $0x19a] sm:$0xff] }
 0x238   : > { %v8483_v62 = vld [vmem:[%s9773_s29 + $0x1b8] sm:$0xff] }
 0x239   : > { %v2092_v8 = vpop.f32.mrf.mxu2 }
 0x23a   : > { %v2951_v20 = vpop.f32.mrf.mxu3  ;;  %v2382_v47 = vadd.f32 %v2092_v8, %v1363_v6 }
 0x23b   : > { %v1364_v46 = vpop.f32.mrf.mxu1 }
 0x23c   : > { %v3241_v26 = vadd.f32 %v2951_v20, %v2382_v47  ;;  %v3811_v17 = vpop.f32.mrf.mxu0  ;;  %v1365_v34 = vadd.f32 %v1364_v46, %v10234_v53 }
 0x23e   : > { %v10531_v37 = vadd.f32 %v3809_v27, %v3241_v26 }
 0x241   : > { %v2094_v38 = vpop.f32.mrf.mxu2 }
 0x242   : > { %v2953_v41 = vpop.f32.mrf.mxu3  ;;  %v2383_v55 = vadd.f32 %v2094_v38, %v1365_v34  ;;  %v8688_v34 = vld [vmem:[%s9773_s29 + $0x1c1] sm:$0xff] }
 0x243   : > { %v1367_v58 = vpop.f32.mrf.mxu1 }
 0x244   : > { %v3242_v36 = vadd.f32 %v2953_v41, %v2383_v55  ;;  %v3814_v51 = vpop.f32.mrf.mxu0  ;;  %v1368_v61 = vadd.f32 %v1367_v58, %v10246_v59  ;;  %v2639_v55 = vpack.c.bf16 %v8484_v39, %v8483_v62  ;;  %v3497_v58 = vpack.c.bf16 %v8688_v34, %v8687_v45  ;;  %v8486_v62 = vld [vmem:[%s9773_s29 + $0x1d0] sm:$0xff] }
 0x245   : > { %v8689_v39 = vld [vmem:[%s9773_s29 + $0x1c9] sm:$0xff] }
 0x246   : > { %8322 = vmatmul.msk.bf16.gmra.mxu1 %vm577_vm0, %v2636_v48  ;;  %8398 = vmatmul.msk.bf16.gmra.mxu2 %vm577_vm0, %v1779_v9  ;;  %v10542_v53 = vadd.f32 %v3811_v17, %v3242_v36  ;;  %v1672_v48 = vld [vmem:[%s9773_s29 + $0x192] sm:$0xff] }
 0x247   : > { %8602 = vmatmul.msk.bf16.gmra.mxu3 %vm577_vm0, %v2638_v19  ;;  %8806 = vmatmul.msk.bf16.gmra.mxu0 %vm577_vm0, %v3496_v7  ;;  %v1780_v41 = vpack.c.bf16 %v1673_v21, %v1672_v48  ;;  %v1675_v48 = vld [vmem:[%s9773_s29 + $0x1aa] sm:$0xff] }
 0x248   : > { %v8485_v21 = vld [vmem:[%s9773_s29 + $0x1c8] sm:$0xff] }
 0x249   : > { %v2097_v27 = vpop.f32.mrf.mxu2 }
 0x24a   : > { %v2956_v6 = vpop.f32.mrf.mxu3  ;;  %v2384_v8 = vadd.f32 %v2097_v27, %v1368_v61 }
 0x24b   : > { %v1369_v20 = vpop.f32.mrf.mxu1 }
 0x24c   : > { %v3243_v47 = vadd.f32 %v2956_v6, %v2384_v8  ;;  %v3816_v46 = vpop.f32.mrf.mxu0  ;;  %v1370_v17 = vadd.f32 %v1369_v20, %v10259_v1 }
 0x24e   : > { %v10547_v26 = vadd.f32 %v3814_v51, %v3243_v47 }
 0x251   : > { %v2099_v3 = vpop.f32.mrf.mxu2 }
 0x252   : > { %v2958_v43 = vpop.f32.mrf.mxu3  ;;  %v2385_v38 = vadd.f32 %v2099_v3, %v1370_v17  ;;  %v8690_v17 = vld [vmem:[%s9773_s29 + $0x1d1] sm:$0xff] }
 0x253   : > { %v1372_v59 = vpop.f32.mrf.mxu1 }
 0x254   : > { %v3244_v9 = vadd.f32 %v2958_v43, %v2385_v38  ;;  %v3819_v7 = vpop.f32.mrf.mxu0  ;;  %v1373_v36 = vadd.f32 %v1372_v59, %v10271_v5  ;;  %v2640_v38 = vpack.c.bf16 %v8486_v62, %v8485_v21  ;;  %v3498_v59 = vpack.c.bf16 %v8690_v17, %v8689_v39  ;;  %v8488_v21 = vld [vmem:[%s9773_s29 + $0x1e8] sm:$0xff] }
 0x255   : > { %v8691_v62 = vld [vmem:[%s9773_s29 + $0x1e1] sm:$0xff] }
 0x256   : > { %8323 = vmatmul.msk.bf16.gmra.mxu1 %vm577_vm0, %v2637_v33  ;;  %8399 = vmatmul.msk.bf16.gmra.mxu2 %vm577_vm0, %v1780_v41  ;;  %v10558_v1 = vadd.f32 %v3816_v46, %v3244_v9  ;;  %v1674_v33 = vld [vmem:[%s9773_s29 + $0x1a2] sm:$0xff] }
 0x257   : > { %8603 = vmatmul.msk.bf16.gmra.mxu3 %vm577_vm0, %v2639_v55  ;;  %8807 = vmatmul.msk.bf16.gmra.mxu0 %vm577_vm0, %v3497_v58  ;;  %v1781_v43 = vpack.c.bf16 %v1675_v48, %v1674_v33  ;;  %v1677_v33 = vld [vmem:[%s9773_s29 + $0x1c2] sm:$0xff] }
 0x258   : > { %v8487_v48 = vld [vmem:[%s9773_s29 + $0x1e0] sm:$0xff] }
 0x259   : > { %v2102_v51 = vpop.f32.mrf.mxu2 }
 0x25a   : > { %v2961_v61 = vpop.f32.mrf.mxu3  ;;  %v2386_v27 = vadd.f32 %v2102_v51, %v1373_v36 }
 0x25b   : > { %v1374_v6 = vpop.f32.mrf.mxu1 }
 0x25c   : > { %v3245_v8 = vadd.f32 %v2961_v61, %v2386_v27  ;;  %v3821_v20 = vpop.f32.mrf.mxu0  ;;  %v1375_v46 = vadd.f32 %v1374_v6, %v10284_v13 }
 0x25e   : > { %v10563_v47 = vadd.f32 %v3819_v7, %v3245_v8 }
 0x261   : > { %v2104_v45 = vpop.f32.mrf.mxu2 }
 0x262   : > { %v2963_v34 = vpop.f32.mrf.mxu3  ;;  %v2387_v3 = vadd.f32 %v2104_v45, %v1375_v46  ;;  %v8692_v46 = vld [vmem:[%s9773_s29 + $0x1e9] sm:$0xff] }
 0x263   : > { %v1377_v5 = vpop.f32.mrf.mxu1 }
 0x264   : > { %v3246_v41 = vadd.f32 %v2963_v34, %v2387_v3  ;;  %v3824_v58 = vpop.f32.mrf.mxu0  ;;  %v1378_v9 = vadd.f32 %v1377_v5, %v10296_v24  ;;  %v2641_v3 = vpack.c.bf16 %v8488_v21, %v8487_v48  ;;  %v3499_v5 = vpack.c.bf16 %v8692_v46, %v8691_v62  ;;  %v8490_v48 = vld [vmem:[%s9773_s29 + $0x1f8] sm:$0xff] }
 0x265   : > { %v8693_v21 = vld [vmem:[%s9773_s29 + $0x1f1] sm:$0xff] }
 0x266   : > { %8324 = vmatmul.msk.bf16.gmra.mxu1 %vm577_vm0, %v2638_v19  ;;  %8400 = vmatmul.msk.bf16.gmra.mxu2 %vm577_vm0, %v1781_v43  ;;  %v10574_v13 = vadd.f32 %v3821_v20, %v3246_v41  ;;  %v1676_v19 = vld [vmem:[%s9773_s29 + $0x1ba] sm:$0xff] }
 0x267   : > { %8604 = vmatmul.msk.bf16.gmra.mxu3 %vm577_vm0, %v2640_v38  ;;  %8808 = vmatmul.msk.bf16.gmra.mxu0 %vm577_vm0, %v3498_v59  ;;  %v1782_v34 = vpack.c.bf16 %v1677_v33, %v1676_v19  ;;  %v1679_v19 = vld [vmem:[%s9773_s29 + $0x1d2] sm:$0xff] }
 0x268   : > { %v8489_v33 = vld [vmem:[%s9773_s29 + $0x1f0] sm:$0xff] }
 0x269   : > { %v2107_v7 = vpop.f32.mrf.mxu2 }
 0x26a   : > { %v2966_v36 = vpop.f32.mrf.mxu3  ;;  %v2388_v51 = vadd.f32 %v2107_v7, %v1378_v9 }
 0x26b   : > { %v1379_v61 = vpop.f32.mrf.mxu1 }
 0x26c   : > { %v3247_v27 = vadd.f32 %v2966_v36, %v2388_v51  ;;  %v3826_v6 = vpop.f32.mrf.mxu0  ;;  %v1380_v20 = vadd.f32 %v1379_v61, %v10309_v25 }
 0x26e   : > { %v10579_v8 = vadd.f32 %v3824_v58, %v3247_v27 }
 0x271   : > { %v2109_v39 = vpop.f32.mrf.mxu2 }
 0x272   : > { %v2968_v17 = vpop.f32.mrf.mxu3  ;;  %v2389_v45 = vadd.f32 %v2109_v39, %v1380_v20  ;;  %v8694_v20 = vld [vmem:[%s9773_s29 + $0x1f9] sm:$0xff] }
 0x273   : > { %v1382_v24 = vpop.f32.mrf.mxu1 }
 0x274   : > { %v3248_v43 = vadd.f32 %v2968_v17, %v2389_v45  ;;  %v3829_v59 = vpop.f32.mrf.mxu0  ;;  %v1383_v41 = vadd.f32 %v1382_v24, %v10321_v31  ;;  %v2642_v45 = vpack.c.bf16 %v8490_v48, %v8489_v33  ;;  %v3500_v24 = vpack.c.bf16 %v8694_v20, %v8693_v21  ;;  %v8492_v33 = vld [vmem:[%s9773_s29 + $0x210] sm:$0xff] }
 0x275   : > { %v8695_v48 = vld [vmem:[%s9773_s29 + $0x209] sm:$0xff] }
 0x276   : > { %8325 = vmatmul.msk.bf16.gmra.mxu1 %vm577_vm0, %v2639_v55  ;;  %8401 = vmatmul.msk.bf16.gmra.mxu2 %vm577_vm0, %v1782_v34  ;;  %v10590_v25 = vadd.f32 %v3826_v6, %v3248_v43  ;;  %v1678_v55 = vld [vmem:[%s9773_s29 + $0x1ca] sm:$0xff] }
 0x277   : > { %8605 = vmatmul.msk.bf16.gmra.mxu3 %vm577_vm0, %v2641_v3  ;;  %8809 = vmatmul.msk.bf16.gmra.mxu0 %vm577_vm0, %v3499_v5  ;;  %v1783_v17 = vpack.c.bf16 %v1679_v19, %v1678_v55  ;;  %v1681_v55 = vld [vmem:[%s9773_s29 + $0x1ea] sm:$0xff] }
 0x278   : > { %v8491_v19 = vld [vmem:[%s9773_s29 + $0x208] sm:$0xff] }
 0x279   : > { %v2112_v58 = vpop.f32.mrf.mxu2 }
 0x27a   : > { %v2971_v9 = vpop.f32.mrf.mxu3  ;;  %v2390_v7 = vadd.f32 %v2112_v58, %v1383_v41 }
 0x27b   : > { %v1384_v36 = vpop.f32.mrf.mxu1 }
 0x27c   : > { %v3249_v51 = vadd.f32 %v2971_v9, %v2390_v7  ;;  %v3831_v61 = vpop.f32.mrf.mxu0  ;;  %v1385_v6 = vadd.f32 %v1384_v36, %v10334_v42 }
 0x27e   : > { %v10595_v27 = vadd.f32 %v3829_v59, %v3249_v51 }
 0x281   : > { %v2114_v62 = vpop.f32.mrf.mxu2 }
 0x282   : > { %v2973_v46 = vpop.f32.mrf.mxu3  ;;  %v2391_v39 = vadd.f32 %v2114_v62, %v1385_v6  ;;  %v8696_v6 = vld [vmem:[%s9773_s29 + $0x211] sm:$0xff] }
 0x283   : > { %v1387_v31 = vpop.f32.mrf.mxu1 }
 0x284   : > { %v3250_v34 = vadd.f32 %v2973_v46, %v2391_v39  ;;  %v3834_v5 = vpop.f32.mrf.mxu0  ;;  %v1388_v43 = vadd.f32 %v1387_v31, %v10346_v50  ;;  %v2643_v39 = vpack.c.bf16 %v8492_v33, %v8491_v19  ;;  %v3501_v31 = vpack.c.bf16 %v8696_v6, %v8695_v48  ;;  %v8494_v19 = vld [vmem:[%s9773_s29 + $0x220] sm:$0xff] }
 0x285   : > { %v8697_v33 = vld [vmem:[%s9773_s29 + $0x219] sm:$0xff] }
 0x286   : > { %8326 = vmatmul.msk.bf16.gmra.mxu1 %vm577_vm0, %v2640_v38  ;;  %8402 = vmatmul.msk.bf16.gmra.mxu2 %vm577_vm0, %v1783_v17  ;;  %v10606_v42 = vadd.f32 %v3831_v61, %v3250_v34  ;;  %v1680_v38 = vld [vmem:[%s9773_s29 + $0x1e2] sm:$0xff] }
 0x287   : > { %8606 = vmatmul.msk.bf16.gmra.mxu3 %vm577_vm0, %v2642_v45  ;;  %8810 = vmatmul.msk.bf16.gmra.mxu0 %vm577_vm0, %v3500_v24  ;;  %v1784_v46 = vpack.c.bf16 %v1681_v55, %v1680_v38  ;;  %v1683_v38 = vld [vmem:[%s9773_s29 + $0x1fa] sm:$0xff] }
 0x288   : > { %v8493_v55 = vld [vmem:[%s9773_s29 + $0x218] sm:$0xff] }
 0x289   : > { %v2117_v59 = vpop.f32.mrf.mxu2 }
 0x28a   : > { %v2976_v41 = vpop.f32.mrf.mxu3  ;;  %v2392_v58 = vadd.f32 %v2117_v59, %v1388_v43 }
 0x28b   : > { %v1389_v9 = vpop.f32.mrf.mxu1 }
 0x28c   : > { %v3251_v7 = vadd.f32 %v2976_v41, %v2392_v58  ;;  %v3836_v36 = vpop.f32.mrf.mxu0  ;;  %v1390_v61 = vadd.f32 %v1389_v9, %v10359_v56 }
 0x28e   : > { %v10611_v51 = vadd.f32 %v3834_v5, %v3251_v7 }
 0x291   : > { %v2119_v21 = vpop.f32.mrf.mxu2 }
 0x292   : > { %v2978_v20 = vpop.f32.mrf.mxu3  ;;  %v2393_v62 = vadd.f32 %v2119_v21, %v1390_v61  ;;  %v8698_v61 = vld [vmem:[%s9773_s29 + $0x221] sm:$0xff] }
 0x293   : > { %v1392_v50 = vpop.f32.mrf.mxu1 }
 0x294   : > { %v3252_v17 = vadd.f32 %v2978_v20, %v2393_v62  ;;  %v3839_v24 = vpop.f32.mrf.mxu0  ;;  %v1393_v34 = vadd.f32 %v1392_v50, %v9909_v52  ;;  %v2644_v62 = vpack.c.bf16 %v8494_v19, %v8493_v55  ;;  %v3502_v50 = vpack.c.bf16 %v8698_v61, %v8697_v33  ;;  %v8496_v55 = vld [vmem:[%s9773_s29 + $0x238] sm:$0xff] }
 0x295   : > { %v8699_v19 = vld [vmem:[%s9773_s29 + $0x231] sm:$0xff] }
 0x296   : > { %8327 = vmatmul.msk.bf16.gmra.mxu1 %vm577_vm0, %v2641_v3  ;;  %8403 = vmatmul.msk.bf16.gmra.mxu2 %vm577_vm0, %v1784_v46  ;;  %v10622_v56 = vadd.f32 %v3836_v36, %v3252_v17  ;;  %v1682_v3 = vld [vmem:[%s9773_s29 + $0x1f2] sm:$0xff] }
 0x297   : > { %8607 = vmatmul.msk.bf16.gmra.mxu3 %vm577_vm0, %v2643_v39  ;;  %8811 = vmatmul.msk.bf16.gmra.mxu0 %vm577_vm0, %v3501_v31  ;;  %v1785_v20 = vpack.c.bf16 %v1683_v38, %v1682_v3  ;;  %v1685_v3 = vld [vmem:[%s9773_s29 + $0x212] sm:$0xff] }
 0x298   : > { %v8495_v38 = vld [vmem:[%s9773_s29 + $0x230] sm:$0xff] }
 0x299   : > { %v2122_v5 = vpop.f32.mrf.mxu2 }
 0x29a   : > { %v2981_v43 = vpop.f32.mrf.mxu3  ;;  %v2394_v59 = vadd.f32 %v2122_v5, %v1393_v34 }
 0x29b   : > { %v1394_v41 = vpop.f32.mrf.mxu1 }
 0x29c   : > { %v3253_v58 = vadd.f32 %v2981_v43, %v2394_v59  ;;  %v3841_v9 = vpop.f32.mrf.mxu0  ;;  %v1395_v36 = vadd.f32 %v1394_v41, %v9924_v60 }
 0x29e   : > { %v10627_v7 = vadd.f32 %v3839_v24, %v3253_v58 }
 0x2a1   : > { %v2124_v48 = vpop.f32.mrf.mxu2 }
 0x2a2   : > { %v2983_v6 = vpop.f32.mrf.mxu3  ;;  %v2395_v21 = vadd.f32 %v2124_v48, %v1395_v36  ;;  %v8700_v36 = vld [vmem:[%s9773_s29 + $0x239] sm:$0xff] }
 0x2a3   : > { %v1397_v52 = vpop.f32.mrf.mxu1 }
 0x2a4   : > { %v3254_v46 = vadd.f32 %v2983_v6, %v2395_v21  ;;  %v3844_v31 = vpop.f32.mrf.mxu0  ;;  %v1398_v17 = vadd.f32 %v1397_v52, %v9940_v10  ;;  %v2645_v21 = vpack.c.bf16 %v8496_v55, %v8495_v38  ;;  %v3503_v52 = vpack.c.bf16 %v8700_v36, %v8699_v19  ;;  %v8498_v38 = vld [vmem:[%s9773_s29 + $0x248] sm:$0xff]  ;;  %v12985_v55 = vld [vmem:[#allocation12_spill] sm:$0xff] }
 0x2a5   : > { %v8702_v19 = vld [vmem:[%s9773_s29 + $0x249] sm:$0xff] }
 0x2a6   : > { %8328 = vmatmul.msk.bf16.gmra.mxu1 %vm577_vm0, %v2642_v45  ;;  %8404 = vmatmul.msk.bf16.gmra.mxu2 %vm577_vm0, %v1785_v20  ;;  %v10638_v60 = vadd.f32 %v3841_v9, %v3254_v46  ;;  %v1684_v45 = vld [vmem:[%s9773_s29 + $0x20a] sm:$0xff] }
 0x2a7   : > { %8608 = vmatmul.msk.bf16.gmra.mxu3 %vm577_vm0, %v2644_v62  ;;  %8812 = vmatmul.msk.bf16.gmra.mxu0 %vm577_vm0, %v3502_v50  ;;  %v1786_v6 = vpack.c.bf16 %v1685_v3, %v1684_v45  ;;  %v1687_v45 = vld [vmem:[%s9773_s29 + $0x222] sm:$0xff] }
 0x2a8   : > { %v8497_v3 = vld [vmem:[%s9773_s29 + $0x240] sm:$0xff] }
 0x2a9   : > { %v2127_v24 = vpop.f32.mrf.mxu2 }
 0x2aa   : > { %v2986_v34 = vpop.f32.mrf.mxu3  ;;  %v2396_v5 = vadd.f32 %v2127_v24, %v1398_v17 }
 0x2ab   : > { %v1399_v43 = vpop.f32.mrf.mxu1 }
 0x2ac   : > { %v3255_v59 = vadd.f32 %v2986_v34, %v2396_v5  ;;  %v3846_v41 = vpop.f32.mrf.mxu0  ;;  %v1400_v9 = vadd.f32 %v1399_v43, %v9955_v18 }
 0x2ae   : > { %v10643_v58 = vadd.f32 %v3844_v31, %v3255_v59 }
 0x2b1   : > { %v2129_v33 = vpop.f32.mrf.mxu2 }
 0x2b2   : > { %v2988_v61 = vpop.f32.mrf.mxu3  ;;  %v2397_v48 = vadd.f32 %v2129_v33, %v1400_v9  ;;  %v8701_v9 = vld [vmem:[%s9773_s29 + $0x241] sm:$0xff] }
 0x2b3   : > { %v1402_v10 = vpop.f32.mrf.mxu1 }
 0x2b4   : > { %v3256_v20 = vadd.f32 %v2988_v61, %v2397_v48  ;;  %v3849_v50 = vpop.f32.mrf.mxu0  ;;  %v1403_v46 = vadd.f32 %v1402_v10, %v9971_v32  ;;  %v2646_v10 = vpack.c.bf16 %v8498_v38, %v8497_v3  ;;  %v1689_v38 = vld [vmem:[%s9773_s29 + $0x23a] sm:$0xff] }
 0x2b6   : > { %8329 = vmatmul.msk.bf16.gmra.mxu1 %vm577_vm0, %v2643_v39  ;;  %8405 = vmatmul.msk.bf16.gmra.mxu2 %vm577_vm0, %v1786_v6  ;;  %v10654_v18 = vadd.f32 %v3846_v41, %v3256_v20  ;;  %v1686_v39 = vld [vmem:[%s9773_s29 + $0x21a] sm:$0xff]  ;;  %v3504_v6 = vpack.c.bf16 %v8702_v19, %v8701_v9 }
 0x2b7   : > { %8609 = vmatmul.msk.bf16.gmra.mxu3 %vm577_vm0, %v2645_v21  ;;  %8813 = vmatmul.msk.bf16.gmra.mxu0 %vm577_vm0, %v3503_v52  ;;  %v1787_v48 = vpack.c.bf16 %v1687_v45, %v1686_v39  ;;  %v12987_v9 = vld [vmem:[#allocation18_spill] sm:$0xff] }
 0x2b8   : > { %v8703_v19 = vld [vmem:[%s9773_s29 + $0x259] sm:$0xff] }
 0x2b9   : > { %v2132_v31 = vpop.f32.mrf.mxu2 }
 0x2ba   : > { %v2991_v17 = vpop.f32.mrf.mxu3  ;;  %v2398_v24 = vadd.f32 %v2132_v31, %v1403_v46  ;;  %v12986_v46 = vld [vmem:[#allocation15_spill] sm:$0xff] }
 0x2bb   : > { %v1404_v34 = vpop.f32.mrf.mxu1 }
 0x2bc   : > { %v3257_v5 = vadd.f32 %v2991_v17, %v2398_v24  ;;  %v3851_v43 = vpop.f32.mrf.mxu0  ;;  %v1405_v41 = vadd.f32 %v1404_v34, %v12985_v55  ;;  %v8499_v55 = vld [vmem:[%s9773_s29 + $0x258] sm:$0xff] }
 0x2be   : > { %v10659_v59 = vadd.f32 %v3849_v50, %v3257_v5 }
 0x2c1   : > { %v2134_v36 = vpop.f32.mrf.mxu2 }
 0x2c2   : > { %v2993_v33 = vpop.f32.mrf.mxu3  ;;  %v2399_v61 = vadd.f32 %v2134_v36, %v1405_v41  ;;  %v8500_v41 = vld [vmem:[%s9773_s29 + $0x260] sm:$0xff] }
 0x2c3   : > { %v1407_v32 = vpop.f32.mrf.mxu1  ;;  %v8704_v36 = vld [vmem:[%s9773_s29 + $0x261] sm:$0xff] }
 0x2c4   : > { %v3258_v52 = vadd.f32 %v2993_v33, %v2399_v61  ;;  %v3854_v20 = vpop.f32.mrf.mxu0  ;;  %v1408_v31 = vadd.f32 %v1407_v32, %v12986_v46  ;;  %v3505_v46 = vpack.c.bf16 %v8704_v36, %v8703_v19  ;;  %v8501_v19 = vld [vmem:[%s9773_s29 + $0x268] sm:$0xff]  ;;  %v8502_v36 = vld [vmem:[%s9773_s29 + $0x270] sm:$0xff] }
 0x2c6   : > { %8330 = vmatmul.msk.bf16.gmra.mxu1 %vm577_vm0, %v2644_v62  ;;  %8406 = vmatmul.msk.bf16.gmra.mxu2 %vm577_vm0, %v1787_v48  ;;  %v10670_v50 = vadd.f32 %v3851_v43, %v3258_v52  ;;  %v1688_v62 = vld [vmem:[%s9773_s29 + $0x232] sm:$0xff]  ;;  %v2647_v52 = vpack.c.bf16 %v8500_v41, %v8499_v55 }
 0x2c7   : > { %8610 = vmatmul.msk.bf16.gmra.mxu3 %vm577_vm0, %v2646_v10  ;;  %8814 = vmatmul.msk.bf16.gmra.mxu0 %vm577_vm0, %v3504_v6  ;;  %v1788_v6 = vpack.c.bf16 %v1689_v38, %v1688_v62 }
 0x2c9   : > { %v2137_v17 = vpop.f32.mrf.mxu2 }
 0x2ca   : > { %v2996_v24 = vpop.f32.mrf.mxu3  ;;  %v2400_v34 = vadd.f32 %v2137_v17, %v1408_v31 }
 0x2cb   : > { %v1409_v5 = vpop.f32.mrf.mxu1 }
 0x2cc   : > { %v3259_v39 = vadd.f32 %v2996_v24, %v2400_v34  ;;  %v3856_v45 = vpop.f32.mrf.mxu0  ;;  %v1410_v43 = vadd.f32 %v1409_v5, %v12987_v9  ;;  %v12989_v24 = vld [vmem:[#allocation21_spill] sm:$0xff] }
 0x2ce   : > { %v10675_v3 = vadd.f32 %v3854_v20, %v3259_v39 }
 0x2d1   : > { %v2139_v33 = vpop.f32.mrf.mxu2 }
 0x2d2   : > { %v2998_v61 = vpop.f32.mrf.mxu3  ;;  %v2401_v48 = vadd.f32 %v2139_v33, %v1410_v43  ;;  %v1691_v43 = vld [vmem:[%s9773_s29 + $0x24a] sm:$0xff] }
 0x2d3   : > { %v1412_v32 = vpop.f32.mrf.mxu1  ;;  %v12991_v33 = vld [vmem:[#allocation24_spill] sm:$0xff] }
 0x2d4   : > { %v3260_v31 = vadd.f32 %v2998_v61, %v2401_v48  ;;  %v3859_v17 = vpop.f32.mrf.mxu0  ;;  %v1413_v34 = vadd.f32 %v1412_v32, %v12989_v24  ;;  %v8705_v61 = vld [vmem:[%s9773_s29 + $0x269] sm:$0xff]  ;;  %v8706_v48 = vld [vmem:[%s9773_s29 + $0x271] sm:$0xff] }
 0x2d6   : > { %8331 = vmatmul.msk.bf16.gmra.mxu1 %vm577_vm0, %v2645_v21  ;;  %8407 = vmatmul.msk.bf16.gmra.mxu2 %vm577_vm0, %v1788_v6  ;;  %v10686_v20 = vadd.f32 %v3856_v45, %v3260_v31  ;;  %v1690_v21 = vld [vmem:[%s9773_s29 + $0x242] sm:$0xff] }
 0x2d7   : > { %8611 = vmatmul.msk.bf16.gmra.mxu3 %vm577_vm0, %v2647_v52  ;;  %8815 = vmatmul.msk.bf16.gmra.mxu0 %vm577_vm0, %v3505_v46  ;;  %v1789_v24 = vpack.c.bf16 %v1691_v43, %v1690_v21 }
 0x2d8   : > { %12988 = vst [vmem:[#allocation12_spill] sm:$0xff] %v10686_v20  ;;  %v10699_v20 = vpack.c.bf16 %v8502_v36, %v8501_v19 }
 0x2d9   : > { %v2142_v5 = vpop.f32.mrf.mxu2 }
 0x2da   : > { %v3001_v39 = vpop.f32.mrf.mxu3  ;;  %v2402_v62 = vadd.f32 %v2142_v5, %v1413_v34  ;;  %v3506_v34 = vpack.c.bf16 %v8706_v48, %v8705_v61  ;;  %v1693_v61 = vld [vmem:[%s9773_s29 + $0x262] sm:$0xff] }
 0x2db   : > { %v1414_v38 = vpop.f32.mrf.mxu1  ;;  %v8503_v48 = vld [vmem:[%s9773_s29 + $0x280] sm:$0xff] }
 0x2dc   : > { %v3261_v55 = vadd.f32 %v3001_v39, %v2402_v62  ;;  %v3861_v41 = vpop.f32.mrf.mxu0  ;;  %v1415_v45 = vadd.f32 %v1414_v38, %v12991_v33  ;;  %v12993_v62 = vld [vmem:[#allocation27_spill] sm:$0xff]  ;;  %v1692_v33 = vld [vmem:[%s9773_s29 + $0x25a] sm:$0xff] }
 0x2de   : > { %v10691_v9 = vadd.f32 %v3859_v17, %v3261_v55 }
 0x2e0   : > { %12990 = vst [vmem:[#allocation15_spill] sm:$0xff] %v10691_v9 }
 0x2e1   : > { %v2144_v6 = vpop.f32.mrf.mxu2 }
 0x2e2   : > { %v3003_v46 = vpop.f32.mrf.mxu3  ;;  %v2403_v31 = vadd.f32 %v2144_v6, %v1415_v45  ;;  %v8504_v6 = vld [vmem:[%s9773_s29 + $0x288] sm:$0xff] }
 0x2e3   : > { %v1417_v32 = vpop.f32.mrf.mxu1  ;;  %v10718_v9 = vpack.c.bf16 %v8504_v6, %v8503_v48 }
 0x2e4   : > { %v3262_v5 = vadd.f32 %v3003_v46, %v2403_v31  ;;  %v3864_v17 = vpop.f32.mrf.mxu0  ;;  %v1418_v38 = vadd.f32 %v1417_v32, %v12993_v62  ;;  %v12995_v46 = vld [vmem:[#allocation30_spill] sm:$0xff]  ;;  %v1790_v62 = vpack.c.bf16 %v1693_v61, %v1692_v33 }
 0x2e5   : > { %v8707_v31 = vld [vmem:[%s9773_s29 + $0x281] sm:$0xff] }
 0x2e6   : > { %8332 = vmatmul.msk.bf16.gmra.mxu1 %vm577_vm0, %v2646_v10  ;;  %8408 = vmatmul.msk.bf16.gmra.mxu2 %vm577_vm0, %v1789_v24  ;;  %v10705_v39 = vadd.f32 %v3861_v41, %v3262_v5  ;;  %v8708_v24 = vld [vmem:[%s9773_s29 + $0x289] sm:$0xff] }
 0x2e7   : > { %8612 = vmatmul.msk.bf16.gmra.mxu3 %vm577_vm0, %v10699_v20  ;;  %8816 = vmatmul.msk.bf16.gmra.mxu0 %vm577_vm0, %v3506_v34 }
 0x2e8   : > { %12992 = vst [vmem:[#allocation18_spill] sm:$0xff] %v10705_v39 }
 0x2e9   : > { %v2147_v55 = vpop.f32.mrf.mxu2 }
 0x2ea   : > { %v3006_v21 = vpop.f32.mrf.mxu3  ;;  %v2404_v43 = vadd.f32 %v2147_v55, %v1418_v38  ;;  %v3507_v38 = vpack.c.bf16 %v8708_v24, %v8707_v31  ;;  %v1694_v31 = vld [vmem:[%s9773_s29 + $0x26a] sm:$0xff] }
 0x2eb   : > { %v1419_v19 = vpop.f32.mrf.mxu1 }
 0x2ec   : > { %v3263_v36 = vadd.f32 %v3006_v21, %v2404_v43  ;;  %v3866_v10 = vpop.f32.mrf.mxu0  ;;  %v1420_v41 = vadd.f32 %v1419_v19, %v12995_v46  ;;  %v12997_v19 = vld [vmem:[#allocation33_spill] sm:$0xff]  ;;  %v9680_v46 = vld [vmem:[%s12891_s1 + $0x50] sm:$0xff] }
 0x2ed   : > { %4615 = vmatpush.bf16.msra.mxu1 %v9680_v46 }
 0x2ee   : > { %v10710_v45 = vadd.f32 %v3864_v17, %v3263_v36  ;;  %v9682_v17 = vld [vmem:[%s12891_s1 + $0x60] sm:$0xff] }
 0x2ef   : > { %5474 = vmatpush.bf16.msra.mxu2 %v9682_v17  ;;  %v8710_v17 = vld [vmem:[%s9773_s29 + $0x299] sm:$0xff] }
 0x2f0   : > { %12994 = vst [vmem:[#allocation21_spill] sm:$0xff] %v10710_v45 }
 0x2f1   : > { %v2149_v5 = vpop.f32.mrf.mxu2 }
 0x2f2   : > { %v3008_v34 = vpop.f32.mrf.mxu3  ;;  %v2405_v39 = vadd.f32 %v2149_v5, %v1420_v41  ;;  %v9686_v41 = vld [vmem:[%s12891_s1 + $0x80] sm:$0xff]  ;;  %v1695_v5 = vld [vmem:[%s9773_s29 + $0x272] sm:$0xff] }
 0x2f3   : > { %v1422_v32 = vpop.f32.mrf.mxu1  ;;  %7190 = vmatpush.bf16.msra.mxu0 %v9686_v41 }
 0x2f4   : > { %v3264_v55 = vadd.f32 %v3008_v34, %v2405_v39  ;;  %v3869_v21 = vpop.f32.mrf.mxu0  ;;  %v9684_v39 = vld [vmem:[%s12891_s1 + $0x70] sm:$0xff] }
 0x2f5   : > { %6332 = vmatpush.bf16.msra.mxu3 %v9684_v39  ;;  %v8505_v34 = vld [vmem:[%s9773_s29 + $0x290] sm:$0xff] }
 0x2f6   : > { %8333 = vmatmul.msk.bf16.gmra.mxu1 %vm577_vm0, %v2647_v52  ;;  %8409 = vmatmul.msk.bf16.gmra.mxu2 %vm577_vm0, %v1790_v62  ;;  %v10727_v43 = vadd.f32 %v3866_v10, %v3264_v55  ;;  %v1423_v52 = vadd.f32 %v1422_v32, %v12997_v19  ;;  %v8506_v32 = vld [vmem:[%s9773_s29 + $0x298] sm:$0xff]  ;;  %v12999_v62 = vld [vmem:[#allocation36_spill] sm:$0xff] }
 0x2f7   : > { %8613 = vmatmul.msk.bf16.gmra.mxu3 %vm577_vm0, %v10718_v9  ;;  %8817 = vmatmul.msk.bf16.gmra.mxu0 %vm577_vm0, %v3507_v38  ;;  %v8709_v55 = vld [vmem:[%s9773_s29 + $0x291] sm:$0xff] }
 0x2f8   : > { %12996 = vst [vmem:[#allocation24_spill] sm:$0xff] %v10727_v43  ;;  %v3508_v43 = vpack.c.bf16 %v8710_v17, %v8709_v55  ;;  %v1697_v55 = vld [vmem:[%s9773_s29 + $0x28a] sm:$0xff] }
 0x2f9   : > { %v2152_v36 = vpop.f32.mrf.mxu2  ;;  %v8507_v17 = vld [vmem:[%s9773_s29 + $0x2a8] sm:$0xff] }
 0x2fa   : > { %v3011_v33 = vpop.f32.mrf.mxu3  ;;  %v2406_v61 = vadd.f32 %v2152_v36, %v1423_v52 }
 0x2fb   : > { %v1424_v10 = vpop.f32.mrf.mxu1 }
 0x2fc   : > { %v3265_v48 = vadd.f32 %v3011_v33, %v2406_v61  ;;  %v3871_v6 = vpop.f32.mrf.mxu0  ;;  %v1425_v38 = vadd.f32 %v1424_v10, %v12999_v62  ;;  %v1791_v33 = vpack.c.bf16 %v1695_v5, %v1694_v31  ;;  %v2650_v61 = vpack.c.bf16 %v8506_v32, %v8505_v34  ;;  %v13001_v10 = vld [vmem:[#allocation39_spill] sm:$0xff] }
 0x2fe   : > { %v10741_v24 = vadd.f32 %v3869_v21, %v3265_v48 }
 0x300   : > { %12998 = vst [vmem:[#allocation27_spill] sm:$0xff] %v10741_v24 }
 0x301   : > { %v2154_v39 = vpop.f32.mrf.mxu2 }
 0x302   : > { %v3013_v19 = vpop.f32.mrf.mxu3  ;;  %v2407_v52 = vadd.f32 %v2154_v39, %v1425_v38  ;;  %v8508_v39 = vld [vmem:[%s9773_s29 + $0x2b0] sm:$0xff] }
 0x303   : > { %v1427_v36 = vpop.f32.mrf.mxu1  ;;  %v2651_v24 = vpack.c.bf16 %v8508_v39, %v8507_v17 }
 0x304   : > { %v3266_v45 = vadd.f32 %v3013_v19, %v2407_v52  ;;  %v3874_v46 = vpop.f32.mrf.mxu0  ;;  %v1428_v48 = vadd.f32 %v1427_v36, %v13001_v10  ;;  %v13003_v19 = vld [vmem:[#allocation42_spill] sm:$0xff]  ;;  %v8712_v52 = vld [vmem:[%s9773_s29 + $0x2b1] sm:$0xff] }
 0x306   : > { %8334 = vmatmul.msk.bf16.gmra.mxu1 %vm577_vm0, %v10699_v20  ;;  %8410 = vmatmul.msk.bf16.gmra.mxu2 %vm577_vm0, %v1791_v33  ;;  %v10753_v21 = vadd.f32 %v3871_v6, %v3266_v45  ;;  %v1696_v20 = vld [vmem:[%s9773_s29 + $0x282] sm:$0xff] }
 0x307   : > { %8614 = vmatmul.msk.bf16.gmra.mxu3 %vm577_vm0, %v2650_v61  ;;  %8818 = vmatmul.msk.bf16.gmra.mxu0 %vm577_vm0, %v3508_v43  ;;  %v8711_v6 = vld [vmem:[%s9773_s29 + $0x2a9] sm:$0xff]  ;;  %v1792_v10 = vpack.c.bf16 %v1697_v55, %v1696_v20 }
 0x308   : > { %13000 = vst [vmem:[#allocation30_spill] sm:$0xff] %v10753_v21 }
 0x309   : > { %v2157_v41 = vpop.f32.mrf.mxu2 }
 0x30a   : > { %v3016_v31 = vpop.f32.mrf.mxu3  ;;  %v2408_v5 = vadd.f32 %v2157_v41, %v1428_v48  ;;  %v3509_v48 = vpack.c.bf16 %v8712_v52, %v8711_v6  ;;  %v8509_v6 = vld [vmem:[%s9773_s29 + $0x2b8] sm:$0xff]  ;;  %v8510_v52 = vld [vmem:[%s9773_s29 + $0x2c0] sm:$0xff] }
 0x30b   : > { %v1429_v34 = vpop.f32.mrf.mxu1 }
 0x30c   : > { %v3267_v32 = vadd.f32 %v3016_v31, %v2408_v5  ;;  %v3876_v62 = vpop.f32.mrf.mxu0  ;;  %v1430_v45 = vadd.f32 %v1429_v34, %v13003_v19  ;;  %v13005_v5 = vld [vmem:[#allocation45_spill] sm:$0xff] }
 0x30e   : > { %v10758_v38 = vadd.f32 %v3874_v46, %v3267_v32 }
 0x310   : > { %13002 = vst [vmem:[#allocation33_spill] sm:$0xff] %v10758_v38  ;;  %v2652_v38 = vpack.c.bf16 %v8510_v52, %v8509_v6 }
 0x311   : > { %v2159_v33 = vpop.f32.mrf.mxu2 }
 0x312   : > { %v3018_v43 = vpop.f32.mrf.mxu3  ;;  %v2409_v21 = vadd.f32 %v2159_v33, %v1430_v45  ;;  %v1699_v45 = vld [vmem:[%s9773_s29 + $0x29a] sm:$0xff]  ;;  %v13007_v33 = vld [vmem:[#allocation48_spill] sm:$0xff] }
 0x313   : > { %v1432_v36 = vpop.f32.mrf.mxu1 }
 0x314   : > { %v3268_v41 = vadd.f32 %v3018_v43, %v2409_v21  ;;  %v3879_v31 = vpop.f32.mrf.mxu0  ;;  %v1433_v34 = vadd.f32 %v1432_v36, %v13005_v5  ;;  %v8713_v43 = vld [vmem:[%s9773_s29 + $0x2b9] sm:$0xff] }
 0x316   : > { %8335 = vmatmul.msk.bf16.gmra.mxu1 %vm577_vm0, %v10718_v9  ;;  %8411 = vmatmul.msk.bf16.gmra.mxu2 %vm577_vm0, %v1792_v10  ;;  %v10770_v46 = vadd.f32 %v3876_v62, %v3268_v41  ;;  %v1698_v9 = vld [vmem:[%s9773_s29 + $0x292] sm:$0xff]  ;;  %v8714_v10 = vld [vmem:[%s9773_s29 + $0x2c1] sm:$0xff] }
 0x317   : > { %8615 = vmatmul.msk.bf16.gmra.mxu3 %vm577_vm0, %v2651_v24  ;;  %8819 = vmatmul.msk.bf16.gmra.mxu0 %vm577_vm0, %v3509_v48  ;;  %v1793_v5 = vpack.c.bf16 %v1699_v45, %v1698_v9 }
 0x318   : > { %13004 = vst [vmem:[#allocation36_spill] sm:$0xff] %v10770_v46 }
 0x319   : > { %v2162_v21 = vpop.f32.mrf.mxu2 }
 0x31a   : > { %v3021_v32 = vpop.f32.mrf.mxu3  ;;  %v2410_v20 = vadd.f32 %v2162_v21, %v1433_v34  ;;  %v3510_v34 = vpack.c.bf16 %v8714_v10, %v8713_v43  ;;  %v8511_v43 = vld [vmem:[%s9773_s29 + $0x2d0] sm:$0xff]  ;;  %v8512_v10 = vld [vmem:[%s9773_s29 + $0x2d8] sm:$0xff] }
 0x31b   : > { %v1434_v55 = vpop.f32.mrf.mxu1 }
 0x31c   : > { %v3269_v17 = vadd.f32 %v3021_v32, %v2410_v20  ;;  %v3881_v39 = vpop.f32.mrf.mxu0  ;;  %v1435_v62 = vadd.f32 %v1434_v55, %v13007_v33  ;;  %v13009_v20 = vld [vmem:[#allocation51_spill] sm:$0xff] }
 0x31e   : > { %v10775_v19 = vadd.f32 %v3879_v31, %v3269_v17 }
 0x320   : > { %13006 = vst [vmem:[#allocation39_spill] sm:$0xff] %v10775_v19  ;;  %v2653_v19 = vpack.c.bf16 %v8512_v10, %v8511_v43 }
 0x321   : > { %v2164_v41 = vpop.f32.mrf.mxu2 }
 0x322   : > { %v3023_v48 = vpop.f32.mrf.mxu3  ;;  %v2411_v46 = vadd.f32 %v2164_v41, %v1435_v62  ;;  %v1701_v62 = vld [vmem:[%s9773_s29 + $0x2b2] sm:$0xff]  ;;  %v13011_v41 = vld [vmem:[#allocation54_spill] sm:$0xff] }
 0x323   : > { %v1437_v36 = vpop.f32.mrf.mxu1 }
 0x324   : > { %v3270_v21 = vadd.f32 %v3023_v48, %v2411_v46  ;;  %v3884_v32 = vpop.f32.mrf.mxu0  ;;  %v1438_v55 = vadd.f32 %v1437_v36, %v13009_v20  ;;  %v8715_v48 = vld [vmem:[%s9773_s29 + $0x2d1] sm:$0xff] }
 0x326   : > { %8336 = vmatmul.msk.bf16.gmra.mxu1 %vm577_vm0, %v2650_v61  ;;  %8412 = vmatmul.msk.bf16.gmra.mxu2 %vm577_vm0, %v1793_v5  ;;  %v10786_v31 = vadd.f32 %v3881_v39, %v3270_v21  ;;  %v1700_v61 = vld [vmem:[%s9773_s29 + $0x2aa] sm:$0xff]  ;;  %v8716_v5 = vld [vmem:[%s9773_s29 + $0x2d9] sm:$0xff] }
 0x327   : > { %8616 = vmatmul.msk.bf16.gmra.mxu3 %vm577_vm0, %v2652_v38  ;;  %8820 = vmatmul.msk.bf16.gmra.mxu0 %vm577_vm0, %v3510_v34  ;;  %v1794_v20 = vpack.c.bf16 %v1701_v62, %v1700_v61 }
 0x328   : > { %13008 = vst [vmem:[#allocation42_spill] sm:$0xff] %v10786_v31 }
 0x329   : > { %v2167_v17 = vpop.f32.mrf.mxu2 }
 0x32a   : > { %v3026_v46 = vpop.f32.mrf.mxu3  ;;  %v2412_v9 = vadd.f32 %v2167_v17, %v1438_v55  ;;  %v3511_v55 = vpack.c.bf16 %v8716_v5, %v8715_v48  ;;  %v8513_v48 = vld [vmem:[%s9773_s29 + $0x2e0] sm:$0xff]  ;;  %v8514_v5 = vld [vmem:[%s9773_s29 + $0x2e8] sm:$0xff] }
 0x32b   : > { %v1439_v45 = vpop.f32.mrf.mxu1 }
 0x32c   : > { %v3271_v6 = vadd.f32 %v3026_v46, %v2412_v9  ;;  %v3886_v52 = vpop.f32.mrf.mxu0  ;;  %v1440_v39 = vadd.f32 %v1439_v45, %v13011_v41  ;;  %v13013_v9 = vld [vmem:[#allocation57_spill] sm:$0xff] }
 0x32e   : > { %v10791_v33 = vadd.f32 %v3884_v32, %v3271_v6 }
 0x330   : > { %13010 = vst [vmem:[#allocation45_spill] sm:$0xff] %v10791_v33  ;;  %v2654_v33 = vpack.c.bf16 %v8514_v5, %v8513_v48 }
 0x331   : > { %v2169_v21 = vpop.f32.mrf.mxu2 }
 0x332   : > { %v3028_v34 = vpop.f32.mrf.mxu3  ;;  %v2413_v31 = vadd.f32 %v2169_v21, %v1440_v39  ;;  %v1703_v39 = vld [vmem:[%s9773_s29 + $0x2c2] sm:$0xff]  ;;  %v13015_v21 = vld [vmem:[#allocation60_spill] sm:$0xff] }
 0x333   : > { %v1442_v36 = vpop.f32.mrf.mxu1 }
 0x334   : > { %v3272_v17 = vadd.f32 %v3028_v34, %v2413_v31  ;;  %v3889_v46 = vpop.f32.mrf.mxu0  ;;  %v1443_v45 = vadd.f32 %v1442_v36, %v13013_v9  ;;  %v8717_v34 = vld [vmem:[%s9773_s29 + $0x2e1] sm:$0xff] }
 0x336   : > { %8337 = vmatmul.msk.bf16.gmra.mxu1 %vm577_vm0, %v2651_v24  ;;  %8413 = vmatmul.msk.bf16.gmra.mxu2 %vm577_vm0, %v1794_v20  ;;  %v10802_v32 = vadd.f32 %v3886_v52, %v3272_v17  ;;  %v1702_v24 = vld [vmem:[%s9773_s29 + $0x2ba] sm:$0xff]  ;;  %v8718_v20 = vld [vmem:[%s9773_s29 + $0x2e9] sm:$0xff] }
 0x337   : > { %8617 = vmatmul.msk.bf16.gmra.mxu3 %vm577_vm0, %v2653_v19  ;;  %8821 = vmatmul.msk.bf16.gmra.mxu0 %vm577_vm0, %v3511_v55  ;;  %v1795_v9 = vpack.c.bf16 %v1703_v39, %v1702_v24 }
 0x338   : > { %13012 = vst [vmem:[#allocation48_spill] sm:$0xff] %v10802_v32 }
 0x339   : > { %v2172_v6 = vpop.f32.mrf.mxu2 }
 0x33a   : > { %v3031_v31 = vpop.f32.mrf.mxu3  ;;  %v2414_v61 = vadd.f32 %v2172_v6, %v1443_v45  ;;  %v3512_v45 = vpack.c.bf16 %v8718_v20, %v8717_v34  ;;  %v8515_v34 = vld [vmem:[%s9773_s29 + $0x2f8] sm:$0xff]  ;;  %v8516_v20 = vld [vmem:[%s9773_s29 + $0x300] sm:$0xff] }
 0x33b   : > { %v1444_v62 = vpop.f32.mrf.mxu1 }
 0x33c   : > { %v3273_v43 = vadd.f32 %v3031_v31, %v2414_v61  ;;  %v3891_v10 = vpop.f32.mrf.mxu0  ;;  %v1445_v52 = vadd.f32 %v1444_v62, %v13015_v21  ;;  %v13017_v61 = vld [vmem:[#allocation63_spill] sm:$0xff] }
 0x33e   : > { %v10807_v41 = vadd.f32 %v3889_v46, %v3273_v43 }
 0x340   : > { %13014 = vst [vmem:[#allocation51_spill] sm:$0xff] %v10807_v41  ;;  %v2655_v41 = vpack.c.bf16 %v8516_v20, %v8515_v34 }
 0x341   : > { %v2174_v17 = vpop.f32.mrf.mxu2 }
 0x342   : > { %v3033_v55 = vpop.f32.mrf.mxu3  ;;  %v2415_v32 = vadd.f32 %v2174_v17, %v1445_v52  ;;  %v1705_v52 = vld [vmem:[%s9773_s29 + $0x2da] sm:$0xff] }
 0x343   : > { %v1447_v36 = vpop.f32.mrf.mxu1  ;;  %v13019_v17 = vld [vmem:[#allocation66_spill] sm:$0xff] }
 0x344   : > { %v3274_v6 = vadd.f32 %v3033_v55, %v2415_v32  ;;  %v3894_v31 = vpop.f32.mrf.mxu0  ;;  %v1448_v62 = vadd.f32 %v1447_v36, %v13017_v61  ;;  %v8719_v55 = vld [vmem:[%s9773_s29 + $0x2f9] sm:$0xff] }
 0x346   : > { %8338 = vmatmul.msk.bf16.gmra.mxu1 %vm577_vm0, %v2652_v38  ;;  %8414 = vmatmul.msk.bf16.gmra.mxu2 %vm577_vm0, %v1795_v9  ;;  %v10818_v46 = vadd.f32 %v3891_v10, %v3274_v6  ;;  %v1704_v38 = vld [vmem:[%s9773_s29 + $0x2d2] sm:$0xff]  ;;  %v8720_v9 = vld [vmem:[%s9773_s29 + $0x301] sm:$0xff] }
 0x347   : > { %8618 = vmatmul.msk.bf16.gmra.mxu3 %vm577_vm0, %v2654_v33  ;;  %8822 = vmatmul.msk.bf16.gmra.mxu0 %vm577_vm0, %v3512_v45  ;;  %v1796_v61 = vpack.c.bf16 %v1705_v52, %v1704_v38 }
 0x348   : > { %13016 = vst [vmem:[#allocation54_spill] sm:$0xff] %v10818_v46 }
 0x349   : > { %v2177_v43 = vpop.f32.mrf.mxu2 }
 0x34a   : > { %v3036_v32 = vpop.f32.mrf.mxu3  ;;  %v2416_v24 = vadd.f32 %v2177_v43, %v1448_v62  ;;  %v3513_v62 = vpack.c.bf16 %v8720_v9, %v8719_v55  ;;  %v8517_v55 = vld [vmem:[%s9773_s29 + $0x308] sm:$0xff]  ;;  %v8518_v9 = vld [vmem:[%s9773_s29 + $0x310] sm:$0xff] }
 0x34b   : > { %v1449_v39 = vpop.f32.mrf.mxu1 }
 0x34c   : > { %v3275_v48 = vadd.f32 %v3036_v32, %v2416_v24  ;;  %v3896_v5 = vpop.f32.mrf.mxu0  ;;  %v1450_v10 = vadd.f32 %v1449_v39, %v13019_v17  ;;  %v13021_v24 = vld [vmem:[#allocation69_spill] sm:$0xff] }
 0x34e   : > { %v10823_v21 = vadd.f32 %v3894_v31, %v3275_v48 }
 0x350   : > { %13018 = vst [vmem:[#allocation57_spill] sm:$0xff] %v10823_v21  ;;  %v2656_v21 = vpack.c.bf16 %v8518_v9, %v8517_v55 }
 0x351   : > { %v2179_v6 = vpop.f32.mrf.mxu2 }
 0x352   : > { %v3038_v45 = vpop.f32.mrf.mxu3  ;;  %v2417_v46 = vadd.f32 %v2179_v6, %v1450_v10  ;;  %v1707_v10 = vld [vmem:[%s9773_s29 + $0x2ea] sm:$0xff] }
 0x353   : > { %v1452_v36 = vpop.f32.mrf.mxu1  ;;  %v13023_v6 = vld [vmem:[#allocation72_spill] sm:$0xff] }
 0x354   : > { %v3276_v43 = vadd.f32 %v3038_v45, %v2417_v46  ;;  %v3899_v32 = vpop.f32.mrf.mxu0  ;;  %v1453_v39 = vadd.f32 %v1452_v36, %v13021_v24  ;;  %v8721_v45 = vld [vmem:[%s9773_s29 + $0x309] sm:$0xff] }
 0x356   : > { %8339 = vmatmul.msk.bf16.gmra.mxu1 %vm577_vm0, %v2653_v19  ;;  %8415 = vmatmul.msk.bf16.gmra.mxu2 %vm577_vm0, %v1796_v61  ;;  %v10834_v31 = vadd.f32 %v3896_v5, %v3276_v43  ;;  %v1706_v19 = vld [vmem:[%s9773_s29 + $0x2e2] sm:$0xff]  ;;  %v8722_v61 = vld [vmem:[%s9773_s29 + $0x311] sm:$0xff] }
 0x357   : > { %8619 = vmatmul.msk.bf16.gmra.mxu3 %vm577_vm0, %v2655_v41  ;;  %8823 = vmatmul.msk.bf16.gmra.mxu0 %vm577_vm0, %v3513_v62  ;;  %v1797_v24 = vpack.c.bf16 %v1707_v10, %v1706_v19 }
 0x358   : > { %13020 = vst [vmem:[#allocation60_spill] sm:$0xff] %v10834_v31 }
 0x359   : > { %v2182_v48 = vpop.f32.mrf.mxu2 }
 0x35a   : > { %v3041_v46 = vpop.f32.mrf.mxu3  ;;  %v2418_v38 = vadd.f32 %v2182_v48, %v1453_v39  ;;  %v3514_v39 = vpack.c.bf16 %v8722_v61, %v8721_v45  ;;  %v8519_v45 = vld [vmem:[%s9773_s29 + $0x320] sm:$0xff]  ;;  %v8520_v61 = vld [vmem:[%s9773_s29 + $0x328] sm:$0xff] }
 0x35b   : > { %v1454_v52 = vpop.f32.mrf.mxu1 }
 0x35c   : > { %v3277_v34 = vadd.f32 %v3041_v46, %v2418_v38  ;;  %v3901_v20 = vpop.f32.mrf.mxu0  ;;  %v1455_v5 = vadd.f32 %v1454_v52, %v13023_v6  ;;  %v13025_v38 = vld [vmem:[#allocation75_spill] sm:$0xff] }
 0x35e   : > { %v10839_v17 = vadd.f32 %v3899_v32, %v3277_v34 }
 0x360   : > { %13022 = vst [vmem:[#allocation63_spill] sm:$0xff] %v10839_v17  ;;  %v2657_v17 = vpack.c.bf16 %v8520_v61, %v8519_v45 }
 0x361   : > { %v2184_v43 = vpop.f32.mrf.mxu2 }
 0x362   : > { %v3043_v62 = vpop.f32.mrf.mxu3  ;;  %v2419_v31 = vadd.f32 %v2184_v43, %v1455_v5  ;;  %v1709_v5 = vld [vmem:[%s9773_s29 + $0x302] sm:$0xff] }
 0x363   : > { %v1457_v36 = vpop.f32.mrf.mxu1  ;;  %v13027_v43 = vld [vmem:[#allocation78_spill] sm:$0xff] }
 0x364   : > { %v3278_v48 = vadd.f32 %v3043_v62, %v2419_v31  ;;  %v3904_v46 = vpop.f32.mrf.mxu0  ;;  %v1458_v52 = vadd.f32 %v1457_v36, %v13025_v38  ;;  %v8723_v62 = vld [vmem:[%s9773_s29 + $0x321] sm:$0xff] }
 0x366   : > { %8340 = vmatmul.msk.bf16.gmra.mxu1 %vm577_vm0, %v2654_v33  ;;  %8416 = vmatmul.msk.bf16.gmra.mxu2 %vm577_vm0, %v1797_v24  ;;  %v10850_v32 = vadd.f32 %v3901_v20, %v3278_v48  ;;  %v1708_v33 = vld [vmem:[%s9773_s29 + $0x2fa] sm:$0xff]  ;;  %v8724_v24 = vld [vmem:[%s9773_s29 + $0x329] sm:$0xff] }
 0x367   : > { %8620 = vmatmul.msk.bf16.gmra.mxu3 %vm577_vm0, %v2656_v21  ;;  %8824 = vmatmul.msk.bf16.gmra.mxu0 %vm577_vm0, %v3514_v39  ;;  %v1798_v38 = vpack.c.bf16 %v1709_v5, %v1708_v33 }
 0x368   : > { %13024 = vst [vmem:[#allocation66_spill] sm:$0xff] %v10850_v32 }
 0x369   : > { %v2187_v34 = vpop.f32.mrf.mxu2 }
 0x36a   : > { %v3046_v31 = vpop.f32.mrf.mxu3  ;;  %v2420_v19 = vadd.f32 %v2187_v34, %v1458_v52  ;;  %v3515_v52 = vpack.c.bf16 %v8724_v24, %v8723_v62  ;;  %v8521_v62 = vld [vmem:[%s9773_s29 + $0x330] sm:$0xff]  ;;  %v8522_v24 = vld [vmem:[%s9773_s29 + $0x338] sm:$0xff] }
 0x36b   : > { %v1459_v10 = vpop.f32.mrf.mxu1 }
 0x36c   : > { %v3279_v55 = vadd.f32 %v3046_v31, %v2420_v19  ;;  %v3906_v9 = vpop.f32.mrf.mxu0  ;;  %v1460_v20 = vadd.f32 %v1459_v10, %v13027_v43  ;;  %v13029_v19 = vld [vmem:[#allocation81_spill] sm:$0xff] }
 0x36e   : > { %v10855_v6 = vadd.f32 %v3904_v46, %v3279_v55 }
 0x370   : > { %13026 = vst [vmem:[#allocation69_spill] sm:$0xff] %v10855_v6  ;;  %v2658_v6 = vpack.c.bf16 %v8522_v24, %v8521_v62 }
 0x371   : > { %v2189_v48 = vpop.f32.mrf.mxu2 }
 0x372   : > { %v3048_v39 = vpop.f32.mrf.mxu3  ;;  %v2421_v32 = vadd.f32 %v2189_v48, %v1460_v20  ;;  %v1711_v20 = vld [vmem:[%s9773_s29 + $0x312] sm:$0xff] }
 0x373   : > { %v1462_v36 = vpop.f32.mrf.mxu1  ;;  %v13031_v48 = vld [vmem:[#allocation84_spill] sm:$0xff] }
 0x374   : > { %v3280_v34 = vadd.f32 %v3048_v39, %v2421_v32  ;;  %v3909_v31 = vpop.f32.mrf.mxu0  ;;  %v1463_v10 = vadd.f32 %v1462_v36, %v13029_v19  ;;  %v8725_v39 = vld [vmem:[%s9773_s29 + $0x331] sm:$0xff] }
 0x376   : > { %8341 = vmatmul.msk.bf16.gmra.mxu1 %vm577_vm0, %v2655_v41  ;;  %8417 = vmatmul.msk.bf16.gmra.mxu2 %vm577_vm0, %v1798_v38  ;;  %v10866_v46 = vadd.f32 %v3906_v9, %v3280_v34  ;;  %v1710_v41 = vld [vmem:[%s9773_s29 + $0x30a] sm:$0xff]  ;;  %v8726_v38 = vld [vmem:[%s9773_s29 + $0x339] sm:$0xff] }
 0x377   : > { %8621 = vmatmul.msk.bf16.gmra.mxu3 %vm577_vm0, %v2657_v17  ;;  %8825 = vmatmul.msk.bf16.gmra.mxu0 %vm577_vm0, %v3515_v52  ;;  %v1799_v19 = vpack.c.bf16 %v1711_v20, %v1710_v41 }
 0x378   : > { %13028 = vst [vmem:[#allocation72_spill] sm:$0xff] %v10866_v46 }
 0x379   : > { %v2192_v55 = vpop.f32.mrf.mxu2 }
 0x37a   : > { %v3051_v32 = vpop.f32.mrf.mxu3  ;;  %v2422_v33 = vadd.f32 %v2192_v55, %v1463_v10  ;;  %v3516_v10 = vpack.c.bf16 %v8726_v38, %v8725_v39  ;;  %v8523_v39 = vld [vmem:[%s9773_s29 + $0x348] sm:$0xff]  ;;  %v8524_v38 = vld [vmem:[%s9773_s29 + $0x350] sm:$0xff] }
 0x37b   : > { %v1464_v5 = vpop.f32.mrf.mxu1 }
 0x37c   : > { %v3281_v45 = vadd.f32 %v3051_v32, %v2422_v33  ;;  %v3911_v61 = vpop.f32.mrf.mxu0  ;;  %v1465_v9 = vadd.f32 %v1464_v5, %v13031_v48  ;;  %v13033_v33 = vld [vmem:[#allocation87_spill] sm:$0xff] }
 0x37e   : > { %v10871_v43 = vadd.f32 %v3909_v31, %v3281_v45 }
 0x380   : > { %13030 = vst [vmem:[#allocation75_spill] sm:$0xff] %v10871_v43  ;;  %v2659_v43 = vpack.c.bf16 %v8524_v38, %v8523_v39 }
 0x381   : > { %v2194_v34 = vpop.f32.mrf.mxu2 }
 0x382   : > { %v3053_v52 = vpop.f32.mrf.mxu3  ;;  %v2423_v46 = vadd.f32 %v2194_v34, %v1465_v9  ;;  %v1713_v9 = vld [vmem:[%s9773_s29 + $0x32a] sm:$0xff]  ;;  %v13035_v34 = vld [vmem:[#allocation90_spill] sm:$0xff] }
 0x383   : > { %v1467_v36 = vpop.f32.mrf.mxu1 }
 0x384   : > { %v3282_v55 = vadd.f32 %v3053_v52, %v2423_v46  ;;  %v3914_v32 = vpop.f32.mrf.mxu0  ;;  %v1468_v5 = vadd.f32 %v1467_v36, %v13033_v33  ;;  %v8727_v52 = vld [vmem:[%s9773_s29 + $0x349] sm:$0xff] }
 0x386   : > { %8342 = vmatmul.msk.bf16.gmra.mxu1 %vm577_vm0, %v2656_v21  ;;  %8418 = vmatmul.msk.bf16.gmra.mxu2 %vm577_vm0, %v1799_v19  ;;  %v10882_v31 = vadd.f32 %v3911_v61, %v3282_v55  ;;  %v1712_v21 = vld [vmem:[%s9773_s29 + $0x322] sm:$0xff]  ;;  %v8728_v19 = vld [vmem:[%s9773_s29 + $0x351] sm:$0xff] }
 0x387   : > { %8622 = vmatmul.msk.bf16.gmra.mxu3 %vm577_vm0, %v2658_v6  ;;  %8826 = vmatmul.msk.bf16.gmra.mxu0 %vm577_vm0, %v3516_v10  ;;  %v1800_v33 = vpack.c.bf16 %v1713_v9, %v1712_v21 }
 0x388   : > { %13032 = vst [vmem:[#allocation78_spill] sm:$0xff] %v10882_v31 }
 0x389   : > { %v2197_v45 = vpop.f32.mrf.mxu2 }
 0x38a   : > { %v3056_v46 = vpop.f32.mrf.mxu3  ;;  %v2424_v41 = vadd.f32 %v2197_v45, %v1468_v5  ;;  %v3517_v5 = vpack.c.bf16 %v8728_v19, %v8727_v52  ;;  %v8525_v52 = vld [vmem:[%s9773_s29 + $0x358] sm:$0xff]  ;;  %v8526_v19 = vld [vmem:[%s9773_s29 + $0x360] sm:$0xff] }
 0x38b   : > { %v1469_v20 = vpop.f32.mrf.mxu1 }
 0x38c   : > { %v3283_v62 = vadd.f32 %v3056_v46, %v2424_v41  ;;  %v3916_v24 = vpop.f32.mrf.mxu0  ;;  %v1470_v61 = vadd.f32 %v1469_v20, %v13035_v34  ;;  %v13037_v41 = vld [vmem:[#allocation2_spill] sm:$0xff] }
 0x38e   : > { %v10887_v48 = vadd.f32 %v3914_v32, %v3283_v62 }
 0x390   : > { %13034 = vst [vmem:[#allocation81_spill] sm:$0xff] %v10887_v48  ;;  %v2660_v48 = vpack.c.bf16 %v8526_v19, %v8525_v52 }
 0x391   : > { %v2199_v55 = vpop.f32.mrf.mxu2 }
 0x392   : > { %v3058_v10 = vpop.f32.mrf.mxu3  ;;  %v2425_v31 = vadd.f32 %v2199_v55, %v1470_v61  ;;  %v1715_v61 = vld [vmem:[%s9773_s29 + $0x33a] sm:$0xff]  ;;  %v13039_v55 = vld [vmem:[#allocation4_spill] sm:$0xff] }
 0x393   : > { %v1472_v36 = vpop.f32.mrf.mxu1 }
 0x394   : > { %v3284_v45 = vadd.f32 %v3058_v10, %v2425_v31  ;;  %v3919_v46 = vpop.f32.mrf.mxu0  ;;  %v1473_v20 = vadd.f32 %v1472_v36, %v13037_v41  ;;  %v8729_v10 = vld [vmem:[%s9773_s29 + $0x359] sm:$0xff] }
 0x396   : > { %8343 = vmatmul.msk.bf16.gmra.mxu1 %vm577_vm0, %v2657_v17  ;;  %8419 = vmatmul.msk.bf16.gmra.mxu2 %vm577_vm0, %v1800_v33  ;;  %v10898_v32 = vadd.f32 %v3916_v24, %v3284_v45  ;;  %v1714_v17 = vld [vmem:[%s9773_s29 + $0x332] sm:$0xff]  ;;  %v8730_v33 = vld [vmem:[%s9773_s29 + $0x361] sm:$0xff] }
 0x397   : > { %8623 = vmatmul.msk.bf16.gmra.mxu3 %vm577_vm0, %v2659_v43  ;;  %8827 = vmatmul.msk.bf16.gmra.mxu0 %vm577_vm0, %v3517_v5  ;;  %v1801_v41 = vpack.c.bf16 %v1715_v61, %v1714_v17 }
 0x398   : > { %13036 = vst [vmem:[#allocation84_spill] sm:$0xff] %v10898_v32 }
 0x399   : > { %v2202_v62 = vpop.f32.mrf.mxu2 }
 0x39a   : > { %v3061_v31 = vpop.f32.mrf.mxu3  ;;  %v2426_v21 = vadd.f32 %v2202_v62, %v1473_v20  ;;  %v3518_v20 = vpack.c.bf16 %v8730_v33, %v8729_v10  ;;  %v8527_v10 = vld [vmem:[%s9773_s29 + $0x370] sm:$0xff]  ;;  %v8528_v33 = vld [vmem:[%s9773_s29 + $0x378] sm:$0xff] }
 0x39b   : > { %v1474_v9 = vpop.f32.mrf.mxu1 }
 0x39c   : > { %v3285_v39 = vadd.f32 %v3061_v31, %v2426_v21  ;;  %v3921_v38 = vpop.f32.mrf.mxu0  ;;  %v1475_v24 = vadd.f32 %v1474_v9, %v13039_v55  ;;  %v13041_v21 = vld [vmem:[#allocation6_spill] sm:$0xff] }
 0x39e   : > { %v10903_v34 = vadd.f32 %v3919_v46, %v3285_v39 }
 0x3a0   : > { %13038 = vst [vmem:[#allocation87_spill] sm:$0xff] %v10903_v34  ;;  %v2661_v34 = vpack.c.bf16 %v8528_v33, %v8527_v10 }
 0x3a1   : > { %v2204_v45 = vpop.f32.mrf.mxu2 }
 0x3a2   : > { %v3063_v5 = vpop.f32.mrf.mxu3  ;;  %v2427_v32 = vadd.f32 %v2204_v45, %v1475_v24  ;;  %v1717_v24 = vld [vmem:[%s9773_s29 + $0x352] sm:$0xff] }
 0x3a3   : > { %v1477_v36 = vpop.f32.mrf.mxu1  ;;  %v13043_v45 = vld [vmem:[#allocation8_spill] sm:$0xff] }
 0x3a4   : > { %v3286_v62 = vadd.f32 %v3063_v5, %v2427_v32  ;;  %v3924_v31 = vpop.f32.mrf.mxu0  ;;  %v1478_v9 = vadd.f32 %v1477_v36, %v13041_v21  ;;  %v8731_v5 = vld [vmem:[%s9773_s29 + $0x371] sm:$0xff] }
 0x3a6   : > { %8344 = vmatmul.msk.bf16.gmra.mxu1 %vm577_vm0, %v2658_v6  ;;  %8420 = vmatmul.msk.bf16.gmra.mxu2 %vm577_vm0, %v1801_v41  ;;  %v10914_v46 = vadd.f32 %v3921_v38, %v3286_v62  ;;  %v1716_v6 = vld [vmem:[%s9773_s29 + $0x34a] sm:$0xff]  ;;  %v8732_v41 = vld [vmem:[%s9773_s29 + $0x379] sm:$0xff] }
 0x3a7   : > { %8624 = vmatmul.msk.bf16.gmra.mxu3 %vm577_vm0, %v2660_v48  ;;  %8828 = vmatmul.msk.bf16.gmra.mxu0 %vm577_vm0, %v3518_v20  ;;  %v1802_v21 = vpack.c.bf16 %v1717_v24, %v1716_v6 }
 0x3a8   : > { %13040 = vst [vmem:[#allocation90_spill] sm:$0xff] %v10914_v46 }
 0x3a9   : > { %v2207_v39 = vpop.f32.mrf.mxu2 }
 0x3aa   : > { %v3066_v32 = vpop.f32.mrf.mxu3  ;;  %v2428_v17 = vadd.f32 %v2207_v39, %v1478_v9  ;;  %v3519_v9 = vpack.c.bf16 %v8732_v41, %v8731_v5  ;;  %v8529_v5 = vld [vmem:[%s9773_s29 + $0x380] sm:$0xff]  ;;  %v8530_v41 = vld [vmem:[%s9773_s29 + $0x388] sm:$0xff] }
 0x3ab   : > { %v1479_v61 = vpop.f32.mrf.mxu1 }
 0x3ac   : > { %v3287_v52 = vadd.f32 %v3066_v32, %v2428_v17  ;;  %v3926_v19 = vpop.f32.mrf.mxu0  ;;  %v1480_v38 = vadd.f32 %v1479_v61, %v13043_v45  ;;  %v13045_v17 = vld [vmem:[#allocation10_spill] sm:$0xff] }
 0x3ae   : > { %v10919_v55 = vadd.f32 %v3924_v31, %v3287_v52 }
 0x3b0   : > { %13042 = vst [vmem:[#allocation2_spill] sm:$0xff] %v10919_v55  ;;  %v2662_v55 = vpack.c.bf16 %v8530_v41, %v8529_v5 }
 0x3b1   : > { %v2209_v62 = vpop.f32.mrf.mxu2 }
 0x3b2   : > { %v3068_v20 = vpop.f32.mrf.mxu3  ;;  %v2429_v46 = vadd.f32 %v2209_v62, %v1480_v38  ;;  %v1719_v38 = vld [vmem:[%s9773_s29 + $0x362] sm:$0xff]  ;;  %v13047_v62 = vld [vmem:[#allocation13_spill] sm:$0xff] }
 0x3b3   : > { %v1482_v36 = vpop.f32.mrf.mxu1 }
 0x3b4   : > { %v3288_v39 = vadd.f32 %v3068_v20, %v2429_v46  ;;  %v3929_v32 = vpop.f32.mrf.mxu0  ;;  %v1483_v61 = vadd.f32 %v1482_v36, %v13045_v17  ;;  %v8733_v20 = vld [vmem:[%s9773_s29 + $0x381] sm:$0xff] }
 0x3b6   : > { %8345 = vmatmul.msk.bf16.gmra.mxu1 %vm577_vm0, %v2659_v43  ;;  %8421 = vmatmul.msk.bf16.gmra.mxu2 %vm577_vm0, %v1802_v21  ;;  %v10930_v31 = vadd.f32 %v3926_v19, %v3288_v39  ;;  %v1718_v43 = vld [vmem:[%s9773_s29 + $0x35a] sm:$0xff]  ;;  %v8734_v21 = vld [vmem:[%s9773_s29 + $0x389] sm:$0xff] }
 0x3b7   : > { %8625 = vmatmul.msk.bf16.gmra.mxu3 %vm577_vm0, %v2661_v34  ;;  %8829 = vmatmul.msk.bf16.gmra.mxu0 %vm577_vm0, %v3519_v9  ;;  %v1803_v17 = vpack.c.bf16 %v1719_v38, %v1718_v43 }
 0x3b8   : > { %13044 = vst [vmem:[#allocation4_spill] sm:$0xff] %v10930_v31 }
 0x3b9   : > { %v2212_v52 = vpop.f32.mrf.mxu2 }
 0x3ba   : > { %v3071_v46 = vpop.f32.mrf.mxu3  ;;  %v2430_v6 = vadd.f32 %v2212_v52, %v1483_v61  ;;  %v3520_v61 = vpack.c.bf16 %v8734_v21, %v8733_v20  ;;  %v8531_v20 = vld [vmem:[%s9773_s29 + $0x398] sm:$0xff]  ;;  %v8532_v21 = vld [vmem:[%s9773_s29 + $0x3a0] sm:$0xff] }
 0x3bb   : > { %v1484_v24 = vpop.f32.mrf.mxu1 }
 0x3bc   : > { %v3289_v10 = vadd.f32 %v3071_v46, %v2430_v6  ;;  %v3931_v33 = vpop.f32.mrf.mxu0  ;;  %v1485_v19 = vadd.f32 %v1484_v24, %v13047_v62  ;;  %v13049_v6 = vld [vmem:[#allocation16_spill] sm:$0xff] }
 0x3be   : > { %v10935_v45 = vadd.f32 %v3929_v32, %v3289_v10 }
 0x3c0   : > { %13046 = vst [vmem:[#allocation6_spill] sm:$0xff] %v10935_v45  ;;  %v2663_v45 = vpack.c.bf16 %v8532_v21, %v8531_v20 }
 0x3c1   : > { %v2214_v39 = vpop.f32.mrf.mxu2 }
 0x3c2   : > { %v3073_v9 = vpop.f32.mrf.mxu3  ;;  %v2431_v31 = vadd.f32 %v2214_v39, %v1485_v19  ;;  %v1721_v19 = vld [vmem:[%s9773_s29 + $0x37a] sm:$0xff]  ;;  %v13051_v39 = vld [vmem:[#allocation19_spill] sm:$0xff] }
 0x3c3   : > { %v1487_v36 = vpop.f32.mrf.mxu1 }
 0x3c4   : > { %v3290_v52 = vadd.f32 %v3073_v9, %v2431_v31  ;;  %v3934_v46 = vpop.f32.mrf.mxu0  ;;  %v1488_v24 = vadd.f32 %v1487_v36, %v13049_v6  ;;  %v8735_v9 = vld [vmem:[%s9773_s29 + $0x399] sm:$0xff] }
 0x3c6   : > { %8346 = vmatmul.msk.bf16.gmra.mxu1 %vm577_vm0, %v2660_v48  ;;  %8422 = vmatmul.msk.bf16.gmra.mxu2 %vm577_vm0, %v1803_v17  ;;  %v10946_v32 = vadd.f32 %v3931_v33, %v3290_v52  ;;  %v1720_v48 = vld [vmem:[%s9773_s29 + $0x372] sm:$0xff]  ;;  %v8736_v17 = vld [vmem:[%s9773_s29 + $0x3a1] sm:$0xff] }
 0x3c7   : > { %8626 = vmatmul.msk.bf16.gmra.mxu3 %vm577_vm0, %v2662_v55  ;;  %8830 = vmatmul.msk.bf16.gmra.mxu0 %vm577_vm0, %v3520_v61  ;;  %v1804_v6 = vpack.c.bf16 %v1721_v19, %v1720_v48 }
 0x3c8   : > { %13048 = vst [vmem:[#allocation8_spill] sm:$0xff] %v10946_v32 }
 0x3c9   : > { %v2217_v10 = vpop.f32.mrf.mxu2 }
 0x3ca   : > { %v3076_v31 = vpop.f32.mrf.mxu3  ;;  %v2432_v43 = vadd.f32 %v2217_v10, %v1488_v24  ;;  %v3521_v24 = vpack.c.bf16 %v8736_v17, %v8735_v9  ;;  %v8533_v9 = vld [vmem:[%s9773_s29 + $0x3a8] sm:$0xff]  ;;  %v8534_v17 = vld [vmem:[%s9773_s29 + $0x3b0] sm:$0xff] }
 0x3cb   : > { %v1489_v38 = vpop.f32.mrf.mxu1 }
 0x3cc   : > { %v3291_v5 = vadd.f32 %v3076_v31, %v2432_v43  ;;  %v3936_v41 = vpop.f32.mrf.mxu0  ;;  %v1490_v33 = vadd.f32 %v1489_v38, %v13051_v39  ;;  %v13053_v43 = vld [vmem:[#allocation22_spill] sm:$0xff] }
 0x3ce   : > { %v10951_v62 = vadd.f32 %v3934_v46, %v3291_v5 }
 0x3d0   : > { %13050 = vst [vmem:[#allocation10_spill] sm:$0xff] %v10951_v62  ;;  %v2664_v62 = vpack.c.bf16 %v8534_v17, %v8533_v9 }
 0x3d1   : > { %v2219_v52 = vpop.f32.mrf.mxu2 }
 0x3d2   : > { %v3078_v61 = vpop.f32.mrf.mxu3  ;;  %v2433_v32 = vadd.f32 %v2219_v52, %v1490_v33  ;;  %v1723_v33 = vld [vmem:[%s9773_s29 + $0x38a] sm:$0xff]  ;;  %v13055_v52 = vld [vmem:[#allocation25_spill] sm:$0xff] }
 0x3d3   : > { %v1492_v36 = vpop.f32.mrf.mxu1 }
 0x3d4   : > { %v3292_v10 = vadd.f32 %v3078_v61, %v2433_v32  ;;  %v3939_v31 = vpop.f32.mrf.mxu0  ;;  %v1493_v38 = vadd.f32 %v1492_v36, %v13053_v43  ;;  %v8737_v61 = vld [vmem:[%s9773_s29 + $0x3a9] sm:$0xff] }
 0x3d6   : > { %8347 = vmatmul.msk.bf16.gmra.mxu1 %vm577_vm0, %v2661_v34  ;;  %8423 = vmatmul.msk.bf16.gmra.mxu2 %vm577_vm0, %v1804_v6  ;;  %v10962_v46 = vadd.f32 %v3936_v41, %v3292_v10  ;;  %v1722_v34 = vld [vmem:[%s9773_s29 + $0x382] sm:$0xff]  ;;  %v8738_v6 = vld [vmem:[%s9773_s29 + $0x3b1] sm:$0xff] }
 0x3d7   : > { %8627 = vmatmul.msk.bf16.gmra.mxu3 %vm577_vm0, %v2663_v45  ;;  %8831 = vmatmul.msk.bf16.gmra.mxu0 %vm577_vm0, %v3521_v24  ;;  %v1805_v43 = vpack.c.bf16 %v1723_v33, %v1722_v34 }
 0x3d8   : > { %13052 = vst [vmem:[#allocation13_spill] sm:$0xff] %v10962_v46 }
 0x3d9   : > { %v2222_v5 = vpop.f32.mrf.mxu2 }
 0x3da   : > { %v3081_v32 = vpop.f32.mrf.mxu3  ;;  %v2434_v48 = vadd.f32 %v2222_v5, %v1493_v38  ;;  %v3522_v38 = vpack.c.bf16 %v8738_v6, %v8737_v61  ;;  %v8535_v61 = vld [vmem:[%s9773_s29 + $0x3c0] sm:$0xff]  ;;  %v8536_v6 = vld [vmem:[%s9773_s29 + $0x3c8] sm:$0xff] }
 0x3db   : > { %v1494_v19 = vpop.f32.mrf.mxu1 }
 0x3dc   : > { %v3293_v20 = vadd.f32 %v3081_v32, %v2434_v48  ;;  %v3941_v21 = vpop.f32.mrf.mxu0  ;;  %v1495_v41 = vadd.f32 %v1494_v19, %v13055_v52  ;;  %v13057_v48 = vld [vmem:[#allocation28_spill] sm:$0xff] }
 0x3de   : > { %v10967_v39 = vadd.f32 %v3939_v31, %v3293_v20 }
 0x3e0   : > { %13054 = vst [vmem:[#allocation16_spill] sm:$0xff] %v10967_v39  ;;  %v2665_v39 = vpack.c.bf16 %v8536_v6, %v8535_v61 }
 0x3e1   : > { %v2224_v10 = vpop.f32.mrf.mxu2 }
 0x3e2   : > { %v3083_v24 = vpop.f32.mrf.mxu3  ;;  %v2435_v46 = vadd.f32 %v2224_v10, %v1495_v41  ;;  %v1725_v41 = vld [vmem:[%s9773_s29 + $0x3a2] sm:$0xff] }
 0x3e3   : > { %v1497_v36 = vpop.f32.mrf.mxu1  ;;  %v13059_v10 = vld [vmem:[#allocation31_spill] sm:$0xff] }
 0x3e4   : > { %v3294_v5 = vadd.f32 %v3083_v24, %v2435_v46  ;;  %v3944_v32 = vpop.f32.mrf.mxu0  ;;  %v1498_v19 = vadd.f32 %v1497_v36, %v13057_v48  ;;  %v8739_v24 = vld [vmem:[%s9773_s29 + $0x3c1] sm:$0xff] }
 0x3e6   : > { %8348 = vmatmul.msk.bf16.gmra.mxu1 %vm577_vm0, %v2662_v55  ;;  %8424 = vmatmul.msk.bf16.gmra.mxu2 %vm577_vm0, %v1805_v43  ;;  %v10978_v31 = vadd.f32 %v3941_v21, %v3294_v5  ;;  %v1724_v55 = vld [vmem:[%s9773_s29 + $0x39a] sm:$0xff]  ;;  %v8740_v43 = vld [vmem:[%s9773_s29 + $0x3c9] sm:$0xff] }
 0x3e7   : > { %8628 = vmatmul.msk.bf16.gmra.mxu3 %vm577_vm0, %v2664_v62  ;;  %8832 = vmatmul.msk.bf16.gmra.mxu0 %vm577_vm0, %v3522_v38  ;;  %v1806_v48 = vpack.c.bf16 %v1725_v41, %v1724_v55 }
 0x3e8   : > { %13056 = vst [vmem:[#allocation19_spill] sm:$0xff] %v10978_v31 }
 0x3e9   : > { %v2227_v20 = vpop.f32.mrf.mxu2 }
 0x3ea   : > { %v3086_v46 = vpop.f32.mrf.mxu3  ;;  %v2436_v34 = vadd.f32 %v2227_v20, %v1498_v19  ;;  %v3523_v19 = vpack.c.bf16 %v8740_v43, %v8739_v24  ;;  %v8537_v24 = vld [vmem:[%s9773_s29 + $0x3d0] sm:$0xff]  ;;  %v8538_v43 = vld [vmem:[%s9773_s29 + $0x3d8] sm:$0xff] }
 0x3eb   : > { %v1499_v33 = vpop.f32.mrf.mxu1 }
 0x3ec   : > { %v3295_v9 = vadd.f32 %v3086_v46, %v2436_v34  ;;  %v3946_v17 = vpop.f32.mrf.mxu0  ;;  %v1500_v21 = vadd.f32 %v1499_v33, %v13059_v10  ;;  %v13061_v34 = vld [vmem:[#allocation34_spill] sm:$0xff] }
 0x3ee   : > { %v10983_v52 = vadd.f32 %v3944_v32, %v3295_v9 }
 0x3f0   : > { %13058 = vst [vmem:[#allocation22_spill] sm:$0xff] %v10983_v52  ;;  %v2666_v52 = vpack.c.bf16 %v8538_v43, %v8537_v24 }
 0x3f1   : > { %v2229_v5 = vpop.f32.mrf.mxu2 }
 0x3f2   : > { %v3088_v38 = vpop.f32.mrf.mxu3  ;;  %v2437_v31 = vadd.f32 %v2229_v5, %v1500_v21  ;;  %v1727_v21 = vld [vmem:[%s9773_s29 + $0x3b2] sm:$0xff] }
 0x3f3   : > { %v1502_v36 = vpop.f32.mrf.mxu1  ;;  %v13063_v5 = vld [vmem:[#allocation37_spill] sm:$0xff] }
 0x3f4   : > { %v3296_v20 = vadd.f32 %v3088_v38, %v2437_v31  ;;  %v3949_v46 = vpop.f32.mrf.mxu0  ;;  %v1503_v33 = vadd.f32 %v1502_v36, %v13061_v34  ;;  %v8741_v38 = vld [vmem:[%s9773_s29 + $0x3d1] sm:$0xff] }
 0x3f6   : > { %8349 = vmatmul.msk.bf16.gmra.mxu1 %vm577_vm0, %v2663_v45  ;;  %8425 = vmatmul.msk.bf16.gmra.mxu2 %vm577_vm0, %v1806_v48  ;;  %v10994_v32 = vadd.f32 %v3946_v17, %v3296_v20  ;;  %v1726_v45 = vld [vmem:[%s9773_s29 + $0x3aa] sm:$0xff]  ;;  %v8742_v48 = vld [vmem:[%s9773_s29 + $0x3d9] sm:$0xff] }
 0x3f7   : > { %8629 = vmatmul.msk.bf16.gmra.mxu3 %vm577_vm0, %v2665_v39  ;;  %8833 = vmatmul.msk.bf16.gmra.mxu0 %vm577_vm0, %v3523_v19  ;;  %v1807_v34 = vpack.c.bf16 %v1727_v21, %v1726_v45 }
 0x3f8   : > { %13060 = vst [vmem:[#allocation25_spill] sm:$0xff] %v10994_v32 }
 0x3f9   : > { %v2232_v9 = vpop.f32.mrf.mxu2 }
 0x3fa   : > { %v3091_v31 = vpop.f32.mrf.mxu3  ;;  %v2438_v55 = vadd.f32 %v2232_v9, %v1503_v33  ;;  %v3524_v33 = vpack.c.bf16 %v8742_v48, %v8741_v38  ;;  %v8539_v38 = vld [vmem:[%s9773_s29 + $0x3e8] sm:$0xff]  ;;  %v8540_v48 = vld [vmem:[%s9773_s29 + $0x3f0] sm:$0xff] }
 0x3fb   : > { %v1504_v41 = vpop.f32.mrf.mxu1 }
 0x3fc   : > { %v3297_v61 = vadd.f32 %v3091_v31, %v2438_v55  ;;  %v3951_v6 = vpop.f32.mrf.mxu0  ;;  %v1505_v17 = vadd.f32 %v1504_v41, %v13063_v5  ;;  %v13065_v55 = vld [vmem:[#allocation40_spill] sm:$0xff] }
 0x3fe   : > { %v10999_v10 = vadd.f32 %v3949_v46, %v3297_v61 }
 0x400   : > { %13062 = vst [vmem:[#allocation28_spill] sm:$0xff] %v10999_v10  ;;  %v2667_v10 = vpack.c.bf16 %v8540_v48, %v8539_v38 }
 0x401   : > { %v2234_v20 = vpop.f32.mrf.mxu2 }
 0x402   : > { %v3093_v19 = vpop.f32.mrf.mxu3  ;;  %v2439_v32 = vadd.f32 %v2234_v20, %v1505_v17  ;;  %v1729_v17 = vld [vmem:[%s9773_s29 + $0x3ca] sm:$0xff] }
 0x403   : > { %v1507_v36 = vpop.f32.mrf.mxu1  ;;  %v13067_v20 = vld [vmem:[#allocation43_spill] sm:$0xff] }
 0x404   : > { %v3298_v9 = vadd.f32 %v3093_v19, %v2439_v32  ;;  %v3954_v31 = vpop.f32.mrf.mxu0  ;;  %v1508_v41 = vadd.f32 %v1507_v36, %v13065_v55  ;;  %v8743_v19 = vld [vmem:[%s9773_s29 + $0x3e9] sm:$0xff] }
 0x406   : > { %8350 = vmatmul.msk.bf16.gmra.mxu1 %vm577_vm0, %v2664_v62  ;;  %8426 = vmatmul.msk.bf16.gmra.mxu2 %vm577_vm0, %v1807_v34  ;;  %v11010_v46 = vadd.f32 %v3951_v6, %v3298_v9  ;;  %v1728_v62 = vld [vmem:[%s9773_s29 + $0x3c2] sm:$0xff]  ;;  %v8744_v34 = vld [vmem:[%s9773_s29 + $0x3f1] sm:$0xff] }
 0x407   : > { %8630 = vmatmul.msk.bf16.gmra.mxu3 %vm577_vm0, %v2666_v52  ;;  %8834 = vmatmul.msk.bf16.gmra.mxu0 %vm577_vm0, %v3524_v33  ;;  %v1808_v55 = vpack.c.bf16 %v1729_v17, %v1728_v62 }
 0x408   : > { %13064 = vst [vmem:[#allocation31_spill] sm:$0xff] %v11010_v46 }
 0x409   : > { %v2237_v61 = vpop.f32.mrf.mxu2 }
 0x40a   : > { %v3096_v32 = vpop.f32.mrf.mxu3  ;;  %v2440_v45 = vadd.f32 %v2237_v61, %v1508_v41  ;;  %v3525_v41 = vpack.c.bf16 %v8744_v34, %v8743_v19  ;;  %v8541_v19 = vld [vmem:[%s9773_s29 + $0x3f8] sm:$0xff]  ;;  %v8542_v34 = vld [vmem:[%s9773_s29 + $0x400] sm:$0xff] }
 0x40b   : > { %v1509_v21 = vpop.f32.mrf.mxu1 }
 0x40c   : > { %v3299_v24 = vadd.f32 %v3096_v32, %v2440_v45  ;;  %v3956_v43 = vpop.f32.mrf.mxu0  ;;  %v1510_v6 = vadd.f32 %v1509_v21, %v13067_v20  ;;  %v13069_v45 = vld [vmem:[#allocation46_spill] sm:$0xff] }
 0x40e   : > { %v11015_v5 = vadd.f32 %v3954_v31, %v3299_v24 }
 0x410   : > { %13066 = vst [vmem:[#allocation34_spill] sm:$0xff] %v11015_v5  ;;  %v2668_v5 = vpack.c.bf16 %v8542_v34, %v8541_v19 }
 0x411   : > { %v2239_v9 = vpop.f32.mrf.mxu2 }
 0x412   : > { %v3098_v33 = vpop.f32.mrf.mxu3  ;;  %v2441_v46 = vadd.f32 %v2239_v9, %v1510_v6  ;;  %v1731_v6 = vld [vmem:[%s9773_s29 + $0x3da] sm:$0xff] }
 0x413   : > { %v1512_v36 = vpop.f32.mrf.mxu1  ;;  %v13071_v9 = vld [vmem:[#allocation49_spill] sm:$0xff] }
 0x414   : > { %v3300_v61 = vadd.f32 %v3098_v33, %v2441_v46  ;;  %v3959_v32 = vpop.f32.mrf.mxu0  ;;  %v1513_v21 = vadd.f32 %v1512_v36, %v13069_v45  ;;  %v8745_v33 = vld [vmem:[%s9773_s29 + $0x3f9] sm:$0xff] }
 0x416   : > { %8351 = vmatmul.msk.bf16.gmra.mxu1 %vm577_vm0, %v2665_v39  ;;  %8427 = vmatmul.msk.bf16.gmra.mxu2 %vm577_vm0, %v1808_v55  ;;  %v11026_v31 = vadd.f32 %v3956_v43, %v3300_v61  ;;  %v1730_v39 = vld [vmem:[%s9773_s29 + $0x3d2] sm:$0xff]  ;;  %v8746_v55 = vld [vmem:[%s9773_s29 + $0x401] sm:$0xff] }
 0x417   : > { %8631 = vmatmul.msk.bf16.gmra.mxu3 %vm577_vm0, %v2667_v10  ;;  %8835 = vmatmul.msk.bf16.gmra.mxu0 %vm577_vm0, %v3525_v41  ;;  %v1809_v45 = vpack.c.bf16 %v1731_v6, %v1730_v39 }
 0x418   : > { %13068 = vst [vmem:[#allocation37_spill] sm:$0xff] %v11026_v31 }
 0x419   : > { %v2242_v24 = vpop.f32.mrf.mxu2 }
 0x41a   : > { %v3101_v46 = vpop.f32.mrf.mxu3  ;;  %v2442_v62 = vadd.f32 %v2242_v24, %v1513_v21  ;;  %v3526_v21 = vpack.c.bf16 %v8746_v55, %v8745_v33  ;;  %v8543_v33 = vld [vmem:[%s9773_s29 + $0x410] sm:$0xff]  ;;  %v8544_v55 = vld [vmem:[%s9773_s29 + $0x418] sm:$0xff] }
 0x41b   : > { %v1514_v17 = vpop.f32.mrf.mxu1 }
 0x41c   : > { %v3301_v38 = vadd.f32 %v3101_v46, %v2442_v62  ;;  %v3961_v48 = vpop.f32.mrf.mxu0  ;;  %v1515_v43 = vadd.f32 %v1514_v17, %v13071_v9  ;;  %v13073_v62 = vld [vmem:[#allocation52_spill] sm:$0xff] }
 0x41e   : > { %v11031_v20 = vadd.f32 %v3959_v32, %v3301_v38 }
 0x420   : > { %13070 = vst [vmem:[#allocation40_spill] sm:$0xff] %v11031_v20  ;;  %v2669_v20 = vpack.c.bf16 %v8544_v55, %v8543_v33 }
 0x421   : > { %v2244_v61 = vpop.f32.mrf.mxu2 }
 0x422   : > { %v3103_v41 = vpop.f32.mrf.mxu3  ;;  %v2443_v31 = vadd.f32 %v2244_v61, %v1515_v43  ;;  %v1733_v43 = vld [vmem:[%s9773_s29 + $0x3f2] sm:$0xff]  ;;  %v13075_v61 = vld [vmem:[#allocation55_spill] sm:$0xff] }
 0x423   : > { %v1517_v36 = vpop.f32.mrf.mxu1 }
 0x424   : > { %v3302_v24 = vadd.f32 %v3103_v41, %v2443_v31  ;;  %v3964_v46 = vpop.f32.mrf.mxu0  ;;  %v1518_v17 = vadd.f32 %v1517_v36, %v13073_v62  ;;  %v8747_v41 = vld [vmem:[%s9773_s29 + $0x411] sm:$0xff] }
 0x426   : > { %8352 = vmatmul.msk.bf16.gmra.mxu1 %vm577_vm0, %v2666_v52  ;;  %8428 = vmatmul.msk.bf16.gmra.mxu2 %vm577_vm0, %v1809_v45  ;;  %v11042_v32 = vadd.f32 %v3961_v48, %v3302_v24  ;;  %v1732_v52 = vld [vmem:[%s9773_s29 + $0x3ea] sm:$0xff]  ;;  %v8748_v45 = vld [vmem:[%s9773_s29 + $0x419] sm:$0xff] }
 0x427   : > { %8632 = vmatmul.msk.bf16.gmra.mxu3 %vm577_vm0, %v2668_v5  ;;  %8836 = vmatmul.msk.bf16.gmra.mxu0 %vm577_vm0, %v3526_v21  ;;  %v1810_v62 = vpack.c.bf16 %v1733_v43, %v1732_v52 }
 0x428   : > { %13072 = vst [vmem:[#allocation43_spill] sm:$0xff] %v11042_v32 }
 0x429   : > { %v2247_v38 = vpop.f32.mrf.mxu2 }
 0x42a   : > { %v3106_v31 = vpop.f32.mrf.mxu3  ;;  %v2444_v39 = vadd.f32 %v2247_v38, %v1518_v17  ;;  %v3527_v17 = vpack.c.bf16 %v8748_v45, %v8747_v41  ;;  %v8545_v41 = vld [vmem:[%s9773_s29 + $0x420] sm:$0xff]  ;;  %v8546_v45 = vld [vmem:[%s9773_s29 + $0x428] sm:$0xff] }
 0x42b   : > { %v1519_v6 = vpop.f32.mrf.mxu1 }
 0x42c   : > { %v3303_v19 = vadd.f32 %v3106_v31, %v2444_v39  ;;  %v3966_v34 = vpop.f32.mrf.mxu0  ;;  %v1520_v48 = vadd.f32 %v1519_v6, %v13075_v61  ;;  %v13077_v39 = vld [vmem:[#allocation58_spill] sm:$0xff] }
 0x42e   : > { %v11047_v9 = vadd.f32 %v3964_v46, %v3303_v19 }
 0x430   : > { %13074 = vst [vmem:[#allocation46_spill] sm:$0xff] %v11047_v9  ;;  %v2670_v9 = vpack.c.bf16 %v8546_v45, %v8545_v41 }
 0x431   : > { %v2249_v24 = vpop.f32.mrf.mxu2 }
 0x432   : > { %v3108_v21 = vpop.f32.mrf.mxu3  ;;  %v2445_v32 = vadd.f32 %v2249_v24, %v1520_v48  ;;  %v1735_v48 = vld [vmem:[%s9773_s29 + $0x402] sm:$0xff]  ;;  %v13079_v24 = vld [vmem:[#allocation61_spill] sm:$0xff] }
 0x433   : > { %v1522_v36 = vpop.f32.mrf.mxu1 }
 0x434   : > { %v3304_v38 = vadd.f32 %v3108_v21, %v2445_v32  ;;  %v3969_v31 = vpop.f32.mrf.mxu0  ;;  %v1523_v6 = vadd.f32 %v1522_v36, %v13077_v39  ;;  %v8749_v21 = vld [vmem:[%s9773_s29 + $0x421] sm:$0xff] }
 0x436   : > { %8353 = vmatmul.msk.bf16.gmra.mxu1 %vm577_vm0, %v2667_v10  ;;  %8429 = vmatmul.msk.bf16.gmra.mxu2 %vm577_vm0, %v1810_v62  ;;  %v11058_v46 = vadd.f32 %v3966_v34, %v3304_v38  ;;  %v1734_v10 = vld [vmem:[%s9773_s29 + $0x3fa] sm:$0xff]  ;;  %v8750_v62 = vld [vmem:[%s9773_s29 + $0x429] sm:$0xff] }
 0x437   : > { %8633 = vmatmul.msk.bf16.gmra.mxu3 %vm577_vm0, %v2669_v20  ;;  %8837 = vmatmul.msk.bf16.gmra.mxu0 %vm577_vm0, %v3527_v17  ;;  %v1811_v39 = vpack.c.bf16 %v1735_v48, %v1734_v10 }
 0x438   : > { %13076 = vst [vmem:[#allocation49_spill] sm:$0xff] %v11058_v46 }
 0x439   : > { %v2252_v19 = vpop.f32.mrf.mxu2 }
 0x43a   : > { %v3111_v32 = vpop.f32.mrf.mxu3  ;;  %v2446_v52 = vadd.f32 %v2252_v19, %v1523_v6  ;;  %v3528_v6 = vpack.c.bf16 %v8750_v62, %v8749_v21  ;;  %v8547_v21 = vld [vmem:[%s9773_s29 + $0x438] sm:$0xff]  ;;  %v8548_v62 = vld [vmem:[%s9773_s29 + $0x440] sm:$0xff] }
 0x43b   : > { %v1524_v43 = vpop.f32.mrf.mxu1 }
 0x43c   : > { %v3305_v33 = vadd.f32 %v3111_v32, %v2446_v52  ;;  %v3971_v55 = vpop.f32.mrf.mxu0  ;;  %v1525_v34 = vadd.f32 %v1524_v43, %v13079_v24  ;;  %v13081_v52 = vld [vmem:[#allocation64_spill] sm:$0xff] }
 0x43e   : > { %v11063_v61 = vadd.f32 %v3969_v31, %v3305_v33 }
 0x440   : > { %13078 = vst [vmem:[#allocation52_spill] sm:$0xff] %v11063_v61  ;;  %v2671_v61 = vpack.c.bf16 %v8548_v62, %v8547_v21 }
 0x441   : > { %v2254_v38 = vpop.f32.mrf.mxu2 }
 0x442   : > { %v3113_v17 = vpop.f32.mrf.mxu3  ;;  %v2447_v46 = vadd.f32 %v2254_v38, %v1525_v34  ;;  %v1737_v34 = vld [vmem:[%s9773_s29 + $0x41a] sm:$0xff]  ;;  %v13083_v38 = vld [vmem:[#allocation67_spill] sm:$0xff] }
 0x443   : > { %v1527_v36 = vpop.f32.mrf.mxu1 }
 0x444   : > { %v3306_v19 = vadd.f32 %v3113_v17, %v2447_v46  ;;  %v3974_v32 = vpop.f32.mrf.mxu0  ;;  %v1528_v43 = vadd.f32 %v1527_v36, %v13081_v52  ;;  %v8751_v17 = vld [vmem:[%s9773_s29 + $0x439] sm:$0xff] }
 0x446   : > { %8354 = vmatmul.msk.bf16.gmra.mxu1 %vm577_vm0, %v2668_v5  ;;  %8430 = vmatmul.msk.bf16.gmra.mxu2 %vm577_vm0, %v1811_v39  ;;  %v11074_v31 = vadd.f32 %v3971_v55, %v3306_v19  ;;  %v1736_v5 = vld [vmem:[%s9773_s29 + $0x412] sm:$0xff]  ;;  %v8752_v39 = vld [vmem:[%s9773_s29 + $0x441] sm:$0xff] }
 0x447   : > { %8634 = vmatmul.msk.bf16.gmra.mxu3 %vm577_vm0, %v2670_v9  ;;  %8838 = vmatmul.msk.bf16.gmra.mxu0 %vm577_vm0, %v3528_v6  ;;  %v1812_v52 = vpack.c.bf16 %v1737_v34, %v1736_v5 }
 0x448   : > { %13080 = vst [vmem:[#allocation55_spill] sm:$0xff] %v11074_v31 }
 0x449   : > { %v2257_v33 = vpop.f32.mrf.mxu2 }
 0x44a   : > { %v3116_v46 = vpop.f32.mrf.mxu3  ;;  %v2448_v10 = vadd.f32 %v2257_v33, %v1528_v43  ;;  %v3529_v43 = vpack.c.bf16 %v8752_v39, %v8751_v17  ;;  %v8549_v17 = vld [vmem:[%s9773_s29 + $0x448] sm:$0xff]  ;;  %v8550_v39 = vld [vmem:[%s9773_s29 + $0x450] sm:$0xff] }
 0x44b   : > { %v1529_v48 = vpop.f32.mrf.mxu1 }
 0x44c   : > { %v3307_v41 = vadd.f32 %v3116_v46, %v2448_v10  ;;  %v3976_v45 = vpop.f32.mrf.mxu0  ;;  %v1530_v55 = vadd.f32 %v1529_v48, %v13083_v38  ;;  %v13085_v10 = vld [vmem:[#allocation70_spill] sm:$0xff] }
 0x44e   : > { %v11079_v24 = vadd.f32 %v3974_v32, %v3307_v41 }
 0x450   : > { %13082 = vst [vmem:[#allocation58_spill] sm:$0xff] %v11079_v24  ;;  %v2672_v24 = vpack.c.bf16 %v8550_v39, %v8549_v17 }
 0x451   : > { %v2259_v19 = vpop.f32.mrf.mxu2 }
 0x452   : > { %v3118_v6 = vpop.f32.mrf.mxu3  ;;  %v2449_v31 = vadd.f32 %v2259_v19, %v1530_v55  ;;  %v1739_v55 = vld [vmem:[%s9773_s29 + $0x42a] sm:$0xff]  ;;  %v13087_v19 = vld [vmem:[#allocation73_spill] sm:$0xff] }
 0x453   : > { %v1532_v36 = vpop.f32.mrf.mxu1 }
 0x454   : > { %v3308_v33 = vadd.f32 %v3118_v6, %v2449_v31  ;;  %v3979_v46 = vpop.f32.mrf.mxu0  ;;  %v1533_v48 = vadd.f32 %v1532_v36, %v13085_v10  ;;  %v8753_v6 = vld [vmem:[%s9773_s29 + $0x449] sm:$0xff] }
 0x456   : > { %8355 = vmatmul.msk.bf16.gmra.mxu1 %vm577_vm0, %v2669_v20  ;;  %8431 = vmatmul.msk.bf16.gmra.mxu2 %vm577_vm0, %v1812_v52  ;;  %v11090_v32 = vadd.f32 %v3976_v45, %v3308_v33  ;;  %v1738_v20 = vld [vmem:[%s9773_s29 + $0x422] sm:$0xff]  ;;  %v8754_v52 = vld [vmem:[%s9773_s29 + $0x451] sm:$0xff] }
 0x457   : > { %8635 = vmatmul.msk.bf16.gmra.mxu3 %vm577_vm0, %v2671_v61  ;;  %8839 = vmatmul.msk.bf16.gmra.mxu0 %vm577_vm0, %v3529_v43  ;;  %v1813_v10 = vpack.c.bf16 %v1739_v55, %v1738_v20 }
 0x458   : > { %13084 = vst [vmem:[#allocation61_spill] sm:$0xff] %v11090_v32 }
 0x459   : > { %v2262_v41 = vpop.f32.mrf.mxu2 }
 0x45a   : > { %v3121_v31 = vpop.f32.mrf.mxu3  ;;  %v2450_v5 = vadd.f32 %v2262_v41, %v1533_v48  ;;  %v3530_v48 = vpack.c.bf16 %v8754_v52, %v8753_v6  ;;  %v8551_v6 = vld [vmem:[%s9773_s29 + $0x460] sm:$0xff]  ;;  %v8552_v52 = vld [vmem:[%s9773_s29 + $0x468] sm:$0xff] }
 0x45b   : > { %v1534_v34 = vpop.f32.mrf.mxu1 }
 0x45c   : > { %v3309_v21 = vadd.f32 %v3121_v31, %v2450_v5  ;;  %v3981_v62 = vpop.f32.mrf.mxu0  ;;  %v1535_v45 = vadd.f32 %v1534_v34, %v13087_v19  ;;  %v13089_v5 = vld [vmem:[#allocation76_spill] sm:$0xff] }
 0x45e   : > { %v11095_v38 = vadd.f32 %v3979_v46, %v3309_v21 }
 0x460   : > { %13086 = vst [vmem:[#allocation64_spill] sm:$0xff] %v11095_v38  ;;  %v2673_v38 = vpack.c.bf16 %v8552_v52, %v8551_v6 }
 0x461   : > { %v2264_v33 = vpop.f32.mrf.mxu2 }
 0x462   : > { %v3123_v43 = vpop.f32.mrf.mxu3  ;;  %v2451_v32 = vadd.f32 %v2264_v33, %v1535_v45  ;;  %v1741_v45 = vld [vmem:[%s9773_s29 + $0x442] sm:$0xff] }
 0x463   : > { %v1537_v36 = vpop.f32.mrf.mxu1  ;;  %v13091_v33 = vld [vmem:[#allocation79_spill] sm:$0xff] }
 0x464   : > { %v3310_v41 = vadd.f32 %v3123_v43, %v2451_v32  ;;  %v3984_v31 = vpop.f32.mrf.mxu0  ;;  %v1538_v34 = vadd.f32 %v1537_v36, %v13089_v5  ;;  %v8755_v43 = vld [vmem:[%s9773_s29 + $0x461] sm:$0xff] }
 0x466   : > { %8356 = vmatmul.msk.bf16.gmra.mxu1 %vm577_vm0, %v2670_v9  ;;  %8432 = vmatmul.msk.bf16.gmra.mxu2 %vm577_vm0, %v1813_v10  ;;  %v11106_v46 = vadd.f32 %v3981_v62, %v3310_v41  ;;  %v1740_v9 = vld [vmem:[%s9773_s29 + $0x43a] sm:$0xff]  ;;  %v8756_v10 = vld [vmem:[%s9773_s29 + $0x469] sm:$0xff] }
 0x467   : > { %8636 = vmatmul.msk.bf16.gmra.mxu3 %vm577_vm0, %v2672_v24  ;;  %8840 = vmatmul.msk.bf16.gmra.mxu0 %vm577_vm0, %v3530_v48  ;;  %v1814_v5 = vpack.c.bf16 %v1741_v45, %v1740_v9 }
 0x468   : > { %13088 = vst [vmem:[#allocation67_spill] sm:$0xff] %v11106_v46 }
 0x469   : > { %v2267_v21 = vpop.f32.mrf.mxu2 }
 0x46a   : > { %v3126_v32 = vpop.f32.mrf.mxu3  ;;  %v2452_v20 = vadd.f32 %v2267_v21, %v1538_v34  ;;  %v3531_v34 = vpack.c.bf16 %v8756_v10, %v8755_v43  ;;  %v8553_v43 = vld [vmem:[%s9773_s29 + $0x470] sm:$0xff]  ;;  %v8554_v10 = vld [vmem:[%s9773_s29 + $0x478] sm:$0xff] }
 0x46b   : > { %v1539_v55 = vpop.f32.mrf.mxu1 }
 0x46c   : > { %v3311_v17 = vadd.f32 %v3126_v32, %v2452_v20  ;;  %v3986_v39 = vpop.f32.mrf.mxu0  ;;  %v1540_v62 = vadd.f32 %v1539_v55, %v13091_v33  ;;  %v13093_v20 = vld [vmem:[#allocation82_spill] sm:$0xff] }
 0x46e   : > { %v11111_v19 = vadd.f32 %v3984_v31, %v3311_v17 }
 0x470   : > { %13090 = vst [vmem:[#allocation70_spill] sm:$0xff] %v11111_v19  ;;  %v2674_v19 = vpack.c.bf16 %v8554_v10, %v8553_v43 }
 0x471   : > { %v2269_v41 = vpop.f32.mrf.mxu2 }
 0x472   : > { %v3128_v48 = vpop.f32.mrf.mxu3  ;;  %v2453_v46 = vadd.f32 %v2269_v41, %v1540_v62  ;;  %v1743_v62 = vld [vmem:[%s9773_s29 + $0x452] sm:$0xff] }
 0x473   : > { %v1542_v36 = vpop.f32.mrf.mxu1  ;;  %v13095_v41 = vld [vmem:[#allocation85_spill] sm:$0xff] }
 0x474   : > { %v3312_v21 = vadd.f32 %v3128_v48, %v2453_v46  ;;  %v3989_v32 = vpop.f32.mrf.mxu0  ;;  %v1543_v55 = vadd.f32 %v1542_v36, %v13093_v20  ;;  %v8757_v48 = vld [vmem:[%s9773_s29 + $0x471] sm:$0xff] }
 0x476   : > { %8357 = vmatmul.msk.bf16.gmra.mxu1 %vm577_vm0, %v2671_v61  ;;  %8433 = vmatmul.msk.bf16.gmra.mxu2 %vm577_vm0, %v1814_v5  ;;  %v11122_v31 = vadd.f32 %v3986_v39, %v3312_v21  ;;  %v1742_v61 = vld [vmem:[%s9773_s29 + $0x44a] sm:$0xff]  ;;  %v8758_v5 = vld [vmem:[%s9773_s29 + $0x479] sm:$0xff] }
 0x477   : > { %8637 = vmatmul.msk.bf16.gmra.mxu3 %vm577_vm0, %v2673_v38  ;;  %8841 = vmatmul.msk.bf16.gmra.mxu0 %vm577_vm0, %v3531_v34  ;;  %v1815_v20 = vpack.c.bf16 %v1743_v62, %v1742_v61 }
 0x478   : > { %13092 = vst [vmem:[#allocation73_spill] sm:$0xff] %v11122_v31 }
 0x479   : > { %v2272_v17 = vpop.f32.mrf.mxu2 }
 0x47a   : > { %v3131_v46 = vpop.f32.mrf.mxu3  ;;  %v2454_v9 = vadd.f32 %v2272_v17, %v1543_v55  ;;  %v3532_v55 = vpack.c.bf16 %v8758_v5, %v8757_v48  ;;  %v8555_v48 = vld [vmem:[%s9773_s29 + $0x488] sm:$0xff]  ;;  %v8556_v5 = vld [vmem:[%s9773_s29 + $0x490] sm:$0xff] }
 0x47b   : > { %v1544_v45 = vpop.f32.mrf.mxu1 }
 0x47c   : > { %v3313_v6 = vadd.f32 %v3131_v46, %v2454_v9  ;;  %v3991_v52 = vpop.f32.mrf.mxu0  ;;  %v1545_v39 = vadd.f32 %v1544_v45, %v13095_v41  ;;  %v13097_v9 = vld [vmem:[#allocation88_spill] sm:$0xff] }
 0x47e   : > { %v11127_v33 = vadd.f32 %v3989_v32, %v3313_v6 }
 0x480   : > { %13094 = vst [vmem:[#allocation76_spill] sm:$0xff] %v11127_v33  ;;  %v2675_v33 = vpack.c.bf16 %v8556_v5, %v8555_v48 }
 0x481   : > { %v2274_v21 = vpop.f32.mrf.mxu2 }
 0x482   : > { %v3133_v34 = vpop.f32.mrf.mxu3  ;;  %v2455_v31 = vadd.f32 %v2274_v21, %v1545_v39  ;;  %v1745_v39 = vld [vmem:[%s9773_s29 + $0x46a] sm:$0xff] }
 0x483   : > { %v1547_v36 = vpop.f32.mrf.mxu1  ;;  %v13099_v21 = vld [vmem:[#allocation91_spill] sm:$0xff] }
 0x484   : > { %v3314_v17 = vadd.f32 %v3133_v34, %v2455_v31  ;;  %v3994_v46 = vpop.f32.mrf.mxu0  ;;  %v1548_v45 = vadd.f32 %v1547_v36, %v13097_v9  ;;  %v8759_v34 = vld [vmem:[%s9773_s29 + $0x489] sm:$0xff] }
 0x486   : > { %8358 = vmatmul.msk.bf16.gmra.mxu1 %vm577_vm0, %v2672_v24  ;;  %8434 = vmatmul.msk.bf16.gmra.mxu2 %vm577_vm0, %v1815_v20  ;;  %v11138_v32 = vadd.f32 %v3991_v52, %v3314_v17  ;;  %v1744_v24 = vld [vmem:[%s9773_s29 + $0x462] sm:$0xff]  ;;  %v8760_v20 = vld [vmem:[%s9773_s29 + $0x491] sm:$0xff] }
 0x487   : > { %8638 = vmatmul.msk.bf16.gmra.mxu3 %vm577_vm0, %v2674_v19  ;;  %8842 = vmatmul.msk.bf16.gmra.mxu0 %vm577_vm0, %v3532_v55  ;;  %v1816_v9 = vpack.c.bf16 %v1745_v39, %v1744_v24 }
 0x488   : > { %13096 = vst [vmem:[#allocation79_spill] sm:$0xff] %v11138_v32 }
 0x489   : > { %v2277_v6 = vpop.f32.mrf.mxu2 }
 0x48a   : > { %v3136_v31 = vpop.f32.mrf.mxu3  ;;  %v2456_v61 = vadd.f32 %v2277_v6, %v1548_v45  ;;  %v3533_v45 = vpack.c.bf16 %v8760_v20, %v8759_v34  ;;  %v8557_v34 = vld [vmem:[%s9773_s29 + $0x498] sm:$0xff]  ;;  %v8558_v20 = vld [vmem:[%s9773_s29 + $0x4a0] sm:$0xff] }
 0x48b   : > { %v1549_v62 = vpop.f32.mrf.mxu1 }
 0x48c   : > { %v3315_v43 = vadd.f32 %v3136_v31, %v2456_v61  ;;  %v3996_v10 = vpop.f32.mrf.mxu0  ;;  %v1550_v52 = vadd.f32 %v1549_v62, %v13099_v21  ;;  %v13101_v61 = vld [vmem:[#allocation3_spill] sm:$0xff] }
 0x48e   : > { %v11143_v41 = vadd.f32 %v3994_v46, %v3315_v43 }
 0x490   : > { %13098 = vst [vmem:[#allocation82_spill] sm:$0xff] %v11143_v41  ;;  %v2676_v41 = vpack.c.bf16 %v8558_v20, %v8557_v34 }
 0x491   : > { %v2279_v17 = vpop.f32.mrf.mxu2 }
 0x492   : > { %v3138_v55 = vpop.f32.mrf.mxu3  ;;  %v2457_v32 = vadd.f32 %v2279_v17, %v1550_v52  ;;  %v1747_v52 = vld [vmem:[%s9773_s29 + $0x47a] sm:$0xff] }
 0x493   : > { %v1552_v36 = vpop.f32.mrf.mxu1  ;;  %v13103_v17 = vld [vmem:[#allocation5_spill] sm:$0xff] }
 0x494   : > { %v3316_v6 = vadd.f32 %v3138_v55, %v2457_v32  ;;  %v3999_v31 = vpop.f32.mrf.mxu0  ;;  %v1553_v62 = vadd.f32 %v1552_v36, %v13101_v61  ;;  %v8761_v55 = vld [vmem:[%s9773_s29 + $0x499] sm:$0xff] }
 0x496   : > { %8359 = vmatmul.msk.bf16.gmra.mxu1 %vm577_vm0, %v2673_v38  ;;  %8435 = vmatmul.msk.bf16.gmra.mxu2 %vm577_vm0, %v1816_v9  ;;  %v11154_v46 = vadd.f32 %v3996_v10, %v3316_v6  ;;  %v1746_v38 = vld [vmem:[%s9773_s29 + $0x472] sm:$0xff]  ;;  %v8762_v9 = vld [vmem:[%s9773_s29 + $0x4a1] sm:$0xff] }
 0x497   : > { %8639 = vmatmul.msk.bf16.gmra.mxu3 %vm577_vm0, %v2675_v33  ;;  %8843 = vmatmul.msk.bf16.gmra.mxu0 %vm577_vm0, %v3533_v45  ;;  %v1817_v61 = vpack.c.bf16 %v1747_v52, %v1746_v38 }
 0x498   : > { %13100 = vst [vmem:[#allocation85_spill] sm:$0xff] %v11154_v46 }
 0x499   : > { %v2282_v43 = vpop.f32.mrf.mxu2 }
 0x49a   : > { %v3141_v32 = vpop.f32.mrf.mxu3  ;;  %v2458_v24 = vadd.f32 %v2282_v43, %v1553_v62  ;;  %v3534_v62 = vpack.c.bf16 %v8762_v9, %v8761_v55  ;;  %v8559_v55 = vld [vmem:[%s9773_s29 + $0x4b0] sm:$0xff]  ;;  %v8560_v9 = vld [vmem:[%s9773_s29 + $0x4b8] sm:$0xff] }
 0x49b   : > { %v1554_v39 = vpop.f32.mrf.mxu1 }
 0x49c   : > { %v3317_v48 = vadd.f32 %v3141_v32, %v2458_v24  ;;  %v4001_v5 = vpop.f32.mrf.mxu0  ;;  %v1555_v10 = vadd.f32 %v1554_v39, %v13103_v17  ;;  %v13105_v24 = vld [vmem:[#allocation7_spill] sm:$0xff] }
 0x49e   : > { %v11159_v21 = vadd.f32 %v3999_v31, %v3317_v48 }
 0x4a0   : > { %13102 = vst [vmem:[#allocation88_spill] sm:$0xff] %v11159_v21  ;;  %v2677_v21 = vpack.c.bf16 %v8560_v9, %v8559_v55 }
 0x4a1   : > { %v2284_v6 = vpop.f32.mrf.mxu2 }
 0x4a2   : > { %v3143_v45 = vpop.f32.mrf.mxu3  ;;  %v2459_v46 = vadd.f32 %v2284_v6, %v1555_v10  ;;  %v1749_v10 = vld [vmem:[%s9773_s29 + $0x492] sm:$0xff] }
 0x4a3   : > { %v1557_v36 = vpop.f32.mrf.mxu1  ;;  %v13107_v6 = vld [vmem:[#allocation9_spill] sm:$0xff] }
 0x4a4   : > { %v3318_v43 = vadd.f32 %v3143_v45, %v2459_v46  ;;  %v4004_v32 = vpop.f32.mrf.mxu0  ;;  %v1558_v39 = vadd.f32 %v1557_v36, %v13105_v24  ;;  %v8763_v45 = vld [vmem:[%s9773_s29 + $0x4b1] sm:$0xff] }
 0x4a6   : > { %8360 = vmatmul.msk.bf16.gmra.mxu1 %vm577_vm0, %v2674_v19  ;;  %8436 = vmatmul.msk.bf16.gmra.mxu2 %vm577_vm0, %v1817_v61  ;;  %v11170_v31 = vadd.f32 %v4001_v5, %v3318_v43  ;;  %v1748_v19 = vld [vmem:[%s9773_s29 + $0x48a] sm:$0xff]  ;;  %v8764_v61 = vld [vmem:[%s9773_s29 + $0x4b9] sm:$0xff] }
 0x4a7   : > { %8640 = vmatmul.msk.bf16.gmra.mxu3 %vm577_vm0, %v2676_v41  ;;  %8844 = vmatmul.msk.bf16.gmra.mxu0 %vm577_vm0, %v3534_v62  ;;  %v1818_v24 = vpack.c.bf16 %v1749_v10, %v1748_v19 }
 0x4a8   : > { %13104 = vst [vmem:[#allocation91_spill] sm:$0xff] %v11170_v31 }
 0x4a9   : > { %v2287_v48 = vpop.f32.mrf.mxu2 }
 0x4aa   : > { %v3146_v46 = vpop.f32.mrf.mxu3  ;;  %v2460_v38 = vadd.f32 %v2287_v48, %v1558_v39  ;;  %v3535_v39 = vpack.c.bf16 %v8764_v61, %v8763_v45  ;;  %v8561_v45 = vld [vmem:[%s9773_s29 + $0x4c0] sm:$0xff]  ;;  %v8562_v61 = vld [vmem:[%s9773_s29 + $0x4c8] sm:$0xff] }
 0x4ab   : > { %v1559_v52 = vpop.f32.mrf.mxu1 }
 0x4ac   : > { %v3319_v34 = vadd.f32 %v3146_v46, %v2460_v38  ;;  %v4006_v20 = vpop.f32.mrf.mxu0  ;;  %v1560_v5 = vadd.f32 %v1559_v52, %v13107_v6  ;;  %v13109_v38 = vld [vmem:[#allocation11_spill] sm:$0xff] }
 0x4ae   : > { %v11175_v17 = vadd.f32 %v4004_v32, %v3319_v34 }
 0x4b0   : > { %13106 = vst [vmem:[#allocation3_spill] sm:$0xff] %v11175_v17  ;;  %v2678_v17 = vpack.c.bf16 %v8562_v61, %v8561_v45 }
 0x4b1   : > { %v2289_v43 = vpop.f32.mrf.mxu2 }
 0x4b2   : > { %v3148_v62 = vpop.f32.mrf.mxu3  ;;  %v2461_v31 = vadd.f32 %v2289_v43, %v1560_v5  ;;  %v1751_v5 = vld [vmem:[%s9773_s29 + $0x4a2] sm:$0xff] }
 0x4b3   : > { %v1562_v36 = vpop.f32.mrf.mxu1  ;;  %v13111_v43 = vld [vmem:[#allocation14_spill] sm:$0xff] }
 0x4b4   : > { %v3320_v48 = vadd.f32 %v3148_v62, %v2461_v31  ;;  %v4009_v46 = vpop.f32.mrf.mxu0  ;;  %v1563_v52 = vadd.f32 %v1562_v36, %v13109_v38  ;;  %v8765_v62 = vld [vmem:[%s9773_s29 + $0x4c1] sm:$0xff] }
 0x4b6   : > { %8361 = vmatmul.msk.bf16.gmra.mxu1 %vm577_vm0, %v2675_v33  ;;  %8437 = vmatmul.msk.bf16.gmra.mxu2 %vm577_vm0, %v1818_v24  ;;  %v11186_v32 = vadd.f32 %v4006_v20, %v3320_v48  ;;  %v1750_v33 = vld [vmem:[%s9773_s29 + $0x49a] sm:$0xff]  ;;  %v8766_v24 = vld [vmem:[%s9773_s29 + $0x4c9] sm:$0xff] }
 0x4b7   : > { %8641 = vmatmul.msk.bf16.gmra.mxu3 %vm577_vm0, %v2677_v21  ;;  %8845 = vmatmul.msk.bf16.gmra.mxu0 %vm577_vm0, %v3535_v39  ;;  %v1819_v38 = vpack.c.bf16 %v1751_v5, %v1750_v33 }
 0x4b8   : > { %13108 = vst [vmem:[#allocation5_spill] sm:$0xff] %v11186_v32 }
 0x4b9   : > { %v2292_v34 = vpop.f32.mrf.mxu2 }
 0x4ba   : > { %v3151_v31 = vpop.f32.mrf.mxu3  ;;  %v2462_v19 = vadd.f32 %v2292_v34, %v1563_v52  ;;  %v3536_v52 = vpack.c.bf16 %v8766_v24, %v8765_v62  ;;  %v8563_v62 = vld [vmem:[%s9773_s29 + $0x4d8] sm:$0xff]  ;;  %v8564_v24 = vld [vmem:[%s9773_s29 + $0x4e0] sm:$0xff] }
 0x4bb   : > { %v1564_v10 = vpop.f32.mrf.mxu1 }
 0x4bc   : > { %v3321_v55 = vadd.f32 %v3151_v31, %v2462_v19  ;;  %v4011_v9 = vpop.f32.mrf.mxu0  ;;  %v1565_v20 = vadd.f32 %v1564_v10, %v13111_v43  ;;  %v13113_v19 = vld [vmem:[#allocation17_spill] sm:$0xff] }
 0x4be   : > { %v11191_v6 = vadd.f32 %v4009_v46, %v3321_v55 }
 0x4c0   : > { %13110 = vst [vmem:[#allocation7_spill] sm:$0xff] %v11191_v6  ;;  %v2679_v6 = vpack.c.bf16 %v8564_v24, %v8563_v62 }
 0x4c1   : > { %v2294_v48 = vpop.f32.mrf.mxu2 }
 0x4c2   : > { %v3153_v39 = vpop.f32.mrf.mxu3  ;;  %v2463_v32 = vadd.f32 %v2294_v48, %v1565_v20  ;;  %v1753_v20 = vld [vmem:[%s9773_s29 + $0x4ba] sm:$0xff]  ;;  %v13115_v48 = vld [vmem:[#allocation20_spill] sm:$0xff] }
 0x4c3   : > { %v1567_v36 = vpop.f32.mrf.mxu1 }
 0x4c4   : > { %v3322_v34 = vadd.f32 %v3153_v39, %v2463_v32  ;;  %v4014_v31 = vpop.f32.mrf.mxu0  ;;  %v1568_v10 = vadd.f32 %v1567_v36, %v13113_v19  ;;  %v8767_v39 = vld [vmem:[%s9773_s29 + $0x4d9] sm:$0xff] }
 0x4c6   : > { %8362 = vmatmul.msk.bf16.gmra.mxu1 %vm577_vm0, %v2676_v41  ;;  %8438 = vmatmul.msk.bf16.gmra.mxu2 %vm577_vm0, %v1819_v38  ;;  %v11202_v46 = vadd.f32 %v4011_v9, %v3322_v34  ;;  %v1752_v41 = vld [vmem:[%s9773_s29 + $0x4b2] sm:$0xff]  ;;  %v8768_v38 = vld [vmem:[%s9773_s29 + $0x4e1] sm:$0xff] }
 0x4c7   : > { %8642 = vmatmul.msk.bf16.gmra.mxu3 %vm577_vm0, %v2678_v17  ;;  %8846 = vmatmul.msk.bf16.gmra.mxu0 %vm577_vm0, %v3536_v52  ;;  %v1820_v19 = vpack.c.bf16 %v1753_v20, %v1752_v41 }
 0x4c8   : > { %13112 = vst [vmem:[#allocation9_spill] sm:$0xff] %v11202_v46 }
 0x4c9   : > { %v2297_v55 = vpop.f32.mrf.mxu2 }
 0x4ca   : > { %v3156_v32 = vpop.f32.mrf.mxu3  ;;  %v2464_v33 = vadd.f32 %v2297_v55, %v1568_v10  ;;  %v3537_v10 = vpack.c.bf16 %v8768_v38, %v8767_v39  ;;  %v8565_v39 = vld [vmem:[%s9773_s29 + $0x4e8] sm:$0xff]  ;;  %v8566_v38 = vld [vmem:[%s9773_s29 + $0x4f0] sm:$0xff] }
 0x4cb   : > { %v1569_v5 = vpop.f32.mrf.mxu1 }
 0x4cc   : > { %v3323_v45 = vadd.f32 %v3156_v32, %v2464_v33  ;;  %v4016_v61 = vpop.f32.mrf.mxu0  ;;  %v1570_v9 = vadd.f32 %v1569_v5, %v13115_v48  ;;  %v13117_v33 = vld [vmem:[#allocation23_spill] sm:$0xff] }
 0x4ce   : > { %v11207_v43 = vadd.f32 %v4014_v31, %v3323_v45 }
 0x4d0   : > { %13114 = vst [vmem:[#allocation11_spill] sm:$0xff] %v11207_v43  ;;  %v2680_v43 = vpack.c.bf16 %v8566_v38, %v8565_v39 }
 0x4d1   : > { %v2299_v34 = vpop.f32.mrf.mxu2 }
 0x4d2   : > { %v3158_v52 = vpop.f32.mrf.mxu3  ;;  %v2465_v46 = vadd.f32 %v2299_v34, %v1570_v9  ;;  %v1755_v9 = vld [vmem:[%s9773_s29 + $0x4ca] sm:$0xff]  ;;  %v13119_v34 = vld [vmem:[#allocation26_spill] sm:$0xff] }
 0x4d3   : > { %v1572_v36 = vpop.f32.mrf.mxu1 }
 0x4d4   : > { %v3324_v55 = vadd.f32 %v3158_v52, %v2465_v46  ;;  %v4019_v32 = vpop.f32.mrf.mxu0  ;;  %v1573_v5 = vadd.f32 %v1572_v36, %v13117_v33  ;;  %v8769_v52 = vld [vmem:[%s9773_s29 + $0x4e9] sm:$0xff] }
 0x4d6   : > { %8363 = vmatmul.msk.bf16.gmra.mxu1 %vm577_vm0, %v2677_v21  ;;  %8439 = vmatmul.msk.bf16.gmra.mxu2 %vm577_vm0, %v1820_v19  ;;  %v11218_v31 = vadd.f32 %v4016_v61, %v3324_v55  ;;  %v1754_v21 = vld [vmem:[%s9773_s29 + $0x4c2] sm:$0xff]  ;;  %v8770_v19 = vld [vmem:[%s9773_s29 + $0x4f1] sm:$0xff] }
 0x4d7   : > { %8643 = vmatmul.msk.bf16.gmra.mxu3 %vm577_vm0, %v2679_v6  ;;  %8847 = vmatmul.msk.bf16.gmra.mxu0 %vm577_vm0, %v3537_v10  ;;  %v1821_v33 = vpack.c.bf16 %v1755_v9, %v1754_v21 }
 0x4d8   : > { %13116 = vst [vmem:[#allocation14_spill] sm:$0xff] %v11218_v31 }
 0x4d9   : > { %v2302_v45 = vpop.f32.mrf.mxu2 }
 0x4da   : > { %v3161_v46 = vpop.f32.mrf.mxu3  ;;  %v2466_v41 = vadd.f32 %v2302_v45, %v1573_v5  ;;  %v3538_v5 = vpack.c.bf16 %v8770_v19, %v8769_v52  ;;  %v8567_v52 = vld [vmem:[%s9773_s29 + $0x500] sm:$0xff]  ;;  %v8568_v19 = vld [vmem:[%s9773_s29 + $0x508] sm:$0xff] }
 0x4db   : > { %v1574_v20 = vpop.f32.mrf.mxu1 }
 0x4dc   : > { %v3325_v62 = vadd.f32 %v3161_v46, %v2466_v41  ;;  %v4021_v24 = vpop.f32.mrf.mxu0  ;;  %v1575_v61 = vadd.f32 %v1574_v20, %v13119_v34  ;;  %v13121_v41 = vld [vmem:[#allocation29_spill] sm:$0xff] }
 0x4de   : > { %v11223_v48 = vadd.f32 %v4019_v32, %v3325_v62 }
 0x4e0   : > { %13118 = vst [vmem:[#allocation17_spill] sm:$0xff] %v11223_v48  ;;  %v2681_v48 = vpack.c.bf16 %v8568_v19, %v8567_v52 }
 0x4e1   : > { %v2304_v55 = vpop.f32.mrf.mxu2 }
 0x4e2   : > { %v3163_v10 = vpop.f32.mrf.mxu3  ;;  %v2467_v31 = vadd.f32 %v2304_v55, %v1575_v61  ;;  %v1757_v61 = vld [vmem:[%s9773_s29 + $0x4e2] sm:$0xff]  ;;  %v13123_v55 = vld [vmem:[#allocation32_spill] sm:$0xff] }
 0x4e3   : > { %v1577_v36 = vpop.f32.mrf.mxu1 }
 0x4e4   : > { %v3326_v45 = vadd.f32 %v3163_v10, %v2467_v31  ;;  %v4024_v46 = vpop.f32.mrf.mxu0  ;;  %v1578_v20 = vadd.f32 %v1577_v36, %v13121_v41  ;;  %v8771_v10 = vld [vmem:[%s9773_s29 + $0x501] sm:$0xff] }
 0x4e6   : > { %8364 = vmatmul.msk.bf16.gmra.mxu1 %vm577_vm0, %v2678_v17  ;;  %8440 = vmatmul.msk.bf16.gmra.mxu2 %vm577_vm0, %v1821_v33  ;;  %v11234_v32 = vadd.f32 %v4021_v24, %v3326_v45  ;;  %v1756_v17 = vld [vmem:[%s9773_s29 + $0x4da] sm:$0xff]  ;;  %v8772_v33 = vld [vmem:[%s9773_s29 + $0x509] sm:$0xff] }
 0x4e7   : > { %8644 = vmatmul.msk.bf16.gmra.mxu3 %vm577_vm0, %v2680_v43  ;;  %8848 = vmatmul.msk.bf16.gmra.mxu0 %vm577_vm0, %v3538_v5  ;;  %v1822_v41 = vpack.c.bf16 %v1757_v61, %v1756_v17 }
 0x4e8   : > { %13120 = vst [vmem:[#allocation20_spill] sm:$0xff] %v11234_v32 }
 0x4e9   : > { %v2307_v62 = vpop.f32.mrf.mxu2 }
 0x4ea   : > { %v3166_v31 = vpop.f32.mrf.mxu3  ;;  %v2468_v21 = vadd.f32 %v2307_v62, %v1578_v20  ;;  %v3539_v20 = vpack.c.bf16 %v8772_v33, %v8771_v10  ;;  %v8569_v10 = vld [vmem:[%s9773_s29 + $0x510] sm:$0xff]  ;;  %v13127_v33 = vld [vmem:[#allocation38_spill] sm:$0xff] }
 0x4eb   : > { %v1579_v9 = vpop.f32.mrf.mxu1 }
 0x4ec   : > { %v3327_v39 = vadd.f32 %v3166_v31, %v2468_v21  ;;  %v4026_v38 = vpop.f32.mrf.mxu0  ;;  %v1580_v24 = vadd.f32 %v1579_v9, %v13123_v55  ;;  %v13125_v21 = vld [vmem:[#allocation35_spill] sm:$0xff] }
 0x4ee   : > { %v11239_v34 = vadd.f32 %v4024_v46, %v3327_v39 }
 0x4f0   : > { %13122 = vst [vmem:[#allocation23_spill] sm:$0xff] %v11239_v34 }
 0x4f1   : > { %v2309_v45 = vpop.f32.mrf.mxu2 }
 0x4f2   : > { %v3168_v5 = vpop.f32.mrf.mxu3  ;;  %v2469_v32 = vadd.f32 %v2309_v45, %v1580_v24  ;;  %v1759_v24 = vld [vmem:[%s9773_s29 + $0x4f2] sm:$0xff] }
 0x4f3   : > { %v1582_v36 = vpop.f32.mrf.mxu1  ;;  %v8773_v45 = vld [vmem:[%s9773_s29 + $0x511] sm:$0xff] }
 0x4f4   : > { %v3328_v62 = vadd.f32 %v3168_v5, %v2469_v32  ;;  %v4029_v31 = vpop.f32.mrf.mxu0  ;;  %v1583_v9 = vadd.f32 %v1582_v36, %v13125_v21  ;;  %v8774_v5 = vld [vmem:[%s9773_s29 + $0x519] sm:$0xff] }
 0x4f6   : > { %8365 = vmatmul.msk.bf16.gmra.mxu1 %vm577_vm0, %v2679_v6  ;;  %8441 = vmatmul.msk.bf16.gmra.mxu2 %vm577_vm0, %v1822_v41  ;;  %v11250_v46 = vadd.f32 %v4026_v38, %v3328_v62  ;;  %v1758_v6 = vld [vmem:[%s9773_s29 + $0x4ea] sm:$0xff] }
 0x4f7   : > { %8645 = vmatmul.msk.bf16.gmra.mxu3 %vm577_vm0, %v2681_v48  ;;  %8849 = vmatmul.msk.bf16.gmra.mxu0 %vm577_vm0, %v3539_v20  ;;  %v8570_v48 = vld [vmem:[%s9773_s29 + $0x518] sm:$0xff]  ;;  %v1823_v21 = vpack.c.bf16 %v1759_v24, %v1758_v6 }
 0x4f8   : > { %13124 = vst [vmem:[#allocation26_spill] sm:$0xff] %v11250_v46  ;;  %v2682_v46 = vpack.c.bf16 %v8570_v48, %v8569_v10 }
 0x4f9   : > { %v2312_v39 = vpop.f32.mrf.mxu2 }
 0x4fa   : > { %v3171_v32 = vpop.f32.mrf.mxu3  ;;  %v2470_v17 = vadd.f32 %v2312_v39, %v1583_v9  ;;  %v3540_v9 = vpack.c.bf16 %v8774_v5, %v8773_v45  ;;  %v9055_v45 = vld [vmem:[%s9773_s29 + $0x50] sm:$0xff] }
 0x4fb   : > { %v1584_v61 = vpop.f32.mrf.mxu1 }
 0x4fc   : > { %v3329_v52 = vadd.f32 %v3171_v32, %v2470_v17  ;;  %v4031_v19 = vpop.f32.mrf.mxu0  ;;  %v1585_v38 = vadd.f32 %v1584_v61, %v13127_v33  ;;  %v13129_v17 = vld [vmem:[#allocation41_spill] sm:$0xff]  ;;  %v8851_v33 = vld [vmem:[%s9773_s29 + $0x2a] sm:$0xff] }
 0x4fe   : > { %v11255_v55 = vadd.f32 %v4029_v31, %v3329_v52 }
 0x500   : > { %13126 = vst [vmem:[#allocation29_spill] sm:$0xff] %v11255_v55 }
 0x501   : > { %v2314_v41 = vpop.f32.mrf.mxu2 }
 0x502   : > { %v3173_v20 = vpop.f32.mrf.mxu3  ;;  %v2471_v62 = vadd.f32 %v2314_v41, %v1585_v38  ;;  %v8852_v38 = vld [vmem:[%s9773_s29 + $0x32] sm:$0xff] }
 0x503   : > { %v1587_v36 = vpop.f32.mrf.mxu1  ;;  %v9260_v41 = vld [vmem:[%s9773_s29 + $0x59] sm:$0xff] }
 0x504   : > { %v3330_v39 = vadd.f32 %v3173_v20, %v2471_v62  ;;  %v4034_v31 = vpop.f32.mrf.mxu0  ;;  %v1588_v61 = vadd.f32 %v1587_v36, %v13129_v17  ;;  %v13131_v20 = vld [vmem:[#allocation44_spill] sm:$0xff]  ;;  %v4335_v17 = vpack.c.bf16 %v8852_v38, %v8851_v33  ;;  %v13133_v33 = vld [vmem:[#allocation47_spill] sm:$0xff] }
 0x506   : > { %8366 = vmatmul.msk.bf16.gmra.mxu1 %vm577_vm0, %v2680_v43  ;;  %8442 = vmatmul.msk.bf16.gmra.mxu2 %vm577_vm0, %v1823_v21  ;;  %v11266_v32 = vadd.f32 %v4031_v19, %v3330_v39  ;;  %v9259_v19 = vld [vmem:[%s9773_s29 + $0x51] sm:$0xff] }
 0x507   : > { %8646 = vmatmul.msk.bf16.gmra.mxu3 %vm577_vm0, %v2682_v46  ;;  %8850 = vmatmul.msk.bf16.gmra.mxu0 %vm577_vm0, %v3540_v9  ;;  %v9056_v46 = vld [vmem:[%s9773_s29 + $0x58] sm:$0xff] }
 0x508   : > { %13128 = vst [vmem:[#allocation32_spill] sm:$0xff] %v11266_v32  ;;  %v9463_v21 = vld [vmem:[%s9773_s29 + $0x52] sm:$0xff]  ;;  %v9464_v9 = vld [vmem:[%s9773_s29 + $0x5a] sm:$0xff] }
 0x509   : > { %v2317_v52 = vpop.f32.mrf.mxu2 }
 0x50a   : > { %v3176_v6 = vpop.f32.mrf.mxu3  ;;  %v2472_v24 = vadd.f32 %v2317_v52, %v1588_v61  ;;  %v5194_v52 = vpack.c.bf16 %v9056_v46, %v9055_v45 }
 0x50b   : > { %v1589_v10 = vpop.f32.mrf.mxu1 }
 0x50c   : > { %v3331_v43 = vadd.f32 %v3176_v6, %v2472_v24  ;;  %v4036_v48 = vpop.f32.mrf.mxu0  ;;  %v1590_v62 = vadd.f32 %v1589_v10, %v13131_v20  ;;  %v6052_v6 = vpack.c.bf16 %v9260_v41, %v9259_v19  ;;  %v11281_v24 = vpack.c.bf16 %v9464_v9, %v9463_v21  ;;  %v8854_v21 = vld [vmem:[%s9773_s29 + $0x42] sm:$0xff] }
 0x50d   : > { %v9057_v9 = vld [vmem:[%s9773_s29 + $0x60] sm:$0xff] }
 0x50e   : > { %v11273_v5 = vadd.f32 %v4034_v31, %v3331_v43 }
 0x510   : > { %13130 = vst [vmem:[#allocation35_spill] sm:$0xff] %v11273_v5 }
 0x511   : > { %v2319_v36 = vpop.f32.mrf.mxu2 }
 0x512   : > { %v3178_v39 = vpop.f32.mrf.mxu3  ;;  %v2473_v32 = vadd.f32 %v2319_v36, %v1590_v62  ;;  %v8853_v62 = vld [vmem:[%s9773_s29 + $0x3a] sm:$0xff] }
 0x513   : > { %v1592_v61 = vpop.f32.mrf.mxu1  ;;  %v4336_v5 = vpack.c.bf16 %v8854_v21, %v8853_v62 }
 0x514   : > { %v3332_v31 = vadd.f32 %v3178_v39, %v2473_v32  ;;  %v4039_v43 = vpop.f32.mrf.mxu0  ;;  %v1593_v38 = vadd.f32 %v1592_v61, %v13133_v33  ;;  %v9261_v39 = vld [vmem:[%s9773_s29 + $0x61] sm:$0xff] }
 0x516   : > { %8991 = vmatmul.msk.bf16.vlgmr.msra.gmra.mxu1 %vm577_vm0, %v4335_v17  ;;  %9195 = vmatmul.msk.bf16.vlgmr.msra.gmra.mxu2 %vm577_vm0, %v5194_v52  ;;  %v11286_v10 = vadd.f32 %v4036_v48, %v3332_v31  ;;  %v9058_v48 = vld [vmem:[%s9773_s29 + $0x68] sm:$0xff]  ;;  %v13135_v52 = vld [vmem:[#allocation50_spill] sm:$0xff] }
 0x517   : > { %9399 = vmatmul.msk.bf16.vlgmr.msra.gmra.mxu3 %vm577_vm0, %v6052_v6  ;;  %9603 = vmatmul.msk.bf16.vlgmr.msra.gmra.mxu0 %vm577_vm0, %v11281_v24  ;;  %v9262_v17 = vld [vmem:[%s9773_s29 + $0x69] sm:$0xff] }
 0x518   : > { %13132 = vst [vmem:[#allocation38_spill] sm:$0xff] %v11286_v10  ;;  %v9465_v31 = vld [vmem:[%s9773_s29 + $0x62] sm:$0xff]  ;;  %v9466_v10 = vld [vmem:[%s9773_s29 + $0x6a] sm:$0xff] }
 0x519   : > { %v2322_v32 = vpop.f32.mrf.mxu2 }
 0x51a   : > { %v3181_v45 = vpop.f32.mrf.mxu3  ;;  %v2474_v46 = vadd.f32 %v2322_v32, %v1593_v38  ;;  %v5195_v32 = vpack.c.bf16 %v9058_v48, %v9057_v9 }
 0x51b   : > { %v1594_v19 = vpop.f32.mrf.mxu1 }
 0x51c   : > { %v3333_v41 = vadd.f32 %v3181_v45, %v2474_v46  ;;  %v4041_v20 = vpop.f32.mrf.mxu0  ;;  %v1595_v6 = vadd.f32 %v1594_v19, %v13135_v52  ;;  %v6053_v45 = vpack.c.bf16 %v9262_v17, %v9261_v39  ;;  %v6911_v46 = vpack.c.bf16 %v9466_v10, %v9465_v31  ;;  %v9060_v52 = vld [vmem:[%s9773_s29 + $0x80] sm:$0xff] }
 0x51d   : > { %v9264_v31 = vld [vmem:[%s9773_s29 + $0x81] sm:$0xff] }
 0x51e   : > { %v11294_v36 = vadd.f32 %v4039_v43, %v3333_v41  ;;  %v13137_v41 = vld [vmem:[#allocation53_spill] sm:$0xff] }
 0x520   : > { %13134 = vst [vmem:[#allocation41_spill] sm:$0xff] %v11294_v36 }
 0x521   : > { %v2324_v61 = vpop.f32.mrf.mxu2 }
 0x522   : > { %v3183_v33 = vpop.f32.mrf.mxu3  ;;  %v2475_v55 = vadd.f32 %v2324_v61, %v1595_v6  ;;  %v9263_v6 = vld [vmem:[%s9773_s29 + $0x79] sm:$0xff]  ;;  %v13139_v61 = vld [vmem:[#allocation56_spill] sm:$0xff] }
 0x523   : > { %v1597_v38 = vpop.f32.mrf.mxu1  ;;  %v6054_v36 = vpack.c.bf16 %v9264_v31, %v9263_v6 }
 0x524   : > { %v3334_v34 = vadd.f32 %v3183_v33, %v2475_v55  ;;  %v4044_v43 = vpop.f32.mrf.mxu0  ;;  %v1598_v62 = vadd.f32 %v1597_v38, %v13137_v41  ;;  %v9468_v33 = vld [vmem:[%s9773_s29 + $0x82] sm:$0xff] }
 0x526   : > { %8992 = vmatmul.msk.bf16.gmra.mxu1 %vm577_vm0, %v4336_v5  ;;  %9196 = vmatmul.msk.bf16.gmra.mxu2 %vm577_vm0, %v5195_v32  ;;  %v11305_v19 = vadd.f32 %v4041_v20, %v3334_v34  ;;  %v9059_v5 = vld [vmem:[%s9773_s29 + $0x78] sm:$0xff] }
 0x527   : > { %9400 = vmatmul.msk.bf16.gmra.mxu3 %vm577_vm0, %v6053_v45  ;;  %9604 = vmatmul.msk.bf16.gmra.mxu0 %vm577_vm0, %v6911_v46  ;;  %v9467_v20 = vld [vmem:[%s9773_s29 + $0x7a] sm:$0xff]  ;;  %v5196_v41 = vpack.c.bf16 %v9060_v52, %v9059_v5 }
 0x528   : > { %13136 = vst [vmem:[#allocation44_spill] sm:$0xff] %v11305_v19 }
 0x529   : > { %v2327_v10 = vpop.f32.mrf.mxu2 }
 0x52a   : > { %v3186_v55 = vpop.f32.mrf.mxu3  ;;  %v2476_v21 = vadd.f32 %v2327_v10, %v1598_v62  ;;  %v6912_v62 = vpack.c.bf16 %v9468_v33, %v9467_v20  ;;  %v9265_v20 = vld [vmem:[%s9773_s29 + $0x89] sm:$0xff]  ;;  %v13143_v33 = vld [vmem:[#allocation62_spill] sm:$0xff] }
 0x52b   : > { %v1599_v9 = vpop.f32.mrf.mxu1 }
 0x52c   : > { %v3335_v48 = vadd.f32 %v3186_v55, %v2476_v21  ;;  %v4046_v39 = vpop.f32.mrf.mxu0  ;;  %v1600_v34 = vadd.f32 %v1599_v9, %v13139_v61  ;;  %v13141_v21 = vld [vmem:[#allocation59_spill] sm:$0xff] }
 0x52e   : > { %v11310_v17 = vadd.f32 %v4044_v43, %v3335_v48 }
 0x530   : > { %13138 = vst [vmem:[#allocation47_spill] sm:$0xff] %v11310_v17 }
 0x531   : > { %v2329_v32 = vpop.f32.mrf.mxu2 }
 0x532   : > { %v3188_v45 = vpop.f32.mrf.mxu3  ;;  %v2477_v19 = vadd.f32 %v2329_v32, %v1600_v34  ;;  %v9062_v34 = vld [vmem:[%s9773_s29 + $0x90] sm:$0xff] }
 0x533   : > { %v1602_v38 = vpop.f32.mrf.mxu1  ;;  %v9469_v32 = vld [vmem:[%s9773_s29 + $0x8a] sm:$0xff] }
 0x534   : > { %v3336_v10 = vadd.f32 %v3188_v45, %v2477_v19  ;;  %v4049_v55 = vpop.f32.mrf.mxu0  ;;  %v1603_v9 = vadd.f32 %v1602_v38, %v13141_v21  ;;  %v9470_v45 = vld [vmem:[%s9773_s29 + $0x92] sm:$0xff] }
 0x536   : > { %8993 = vmatmul.msk.bf16.gmra.mxu1 %vm577_vm0, %v11281_v24  ;;  %9197 = vmatmul.msk.bf16.gmra.mxu2 %vm577_vm0, %v5196_v41  ;;  %v11322_v43 = vadd.f32 %v4046_v39, %v3336_v10  ;;  %v9061_v24 = vld [vmem:[%s9773_s29 + $0x88] sm:$0xff] }
 0x537   : > { %9401 = vmatmul.msk.bf16.gmra.mxu3 %vm577_vm0, %v6054_v36  ;;  %9605 = vmatmul.msk.bf16.gmra.mxu0 %vm577_vm0, %v6912_v62  ;;  %v9266_v36 = vld [vmem:[%s9773_s29 + $0x91] sm:$0xff]  ;;  %v5197_v21 = vpack.c.bf16 %v9062_v34, %v9061_v24 }
 0x538   : > { %13140 = vst [vmem:[#allocation50_spill] sm:$0xff] %v11322_v43  ;;  %v6055_v17 = vpack.c.bf16 %v9266_v36, %v9265_v20 }
 0x539   : > { %v2332_v19 = vpop.f32.mrf.mxu2 }
 0x53a   : > { %v3191_v48 = vpop.f32.mrf.mxu3  ;;  %v2478_v5 = vadd.f32 %v2332_v19, %v1603_v9  ;;  %v6913_v9 = vpack.c.bf16 %v9470_v45, %v9469_v32  ;;  %v9267_v32 = vld [vmem:[%s9773_s29 + $0xa1] sm:$0xff]  ;;  %v13147_v45 = vld [vmem:[#allocation68_spill] sm:$0xff] }
 0x53b   : > { %v1604_v52 = vpop.f32.mrf.mxu1 }
 0x53c   : > { %v3337_v6 = vadd.f32 %v3191_v48, %v2478_v5  ;;  %v4051_v31 = vpop.f32.mrf.mxu0  ;;  %v1605_v39 = vadd.f32 %v1604_v52, %v13143_v33  ;;  %v13145_v5 = vld [vmem:[#allocation65_spill] sm:$0xff] }
 0x53e   : > { %v11327_v61 = vadd.f32 %v4049_v55, %v3337_v6 }
 0x540   : > { %13142 = vst [vmem:[#allocation53_spill] sm:$0xff] %v11327_v61 }
 0x541   : > { %v2334_v41 = vpop.f32.mrf.mxu2 }
 0x542   : > { %v3193_v10 = vpop.f32.mrf.mxu3  ;;  %v2479_v43 = vadd.f32 %v2334_v41, %v1605_v39  ;;  %v9064_v39 = vld [vmem:[%s9773_s29 + $0xa8] sm:$0xff] }
 0x543   : > { %v1607_v38 = vpop.f32.mrf.mxu1  ;;  %v9471_v41 = vld [vmem:[%s9773_s29 + $0xa2] sm:$0xff] }
 0x544   : > { %v3338_v19 = vadd.f32 %v3193_v10, %v2479_v43  ;;  %v4054_v48 = vpop.f32.mrf.mxu0  ;;  %v1608_v52 = vadd.f32 %v1607_v38, %v13145_v5  ;;  %v9472_v10 = vld [vmem:[%s9773_s29 + $0xaa] sm:$0xff] }
 0x546   : > { %8994 = vmatmul.msk.bf16.gmra.mxu1 %vm577_vm0, %v6911_v46  ;;  %9198 = vmatmul.msk.bf16.gmra.mxu2 %vm577_vm0, %v5197_v21  ;;  %v11338_v55 = vadd.f32 %v4051_v31, %v3338_v19  ;;  %v9063_v46 = vld [vmem:[%s9773_s29 + $0xa0] sm:$0xff] }
 0x547   : > { %9402 = vmatmul.msk.bf16.gmra.mxu3 %vm577_vm0, %v6055_v17  ;;  %9606 = vmatmul.msk.bf16.gmra.mxu0 %vm577_vm0, %v6913_v9  ;;  %v9268_v17 = vld [vmem:[%s9773_s29 + $0xa9] sm:$0xff]  ;;  %v5198_v5 = vpack.c.bf16 %v9064_v39, %v9063_v46 }
 0x548   : > { %13144 = vst [vmem:[#allocation56_spill] sm:$0xff] %v11338_v55  ;;  %v6056_v61 = vpack.c.bf16 %v9268_v17, %v9267_v32 }
 0x549   : > { %v2337_v6 = vpop.f32.mrf.mxu2 }
 0x54a   : > { %v3196_v43 = vpop.f32.mrf.mxu3  ;;  %v2480_v24 = vadd.f32 %v2337_v6, %v1608_v52  ;;  %v6914_v52 = vpack.c.bf16 %v9472_v10, %v9471_v41  ;;  %v9269_v41 = vld [vmem:[%s9773_s29 + $0xb1] sm:$0xff]  ;;  %v13151_v10 = vld [vmem:[#allocation74_spill] sm:$0xff] }
 0x54b   : > { %v1609_v34 = vpop.f32.mrf.mxu1 }
 0x54c   : > { %v3339_v20 = vadd.f32 %v3196_v43, %v2480_v24  ;;  %v4056_v36 = vpop.f32.mrf.mxu0  ;;  %v1610_v31 = vadd.f32 %v1609_v34, %v13147_v45  ;;  %v13149_v24 = vld [vmem:[#allocation71_spill] sm:$0xff] }
 0x54e   : > { %v11343_v33 = vadd.f32 %v4054_v48, %v3339_v20 }
 0x550   : > { %13146 = vst [vmem:[#allocation59_spill] sm:$0xff] %v11343_v33 }
 0x551   : > { %v2339_v21 = vpop.f32.mrf.mxu2 }
 0x552   : > { %v3198_v19 = vpop.f32.mrf.mxu3  ;;  %v2481_v55 = vadd.f32 %v2339_v21, %v1610_v31  ;;  %v9066_v31 = vld [vmem:[%s9773_s29 + $0xb8] sm:$0xff] }
 0x553   : > { %v1612_v38 = vpop.f32.mrf.mxu1  ;;  %v9473_v21 = vld [vmem:[%s9773_s29 + $0xb2] sm:$0xff] }
 0x554   : > { %v3340_v6 = vadd.f32 %v3198_v19, %v2481_v55  ;;  %v4059_v43 = vpop.f32.mrf.mxu0  ;;  %v1613_v34 = vadd.f32 %v1612_v38, %v13149_v24  ;;  %v9474_v19 = vld [vmem:[%s9773_s29 + $0xba] sm:$0xff] }
 0x556   : > { %8995 = vmatmul.msk.bf16.gmra.mxu1 %vm577_vm0, %v6912_v62  ;;  %9199 = vmatmul.msk.bf16.gmra.mxu2 %vm577_vm0, %v5198_v5  ;;  %v11354_v48 = vadd.f32 %v4056_v36, %v3340_v6  ;;  %v9065_v62 = vld [vmem:[%s9773_s29 + $0xb0] sm:$0xff] }
 0x557   : > { %9403 = vmatmul.msk.bf16.gmra.mxu3 %vm577_vm0, %v6056_v61  ;;  %9607 = vmatmul.msk.bf16.gmra.mxu0 %vm577_vm0, %v6914_v52  ;;  %v9270_v61 = vld [vmem:[%s9773_s29 + $0xb9] sm:$0xff]  ;;  %v5199_v24 = vpack.c.bf16 %v9066_v31, %v9065_v62 }
 0x558   : > { %13148 = vst [vmem:[#allocation62_spill] sm:$0xff] %v11354_v48  ;;  %v6057_v33 = vpack.c.bf16 %v9270_v61, %v9269_v41 }
 0x559   : > { %v2342_v20 = vpop.f32.mrf.mxu2 }
 0x55a   : > { %v3201_v55 = vpop.f32.mrf.mxu3  ;;  %v2482_v46 = vadd.f32 %v2342_v20, %v1613_v34  ;;  %v6915_v34 = vpack.c.bf16 %v9474_v19, %v9473_v21  ;;  %v9271_v21 = vld [vmem:[%s9773_s29 + $0xc9] sm:$0xff] }
 0x55b   : > { %v1614_v39 = vpop.f32.mrf.mxu1  ;;  %v13155_v19 = vld [vmem:[#allocation80_spill] sm:$0xff] }
 0x55c   : > { %v3341_v32 = vadd.f32 %v3201_v55, %v2482_v46  ;;  %v4061_v17 = vpop.f32.mrf.mxu0  ;;  %v1615_v36 = vadd.f32 %v1614_v39, %v13151_v10  ;;  %v13153_v46 = vld [vmem:[#allocation77_spill] sm:$0xff] }
 0x55e   : > { %v11359_v45 = vadd.f32 %v4059_v43, %v3341_v32 }
 0x560   : > { %13150 = vst [vmem:[#allocation65_spill] sm:$0xff] %v11359_v45 }
 0x561   : > { %v2344_v5 = vpop.f32.mrf.mxu2 }
 0x562   : > { %v3203_v6 = vpop.f32.mrf.mxu3  ;;  %v2483_v48 = vadd.f32 %v2344_v5, %v1615_v36  ;;  %v9068_v36 = vld [vmem:[%s9773_s29 + $0xd0] sm:$0xff] }
 0x563   : > { %v1617_v38 = vpop.f32.mrf.mxu1  ;;  %v9475_v5 = vld [vmem:[%s9773_s29 + $0xca] sm:$0xff] }
 0x564   : > { %v3342_v20 = vadd.f32 %v3203_v6, %v2483_v48  ;;  %v4064_v55 = vpop.f32.mrf.mxu0  ;;  %v1618_v39 = vadd.f32 %v1617_v38, %v13153_v46  ;;  %v9476_v6 = vld [vmem:[%s9773_s29 + $0xd2] sm:$0xff] }
 0x566   : > { %8996 = vmatmul.msk.bf16.gmra.mxu1 %vm577_vm0, %v6913_v9  ;;  %9200 = vmatmul.msk.bf16.gmra.mxu2 %vm577_vm0, %v5199_v24  ;;  %v11370_v43 = vadd.f32 %v4061_v17, %v3342_v20  ;;  %v9067_v9 = vld [vmem:[%s9773_s29 + $0xc8] sm:$0xff] }
 0x567   : > { %9404 = vmatmul.msk.bf16.gmra.mxu3 %vm577_vm0, %v6057_v33  ;;  %9608 = vmatmul.msk.bf16.gmra.mxu0 %vm577_vm0, %v6915_v34  ;;  %v9272_v33 = vld [vmem:[%s9773_s29 + $0xd1] sm:$0xff]  ;;  %v5200_v46 = vpack.c.bf16 %v9068_v36, %v9067_v9 }
 0x568   : > { %13152 = vst [vmem:[#allocation68_spill] sm:$0xff] %v11370_v43  ;;  %v6058_v45 = vpack.c.bf16 %v9272_v33, %v9271_v21 }
 0x569   : > { %v2347_v32 = vpop.f32.mrf.mxu2 }
 0x56a   : > { %v3206_v48 = vpop.f32.mrf.mxu3  ;;  %v2484_v62 = vadd.f32 %v2347_v32, %v1618_v39  ;;  %v6916_v39 = vpack.c.bf16 %v9476_v6, %v9475_v5  ;;  %v9273_v5 = vld [vmem:[%s9773_s29 + $0xd9] sm:$0xff] }
 0x56b   : > { %v1619_v31 = vpop.f32.mrf.mxu1  ;;  %v13159_v6 = vld [vmem:[#allocation86_spill] sm:$0xff] }
 0x56c   : > { %v3343_v41 = vadd.f32 %v3206_v48, %v2484_v62  ;;  %v4066_v61 = vpop.f32.mrf.mxu0  ;;  %v1620_v17 = vadd.f32 %v1619_v31, %v13155_v19  ;;  %v13157_v62 = vld [vmem:[#allocation83_spill] sm:$0xff] }
 0x56e   : > { %v11375_v10 = vadd.f32 %v4064_v55, %v3343_v41 }
 0x570   : > { %13154 = vst [vmem:[#allocation71_spill] sm:$0xff] %v11375_v10 }
 0x571   : > { %v2349_v24 = vpop.f32.mrf.mxu2 }
 0x572   : > { %v3208_v20 = vpop.f32.mrf.mxu3  ;;  %v2485_v43 = vadd.f32 %v2349_v24, %v1620_v17  ;;  %v9070_v17 = vld [vmem:[%s9773_s29 + $0xe0] sm:$0xff] }
 0x573   : > { %v1622_v38 = vpop.f32.mrf.mxu1  ;;  %v9477_v24 = vld [vmem:[%s9773_s29 + $0xda] sm:$0xff] }
 0x574   : > { %v3344_v32 = vadd.f32 %v3208_v20, %v2485_v43  ;;  %v4069_v48 = vpop.f32.mrf.mxu0  ;;  %v1623_v31 = vadd.f32 %v1622_v38, %v13157_v62  ;;  %v9478_v20 = vld [vmem:[%s9773_s29 + $0xe2] sm:$0xff] }
 0x576   : > { %8997 = vmatmul.msk.bf16.gmra.mxu1 %vm577_vm0, %v6914_v52  ;;  %9201 = vmatmul.msk.bf16.gmra.mxu2 %vm577_vm0, %v5200_v46  ;;  %v11386_v55 = vadd.f32 %v4066_v61, %v3344_v32  ;;  %v9069_v52 = vld [vmem:[%s9773_s29 + $0xd8] sm:$0xff] }
 0x577   : > { %9405 = vmatmul.msk.bf16.gmra.mxu3 %vm577_vm0, %v6058_v45  ;;  %9609 = vmatmul.msk.bf16.gmra.mxu0 %vm577_vm0, %v6916_v39  ;;  %v9274_v45 = vld [vmem:[%s9773_s29 + $0xe1] sm:$0xff]  ;;  %v5201_v62 = vpack.c.bf16 %v9070_v17, %v9069_v52 }
 0x578   : > { %13156 = vst [vmem:[#allocation74_spill] sm:$0xff] %v11386_v55  ;;  %v6059_v10 = vpack.c.bf16 %v9274_v45, %v9273_v5  ;;  %v9071_v45 = vld [vmem:[%s9773_s29 + $0xf0] sm:$0xff] }
 0x579   : > { %v2352_v41 = vpop.f32.mrf.mxu2 }
 0x57a   : > { %v3211_v43 = vpop.f32.mrf.mxu3  ;;  %v2486_v9 = vadd.f32 %v2352_v41, %v1623_v31  ;;  %v11399_v31 = vpack.c.bf16 %v9478_v20, %v9477_v24  ;;  %v9276_v24 = vld [vmem:[%s9773_s29 + $0xf9] sm:$0xff] }
 0x57b   : > { %v1624_v36 = vpop.f32.mrf.mxu1 }
 0x57c   : > { %v3345_v21 = vadd.f32 %v3211_v43, %v2486_v9  ;;  %v4071_v33 = vpop.f32.mrf.mxu0  ;;  %v1625_v61 = vadd.f32 %v1624_v36, %v13159_v6  ;;  %v13161_v9 = vld [vmem:[#allocation89_spill] sm:$0xff] }
 0x57e   : > { %v11391_v19 = vadd.f32 %v4069_v48, %v3345_v21 }
 0x580   : > { %13158 = vst [vmem:[#allocation77_spill] sm:$0xff] %v11391_v19 }
 0x581   : > { %v2354_v46 = vpop.f32.mrf.mxu2 }
 0x582   : > { %v3213_v32 = vpop.f32.mrf.mxu3  ;;  %v2487_v55 = vadd.f32 %v2354_v46, %v1625_v61  ;;  %v9072_v61 = vld [vmem:[%s9773_s29 + $0xf8] sm:$0xff] }
 0x583   : > { %v1627_v38 = vpop.f32.mrf.mxu1  ;;  %v9479_v46 = vld [vmem:[%s9773_s29 + $0xf2] sm:$0xff] }
 0x584   : > { %v3346_v41 = vadd.f32 %v3213_v32, %v2487_v55  ;;  %v4074_v48 = vpop.f32.mrf.mxu0  ;;  %v1628_v36 = vadd.f32 %v1627_v38, %v13161_v9  ;;  %v9480_v32 = vld [vmem:[%s9773_s29 + $0xfa] sm:$0xff]  ;;  %v5202_v9 = vpack.c.bf16 %v9072_v61, %v9071_v45 }
 0x586   : > { %8998 = vmatmul.msk.bf16.gmra.mxu1 %vm577_vm0, %v6915_v34  ;;  %9202 = vmatmul.msk.bf16.gmra.mxu2 %vm577_vm0, %v5201_v62  ;;  %v11404_v43 = vadd.f32 %v4071_v33, %v3346_v41  ;;  %v13162_v33 = vld [vmem:[#allocation92_spill] sm:$0xff] }
 0x587   : > { %9406 = vmatmul.msk.bf16.gmra.mxu3 %vm577_vm0, %v6059_v10  ;;  %9610 = vmatmul.msk.bf16.gmra.mxu0 %vm577_vm0, %v11399_v31  ;;  %v9275_v10 = vld [vmem:[%s9773_s29 + $0xf1] sm:$0xff] }
 0x588   : > { %13160 = vst [vmem:[#allocation80_spill] sm:$0xff] %v11404_v43  ;;  %v6060_v19 = vpack.c.bf16 %v9276_v24, %v9275_v10  ;;  %v11436_v10 = vld [vmem:[%s12892_s2 + $0x1] ss:$0 sm:$0xff]  ;;  %v9074_v24 = vld [vmem:[%s9773_s29 + $0x108] sm:$0xff] }
 0x589   : > { %v2357_v55 = vpop.f32.mrf.mxu2 }
 0x58a   : > { %v3216_v21 = vpop.f32.mrf.mxu3  ;;  %v2488_v52 = vadd.f32 %v2357_v55, %v1628_v36  ;;  %v11418_v36 = vpack.c.bf16 %v9480_v32, %v9479_v46 }
 0x58b   : > { %v1629_v17 = vpop.f32.mrf.mxu1 }
 0x58c   : > { %v3347_v5 = vadd.f32 %v3216_v21, %v2488_v52  ;;  %v4076_v34 = vpop.f32.mrf.mxu0  ;;  %v1630_v20 = vadd.f32 %v1629_v17, %v13162_v33  ;;  %v9277_v33 = vld [vmem:[%s9773_s29 + $0x101] sm:$0xff] }
 0x58e   : > { %v11410_v6 = vadd.f32 %v4074_v48, %v3347_v5 }
 0x591   : > { %v2359_v62 = vpop.f32.mrf.mxu2 }
 0x592   : > { %v3218_v41 = vpop.f32.mrf.mxu3  ;;  %v2489_v43 = vadd.f32 %v2359_v62, %v1630_v20  ;;  %v9278_v20 = vld [vmem:[%s9773_s29 + $0x109] sm:$0xff] }
 0x593   : > { %v4617_v38 = vpop.f32.mrf.mxu1  ;;  %v9481_v62 = vld [vmem:[%s9773_s29 + $0x102] sm:$0xff] }
 0x594   : > { %v3348_v55 = vadd.f32 %v3218_v41, %v2489_v43  ;;  %v7192_v21 = vpop.f32.mrf.mxu0  ;;  %v4937_v52 = vadd.f32 %v4617_v38, %v10376_v63  ;;  %v9073_v63 = vld [vmem:[%s9773_s29 + $0x100] sm:$0xff]  ;;  %v9482_v41 = vld [vmem:[%s9773_s29 + $0x10a] sm:$0xff] }
 0x596   : > { %8999 = vmatmul.msk.bf16.gmra.mxu1 %vm577_vm0, %v6916_v39  ;;  %9203 = vmatmul.msk.bf16.gmra.mxu2 %vm577_vm0, %v5202_v9  ;;  %v11423_v48 = vadd.f32 %v4076_v34, %v3348_v55 }
 0x597   : > { %9407 = vmatmul.msk.bf16.gmra.mxu3 %vm577_vm0, %v6060_v19  ;;  %9611 = vmatmul.msk.bf16.gmra.mxu0 %vm577_vm0, %v11418_v36  ;;  %v11431_v19 = vld [vmem:[%s12892_s2] ss:$0 sm:$0xff] }
 0x599   : > { %v5476_v43 = vpop.f32.mrf.mxu2 }
 0x59a   : > { %v6334_v17 = vpop.f32.mrf.mxu3  ;;  %v5796_v39 = vadd.f32 %v5476_v43, %v4937_v52  ;;  %v5203_v43 = vpack.c.bf16 %v9074_v24, %v9073_v63 }
 0x59b   : > { %v4619_v5 = vpop.f32.mrf.mxu1 }
 0x59c   : > { %v6654_v45 = vadd.f32 %v6334_v17, %v5796_v39  ;;  %v7194_v34 = vpop.f32.mrf.mxu0  ;;  %v4938_v32 = vadd.f32 %v4619_v5, %v10385_v54  ;;  %v6061_v17 = vpack.c.bf16 %v9278_v20, %v9277_v33  ;;  %v11453_v39 = vpack.c.bf16 %v9482_v41, %v9481_v62 }
 0x59e   : > { %v7512_v61 = vadd.f32 %v7192_v21, %v6654_v45 }
 0x5a0   : > { %v7642_v46 = vmul.f32 %v11431_v19, %v7512_v61 }
 0x5a1   : > { %v5478_v38 = vpop.f32.mrf.mxu2 }
 0x5a2   : > { %v6336_v9 = vpop.f32.mrf.mxu3  ;;  %v7772_v55 = vadd.f32 %v11436_v10, %v7642_v46  ;;  %v5797_v21 = vadd.f32 %v5478_v38, %v4938_v32 }
 0x5a3   : > { %v4622_v52 = vpop.f32.mrf.mxu1 }
 0x5a4   : > { %v7900_v45 = vmax.f32 %v7772_v55, 0.0  ;;  %v6655_v54 = vadd.f32 %v6336_v9, %v5797_v21  ;;  %v7197_v5 = vpop.f32.mrf.mxu0  ;;  %v4939_v24 = vadd.f32 %v4622_v52, %v10391_v16  ;;  %v9075_v9 = vld [vmem:[%s9773_s29 + $0x118] sm:$0xff]  ;;  %v9076_v55 = vld [vmem:[%s9773_s29 + $0x120] sm:$0xff] }
 0x5a5   : > { %v9279_v21 = vld [vmem:[%s9773_s29 + $0x119] sm:$0xff] }
 0x5a6   : > { %9000 = vmatmul.msk.bf16.gmra.mxu1 %vm577_vm0, %v11399_v31  ;;  %8028 = vst.msk [vmem:[%s11451_s10] sm:$0xff] %vm577_vm0, %v7900_v45  ;;  %v7513_v61 = vadd.f32 %v7194_v34, %v6655_v54  ;;  %9204 = vmatmul.msk.bf16.gmra.mxu2 %vm577_vm0, %v5203_v43  ;;  %v9280_v43 = vld [vmem:[%s9773_s29 + $0x121] sm:$0xff] }
 0x5a7   : > { %9408 = vmatmul.msk.bf16.gmra.mxu3 %vm577_vm0, %v6061_v17  ;;  %9612 = vmatmul.msk.bf16.gmra.mxu0 %vm577_vm0, %v11453_v39  ;;  %v9483_v17 = vld [vmem:[%s9773_s29 + $0x11a] sm:$0xff]  ;;  %v9484_v45 = vld [vmem:[%s9773_s29 + $0x122] sm:$0xff] }
 0x5a8   : > { %v7643_v63 = vmul.f32 %v11431_v19, %v7513_v61 }
 0x5a9   : > { %v5481_v31 = vpop.f32.mrf.mxu2 }
 0x5aa   : > { %v6339_v33 = vpop.f32.mrf.mxu3  ;;  %v7773_v34 = vadd.f32 %v11436_v10, %v7643_v63  ;;  %v5798_v20 = vadd.f32 %v5481_v31, %v4939_v24 }
 0x5ab   : > { %v4624_v46 = vpop.f32.mrf.mxu1 }
 0x5ac   : > { %v7901_v32 = vmax.f32 %v7773_v34, 0.0  ;;  %v6656_v62 = vadd.f32 %v6339_v33, %v5798_v20  ;;  %v7199_v41 = vpop.f32.mrf.mxu0  ;;  %v4940_v52 = vadd.f32 %v4624_v46, %v10400_v29  ;;  %v5204_v33 = vpack.c.bf16 %v9076_v55, %v9075_v9 }
 0x5ad   : > { %v6062_v34 = vpack.c.bf16 %v9280_v43, %v9279_v21 }
 0x5ae   : > { %8029 = vst.msk [vmem:[%s11451_s10 + $0x8] sm:$0xff] %vm577_vm0, %v7901_v32  ;;  %v7514_v38 = vadd.f32 %v7197_v5, %v6656_v62  ;;  %v11477_v5 = vpack.c.bf16 %v9484_v45, %v9483_v17  ;;  %v9077_v45 = vld [vmem:[%s9773_s29 + $0x128] sm:$0xff] }
 0x5b0   : > { %v7644_v16 = vmul.f32 %v11431_v19, %v7514_v38 }
 0x5b1   : > { %v5483_v54 = vpop.f32.mrf.mxu2 }
 0x5b2   : > { %v6341_v61 = vpop.f32.mrf.mxu3  ;;  %v7774_v63 = vadd.f32 %v11436_v10, %v7644_v16  ;;  %v5799_v24 = vadd.f32 %v5483_v54, %v4940_v52  ;;  %v9078_v54 = vld [vmem:[%s9773_s29 + $0x130] sm:$0xff] }
 0x5b3   : > { %v4627_v31 = vpop.f32.mrf.mxu1 }
 0x5b4   : > { %v7902_v20 = vmax.f32 %v7774_v63, 0.0  ;;  %v6657_v32 = vadd.f32 %v6341_v61, %v5799_v24  ;;  %v7202_v62 = vpop.f32.mrf.mxu0  ;;  %v4941_v38 = vadd.f32 %v4627_v31, %v10406_v14  ;;  %v9281_v61 = vld [vmem:[%s9773_s29 + $0x129] sm:$0xff]  ;;  %v9282_v63 = vld [vmem:[%s9773_s29 + $0x131] sm:$0xff] }
 0x5b5   : > { %v9485_v31 = vld [vmem:[%s9773_s29 + $0x12a] sm:$0xff] }
 0x5b6   : > { %9001 = vmatmul.msk.bf16.gmra.mxu1 %vm577_vm0, %v11418_v36  ;;  %8030 = vst.msk [vmem:[%s11451_s10 + $0x10] sm:$0xff] %vm577_vm0, %v7902_v20  ;;  %v7515_v29 = vadd.f32 %v7199_v41, %v6657_v32  ;;  %9205 = vmatmul.msk.bf16.gmra.mxu2 %vm577_vm0, %v5204_v33  ;;  %v9486_v33 = vld [vmem:[%s9773_s29 + $0x132] sm:$0xff] }
 0x5b7   : > { %9409 = vmatmul.msk.bf16.gmra.mxu3 %vm577_vm0, %v6062_v34  ;;  %9613 = vmatmul.msk.bf16.gmra.mxu0 %vm577_vm0, %v11477_v5 }
 0x5b8   : > { %v7645_v46 = vmul.f32 %v11431_v19, %v7515_v29 }
 0x5b9   : > { %v5486_v36 = vpop.f32.mrf.mxu2 }
 0x5ba   : > { %v6344_v9 = vpop.f32.mrf.mxu3  ;;  %v7775_v41 = vadd.f32 %v11436_v10, %v7645_v46  ;;  %v5800_v55 = vadd.f32 %v5486_v36, %v4941_v38  ;;  %v5205_v38 = vpack.c.bf16 %v9078_v54, %v9077_v45  ;;  %v6063_v36 = vpack.c.bf16 %v9282_v63, %v9281_v61 }
 0x5bb   : > { %v4629_v21 = vpop.f32.mrf.mxu1 }
 0x5bc   : > { %v7903_v43 = vmax.f32 %v7775_v41, 0.0  ;;  %v6658_v16 = vadd.f32 %v6344_v9, %v5800_v55  ;;  %v7204_v52 = vpop.f32.mrf.mxu0  ;;  %v4942_v24 = vadd.f32 %v4629_v21, %v10415_v35 }
 0x5be   : > { %8031 = vst.msk [vmem:[%s11451_s10 + $0x18] sm:$0xff] %vm577_vm0, %v7903_v43  ;;  %v7516_v17 = vadd.f32 %v7202_v62, %v6658_v16  ;;  %v11501_v62 = vpack.c.bf16 %v9486_v33, %v9485_v31  ;;  %v9080_v31 = vld [vmem:[%s9773_s29 + $0x148] sm:$0xff] }
 0x5bf   : > { %v9283_v33 = vld [vmem:[%s9773_s29 + $0x141] sm:$0xff] }
 0x5c0   : > { %v7646_v14 = vmul.f32 %v11431_v19, %v7516_v17 }
 0x5c1   : > { %v5488_v34 = vpop.f32.mrf.mxu2 }
 0x5c2   : > { %v6346_v20 = vpop.f32.mrf.mxu3  ;;  %v7776_v32 = vadd.f32 %v11436_v10, %v7646_v14  ;;  %v5801_v29 = vadd.f32 %v5488_v34, %v4942_v24  ;;  %v9079_v24 = vld [vmem:[%s9773_s29 + $0x140] sm:$0xff]  ;;  %v9284_v34 = vld [vmem:[%s9773_s29 + $0x149] sm:$0xff] }
 0x5c3   : > { %v4632_v46 = vpop.f32.mrf.mxu1 }
 0x5c4   : > { %v7904_v9 = vmax.f32 %v7776_v32, 0.0  ;;  %v6659_v41 = vadd.f32 %v6346_v20, %v5801_v29  ;;  %v7207_v55 = vpop.f32.mrf.mxu0  ;;  %v4943_v43 = vadd.f32 %v4632_v46, %v10421_v57  ;;  %v9487_v32 = vld [vmem:[%s9773_s29 + $0x142] sm:$0xff]  ;;  %v9488_v29 = vld [vmem:[%s9773_s29 + $0x14a] sm:$0xff] }
 0x5c6   : > { %9002 = vmatmul.msk.bf16.gmra.mxu1 %vm577_vm0, %v11453_v39  ;;  %8032 = vst.msk [vmem:[%s11451_s10 + $0x20] sm:$0xff] %vm577_vm0, %v7904_v9  ;;  %v7517_v35 = vadd.f32 %v7204_v52, %v6659_v41  ;;  %9206 = vmatmul.msk.bf16.gmra.mxu2 %vm577_vm0, %v5205_v38 }
 0x5c7   : > { %9410 = vmatmul.msk.bf16.gmra.mxu3 %vm577_vm0, %v6063_v36  ;;  %9614 = vmatmul.msk.bf16.gmra.mxu0 %vm577_vm0, %v11501_v62 }
 0x5c8   : > { %v7647_v21 = vmul.f32 %v11431_v19, %v7517_v35  ;;  %v5206_v35 = vpack.c.bf16 %v9080_v31, %v9079_v24 }
 0x5c9   : > { %v5491_v39 = vpop.f32.mrf.mxu2 }
 0x5ca   : > { %v6349_v16 = vpop.f32.mrf.mxu3  ;;  %v7777_v52 = vadd.f32 %v11436_v10, %v7647_v21  ;;  %v5802_v17 = vadd.f32 %v5491_v39, %v4943_v43  ;;  %v6064_v21 = vpack.c.bf16 %v9284_v34, %v9283_v33  ;;  %v9081_v34 = vld [vmem:[%s9773_s29 + $0x150] sm:$0xff] }
 0x5cb   : > { %v4634_v45 = vpop.f32.mrf.mxu1 }
 0x5cc   : > { %v7905_v54 = vmax.f32 %v7777_v52, 0.0  ;;  %v6660_v61 = vadd.f32 %v6349_v16, %v5802_v17  ;;  %v7209_v63 = vpop.f32.mrf.mxu0  ;;  %v4944_v20 = vadd.f32 %v4634_v45, %v10430_v4 }
 0x5ce   : > { %8033 = vst.msk [vmem:[%s11451_s10 + $0x28] sm:$0xff] %vm577_vm0, %v7905_v54  ;;  %v7518_v14 = vadd.f32 %v7207_v55, %v6660_v61  ;;  %v11525_v55 = vpack.c.bf16 %v9488_v29, %v9487_v32  ;;  %v9286_v32 = vld [vmem:[%s9773_s29 + $0x159] sm:$0xff] }
 0x5d0   : > { %v7648_v57 = vmul.f32 %v11431_v19, %v7518_v14 }
 0x5d1   : > { %v5493_v46 = vpop.f32.mrf.mxu2 }
 0x5d2   : > { %v6351_v38 = vpop.f32.mrf.mxu3  ;;  %v7778_v36 = vadd.f32 %v11436_v10, %v7648_v57  ;;  %v5803_v9 = vadd.f32 %v5493_v46, %v4944_v20  ;;  %v9082_v57 = vld [vmem:[%s9773_s29 + $0x158] sm:$0xff] }
 0x5d3   : > { %v4637_v41 = vpop.f32.mrf.mxu1  ;;  %v9285_v20 = vld [vmem:[%s9773_s29 + $0x151] sm:$0xff] }
 0x5d4   : > { %v7906_v43 = vmax.f32 %v7778_v36, 0.0  ;;  %v6661_v39 = vadd.f32 %v6351_v38, %v5803_v9  ;;  %v7212_v16 = vpop.f32.mrf.mxu0  ;;  %v4945_v17 = vadd.f32 %v4637_v41, %v10436_v15  ;;  %v9489_v46 = vld [vmem:[%s9773_s29 + $0x152] sm:$0xff]  ;;  %v9490_v38 = vld [vmem:[%s9773_s29 + $0x15a] sm:$0xff] }
 0x5d6   : > { %9003 = vmatmul.msk.bf16.gmra.mxu1 %vm577_vm0, %v11477_v5  ;;  %8034 = vst.msk [vmem:[%s11451_s10 + $0x30] sm:$0xff] %vm577_vm0, %v7906_v43  ;;  %v7519_v4 = vadd.f32 %v7209_v63, %v6661_v39  ;;  %9207 = vmatmul.msk.bf16.gmra.mxu2 %vm577_vm0, %v5206_v35  ;;  %v5207_v43 = vpack.c.bf16 %v9082_v57, %v9081_v34  ;;  %v9083_v57 = vld [vmem:[%s9773_s29 + $0x168] sm:$0xff] }
 0x5d7   : > { %9411 = vmatmul.msk.bf16.gmra.mxu3 %vm577_vm0, %v6064_v21  ;;  %9615 = vmatmul.msk.bf16.gmra.mxu0 %vm577_vm0, %v11525_v55  ;;  %v6065_v39 = vpack.c.bf16 %v9286_v32, %v9285_v20  ;;  %v9084_v20 = vld [vmem:[%s9773_s29 + $0x170] sm:$0xff] }
 0x5d8   : > { %v7649_v52 = vmul.f32 %v11431_v19, %v7519_v4  ;;  %v9287_v32 = vld [vmem:[%s9773_s29 + $0x169] sm:$0xff] }
 0x5d9   : > { %v5496_v5 = vpop.f32.mrf.mxu2 }
 0x5da   : > { %v6354_v45 = vpop.f32.mrf.mxu3  ;;  %v7779_v54 = vadd.f32 %v11436_v10, %v7649_v52  ;;  %v5804_v61 = vadd.f32 %v5496_v5, %v4945_v17 }
 0x5db   : > { %v4639_v63 = vpop.f32.mrf.mxu1 }
 0x5dc   : > { %v7907_v14 = vmax.f32 %v7779_v54, 0.0  ;;  %v6662_v24 = vadd.f32 %v6354_v45, %v5804_v61  ;;  %v7214_v31 = vpop.f32.mrf.mxu0  ;;  %v4946_v29 = vadd.f32 %v4639_v63, %v10445_v49 }
 0x5de   : > { %8035 = vst.msk [vmem:[%s11451_s10 + $0x38] sm:$0xff] %vm577_vm0, %v7907_v14  ;;  %v7520_v33 = vadd.f32 %v7212_v16, %v6662_v24  ;;  %v11549_v16 = vpack.c.bf16 %v9490_v38, %v9489_v46  ;;  %v9491_v46 = vld [vmem:[%s9773_s29 + $0x16a] sm:$0xff]  ;;  %v9492_v38 = vld [vmem:[%s9773_s29 + $0x172] sm:$0xff] }
 0x5e0   : > { %v7650_v15 = vmul.f32 %v11431_v19, %v7520_v33 }
 0x5e1   : > { %v5498_v36 = vpop.f32.mrf.mxu2 }
 0x5e2   : > { %v6356_v9 = vpop.f32.mrf.mxu3  ;;  %v7780_v41 = vadd.f32 %v11436_v10, %v7650_v15  ;;  %v5805_v35 = vadd.f32 %v5498_v36, %v4946_v29  ;;  %v9288_v15 = vld [vmem:[%s9773_s29 + $0x171] sm:$0xff] }
 0x5e3   : > { %v4642_v21 = vpop.f32.mrf.mxu1 }
 0x5e4   : > { %v7908_v4 = vmax.f32 %v7780_v41, 0.0  ;;  %v6663_v52 = vadd.f32 %v6356_v9, %v5805_v35  ;;  %v7217_v17 = vpop.f32.mrf.mxu0  ;;  %v4947_v45 = vadd.f32 %v4642_v21, %v10451_v40 }
 0x5e6   : > { %9004 = vmatmul.msk.bf16.gmra.mxu1 %vm577_vm0, %v11501_v62  ;;  %8036 = vst.msk [vmem:[%s11451_s10 + $0x40] sm:$0xff] %vm577_vm0, %v7908_v4  ;;  %v7521_v49 = vadd.f32 %v7214_v31, %v6663_v52  ;;  %9208 = vmatmul.msk.bf16.gmra.mxu2 %vm577_vm0, %v5207_v43  ;;  %v5208_v43 = vpack.c.bf16 %v9084_v20, %v9083_v57  ;;  %v9086_v57 = vld [vmem:[%s9773_s29 + $0x180] sm:$0xff] }
 0x5e7   : > { %9412 = vmatmul.msk.bf16.gmra.mxu3 %vm577_vm0, %v6065_v39  ;;  %9616 = vmatmul.msk.bf16.gmra.mxu0 %vm577_vm0, %v11549_v16  ;;  %v6066_v39 = vpack.c.bf16 %v9288_v15, %v9287_v32  ;;  %v11573_v4 = vpack.c.bf16 %v9492_v38, %v9491_v46  ;;  %v9289_v20 = vld [vmem:[%s9773_s29 + $0x179] sm:$0xff]  ;;  %v9290_v32 = vld [vmem:[%s9773_s29 + $0x181] sm:$0xff] }
 0x5e8   : > { %v7651_v5 = vmul.f32 %v11431_v19, %v7521_v49 }
 0x5e9   : > { %v5501_v62 = vpop.f32.mrf.mxu2 }
 0x5ea   : > { %v6359_v54 = vpop.f32.mrf.mxu3  ;;  %v7781_v61 = vadd.f32 %v11436_v10, %v7651_v5  ;;  %v5806_v63 = vadd.f32 %v5501_v62, %v4947_v45 }
 0x5eb   : > { %v4644_v14 = vpop.f32.mrf.mxu1 }
 0x5ec   : > { %v7909_v24 = vmax.f32 %v7781_v61, 0.0  ;;  %v6664_v31 = vadd.f32 %v6359_v54, %v5806_v63  ;;  %v7219_v33 = vpop.f32.mrf.mxu0  ;;  %v4948_v29 = vadd.f32 %v4644_v14, %v10462_v0 }
 0x5ee   : > { %8037 = vst.msk [vmem:[%s11451_s10 + $0x48] sm:$0xff] %vm577_vm0, %v7909_v24  ;;  %v7522_v34 = vadd.f32 %v7217_v17, %v6664_v31 }
 0x5f0   : > { %v7652_v40 = vmul.f32 %v11431_v19, %v7522_v34  ;;  %v9085_v34 = vld [vmem:[%s9773_s29 + $0x178] sm:$0xff] }
 0x5f1   : > { %v5503_v36 = vpop.f32.mrf.mxu2 }
 0x5f2   : > { %v6361_v9 = vpop.f32.mrf.mxu3  ;;  %v7782_v41 = vadd.f32 %v11436_v10, %v7652_v40  ;;  %v5807_v35 = vadd.f32 %v5503_v36, %v4948_v29  ;;  %v9493_v40 = vld [vmem:[%s9773_s29 + $0x17a] sm:$0xff]  ;;  %v9494_v29 = vld [vmem:[%s9773_s29 + $0x182] sm:$0xff] }
 0x5f3   : > { %v4647_v21 = vpop.f32.mrf.mxu1 }
 0x5f4   : > { %v7910_v52 = vmax.f32 %v7782_v41, 0.0  ;;  %v6665_v17 = vadd.f32 %v6361_v9, %v5807_v35  ;;  %v7222_v49 = vpop.f32.mrf.mxu0  ;;  %v4949_v45 = vadd.f32 %v4647_v21, %v10467_v2  ;;  %v5209_v35 = vpack.c.bf16 %v9086_v57, %v9085_v34  ;;  %v9292_v34 = vld [vmem:[%s9773_s29 + $0x199] sm:$0xff] }
 0x5f5   : > { %v6067_v21 = vpack.c.bf16 %v9290_v32, %v9289_v20  ;;  %v9495_v20 = vld [vmem:[%s9773_s29 + $0x192] sm:$0xff]  ;;  %v9496_v32 = vld [vmem:[%s9773_s29 + $0x19a] sm:$0xff] }
 0x5f6   : > { %9005 = vmatmul.msk.bf16.gmra.mxu1 %vm577_vm0, %v11525_v55  ;;  %8038 = vst.msk [vmem:[%s11451_s10 + $0x50] sm:$0xff] %vm577_vm0, %v7910_v52  ;;  %v7523_v0 = vadd.f32 %v7219_v33, %v6665_v17  ;;  %9209 = vmatmul.msk.bf16.gmra.mxu2 %vm577_vm0, %v5208_v43  ;;  %v11597_v43 = vpack.c.bf16 %v9494_v29, %v9493_v40 }
 0x5f7   : > { %9413 = vmatmul.msk.bf16.gmra.mxu3 %vm577_vm0, %v6066_v39  ;;  %9617 = vmatmul.msk.bf16.gmra.mxu0 %vm577_vm0, %v11573_v4 }
 0x5f8   : > { %v7653_v5 = vmul.f32 %v11431_v19, %v7523_v0 }
 0x5f9   : > { %v5506_v55 = vpop.f32.mrf.mxu2 }
 0x5fa   : > { %v6364_v62 = vpop.f32.mrf.mxu3  ;;  %v7783_v54 = vadd.f32 %v11436_v10, %v7653_v5  ;;  %v5808_v61 = vadd.f32 %v5506_v55, %v4949_v45 }
 0x5fb   : > { %v4649_v63 = vpop.f32.mrf.mxu1 }
 0x5fc   : > { %v7911_v14 = vmax.f32 %v7783_v54, 0.0  ;;  %v6666_v24 = vadd.f32 %v6364_v62, %v5808_v61  ;;  %v7224_v31 = vpop.f32.mrf.mxu0  ;;  %v4950_v15 = vadd.f32 %v4649_v63, %v10478_v12 }
 0x5fe   : > { %8039 = vst.msk [vmem:[%s11451_s10 + $0x58] sm:$0xff] %vm577_vm0, %v7911_v14  ;;  %v7524_v33 = vadd.f32 %v7222_v49, %v6666_v24  ;;  %v9087_v24 = vld [vmem:[%s9773_s29 + $0x190] sm:$0xff] }
 0x600   : > { %v7654_v2 = vmul.f32 %v11431_v19, %v7524_v33  ;;  %v9291_v33 = vld [vmem:[%s9773_s29 + $0x191] sm:$0xff] }
 0x601   : > { %v5508_v46 = vpop.f32.mrf.mxu2 }
 0x602   : > { %v6366_v38 = vpop.f32.mrf.mxu3  ;;  %v7784_v36 = vadd.f32 %v11436_v10, %v7654_v2  ;;  %v5809_v9 = vadd.f32 %v5508_v46, %v4950_v15 }
 0x603   : > { %v4652_v41 = vpop.f32.mrf.mxu1 }
 0x604   : > { %v7912_v39 = vmax.f32 %v7784_v36, 0.0  ;;  %v6667_v52 = vadd.f32 %v6366_v38, %v5809_v9  ;;  %v7227_v17 = vpop.f32.mrf.mxu0  ;;  %v4951_v0 = vadd.f32 %v4652_v41, %v10483_v44  ;;  %v6068_v36 = vpack.c.bf16 %v9292_v34, %v9291_v33 }
 0x605   : > { %v11621_v9 = vpack.c.bf16 %v9496_v32, %v9495_v20 }
 0x606   : > { %9006 = vmatmul.msk.bf16.gmra.mxu1 %vm577_vm0, %v11549_v16  ;;  %8040 = vst.msk [vmem:[%s11451_s10 + $0x60] sm:$0xff] %vm577_vm0, %v7912_v39  ;;  %v7525_v12 = vadd.f32 %v7224_v31, %v6667_v52  ;;  %9210 = vmatmul.msk.bf16.gmra.mxu2 %vm577_vm0, %v5209_v35  ;;  %v9088_v31 = vld [vmem:[%s9773_s29 + $0x198] sm:$0xff] }
 0x607   : > { %9414 = vmatmul.msk.bf16.gmra.mxu3 %vm577_vm0, %v6067_v21  ;;  %9618 = vmatmul.msk.bf16.gmra.mxu0 %vm577_vm0, %v11597_v43  ;;  %v5210_v38 = vpack.c.bf16 %v9088_v31, %v9087_v24  ;;  %v9497_v24 = vld [vmem:[%s9773_s29 + $0x1a2] sm:$0xff]  ;;  %v9498_v31 = vld [vmem:[%s9773_s29 + $0x1aa] sm:$0xff] }
 0x608   : > { %v7655_v49 = vmul.f32 %v11431_v19, %v7525_v12 }
 0x609   : > { %v5511_v16 = vpop.f32.mrf.mxu2 }
 0x60a   : > { %v6369_v5 = vpop.f32.mrf.mxu3  ;;  %v7785_v45 = vadd.f32 %v11436_v10, %v7655_v49  ;;  %v5810_v55 = vadd.f32 %v5511_v16, %v4951_v0 }
 0x60b   : > { %v4654_v62 = vpop.f32.mrf.mxu1 }
 0x60c   : > { %v7913_v54 = vmax.f32 %v7785_v45, 0.0  ;;  %v6668_v61 = vadd.f32 %v6369_v5, %v5810_v55  ;;  %v7229_v63 = vpop.f32.mrf.mxu0  ;;  %v4952_v57 = vadd.f32 %v4654_v62, %v10494_v30  ;;  %v9089_v62 = vld [vmem:[%s9773_s29 + $0x1a0] sm:$0xff] }
 0x60e   : > { %8041 = vst.msk [vmem:[%s11451_s10 + $0x68] sm:$0xff] %vm577_vm0, %v7913_v54  ;;  %v7526_v14 = vadd.f32 %v7227_v17, %v6668_v61  ;;  %v9090_v54 = vld [vmem:[%s9773_s29 + $0x1a8] sm:$0xff] }
 0x60f   : > { %v9293_v61 = vld [vmem:[%s9773_s29 + $0x1a1] sm:$0xff]  ;;  %v5211_v32 = vpack.c.bf16 %v9090_v54, %v9089_v62 }
 0x610   : > { %v7656_v44 = vmul.f32 %v11431_v19, %v7526_v14 }
 0x611   : > { %v5513_v2 = vpop.f32.mrf.mxu2 }
 0x612   : > { %v6371_v15 = vpop.f32.mrf.mxu3  ;;  %v7786_v40 = vadd.f32 %v11436_v10, %v7656_v44  ;;  %v5811_v29 = vadd.f32 %v5513_v2, %v4952_v57 }
 0x613   : > { %v4657_v46 = vpop.f32.mrf.mxu1 }
 0x614   : > { %v7914_v41 = vmax.f32 %v7786_v40, 0.0  ;;  %v6669_v35 = vadd.f32 %v6371_v15, %v5811_v29  ;;  %v7232_v21 = vpop.f32.mrf.mxu0  ;;  %v4953_v52 = vadd.f32 %v4657_v46, %v10499_v23  ;;  %v11645_v15 = vpack.c.bf16 %v9498_v31, %v9497_v24 }
 0x616   : > { %9007 = vmatmul.msk.bf16.gmra.mxu1 %vm577_vm0, %v11573_v4  ;;  %8042 = vst.msk [vmem:[%s11451_s10 + $0x70] sm:$0xff] %vm577_vm0, %v7914_v41  ;;  %v7527_v30 = vadd.f32 %v7229_v63, %v6669_v35  ;;  %9211 = vmatmul.msk.bf16.gmra.mxu2 %vm577_vm0, %v5210_v38  ;;  %v9294_v63 = vld [vmem:[%s9773_s29 + $0x1a9] sm:$0xff] }
 0x617   : > { %9415 = vmatmul.msk.bf16.gmra.mxu3 %vm577_vm0, %v6068_v36  ;;  %9619 = vmatmul.msk.bf16.gmra.mxu0 %vm577_vm0, %v11621_v9  ;;  %v6069_v2 = vpack.c.bf16 %v9294_v63, %v9293_v61 }
 0x618   : > { %v7657_v39 = vmul.f32 %v11431_v19, %v7527_v30 }
 0x619   : > { %v5516_v4 = vpop.f32.mrf.mxu2 }
 0x61a   : > { %v6374_v17 = vpop.f32.mrf.mxu3  ;;  %v7787_v12 = vadd.f32 %v11436_v10, %v7657_v39  ;;  %v5812_v49 = vadd.f32 %v5516_v4, %v4953_v52 }
 0x61b   : > { %v4659_v0 = vpop.f32.mrf.mxu1 }
 0x61c   : > { %v7915_v16 = vmax.f32 %v7787_v12, 0.0  ;;  %v6670_v5 = vadd.f32 %v6374_v17, %v5812_v49  ;;  %v7234_v45 = vpop.f32.mrf.mxu0  ;;  %v4954_v14 = vadd.f32 %v4659_v0, %v10510_v11  ;;  %v9091_v12 = vld [vmem:[%s9773_s29 + $0x1b8] sm:$0xff]  ;;  %v9092_v49 = vld [vmem:[%s9773_s29 + $0x1c0] sm:$0xff] }
 0x61d   : > { %v9295_v0 = vld [vmem:[%s9773_s29 + $0x1b9] sm:$0xff] }
 0x61e   : > { %8043 = vst.msk [vmem:[%s11451_s10 + $0x78] sm:$0xff] %vm577_vm0, %v7915_v16  ;;  %v7528_v55 = vadd.f32 %v7232_v21, %v6670_v5  ;;  %v9296_v16 = vld [vmem:[%s9773_s29 + $0x1c1] sm:$0xff] }
 0x61f   : > { %v6070_v24 = vpack.c.bf16 %v9296_v16, %v9295_v0 }
 0x620   : > { %v7658_v23 = vmul.f32 %v11431_v19, %v7528_v55  ;;  %v9500_v55 = vld [vmem:[%s9773_s29 + $0x1c2] sm:$0xff] }
 0x621   : > { %v5518_v33 = vpop.f32.mrf.mxu2 }
 0x622   : > { %v6376_v34 = vpop.f32.mrf.mxu3  ;;  %v7788_v44 = vadd.f32 %v11436_v10, %v7658_v23  ;;  %v5813_v57 = vadd.f32 %v5518_v33, %v4954_v14  ;;  %v5212_v14 = vpack.c.bf16 %v9092_v49, %v9091_v12 }
 0x623   : > { %v4662_v20 = vpop.f32.mrf.mxu1 }
 0x624   : > { %v7916_v40 = vmax.f32 %v7788_v44, 0.0  ;;  %v6671_v29 = vadd.f32 %v6376_v34, %v5813_v57  ;;  %v7237_v46 = vpop.f32.mrf.mxu0  ;;  %v4955_v36 = vadd.f32 %v4662_v20, %v10515_v22 }
 0x626   : > { %9008 = vmatmul.msk.bf16.gmra.mxu1 %vm577_vm0, %v11597_v43  ;;  %8044 = vst.msk [vmem:[%s11451_s10 + $0x80] sm:$0xff] %vm577_vm0, %v7916_v40  ;;  %v7529_v11 = vadd.f32 %v7234_v45, %v6671_v29  ;;  %9212 = vmatmul.msk.bf16.gmra.mxu2 %vm577_vm0, %v5211_v32  ;;  %v9499_v45 = vld [vmem:[%s9773_s29 + $0x1ba] sm:$0xff] }
 0x627   : > { %9416 = vmatmul.msk.bf16.gmra.mxu3 %vm577_vm0, %v6069_v2  ;;  %9620 = vmatmul.msk.bf16.gmra.mxu0 %vm577_vm0, %v11645_v15  ;;  %v11669_v31 = vpack.c.bf16 %v9500_v55, %v9499_v45 }
 0x628   : > { %v7659_v38 = vmul.f32 %v11431_v19, %v7529_v11 }
 0x629   : > { %v5521_v43 = vpop.f32.mrf.mxu2 }
 0x62a   : > { %v6379_v41 = vpop.f32.mrf.mxu3  ;;  %v7789_v35 = vadd.f32 %v11436_v10, %v7659_v38  ;;  %v5814_v21 = vadd.f32 %v5521_v43, %v4955_v36  ;;  %v9093_v43 = vld [vmem:[%s9773_s29 + $0x1c8] sm:$0xff] }
 0x62b   : > { %v4664_v30 = vpop.f32.mrf.mxu1 }
 0x62c   : > { %v7917_v39 = vmax.f32 %v7789_v35, 0.0  ;;  %v6672_v52 = vadd.f32 %v6379_v41, %v5814_v21  ;;  %v7239_v4 = vpop.f32.mrf.mxu0  ;;  %v4956_v5 = vadd.f32 %v4664_v30, %v10526_v28  ;;  %v9094_v41 = vld [vmem:[%s9773_s29 + $0x1d0] sm:$0xff] }
 0x62d   : > { %v9297_v35 = vld [vmem:[%s9773_s29 + $0x1c9] sm:$0xff]  ;;  %v9298_v21 = vld [vmem:[%s9773_s29 + $0x1d1] sm:$0xff]  ;;  %v5213_v16 = vpack.c.bf16 %v9094_v41, %v9093_v43 }
 0x62e   : > { %8045 = vst.msk [vmem:[%s11451_s10 + $0x88] sm:$0xff] %vm577_vm0, %v7917_v39  ;;  %v7530_v17 = vadd.f32 %v7237_v46, %v6672_v52  ;;  %v9501_v39 = vld [vmem:[%s9773_s29 + $0x1ca] sm:$0xff]  ;;  %v9502_v52 = vld [vmem:[%s9773_s29 + $0x1d2] sm:$0xff] }
 0x630   : > { %v7660_v22 = vmul.f32 %v11431_v19, %v7530_v17 }
 0x631   : > { %v5523_v62 = vpop.f32.mrf.mxu2 }
 0x632   : > { %v6381_v54 = vpop.f32.mrf.mxu3  ;;  %v7790_v61 = vadd.f32 %v11436_v10, %v7660_v22  ;;  %v5815_v63 = vadd.f32 %v5523_v62, %v4956_v5  ;;  %v6071_v22 = vpack.c.bf16 %v9298_v21, %v9297_v35  ;;  %v11693_v5 = vpack.c.bf16 %v9502_v52, %v9501_v39 }
 0x633   : > { %v4667_v23 = vpop.f32.mrf.mxu1 }
 0x634   : > { %v7918_v33 = vmax.f32 %v7790_v61, 0.0  ;;  %v6673_v34 = vadd.f32 %v6381_v54, %v5815_v63  ;;  %v7242_v44 = vpop.f32.mrf.mxu0  ;;  %v4957_v20 = vadd.f32 %v4667_v23, %v10531_v37 }
 0x636   : > { %9009 = vmatmul.msk.bf16.gmra.mxu1 %vm577_vm0, %v11621_v9  ;;  %8046 = vst.msk [vmem:[%s11451_s10 + $0x90] sm:$0xff] %vm577_vm0, %v7918_v33  ;;  %v7531_v28 = vadd.f32 %v7239_v4, %v6673_v34  ;;  %9213 = vmatmul.msk.bf16.gmra.mxu2 %vm577_vm0, %v5212_v14 }
 0x637   : > { %9417 = vmatmul.msk.bf16.gmra.mxu3 %vm577_vm0, %v6070_v24  ;;  %9621 = vmatmul.msk.bf16.gmra.mxu0 %vm577_vm0, %v11669_v31 }
 0x638   : > { %v7661_v57 = vmul.f32 %v11431_v19, %v7531_v28 }
 0x639   : > { %v5526_v9 = vpop.f32.mrf.mxu2 }
 0x63a   : > { %v6384_v32 = vpop.f32.mrf.mxu3  ;;  %v7791_v2 = vadd.f32 %v11436_v10, %v7661_v57  ;;  %v5816_v40 = vadd.f32 %v5526_v9, %v4957_v20  ;;  %v9095_v57 = vld [vmem:[%s9773_s29 + $0x1e0] sm:$0xff]  ;;  %v9096_v20 = vld [vmem:[%s9773_s29 + $0x1e8] sm:$0xff] }
 0x63b   : > { %v4669_v29 = vpop.f32.mrf.mxu1  ;;  %v9299_v9 = vld [vmem:[%s9773_s29 + $0x1e1] sm:$0xff]  ;;  %v5214_v41 = vpack.c.bf16 %v9096_v20, %v9095_v57 }
 0x63c   : > { %v7919_v46 = vmax.f32 %v7791_v2, 0.0  ;;  %v6674_v11 = vadd.f32 %v6384_v32, %v5816_v40  ;;  %v7244_v38 = vpop.f32.mrf.mxu0  ;;  %v4958_v30 = vadd.f32 %v4669_v29, %v10542_v53  ;;  %v9300_v32 = vld [vmem:[%s9773_s29 + $0x1e9] sm:$0xff] }
 0x63d   : > { %v9503_v40 = vld [vmem:[%s9773_s29 + $0x1e2] sm:$0xff]  ;;  %v9504_v29 = vld [vmem:[%s9773_s29 + $0x1ea] sm:$0xff]  ;;  %v6072_v35 = vpack.c.bf16 %v9300_v32, %v9299_v9 }
 0x63e   : > { %8047 = vst.msk [vmem:[%s11451_s10 + $0x98] sm:$0xff] %vm577_vm0, %v7919_v46  ;;  %v7532_v36 = vadd.f32 %v7242_v44, %v6674_v11  ;;  %v11717_v21 = vpack.c.bf16 %v9504_v29, %v9503_v40 }
 0x640   : > { %v7662_v37 = vmul.f32 %v11431_v19, %v7532_v36 }
 0x641   : > { %v5528_v4 = vpop.f32.mrf.mxu2 }
 0x642   : > { %v6386_v17 = vpop.f32.mrf.mxu3  ;;  %v7792_v12 = vadd.f32 %v11436_v10, %v7662_v37  ;;  %v5817_v49 = vadd.f32 %v5528_v4, %v4958_v30 }
 0x643   : > { %v4672_v0 = vpop.f32.mrf.mxu1 }
 0x644   : > { %v7920_v45 = vmax.f32 %v7792_v12, 0.0  ;;  %v6675_v55 = vadd.f32 %v6386_v17, %v5817_v49  ;;  %v7247_v62 = vpop.f32.mrf.mxu0  ;;  %v4959_v61 = vadd.f32 %v4672_v0, %v10547_v26 }
 0x646   : > { %9010 = vmatmul.msk.bf16.gmra.mxu1 %vm577_vm0, %v11645_v15  ;;  %8048 = vst.msk [vmem:[%s11451_s10 + $0xa0] sm:$0xff] %vm577_vm0, %v7920_v45  ;;  %v7533_v53 = vadd.f32 %v7244_v38, %v6675_v55  ;;  %9214 = vmatmul.msk.bf16.gmra.mxu2 %vm577_vm0, %v5213_v16 }
 0x647   : > { %9418 = vmatmul.msk.bf16.gmra.mxu3 %vm577_vm0, %v6071_v22  ;;  %9622 = vmatmul.msk.bf16.gmra.mxu0 %vm577_vm0, %v11693_v5 }
 0x648   : > { %v7663_v54 = vmul.f32 %v11431_v19, %v7533_v53  ;;  %v9098_v53 = vld [vmem:[%s9773_s29 + $0x1f8] sm:$0xff] }
 0x649   : > { %v5531_v15 = vpop.f32.mrf.mxu2 }
 0x64a   : > { %v6389_v63 = vpop.f32.mrf.mxu3  ;;  %v7793_v23 = vadd.f32 %v11436_v10, %v7663_v54  ;;  %v5818_v14 = vadd.f32 %v5531_v15, %v4959_v61  ;;  %v9301_v54 = vld [vmem:[%s9773_s29 + $0x1f1] sm:$0xff]  ;;  %v9302_v61 = vld [vmem:[%s9773_s29 + $0x1f9] sm:$0xff] }
 0x64b   : > { %v4674_v24 = vpop.f32.mrf.mxu1  ;;  %v6073_v57 = vpack.c.bf16 %v9302_v61, %v9301_v54 }
 0x64c   : > { %v7921_v33 = vmax.f32 %v7793_v23, 0.0  ;;  %v6676_v34 = vadd.f32 %v6389_v63, %v5818_v14  ;;  %v7249_v44 = vpop.f32.mrf.mxu0  ;;  %v4960_v2 = vadd.f32 %v4674_v24, %v10558_v1  ;;  %v9505_v63 = vld [vmem:[%s9773_s29 + $0x1f2] sm:$0xff]  ;;  %v9506_v23 = vld [vmem:[%s9773_s29 + $0x1fa] sm:$0xff] }
 0x64d   : > { %v11741_v20 = vpack.c.bf16 %v9506_v23, %v9505_v63 }
 0x64e   : > { %8049 = vst.msk [vmem:[%s11451_s10 + $0xa8] sm:$0xff] %vm577_vm0, %v7921_v33  ;;  %v7534_v28 = vadd.f32 %v7247_v62, %v6676_v34  ;;  %v9097_v62 = vld [vmem:[%s9773_s29 + $0x1f0] sm:$0xff] }
 0x650   : > { %v7664_v26 = vmul.f32 %v11431_v19, %v7534_v28  ;;  %v5215_v28 = vpack.c.bf16 %v9098_v53, %v9097_v62 }
 0x651   : > { %v5533_v46 = vpop.f32.mrf.mxu2 }
 0x652   : > { %v6391_v11 = vpop.f32.mrf.mxu3  ;;  %v7794_v38 = vadd.f32 %v11436_v10, %v7664_v26  ;;  %v5819_v36 = vadd.f32 %v5533_v46, %v4960_v2 }
 0x653   : > { %v4677_v43 = vpop.f32.mrf.mxu1 }
 0x654   : > { %v7922_v37 = vmax.f32 %v7794_v38, 0.0  ;;  %v6677_v30 = vadd.f32 %v6391_v11, %v5819_v36  ;;  %v7252_v39 = vpop.f32.mrf.mxu0  ;;  %v4961_v4 = vadd.f32 %v4677_v43, %v10563_v47 }
 0x656   : > { %9011 = vmatmul.msk.bf16.gmra.mxu1 %vm577_vm0, %v11669_v31  ;;  %8050 = vst.msk [vmem:[%s11451_s10 + $0xb0] sm:$0xff] %vm577_vm0, %v7922_v37  ;;  %v7535_v1 = vadd.f32 %v7249_v44, %v6677_v30  ;;  %9215 = vmatmul.msk.bf16.gmra.mxu2 %vm577_vm0, %v5214_v41  ;;  %v9099_v37 = vld [vmem:[%s9773_s29 + $0x208] sm:$0xff]  ;;  %v9100_v30 = vld [vmem:[%s9773_s29 + $0x210] sm:$0xff] }
 0x657   : > { %9419 = vmatmul.msk.bf16.gmra.mxu3 %vm577_vm0, %v6072_v35  ;;  %9623 = vmatmul.msk.bf16.gmra.mxu0 %vm577_vm0, %v11717_v21 }
 0x658   : > { %v7665_v52 = vmul.f32 %v11431_v19, %v7535_v1  ;;  %v9304_v1 = vld [vmem:[%s9773_s29 + $0x211] sm:$0xff] }
 0x659   : > { %v5536_v31 = vpop.f32.mrf.mxu2 }
 0x65a   : > { %v6394_v17 = vpop.f32.mrf.mxu3  ;;  %v7795_v12 = vadd.f32 %v11436_v10, %v7665_v52  ;;  %v5820_v49 = vadd.f32 %v5536_v31, %v4961_v4  ;;  %v9507_v4 = vld [vmem:[%s9773_s29 + $0x20a] sm:$0xff]  ;;  %v9508_v31 = vld [vmem:[%s9773_s29 + $0x212] sm:$0xff] }
 0x65b   : > { %v4679_v0 = vpop.f32.mrf.mxu1 }
 0x65c   : > { %v7923_v16 = vmax.f32 %v7795_v12, 0.0  ;;  %v6678_v22 = vadd.f32 %v6394_v17, %v5820_v49  ;;  %v7254_v45 = vpop.f32.mrf.mxu0  ;;  %v4962_v15 = vadd.f32 %v4679_v0, %v10574_v13 }
 0x65e   : > { %8051 = vst.msk [vmem:[%s11451_s10 + $0xb8] sm:$0xff] %vm577_vm0, %v7923_v16  ;;  %v7536_v55 = vadd.f32 %v7252_v39, %v6678_v22  ;;  %v9303_v39 = vld [vmem:[%s9773_s29 + $0x209] sm:$0xff]  ;;  %v5216_v22 = vpack.c.bf16 %v9100_v30, %v9099_v37 }
 0x660   : > { %v7666_v47 = vmul.f32 %v11431_v19, %v7536_v55  ;;  %v11765_v55 = vpack.c.bf16 %v9508_v31, %v9507_v4 }
 0x661   : > { %v5538_v14 = vpop.f32.mrf.mxu2 }
 0x662   : > { %v6396_v24 = vpop.f32.mrf.mxu3  ;;  %v7796_v33 = vadd.f32 %v11436_v10, %v7666_v47  ;;  %v5821_v34 = vadd.f32 %v5538_v14, %v4962_v15  ;;  %v11785_v15 = vld [vmem:[%s12892_s2 + $0x1] ss:$0 sm:$0xff] }
 0x663   : > { %v4682_v44 = vpop.f32.mrf.mxu1 }
 0x664   : > { %v7924_v9 = vmax.f32 %v7796_v33, 0.0  ;;  %v6679_v32 = vadd.f32 %v6396_v24, %v5821_v34  ;;  %v7257_v26 = vpop.f32.mrf.mxu0  ;;  %v4963_v40 = vadd.f32 %v4682_v44, %v10579_v8 }
 0x666   : > { %9012 = vmatmul.msk.bf16.gmra.mxu1 %vm577_vm0, %v11693_v5  ;;  %8052 = vst.msk [vmem:[%s11451_s10 + $0xc0] sm:$0xff] %vm577_vm0, %v7924_v9  ;;  %v7537_v13 = vadd.f32 %v7254_v45, %v6679_v32  ;;  %9216 = vmatmul.msk.bf16.gmra.mxu2 %vm577_vm0, %v5215_v28  ;;  %v6074_v45 = vpack.c.bf16 %v9304_v1, %v9303_v39  ;;  %v9102_v28 = vld [vmem:[%s9773_s29 + $0x220] sm:$0xff] }
 0x667   : > { %9420 = vmatmul.msk.bf16.gmra.mxu3 %vm577_vm0, %v6073_v57  ;;  %9624 = vmatmul.msk.bf16.gmra.mxu0 %vm577_vm0, %v11741_v20  ;;  %v9305_v57 = vld [vmem:[%s9773_s29 + $0x219] sm:$0xff]  ;;  %v9306_v9 = vld [vmem:[%s9773_s29 + $0x221] sm:$0xff] }
 0x668   : > { %v7667_v2 = vmul.f32 %v11431_v19, %v7537_v13  ;;  %v9509_v13 = vld [vmem:[%s9773_s29 + $0x21a] sm:$0xff] }
 0x669   : > { %v5541_v5 = vpop.f32.mrf.mxu2 }
 0x66a   : > { %v6399_v29 = vpop.f32.mrf.mxu3  ;;  %v7797_v46 = vadd.f32 %v11436_v10, %v7667_v2  ;;  %v5822_v11 = vadd.f32 %v5541_v5, %v4963_v40  ;;  %v9510_v2 = vld [vmem:[%s9773_s29 + $0x222] sm:$0xff] }
 0x66b   : > { %v4684_v38 = vpop.f32.mrf.mxu1 }
 0x66c   : > { %v7925_v36 = vmax.f32 %v7797_v46, 0.0  ;;  %v6680_v43 = vadd.f32 %v6399_v29, %v5822_v11  ;;  %v7259_v41 = vpop.f32.mrf.mxu0  ;;  %v4964_v52 = vadd.f32 %v4684_v38, %v10590_v25 }
 0x66e   : > { %8053 = vst.msk [vmem:[%s11451_s10 + $0xc8] sm:$0xff] %vm577_vm0, %v7925_v36  ;;  %v7538_v35 = vadd.f32 %v7257_v26, %v6680_v43  ;;  %v6075_v36 = vpack.c.bf16 %v9306_v9, %v9305_v57  ;;  %v11799_v43 = vpack.c.bf16 %v9510_v2, %v9509_v13 }
 0x670   : > { %v7668_v8 = vmul.f32 %v11431_v19, %v7538_v35  ;;  %v11778_v19 = vld [vmem:[%s12892_s2] ss:$0 sm:$0xff] }
 0x671   : > { %v5543_v17 = vpop.f32.mrf.mxu2 }
 0x672   : > { %v6401_v12 = vpop.f32.mrf.mxu3  ;;  %v7798_v49 = vadd.f32 %v11436_v10, %v7668_v8  ;;  %v5823_v0 = vadd.f32 %v5543_v17, %v4964_v52 }
 0x673   : > { %v4687_v16 = vpop.f32.mrf.mxu1 }
 0x674   : > { %v7926_v62 = vmax.f32 %v7798_v49, 0.0  ;;  %v6681_v53 = vadd.f32 %v6401_v12, %v5823_v0  ;;  %v7262_v54 = vpop.f32.mrf.mxu0  ;;  %v9103_v0 = vld [vmem:[%s9773_s29 + $0x230] sm:$0xff] }
 0x676   : > { %9013 = vmatmul.msk.bf16.gmra.mxu1 %vm577_vm0, %v11717_v21  ;;  %8054 = vst.msk [vmem:[%s11451_s10 + $0xd0] sm:$0xff] %vm577_vm0, %v7926_v62  ;;  %v7539_v25 = vadd.f32 %v7259_v41, %v6681_v53  ;;  %9217 = vmatmul.msk.bf16.gmra.mxu2 %vm577_vm0, %v5216_v22  ;;  %v4965_v21 = vadd.f32 %v4687_v16, %v10595_v27  ;;  %v9101_v27 = vld [vmem:[%s9773_s29 + $0x218] sm:$0xff] }
 0x677   : > { %9421 = vmatmul.msk.bf16.gmra.mxu3 %vm577_vm0, %v6074_v45  ;;  %9625 = vmatmul.msk.bf16.gmra.mxu0 %vm577_vm0, %v11765_v55  ;;  %v5217_v38 = vpack.c.bf16 %v9102_v28, %v9101_v27  ;;  %v9104_v16 = vld [vmem:[%s9773_s29 + $0x238] sm:$0xff] }
 0x678   : > { %v7669_v10 = vmul.f32 %v11778_v19, %v7539_v25  ;;  %v9307_v22 = vld [vmem:[%s9773_s29 + $0x231] sm:$0xff]  ;;  %v9308_v45 = vld [vmem:[%s9773_s29 + $0x239] sm:$0xff] }
 0x679   : > { %v5546_v61 = vpop.f32.mrf.mxu2  ;;  %v9511_v53 = vld [vmem:[%s9773_s29 + $0x232] sm:$0xff] }
 0x67a   : > { %v6404_v47 = vpop.f32.mrf.mxu3  ;;  %v7799_v63 = vadd.f32 %v11785_v15, %v7669_v10  ;;  %v5824_v23 = vadd.f32 %v5546_v61, %v4965_v21 }
 0x67b   : > { %v4689_v14 = vpop.f32.mrf.mxu1 }
 0x67c   : > { %v7927_v24 = vmax.f32 %v7799_v63, 0.0  ;;  %v6682_v33 = vadd.f32 %v6404_v47, %v5824_v23  ;;  %v7264_v34 = vpop.f32.mrf.mxu0  ;;  %v4966_v26 = vadd.f32 %v4689_v14, %v10606_v42  ;;  %v5218_v63 = vpack.c.bf16 %v9104_v16, %v9103_v0 }
 0x67d   : > { %v6076_v23 = vpack.c.bf16 %v9308_v45, %v9307_v22 }
 0x67e   : > { %8055 = vst.msk [vmem:[%s11451_s10 + $0xd8] sm:$0xff] %vm577_vm0, %v7927_v24  ;;  %v7540_v44 = vadd.f32 %v7262_v54, %v6682_v33  ;;  %v9512_v54 = vld [vmem:[%s9773_s29 + $0x23a] sm:$0xff] }
 0x67f   : > { %v11823_v14 = vpack.c.bf16 %v9512_v54, %v9511_v53  ;;  %v9107_v54 = vld [vmem:[%s9773_s29 + $0x258] sm:$0xff] }
 0x680   : > { %v7670_v32 = vmul.f32 %v11778_v19, %v7540_v44 }
 0x681   : > { %v5548_v40 = vpop.f32.mrf.mxu2 }
 0x682   : > { %v6406_v5 = vpop.f32.mrf.mxu3  ;;  %v7800_v29 = vadd.f32 %v11785_v15, %v7670_v32  ;;  %v5825_v46 = vadd.f32 %v5548_v40, %v4966_v26 }
 0x683   : > { %v4692_v11 = vpop.f32.mrf.mxu1 }
 0x684   : > { %v7928_v41 = vmax.f32 %v7800_v29, 0.0  ;;  %v6683_v35 = vadd.f32 %v6406_v5, %v5825_v46  ;;  %v7267_v37 = vpop.f32.mrf.mxu0  ;;  %v4967_v39 = vadd.f32 %v4692_v11, %v10611_v51  ;;  %v9105_v5 = vld [vmem:[%s9773_s29 + $0x240] sm:$0xff]  ;;  %v9106_v29 = vld [vmem:[%s9773_s29 + $0x248] sm:$0xff] }
 0x685   : > { %v9309_v46 = vld [vmem:[%s9773_s29 + $0x241] sm:$0xff]  ;;  %v9310_v11 = vld [vmem:[%s9773_s29 + $0x249] sm:$0xff] }
 0x686   : > { %9014 = vmatmul.msk.bf16.gmra.mxu1 %vm577_vm0, %v11741_v20  ;;  %8056 = vst.msk [vmem:[%s11451_s10 + $0xe0] sm:$0xff] %vm577_vm0, %v7928_v41  ;;  %v7541_v42 = vadd.f32 %v7264_v34, %v6683_v35  ;;  %9218 = vmatmul.msk.bf16.gmra.mxu2 %vm577_vm0, %v5217_v38  ;;  %v9514_v41 = vld [vmem:[%s9773_s29 + $0x24a] sm:$0xff] }
 0x687   : > { %9422 = vmatmul.msk.bf16.gmra.mxu3 %vm577_vm0, %v6075_v36  ;;  %9626 = vmatmul.msk.bf16.gmra.mxu0 %vm577_vm0, %v11799_v43  ;;  %v9513_v36 = vld [vmem:[%s9773_s29 + $0x242] sm:$0xff] }
 0x688   : > { %v7671_v30 = vmul.f32 %v11778_v19, %v7541_v42 }
 0x689   : > { %v5551_v20 = vpop.f32.mrf.mxu2 }
 0x68a   : > { %v6409_v1 = vpop.f32.mrf.mxu3  ;;  %v7801_v8 = vadd.f32 %v11785_v15, %v7671_v30  ;;  %v5826_v52 = vadd.f32 %v5551_v20, %v4967_v39  ;;  %v5219_v20 = vpack.c.bf16 %v9106_v29, %v9105_v5 }
 0x68b   : > { %v4694_v4 = vpop.f32.mrf.mxu1 }
 0x68c   : > { %v7929_v31 = vmax.f32 %v7801_v8, 0.0  ;;  %v6684_v17 = vadd.f32 %v6409_v1, %v5826_v52  ;;  %v7269_v12 = vpop.f32.mrf.mxu0  ;;  %v4968_v62 = vadd.f32 %v4694_v4, %v10622_v56  ;;  %v6077_v1 = vpack.c.bf16 %v9310_v11, %v9309_v46 }
 0x68d   : > { %v11847_v8 = vpack.c.bf16 %v9514_v41, %v9513_v36  ;;  %v9110_v36 = vld [vmem:[%s9773_s29 + $0x270] sm:$0xff] }
 0x68e   : > { %8057 = vst.msk [vmem:[%s11451_s10 + $0xe8] sm:$0xff] %vm577_vm0, %v7929_v31  ;;  %v7542_v49 = vadd.f32 %v7267_v37, %v6684_v17  ;;  %v9313_v41 = vld [vmem:[%s9773_s29 + $0x269] sm:$0xff] }
 0x690   : > { %v7672_v51 = vmul.f32 %v11778_v19, %v7542_v49 }
 0x691   : > { %v5553_v25 = vpop.f32.mrf.mxu2 }
 0x692   : > { %v6411_v10 = vpop.f32.mrf.mxu3  ;;  %v7802_v21 = vadd.f32 %v11785_v15, %v7672_v51  ;;  %v5827_v61 = vadd.f32 %v5553_v25, %v4968_v62  ;;  %v9108_v25 = vld [vmem:[%s9773_s29 + $0x260] sm:$0xff] }
 0x693   : > { %v4697_v47 = vpop.f32.mrf.mxu1 }
 0x694   : > { %v7930_v24 = vmax.f32 %v7802_v21, 0.0  ;;  %v6685_v33 = vadd.f32 %v6411_v10, %v5827_v61  ;;  %v7272_v34 = vpop.f32.mrf.mxu0  ;;  %v4969_v27 = vadd.f32 %v4697_v47, %v10627_v7  ;;  %v9311_v10 = vld [vmem:[%s9773_s29 + $0x259] sm:$0xff]  ;;  %v9312_v21 = vld [vmem:[%s9773_s29 + $0x261] sm:$0xff] }
 0x695   : > { %v9515_v47 = vld [vmem:[%s9773_s29 + $0x25a] sm:$0xff] }
 0x696   : > { %9015 = vmatmul.msk.bf16.gmra.mxu1 %vm577_vm0, %v11765_v55  ;;  %8058 = vst.msk [vmem:[%s11451_s10 + $0xf0] sm:$0xff] %vm577_vm0, %v7930_v24  ;;  %v7543_v56 = vadd.f32 %v7269_v12, %v6685_v33  ;;  %9219 = vmatmul.msk.bf16.gmra.mxu2 %vm577_vm0, %v5218_v63  ;;  %v9516_v63 = vld [vmem:[%s9773_s29 + $0x262] sm:$0xff] }
 0x697   : > { %9423 = vmatmul.msk.bf16.gmra.mxu3 %vm577_vm0, %v6076_v23  ;;  %9627 = vmatmul.msk.bf16.gmra.mxu0 %vm577_vm0, %v11823_v14 }
 0x698   : > { %v7673_v44 = vmul.f32 %v11778_v19, %v7543_v56 }
 0x699   : > { %v5556_v55 = vpop.f32.mrf.mxu2 }
 0x69a   : > { %v6414_v28 = vpop.f32.mrf.mxu3  ;;  %v7803_v57 = vadd.f32 %v11785_v15, %v7673_v44  ;;  %v5828_v9 = vadd.f32 %v5556_v55, %v4969_v27  ;;  %v5220_v44 = vpack.c.bf16 %v9108_v25, %v9107_v54  ;;  %v6078_v27 = vpack.c.bf16 %v9312_v21, %v9311_v10  ;;  %v9111_v21 = vld [vmem:[%s9773_s29 + $0x280] sm:$0xff] }
 0x69b   : > { %v4699_v32 = vpop.f32.mrf.mxu1  ;;  %v11871_v55 = vpack.c.bf16 %v9516_v63, %v9515_v47  ;;  %v9316_v47 = vld [vmem:[%s9773_s29 + $0x289] sm:$0xff] }
 0x69c   : > { %v7931_v26 = vmax.f32 %v7803_v57, 0.0  ;;  %v6686_v13 = vadd.f32 %v6414_v28, %v5828_v9  ;;  %v7274_v2 = vpop.f32.mrf.mxu0  ;;  %v4970_v38 = vadd.f32 %v4699_v32, %v10638_v60  ;;  %v13163_v63 = vld [vmem:[#allocation12_spill] sm:$0xff] }
 0x69e   : > { %8059 = vst.msk [vmem:[%s11451_s10 + $0xf8] sm:$0xff] %vm577_vm0, %v7931_v26  ;;  %v7544_v40 = vadd.f32 %v7272_v34, %v6686_v13 }
 0x6a0   : > { %v7674_v7 = vmul.f32 %v11778_v19, %v7544_v40 }
 0x6a1   : > { %v5558_v35 = vpop.f32.mrf.mxu2 }
 0x6a2   : > { %v6416_v37 = vpop.f32.mrf.mxu3  ;;  %v7804_v42 = vadd.f32 %v11785_v15, %v7674_v7  ;;  %v5829_v30 = vadd.f32 %v5558_v35, %v4970_v38  ;;  %v9109_v38 = vld [vmem:[%s9773_s29 + $0x268] sm:$0xff]  ;;  %v9314_v35 = vld [vmem:[%s9773_s29 + $0x271] sm:$0xff] }
 0x6a3   : > { %v4702_v39 = vpop.f32.mrf.mxu1 }
 0x6a4   : > { %v7932_v52 = vmax.f32 %v7804_v42, 0.0  ;;  %v6687_v4 = vadd.f32 %v6416_v37, %v5829_v30  ;;  %v7277_v31 = vpop.f32.mrf.mxu0  ;;  %v4971_v12 = vadd.f32 %v4702_v39, %v10643_v58  ;;  %v9517_v42 = vld [vmem:[%s9773_s29 + $0x26a] sm:$0xff]  ;;  %v9518_v30 = vld [vmem:[%s9773_s29 + $0x272] sm:$0xff] }
 0x6a6   : > { %9016 = vmatmul.msk.bf16.gmra.mxu1 %vm577_vm0, %v11799_v43  ;;  %8060 = vst.msk [vmem:[%s11451_s10 + $0x100] sm:$0xff] %vm577_vm0, %v7932_v52  ;;  %v7545_v60 = vadd.f32 %v7274_v2, %v6687_v4  ;;  %9220 = vmatmul.msk.bf16.gmra.mxu2 %vm577_vm0, %v5219_v20 }
 0x6a7   : > { %9424 = vmatmul.msk.bf16.gmra.mxu3 %vm577_vm0, %v6077_v1  ;;  %9628 = vmatmul.msk.bf16.gmra.mxu0 %vm577_vm0, %v11847_v8 }
 0x6a8   : > { %v7675_v17 = vmul.f32 %v11778_v19, %v7545_v60  ;;  %v6079_v60 = vpack.c.bf16 %v9314_v35, %v9313_v41 }
 0x6a9   : > { %v5561_v43 = vpop.f32.mrf.mxu2 }
 0x6aa   : > { %v6419_v49 = vpop.f32.mrf.mxu3  ;;  %v7805_v0 = vadd.f32 %v11785_v15, %v7675_v17  ;;  %v5830_v16 = vadd.f32 %v5561_v43, %v4971_v12  ;;  %v11895_v17 = vpack.c.bf16 %v9518_v30, %v9517_v42  ;;  %v9317_v42 = vld [vmem:[%s9773_s29 + $0x291] sm:$0xff]  ;;  %v9318_v30 = vld [vmem:[%s9773_s29 + $0x299] sm:$0xff] }
 0x6ab   : > { %v4704_v22 = vpop.f32.mrf.mxu1 }
 0x6ac   : > { %v7933_v45 = vmax.f32 %v7805_v0, 0.0  ;;  %v6688_v51 = vadd.f32 %v6419_v49, %v5830_v16  ;;  %v7279_v62 = vpop.f32.mrf.mxu0  ;;  %v4972_v61 = vadd.f32 %v4704_v22, %v10654_v18 }
 0x6ae   : > { %8061 = vst.msk [vmem:[%s11451_s10 + $0x108] sm:$0xff] %vm577_vm0, %v7933_v45  ;;  %v7546_v53 = vadd.f32 %v7277_v31, %v6688_v51  ;;  %v5221_v31 = vpack.c.bf16 %v9110_v36, %v9109_v38 }
 0x6b0   : > { %v7676_v58 = vmul.f32 %v11778_v19, %v7546_v53 }
 0x6b1   : > { %v5563_v23 = vpop.f32.mrf.mxu2 }
 0x6b2   : > { %v6421_v24 = vpop.f32.mrf.mxu3  ;;  %v7806_v33 = vadd.f32 %v11785_v15, %v7676_v58  ;;  %v5831_v34 = vadd.f32 %v5563_v23, %v4972_v61  ;;  %v9112_v58 = vld [vmem:[%s9773_s29 + $0x288] sm:$0xff] }
 0x6b3   : > { %v4707_v56 = vpop.f32.mrf.mxu1  ;;  %v9315_v61 = vld [vmem:[%s9773_s29 + $0x281] sm:$0xff] }
 0x6b4   : > { %v7934_v28 = vmax.f32 %v7806_v33, 0.0  ;;  %v6689_v57 = vadd.f32 %v6421_v24, %v5831_v34  ;;  %v7282_v9 = vpop.f32.mrf.mxu0  ;;  %v4973_v26 = vadd.f32 %v4707_v56, %v10659_v59  ;;  %v9519_v24 = vld [vmem:[%s9773_s29 + $0x282] sm:$0xff]  ;;  %v9520_v33 = vld [vmem:[%s9773_s29 + $0x28a] sm:$0xff] }
 0x6b6   : > { %9017 = vmatmul.msk.bf16.gmra.mxu1 %vm577_vm0, %v11823_v14  ;;  %8062 = vst.msk [vmem:[%s11451_s10 + $0x110] sm:$0xff] %vm577_vm0, %v7934_v28  ;;  %v7547_v18 = vadd.f32 %v7279_v62, %v6689_v57  ;;  %9221 = vmatmul.msk.bf16.gmra.mxu2 %vm577_vm0, %v5220_v44  ;;  %v5222_v57 = vpack.c.bf16 %v9112_v58, %v9111_v21 }
 0x6b7   : > { %9425 = vmatmul.msk.bf16.gmra.mxu3 %vm577_vm0, %v6078_v27  ;;  %9629 = vmatmul.msk.bf16.gmra.mxu0 %vm577_vm0, %v11871_v55 }
 0x6b8   : > { %v7677_v32 = vmul.f32 %v11778_v19, %v7547_v18  ;;  %v11919_v18 = vpack.c.bf16 %v9520_v33, %v9519_v24  ;;  %v9116_v24 = vld [vmem:[%s9773_s29 + $0x2b0] sm:$0xff] }
 0x6b9   : > { %v5566_v14 = vpop.f32.mrf.mxu2  ;;  %v9319_v33 = vld [vmem:[%s9773_s29 + $0x2a9] sm:$0xff] }
 0x6ba   : > { %v6424_v13 = vpop.f32.mrf.mxu3  ;;  %v7807_v2 = vadd.f32 %v11785_v15, %v7677_v32  ;;  %v5832_v40 = vadd.f32 %v5566_v14, %v4973_v26 }
 0x6bb   : > { %v4709_v5 = vpop.f32.mrf.mxu1 }
 0x6bc   : > { %v7935_v29 = vmax.f32 %v7807_v2, 0.0  ;;  %v6690_v46 = vadd.f32 %v6424_v13, %v5832_v40  ;;  %v7284_v11 = vpop.f32.mrf.mxu0  ;;  %v4974_v37 = vadd.f32 %v4709_v5, %v10670_v50  ;;  %v13164_v40 = vld [vmem:[#allocation15_spill] sm:$0xff] }
 0x6be   : > { %8063 = vst.msk [vmem:[%s11451_s10 + $0x118] sm:$0xff] %vm577_vm0, %v7935_v29  ;;  %v7548_v7 = vadd.f32 %v7282_v9, %v6690_v46  ;;  %v6080_v9 = vpack.c.bf16 %v9316_v47, %v9315_v61 }
 0x6c0   : > { %v7678_v59 = vmul.f32 %v11778_v19, %v7548_v7 }
 0x6c1   : > { %v5568_v39 = vpop.f32.mrf.mxu2 }
 0x6c2   : > { %v6426_v20 = vpop.f32.mrf.mxu3  ;;  %v7808_v1 = vadd.f32 %v11785_v15, %v7678_v59  ;;  %v5833_v52 = vadd.f32 %v5568_v39, %v4974_v37  ;;  %v9113_v59 = vld [vmem:[%s9773_s29 + $0x290] sm:$0xff]  ;;  %v9114_v37 = vld [vmem:[%s9773_s29 + $0x298] sm:$0xff] }
 0x6c3   : > { %v4712_v4 = vpop.f32.mrf.mxu1 }
 0x6c4   : > { %v7936_v12 = vmax.f32 %v7808_v1, 0.0  ;;  %v6691_v43 = vadd.f32 %v6426_v20, %v5833_v52  ;;  %v7287_v49 = vpop.f32.mrf.mxu0  ;;  %v4975_v16 = vadd.f32 %v4712_v4, %v10675_v3  ;;  %v13165_v20 = vld [vmem:[#allocation18_spill] sm:$0xff]  ;;  %v9521_v52 = vld [vmem:[%s9773_s29 + $0x292] sm:$0xff] }
 0x6c5   : > { %v9522_v4 = vld [vmem:[%s9773_s29 + $0x29a] sm:$0xff] }
 0x6c6   : > { %9018 = vmatmul.msk.bf16.gmra.mxu1 %vm577_vm0, %v11847_v8  ;;  %8064 = vst.msk [vmem:[%s11451_s10 + $0x120] sm:$0xff] %vm577_vm0, %v7936_v12  ;;  %v7549_v50 = vadd.f32 %v7284_v11, %v6691_v43  ;;  %9222 = vmatmul.msk.bf16.gmra.mxu2 %vm577_vm0, %v5221_v31 }
 0x6c7   : > { %9426 = vmatmul.msk.bf16.gmra.mxu3 %vm577_vm0, %v6079_v60  ;;  %9630 = vmatmul.msk.bf16.gmra.mxu0 %vm577_vm0, %v11895_v17 }
 0x6c8   : > { %v7679_v0 = vmul.f32 %v11778_v19, %v7549_v50  ;;  %v5223_v50 = vpack.c.bf16 %v9114_v37, %v9113_v59 }
 0x6c9   : > { %v5571_v8 = vpop.f32.mrf.mxu2 }
 0x6ca   : > { %v6429_v22 = vpop.f32.mrf.mxu3  ;;  %v7809_v45 = vadd.f32 %v11785_v15, %v7679_v0  ;;  %v5834_v51 = vadd.f32 %v5571_v8, %v4975_v16  ;;  %v6081_v0 = vpack.c.bf16 %v9318_v30, %v9317_v42  ;;  %v11943_v16 = vpack.c.bf16 %v9522_v4, %v9521_v52  ;;  %v9118_v52 = vld [vmem:[%s9773_s29 + $0x2c0] sm:$0xff] }
 0x6cb   : > { %v4714_v62 = vpop.f32.mrf.mxu1  ;;  %v9321_v4 = vld [vmem:[%s9773_s29 + $0x2b9] sm:$0xff] }
 0x6cc   : > { %v7937_v53 = vmax.f32 %v7809_v45, 0.0  ;;  %v6692_v54 = vadd.f32 %v6429_v22, %v5834_v51  ;;  %v7289_v25 = vpop.f32.mrf.mxu0  ;;  %v4976_v23 = vadd.f32 %v4714_v62, %v13163_v63 }
 0x6ce   : > { %8065 = vst.msk [vmem:[%s11451_s10 + $0x128] sm:$0xff] %vm577_vm0, %v7937_v53  ;;  %v7550_v10 = vadd.f32 %v7287_v49, %v6692_v54  ;;  %v13166_v53 = vld [vmem:[#allocation21_spill] sm:$0xff] }
 0x6d0   : > { %v7680_v3 = vmul.f32 %v11778_v19, %v7550_v10 }
 0x6d1   : > { %v5573_v34 = vpop.f32.mrf.mxu2 }
 0x6d2   : > { %v6431_v56 = vpop.f32.mrf.mxu3  ;;  %v7810_v44 = vadd.f32 %v11785_v15, %v7680_v3  ;;  %v5835_v27 = vadd.f32 %v5573_v34, %v4976_v23  ;;  %v9115_v23 = vld [vmem:[%s9773_s29 + $0x2a8] sm:$0xff]  ;;  %v9320_v34 = vld [vmem:[%s9773_s29 + $0x2b1] sm:$0xff] }
 0x6d3   : > { %v4717_v28 = vpop.f32.mrf.mxu1 }
 0x6d4   : > { %v7938_v32 = vmax.f32 %v7810_v44, 0.0  ;;  %v6693_v26 = vadd.f32 %v6431_v56, %v5835_v27  ;;  %v7292_v14 = vpop.f32.mrf.mxu0  ;;  %v4977_v5 = vadd.f32 %v4717_v28, %v13164_v40  ;;  %v13167_v44 = vld [vmem:[#allocation24_spill] sm:$0xff]  ;;  %v6082_v40 = vpack.c.bf16 %v9320_v34, %v9319_v33 }
 0x6d5   : > { %v9523_v28 = vld [vmem:[%s9773_s29 + $0x2aa] sm:$0xff] }
 0x6d6   : > { %9019 = vmatmul.msk.bf16.gmra.mxu1 %vm577_vm0, %v11871_v55  ;;  %8066 = vst.msk [vmem:[%s11451_s10 + $0x130] sm:$0xff] %vm577_vm0, %v7938_v32  ;;  %v7551_v13 = vadd.f32 %v7289_v25, %v6693_v26  ;;  %9223 = vmatmul.msk.bf16.gmra.mxu2 %vm577_vm0, %v5222_v57  ;;  %v9524_v57 = vld [vmem:[%s9773_s29 + $0x2b2] sm:$0xff] }
 0x6d7   : > { %9427 = vmatmul.msk.bf16.gmra.mxu3 %vm577_vm0, %v6080_v9  ;;  %9631 = vmatmul.msk.bf16.gmra.mxu0 %vm577_vm0, %v11919_v18 }
 0x6d8   : > { %v7681_v2 = vmul.f32 %v11778_v19, %v7551_v13 }
 0x6d9   : > { %v5576_v55 = vpop.f32.mrf.mxu2 }
 0x6da   : > { %v6434_v29 = vpop.f32.mrf.mxu3  ;;  %v7811_v46 = vadd.f32 %v11785_v15, %v7681_v2  ;;  %v5836_v11 = vadd.f32 %v5576_v55, %v4977_v5  ;;  %v5224_v2 = vpack.c.bf16 %v9116_v24, %v9115_v23  ;;  %v11967_v5 = vpack.c.bf16 %v9524_v57, %v9523_v28  ;;  %v9120_v28 = vld [vmem:[%s9773_s29 + $0x2d8] sm:$0xff] }
 0x6db   : > { %v4719_v7 = vpop.f32.mrf.mxu1  ;;  %v9323_v57 = vld [vmem:[%s9773_s29 + $0x2d1] sm:$0xff] }
 0x6dc   : > { %v7939_v38 = vmax.f32 %v7811_v46, 0.0  ;;  %v6694_v36 = vadd.f32 %v6434_v29, %v5836_v11  ;;  %v7294_v41 = vpop.f32.mrf.mxu0  ;;  %v4978_v1 = vadd.f32 %v4719_v7, %v13165_v20 }
 0x6de   : > { %8067 = vst.msk [vmem:[%s11451_s10 + $0x138] sm:$0xff] %vm577_vm0, %v7939_v38  ;;  %v7552_v35 = vadd.f32 %v7292_v14, %v6694_v36  ;;  %v13168_v38 = vld [vmem:[#allocation27_spill] sm:$0xff] }
 0x6e0   : > { %v7682_v39 = vmul.f32 %v11778_v19, %v7552_v35 }
 0x6e1   : > { %v5578_v31 = vpop.f32.mrf.mxu2 }
 0x6e2   : > { %v6436_v60 = vpop.f32.mrf.mxu3  ;;  %v7812_v12 = vadd.f32 %v11785_v15, %v7682_v39  ;;  %v5837_v43 = vadd.f32 %v5578_v31, %v4978_v1  ;;  %v9117_v1 = vld [vmem:[%s9773_s29 + $0x2b8] sm:$0xff]  ;;  %v9322_v31 = vld [vmem:[%s9773_s29 + $0x2c1] sm:$0xff] }
 0x6e3   : > { %v4722_v49 = vpop.f32.mrf.mxu1 }
 0x6e4   : > { %v7940_v8 = vmax.f32 %v7812_v12, 0.0  ;;  %v6695_v22 = vadd.f32 %v6436_v60, %v5837_v43  ;;  %v7297_v45 = vpop.f32.mrf.mxu0  ;;  %v4979_v54 = vadd.f32 %v4722_v49, %v13166_v53  ;;  %v13169_v12 = vld [vmem:[#allocation30_spill] sm:$0xff]  ;;  %v6083_v53 = vpack.c.bf16 %v9322_v31, %v9321_v4 }
 0x6e5   : > { %v9525_v49 = vld [vmem:[%s9773_s29 + $0x2ba] sm:$0xff] }
 0x6e6   : > { %9020 = vmatmul.msk.bf16.gmra.mxu1 %vm577_vm0, %v11895_v17  ;;  %8068 = vst.msk [vmem:[%s11451_s10 + $0x140] sm:$0xff] %vm577_vm0, %v7940_v8  ;;  %v7553_v51 = vadd.f32 %v7294_v41, %v6695_v22  ;;  %9224 = vmatmul.msk.bf16.gmra.mxu2 %vm577_vm0, %v5223_v50  ;;  %v9526_v50 = vld [vmem:[%s9773_s29 + $0x2c2] sm:$0xff] }
 0x6e7   : > { %9428 = vmatmul.msk.bf16.gmra.mxu3 %vm577_vm0, %v6081_v0  ;;  %9632 = vmatmul.msk.bf16.gmra.mxu0 %vm577_vm0, %v11943_v16 }
 0x6e8   : > { %v7683_v62 = vmul.f32 %v11778_v19, %v7553_v51 }
 0x6e9   : > { %v5581_v17 = vpop.f32.mrf.mxu2 }
 0x6ea   : > { %v6439_v25 = vpop.f32.mrf.mxu3  ;;  %v7813_v10 = vadd.f32 %v11785_v15, %v7683_v62  ;;  %v5838_v21 = vadd.f32 %v5581_v17, %v4979_v54  ;;  %v5225_v62 = vpack.c.bf16 %v9118_v52, %v9117_v1  ;;  %v11991_v54 = vpack.c.bf16 %v9526_v50, %v9525_v49  ;;  %v9122_v49 = vld [vmem:[%s9773_s29 + $0x2e8] sm:$0xff] }
 0x6eb   : > { %v4724_v58 = vpop.f32.mrf.mxu1  ;;  %v9325_v50 = vld [vmem:[%s9773_s29 + $0x2e1] sm:$0xff] }
 0x6ec   : > { %v7941_v61 = vmax.f32 %v7813_v10, 0.0  ;;  %v6696_v47 = vadd.f32 %v6439_v25, %v5838_v21  ;;  %v7299_v3 = vpop.f32.mrf.mxu0  ;;  %v4980_v27 = vadd.f32 %v4724_v58, %v13167_v44 }
 0x6ee   : > { %8069 = vst.msk [vmem:[%s11451_s10 + $0x148] sm:$0xff] %vm577_vm0, %v7941_v61  ;;  %v7554_v63 = vadd.f32 %v7297_v45, %v6696_v47  ;;  %v13170_v61 = vld [vmem:[#allocation33_spill] sm:$0xff] }
 0x6f0   : > { %v7684_v56 = vmul.f32 %v11778_v19, %v7554_v63 }
 0x6f1   : > { %v5583_v9 = vpop.f32.mrf.mxu2 }
 0x6f2   : > { %v6441_v32 = vpop.f32.mrf.mxu3  ;;  %v7814_v26 = vadd.f32 %v11785_v15, %v7684_v56  ;;  %v5839_v14 = vadd.f32 %v5583_v9, %v4980_v27  ;;  %v9119_v27 = vld [vmem:[%s9773_s29 + $0x2d0] sm:$0xff]  ;;  %v9324_v9 = vld [vmem:[%s9773_s29 + $0x2d9] sm:$0xff] }
 0x6f3   : > { %v4727_v13 = vpop.f32.mrf.mxu1 }
 0x6f4   : > { %v7942_v55 = vmax.f32 %v7814_v26, 0.0  ;;  %v6697_v29 = vadd.f32 %v6441_v32, %v5839_v14  ;;  %v7302_v46 = vpop.f32.mrf.mxu0  ;;  %v4981_v36 = vadd.f32 %v4727_v13, %v13168_v38  ;;  %v13171_v26 = vld [vmem:[#allocation36_spill] sm:$0xff]  ;;  %v6084_v38 = vpack.c.bf16 %v9324_v9, %v9323_v57 }
 0x6f5   : > { %v9527_v13 = vld [vmem:[%s9773_s29 + $0x2d2] sm:$0xff] }
 0x6f6   : > { %9021 = vmatmul.msk.bf16.gmra.mxu1 %vm577_vm0, %v11919_v18  ;;  %8070 = vst.msk [vmem:[%s11451_s10 + $0x150] sm:$0xff] %vm577_vm0, %v7942_v55  ;;  %v7555_v11 = vadd.f32 %v7299_v3, %v6697_v29  ;;  %9225 = vmatmul.msk.bf16.gmra.mxu2 %vm577_vm0, %v5224_v2  ;;  %v9528_v2 = vld [vmem:[%s9773_s29 + $0x2da] sm:$0xff] }
 0x6f7   : > { %9429 = vmatmul.msk.bf16.gmra.mxu3 %vm577_vm0, %v6082_v40  ;;  %9633 = vmatmul.msk.bf16.gmra.mxu0 %vm577_vm0, %v11967_v5 }
 0x6f8   : > { %v7685_v7 = vmul.f32 %v11778_v19, %v7555_v11 }
 0x6f9   : > { %v5586_v18 = vpop.f32.mrf.mxu2 }
 0x6fa   : > { %v6444_v41 = vpop.f32.mrf.mxu3  ;;  %v7815_v35 = vadd.f32 %v11785_v15, %v7685_v7  ;;  %v5840_v59 = vadd.f32 %v5586_v18, %v4981_v36  ;;  %v5226_v7 = vpack.c.bf16 %v9120_v28, %v9119_v27  ;;  %v12015_v36 = vpack.c.bf16 %v9528_v2, %v9527_v13  ;;  %v9124_v13 = vld [vmem:[%s9773_s29 + $0x300] sm:$0xff] }
 0x6fb   : > { %v4729_v37 = vpop.f32.mrf.mxu1  ;;  %v9327_v2 = vld [vmem:[%s9773_s29 + $0x2f9] sm:$0xff] }
 0x6fc   : > { %v7943_v42 = vmax.f32 %v7815_v35, 0.0  ;;  %v6698_v30 = vadd.f32 %v6444_v41, %v5840_v59  ;;  %v7304_v39 = vpop.f32.mrf.mxu0  ;;  %v4982_v43 = vadd.f32 %v4729_v37, %v13169_v12 }
 0x6fe   : > { %8071 = vst.msk [vmem:[%s11451_s10 + $0x158] sm:$0xff] %vm577_vm0, %v7943_v42  ;;  %v7556_v20 = vadd.f32 %v7302_v46, %v6698_v30  ;;  %v13172_v42 = vld [vmem:[#allocation39_spill] sm:$0xff] }
 0x700   : > { %v7686_v60 = vmul.f32 %v11778_v19, %v7556_v20 }
 0x701   : > { %v5588_v0 = vpop.f32.mrf.mxu2 }
 0x702   : > { %v6446_v8 = vpop.f32.mrf.mxu3  ;;  %v7816_v22 = vadd.f32 %v11785_v15, %v7686_v60  ;;  %v5841_v45 = vadd.f32 %v5588_v0, %v4982_v43  ;;  %v9121_v43 = vld [vmem:[%s9773_s29 + $0x2e0] sm:$0xff]  ;;  %v9326_v0 = vld [vmem:[%s9773_s29 + $0x2e9] sm:$0xff] }
 0x703   : > { %v4732_v51 = vpop.f32.mrf.mxu1 }
 0x704   : > { %v7944_v17 = vmax.f32 %v7816_v22, 0.0  ;;  %v6699_v25 = vadd.f32 %v6446_v8, %v5841_v45  ;;  %v7307_v10 = vpop.f32.mrf.mxu0  ;;  %v4983_v47 = vadd.f32 %v4732_v51, %v13170_v61  ;;  %v13173_v22 = vld [vmem:[#allocation42_spill] sm:$0xff]  ;;  %v6085_v61 = vpack.c.bf16 %v9326_v0, %v9325_v50 }
 0x705   : > { %v9529_v51 = vld [vmem:[%s9773_s29 + $0x2e2] sm:$0xff] }
 0x706   : > { %9022 = vmatmul.msk.bf16.gmra.mxu1 %vm577_vm0, %v11943_v16  ;;  %8072 = vst.msk [vmem:[%s11451_s10 + $0x160] sm:$0xff] %vm577_vm0, %v7944_v17  ;;  %v7557_v21 = vadd.f32 %v7304_v39, %v6699_v25  ;;  %9226 = vmatmul.msk.bf16.gmra.mxu2 %vm577_vm0, %v5225_v62  ;;  %v9530_v62 = vld [vmem:[%s9773_s29 + $0x2ea] sm:$0xff] }
 0x707   : > { %9430 = vmatmul.msk.bf16.gmra.mxu3 %vm577_vm0, %v6083_v53  ;;  %9634 = vmatmul.msk.bf16.gmra.mxu0 %vm577_vm0, %v11991_v54 }
 0x708   : > { %v7687_v58 = vmul.f32 %v11778_v19, %v7557_v21 }
 0x709   : > { %v5591_v16 = vpop.f32.mrf.mxu2 }
 0x70a   : > { %v6449_v3 = vpop.f32.mrf.mxu3  ;;  %v7817_v63 = vadd.f32 %v11785_v15, %v7687_v58  ;;  %v5842_v23 = vadd.f32 %v5591_v16, %v4983_v47  ;;  %v5227_v58 = vpack.c.bf16 %v9122_v49, %v9121_v43  ;;  %v12039_v47 = vpack.c.bf16 %v9530_v62, %v9529_v51  ;;  %v9126_v51 = vld [vmem:[%s9773_s29 + $0x310] sm:$0xff] }
 0x70b   : > { %v4734_v24 = vpop.f32.mrf.mxu1  ;;  %v9329_v62 = vld [vmem:[%s9773_s29 + $0x309] sm:$0xff] }
 0x70c   : > { %v7945_v33 = vmax.f32 %v7817_v63, 0.0  ;;  %v6700_v34 = vadd.f32 %v6449_v3, %v5842_v23  ;;  %v7309_v56 = vpop.f32.mrf.mxu0  ;;  %v4984_v14 = vadd.f32 %v4734_v24, %v13171_v26 }
 0x70e   : > { %8073 = vst.msk [vmem:[%s11451_s10 + $0x168] sm:$0xff] %vm577_vm0, %v7945_v33  ;;  %v7558_v44 = vadd.f32 %v7307_v10, %v6700_v34  ;;  %v13174_v33 = vld [vmem:[#allocation45_spill] sm:$0xff] }
 0x710   : > { %v7688_v32 = vmul.f32 %v11778_v19, %v7558_v44 }
 0x711   : > { %v5593_v40 = vpop.f32.mrf.mxu2 }
 0x712   : > { %v6451_v55 = vpop.f32.mrf.mxu3  ;;  %v7818_v29 = vadd.f32 %v11785_v15, %v7688_v32  ;;  %v5843_v46 = vadd.f32 %v5593_v40, %v4984_v14  ;;  %v9123_v14 = vld [vmem:[%s9773_s29 + $0x2f8] sm:$0xff]  ;;  %v9328_v40 = vld [vmem:[%s9773_s29 + $0x301] sm:$0xff] }
 0x713   : > { %v4737_v11 = vpop.f32.mrf.mxu1 }
 0x714   : > { %v7946_v18 = vmax.f32 %v7818_v29, 0.0  ;;  %v6701_v41 = vadd.f32 %v6451_v55, %v5843_v46  ;;  %v7312_v35 = vpop.f32.mrf.mxu0  ;;  %v4985_v30 = vadd.f32 %v4737_v11, %v13172_v42  ;;  %v13175_v29 = vld [vmem:[#allocation48_spill] sm:$0xff]  ;;  %v9531_v11 = vld [vmem:[%s9773_s29 + $0x2fa] sm:$0xff]  ;;  %v6086_v42 = vpack.c.bf16 %v9328_v40, %v9327_v2 }
 0x716   : > { %9023 = vmatmul.msk.bf16.gmra.mxu1 %vm577_vm0, %v11967_v5  ;;  %8074 = vst.msk [vmem:[%s11451_s10 + $0x170] sm:$0xff] %vm577_vm0, %v7946_v18  ;;  %v7559_v59 = vadd.f32 %v7309_v56, %v6701_v41  ;;  %9227 = vmatmul.msk.bf16.gmra.mxu2 %vm577_vm0, %v5226_v7  ;;  %v9532_v7 = vld [vmem:[%s9773_s29 + $0x302] sm:$0xff] }
 0x717   : > { %9431 = vmatmul.msk.bf16.gmra.mxu3 %vm577_vm0, %v6084_v38  ;;  %9635 = vmatmul.msk.bf16.gmra.mxu0 %vm577_vm0, %v12015_v36 }
 0x718   : > { %v7689_v37 = vmul.f32 %v11778_v19, %v7559_v59 }
 0x719   : > { %v5596_v5 = vpop.f32.mrf.mxu2 }
 0x71a   : > { %v6454_v39 = vpop.f32.mrf.mxu3  ;;  %v7819_v20 = vadd.f32 %v11785_v15, %v7689_v37  ;;  %v5844_v1 = vadd.f32 %v5596_v5, %v4985_v30  ;;  %v5228_v37 = vpack.c.bf16 %v9124_v13, %v9123_v14  ;;  %v12063_v30 = vpack.c.bf16 %v9532_v7, %v9531_v11  ;;  %v9128_v11 = vld [vmem:[%s9773_s29 + $0x328] sm:$0xff] }
 0x71b   : > { %v4739_v52 = vpop.f32.mrf.mxu1  ;;  %v9331_v7 = vld [vmem:[%s9773_s29 + $0x321] sm:$0xff] }
 0x71c   : > { %v7947_v4 = vmax.f32 %v7819_v20, 0.0  ;;  %v6702_v31 = vadd.f32 %v6454_v39, %v5844_v1  ;;  %v7314_v60 = vpop.f32.mrf.mxu0  ;;  %v4986_v45 = vadd.f32 %v4739_v52, %v13173_v22 }
 0x71e   : > { %8075 = vst.msk [vmem:[%s11451_s10 + $0x178] sm:$0xff] %vm577_vm0, %v7947_v4  ;;  %v7560_v12 = vadd.f32 %v7312_v35, %v6702_v31  ;;  %v13176_v4 = vld [vmem:[#allocation51_spill] sm:$0xff] }
 0x720   : > { %v7690_v8 = vmul.f32 %v11778_v19, %v7560_v12 }
 0x721   : > { %v5598_v53 = vpop.f32.mrf.mxu2 }
 0x722   : > { %v6456_v17 = vpop.f32.mrf.mxu3  ;;  %v7820_v25 = vadd.f32 %v11785_v15, %v7690_v8  ;;  %v5845_v10 = vadd.f32 %v5598_v53, %v4986_v45  ;;  %v9125_v45 = vld [vmem:[%s9773_s29 + $0x308] sm:$0xff]  ;;  %v9330_v53 = vld [vmem:[%s9773_s29 + $0x311] sm:$0xff] }
 0x723   : > { %v4742_v21 = vpop.f32.mrf.mxu1 }
 0x724   : > { %v7948_v16 = vmax.f32 %v7820_v25, 0.0  ;;  %v6703_v3 = vadd.f32 %v6456_v17, %v5845_v10  ;;  %v7317_v63 = vpop.f32.mrf.mxu0  ;;  %v4987_v34 = vadd.f32 %v4742_v21, %v13174_v33  ;;  %v13177_v25 = vld [vmem:[#allocation54_spill] sm:$0xff]  ;;  %v9533_v21 = vld [vmem:[%s9773_s29 + $0x30a] sm:$0xff]  ;;  %v6087_v33 = vpack.c.bf16 %v9330_v53, %v9329_v62 }
 0x726   : > { %9024 = vmatmul.msk.bf16.gmra.mxu1 %vm577_vm0, %v11991_v54  ;;  %8076 = vst.msk [vmem:[%s11451_s10 + $0x180] sm:$0xff] %vm577_vm0, %v7948_v16  ;;  %v7561_v23 = vadd.f32 %v7314_v60, %v6703_v3  ;;  %9228 = vmatmul.msk.bf16.gmra.mxu2 %vm577_vm0, %v5227_v58  ;;  %v9534_v58 = vld [vmem:[%s9773_s29 + $0x312] sm:$0xff] }
 0x727   : > { %9432 = vmatmul.msk.bf16.gmra.mxu3 %vm577_vm0, %v6085_v61  ;;  %9636 = vmatmul.msk.bf16.gmra.mxu0 %vm577_vm0, %v12039_v47 }
 0x728   : > { %v7691_v24 = vmul.f32 %v11778_v19, %v7561_v23 }
 0x729   : > { %v5601_v54 = vpop.f32.mrf.mxu2 }
 0x72a   : > { %v6459_v56 = vpop.f32.mrf.mxu3  ;;  %v7821_v44 = vadd.f32 %v11785_v15, %v7691_v24  ;;  %v5846_v27 = vadd.f32 %v5601_v54, %v4987_v34  ;;  %v5229_v24 = vpack.c.bf16 %v9126_v51, %v9125_v45  ;;  %v12087_v34 = vpack.c.bf16 %v9534_v58, %v9533_v21  ;;  %v9130_v21 = vld [vmem:[%s9773_s29 + $0x338] sm:$0xff] }
 0x72b   : > { %v4744_v28 = vpop.f32.mrf.mxu1  ;;  %v9333_v58 = vld [vmem:[%s9773_s29 + $0x331] sm:$0xff] }
 0x72c   : > { %v7949_v57 = vmax.f32 %v7821_v44, 0.0  ;;  %v6704_v9 = vadd.f32 %v6459_v56, %v5846_v27  ;;  %v7319_v32 = vpop.f32.mrf.mxu0  ;;  %v4988_v46 = vadd.f32 %v4744_v28, %v13175_v29 }
 0x72e   : > { %8077 = vst.msk [vmem:[%s11451_s10 + $0x188] sm:$0xff] %vm577_vm0, %v7949_v57  ;;  %v7562_v26 = vadd.f32 %v7317_v63, %v6704_v9  ;;  %v13178_v57 = vld [vmem:[#allocation57_spill] sm:$0xff] }
 0x730   : > { %v7692_v55 = vmul.f32 %v11778_v19, %v7562_v26 }
 0x731   : > { %v5603_v38 = vpop.f32.mrf.mxu2 }
 0x732   : > { %v6461_v18 = vpop.f32.mrf.mxu3  ;;  %v7822_v41 = vadd.f32 %v11785_v15, %v7692_v55  ;;  %v5847_v35 = vadd.f32 %v5603_v38, %v4988_v46  ;;  %v9127_v46 = vld [vmem:[%s9773_s29 + $0x320] sm:$0xff]  ;;  %v9332_v38 = vld [vmem:[%s9773_s29 + $0x329] sm:$0xff] }
 0x733   : > { %v4747_v59 = vpop.f32.mrf.mxu1 }
 0x734   : > { %v7950_v5 = vmax.f32 %v7822_v41, 0.0  ;;  %v6705_v39 = vadd.f32 %v6461_v18, %v5847_v35  ;;  %v7322_v20 = vpop.f32.mrf.mxu0  ;;  %v4989_v31 = vadd.f32 %v4747_v59, %v13176_v4  ;;  %v13179_v41 = vld [vmem:[#allocation60_spill] sm:$0xff]  ;;  %v9535_v59 = vld [vmem:[%s9773_s29 + $0x322] sm:$0xff]  ;;  %v6088_v4 = vpack.c.bf16 %v9332_v38, %v9331_v7 }
 0x736   : > { %9025 = vmatmul.msk.bf16.gmra.mxu1 %vm577_vm0, %v12015_v36  ;;  %8078 = vst.msk [vmem:[%s11451_s10 + $0x190] sm:$0xff] %vm577_vm0, %v7950_v5  ;;  %v7563_v1 = vadd.f32 %v7319_v32, %v6705_v39  ;;  %9229 = vmatmul.msk.bf16.gmra.mxu2 %vm577_vm0, %v5228_v37  ;;  %v9536_v37 = vld [vmem:[%s9773_s29 + $0x32a] sm:$0xff] }
 0x737   : > { %9433 = vmatmul.msk.bf16.gmra.mxu3 %vm577_vm0, %v6086_v42  ;;  %9637 = vmatmul.msk.bf16.gmra.mxu0 %vm577_vm0, %v12063_v30 }
 0x738   : > { %v7693_v52 = vmul.f32 %v11778_v19, %v7563_v1 }
 0x739   : > { %v5606_v36 = vpop.f32.mrf.mxu2 }
 0x73a   : > { %v6464_v60 = vpop.f32.mrf.mxu3  ;;  %v7823_v12 = vadd.f32 %v11785_v15, %v7693_v52  ;;  %v5848_v43 = vadd.f32 %v5606_v36, %v4989_v31  ;;  %v5230_v52 = vpack.c.bf16 %v9128_v11, %v9127_v46  ;;  %v12111_v31 = vpack.c.bf16 %v9536_v37, %v9535_v59  ;;  %v9132_v59 = vld [vmem:[%s9773_s29 + $0x350] sm:$0xff] }
 0x73b   : > { %v4749_v49 = vpop.f32.mrf.mxu1  ;;  %v9335_v37 = vld [vmem:[%s9773_s29 + $0x349] sm:$0xff] }
 0x73c   : > { %v7951_v50 = vmax.f32 %v7823_v12, 0.0  ;;  %v6706_v0 = vadd.f32 %v6464_v60, %v5848_v43  ;;  %v7324_v8 = vpop.f32.mrf.mxu0  ;;  %v4990_v10 = vadd.f32 %v4749_v49, %v13177_v25  ;;  %v13180_v43 = vld [vmem:[#allocation63_spill] sm:$0xff] }
 0x73e   : > { %8079 = vst.msk [vmem:[%s11451_s10 + $0x198] sm:$0xff] %vm577_vm0, %v7951_v50  ;;  %v7564_v22 = vadd.f32 %v7322_v20, %v6706_v0 }
 0x740   : > { %v7694_v17 = vmul.f32 %v11778_v19, %v7564_v22 }
 0x741   : > { %v5608_v61 = vpop.f32.mrf.mxu2 }
 0x742   : > { %v6466_v16 = vpop.f32.mrf.mxu3  ;;  %v7824_v3 = vadd.f32 %v11785_v15, %v7694_v17  ;;  %v5849_v63 = vadd.f32 %v5608_v61, %v4990_v10  ;;  %v9129_v10 = vld [vmem:[%s9773_s29 + $0x330] sm:$0xff]  ;;  %v9334_v61 = vld [vmem:[%s9773_s29 + $0x339] sm:$0xff] }
 0x743   : > { %v4752_v23 = vpop.f32.mrf.mxu1 }
 0x744   : > { %v7952_v54 = vmax.f32 %v7824_v3, 0.0  ;;  %v6707_v56 = vadd.f32 %v6466_v16, %v5849_v63  ;;  %v7327_v44 = vpop.f32.mrf.mxu0  ;;  %v4991_v9 = vadd.f32 %v4752_v23, %v13178_v57  ;;  %v13181_v3 = vld [vmem:[#allocation66_spill] sm:$0xff]  ;;  %v9537_v23 = vld [vmem:[%s9773_s29 + $0x332] sm:$0xff]  ;;  %v6089_v57 = vpack.c.bf16 %v9334_v61, %v9333_v58 }
 0x746   : > { %9026 = vmatmul.msk.bf16.gmra.mxu1 %vm577_vm0, %v12039_v47  ;;  %8080 = vst.msk [vmem:[%s11451_s10 + $0x1a0] sm:$0xff] %vm577_vm0, %v7952_v54  ;;  %v7565_v27 = vadd.f32 %v7324_v8, %v6707_v56  ;;  %9230 = vmatmul.msk.bf16.gmra.mxu2 %vm577_vm0, %v5229_v24  ;;  %v12131_v8 = vld [vmem:[%s12892_s2 + $0x1] ss:$0 sm:$0xff] }
 0x747   : > { %9434 = vmatmul.msk.bf16.gmra.mxu3 %vm577_vm0, %v6087_v33  ;;  %9638 = vmatmul.msk.bf16.gmra.mxu0 %vm577_vm0, %v12087_v34  ;;  %v9538_v24 = vld [vmem:[%s9773_s29 + $0x33a] sm:$0xff] }
 0x748   : > { %v7695_v28 = vmul.f32 %v11778_v19, %v7565_v27 }
 0x749   : > { %v5611_v47 = vpop.f32.mrf.mxu2 }
 0x74a   : > { %v6469_v32 = vpop.f32.mrf.mxu3  ;;  %v7825_v26 = vadd.f32 %v11785_v15, %v7695_v28  ;;  %v5850_v14 = vadd.f32 %v5611_v47, %v4991_v9  ;;  %v5231_v28 = vpack.c.bf16 %v9130_v21, %v9129_v10  ;;  %v12145_v9 = vpack.c.bf16 %v9538_v24, %v9537_v23  ;;  %v9134_v23 = vld [vmem:[%s9773_s29 + $0x360] sm:$0xff] }
 0x74b   : > { %v4754_v13 = vpop.f32.mrf.mxu1  ;;  %v9337_v24 = vld [vmem:[%s9773_s29 + $0x359] sm:$0xff] }
 0x74c   : > { %v7953_v2 = vmax.f32 %v7825_v26, 0.0  ;;  %v6708_v40 = vadd.f32 %v6469_v32, %v5850_v14  ;;  %v7329_v55 = vpop.f32.mrf.mxu0  ;;  %v4992_v35 = vadd.f32 %v4754_v13, %v13179_v41 }
 0x74e   : > { %8081 = vst.msk [vmem:[%s11451_s10 + $0x1a8] sm:$0xff] %vm577_vm0, %v7953_v2  ;;  %v7566_v29 = vadd.f32 %v7327_v44, %v6708_v40  ;;  %v13182_v2 = vld [vmem:[#allocation69_spill] sm:$0xff] }
 0x750   : > { %v7696_v18 = vmul.f32 %v11778_v19, %v7566_v29 }
 0x751   : > { %v5613_v42 = vpop.f32.mrf.mxu2 }
 0x752   : > { %v6471_v5 = vpop.f32.mrf.mxu3  ;;  %v7826_v39 = vadd.f32 %v11785_v15, %v7696_v18  ;;  %v5851_v20 = vadd.f32 %v5613_v42, %v4992_v35  ;;  %v12124_v15 = vld [vmem:[%s12892_s2] ss:$0 sm:$0xff]  ;;  %v9131_v35 = vld [vmem:[%s9773_s29 + $0x348] sm:$0xff]  ;;  %v9336_v42 = vld [vmem:[%s9773_s29 + $0x351] sm:$0xff] }
 0x753   : > { %v4757_v1 = vpop.f32.mrf.mxu1 }
 0x754   : > { %v7954_v36 = vmax.f32 %v7826_v39, 0.0  ;;  %v6709_v60 = vadd.f32 %v6471_v5, %v5851_v20  ;;  %v7332_v12 = vpop.f32.mrf.mxu0  ;;  %v4993_v49 = vadd.f32 %v4757_v1, %v13180_v43  ;;  %v13183_v39 = vld [vmem:[#allocation72_spill] sm:$0xff]  ;;  %v6090_v43 = vpack.c.bf16 %v9336_v42, %v9335_v37 }
 0x755   : > { %v9539_v1 = vld [vmem:[%s9773_s29 + $0x34a] sm:$0xff] }
 0x756   : > { %9027 = vmatmul.msk.bf16.gmra.mxu1 %vm577_vm0, %v12063_v30  ;;  %8082 = vst.msk [vmem:[%s11451_s10 + $0x1b0] sm:$0xff] %vm577_vm0, %v7954_v36  ;;  %v7567_v19 = vadd.f32 %v7329_v55, %v6709_v60  ;;  %9231 = vmatmul.msk.bf16.gmra.mxu2 %vm577_vm0, %v5230_v52  ;;  %v9540_v52 = vld [vmem:[%s9773_s29 + $0x352] sm:$0xff] }
 0x757   : > { %9435 = vmatmul.msk.bf16.gmra.mxu3 %vm577_vm0, %v6088_v4  ;;  %9639 = vmatmul.msk.bf16.gmra.mxu0 %vm577_vm0, %v12111_v31 }
 0x758   : > { %v7697_v30 = vmul.f32 %v12124_v15, %v7567_v19 }
 0x759   : > { %v5616_v50 = vpop.f32.mrf.mxu2 }
 0x75a   : > { %v6474_v0 = vpop.f32.mrf.mxu3  ;;  %v7827_v22 = vadd.f32 %v12131_v8, %v7697_v30  ;;  %v5852_v45 = vadd.f32 %v5616_v50, %v4993_v49  ;;  %v5232_v30 = vpack.c.bf16 %v9132_v59, %v9131_v35  ;;  %v12169_v49 = vpack.c.bf16 %v9540_v52, %v9539_v1  ;;  %v9136_v1 = vld [vmem:[%s9773_s29 + $0x378] sm:$0xff] }
 0x75b   : > { %v4759_v51 = vpop.f32.mrf.mxu1  ;;  %v9339_v52 = vld [vmem:[%s9773_s29 + $0x371] sm:$0xff] }
 0x75c   : > { %v7955_v62 = vmax.f32 %v7827_v22, 0.0  ;;  %v6710_v53 = vadd.f32 %v6474_v0, %v5852_v45  ;;  %v7334_v17 = vpop.f32.mrf.mxu0  ;;  %v4994_v63 = vadd.f32 %v4759_v51, %v13181_v3 }
 0x75e   : > { %8083 = vst.msk [vmem:[%s11451_s10 + $0x1b8] sm:$0xff] %vm577_vm0, %v7955_v62  ;;  %v7568_v25 = vadd.f32 %v7332_v12, %v6710_v53  ;;  %v13184_v62 = vld [vmem:[#allocation75_spill] sm:$0xff] }
 0x760   : > { %v7698_v16 = vmul.f32 %v12124_v15, %v7568_v25 }
 0x761   : > { %v5618_v33 = vpop.f32.mrf.mxu2 }
 0x762   : > { %v6476_v54 = vpop.f32.mrf.mxu3  ;;  %v7828_v56 = vadd.f32 %v12131_v8, %v7698_v16  ;;  %v5853_v44 = vadd.f32 %v5618_v33, %v4994_v63  ;;  %v9133_v63 = vld [vmem:[%s9773_s29 + $0x358] sm:$0xff]  ;;  %v9338_v33 = vld [vmem:[%s9773_s29 + $0x361] sm:$0xff] }
 0x763   : > { %v4762_v27 = vpop.f32.mrf.mxu1 }
 0x764   : > { %v7956_v47 = vmax.f32 %v7828_v56, 0.0  ;;  %v6711_v32 = vadd.f32 %v6476_v54, %v5853_v44  ;;  %v7337_v26 = vpop.f32.mrf.mxu0  ;;  %v4995_v40 = vadd.f32 %v4762_v27, %v13182_v2  ;;  %v13185_v56 = vld [vmem:[#allocation78_spill] sm:$0xff]  ;;  %v6091_v2 = vpack.c.bf16 %v9338_v33, %v9337_v24 }
 0x765   : > { %v9541_v27 = vld [vmem:[%s9773_s29 + $0x35a] sm:$0xff] }
 0x766   : > { %9028 = vmatmul.msk.bf16.gmra.mxu1 %vm577_vm0, %v12087_v34  ;;  %8084 = vst.msk [vmem:[%s11451_s10 + $0x1c0] sm:$0xff] %vm577_vm0, %v7956_v47  ;;  %v7569_v14 = vadd.f32 %v7334_v17, %v6711_v32  ;;  %9232 = vmatmul.msk.bf16.gmra.mxu2 %vm577_vm0, %v5231_v28  ;;  %v9542_v28 = vld [vmem:[%s9773_s29 + $0x362] sm:$0xff] }
 0x767   : > { %9436 = vmatmul.msk.bf16.gmra.mxu3 %vm577_vm0, %v6089_v57  ;;  %9640 = vmatmul.msk.bf16.gmra.mxu0 %vm577_vm0, %v12145_v9 }
 0x768   : > { %v7699_v13 = vmul.f32 %v12124_v15, %v7569_v14 }
 0x769   : > { %v5621_v34 = vpop.f32.mrf.mxu2 }
 0x76a   : > { %v6479_v55 = vpop.f32.mrf.mxu3  ;;  %v7829_v29 = vadd.f32 %v12131_v8, %v7699_v13  ;;  %v5854_v46 = vadd.f32 %v5621_v34, %v4995_v40  ;;  %v5233_v13 = vpack.c.bf16 %v9134_v23, %v9133_v63  ;;  %v12193_v40 = vpack.c.bf16 %v9542_v28, %v9541_v27  ;;  %v9138_v27 = vld [vmem:[%s9773_s29 + $0x388] sm:$0xff] }
 0x76b   : > { %v4764_v11 = vpop.f32.mrf.mxu1  ;;  %v9341_v28 = vld [vmem:[%s9773_s29 + $0x381] sm:$0xff] }
 0x76c   : > { %v7957_v7 = vmax.f32 %v7829_v29, 0.0  ;;  %v6712_v38 = vadd.f32 %v6479_v55, %v5854_v46  ;;  %v7339_v18 = vpop.f32.mrf.mxu0  ;;  %v4996_v20 = vadd.f32 %v4764_v11, %v13183_v39 }
 0x76e   : > { %8085 = vst.msk [vmem:[%s11451_s10 + $0x1c8] sm:$0xff] %vm577_vm0, %v7957_v7  ;;  %v7570_v41 = vadd.f32 %v7337_v26, %v6712_v38  ;;  %v13186_v7 = vld [vmem:[#allocation81_spill] sm:$0xff] }
 0x770   : > { %v7700_v5 = vmul.f32 %v12124_v15, %v7570_v41 }
 0x771   : > { %v5623_v4 = vpop.f32.mrf.mxu2 }
 0x772   : > { %v6481_v36 = vpop.f32.mrf.mxu3  ;;  %v7830_v60 = vadd.f32 %v12131_v8, %v7700_v5  ;;  %v5855_v12 = vadd.f32 %v5623_v4, %v4996_v20  ;;  %v9135_v20 = vld [vmem:[%s9773_s29 + $0x370] sm:$0xff]  ;;  %v9340_v4 = vld [vmem:[%s9773_s29 + $0x379] sm:$0xff] }
 0x773   : > { %v4767_v19 = vpop.f32.mrf.mxu1 }
 0x774   : > { %v7958_v50 = vmax.f32 %v7830_v60, 0.0  ;;  %v6713_v0 = vadd.f32 %v6481_v36, %v5855_v12  ;;  %v7342_v22 = vpop.f32.mrf.mxu0  ;;  %v4997_v53 = vadd.f32 %v4767_v19, %v13184_v62  ;;  %v13187_v60 = vld [vmem:[#allocation84_spill] sm:$0xff]  ;;  %v6092_v62 = vpack.c.bf16 %v9340_v4, %v9339_v52 }
 0x775   : > { %v9543_v19 = vld [vmem:[%s9773_s29 + $0x372] sm:$0xff] }
 0x776   : > { %9029 = vmatmul.msk.bf16.gmra.mxu1 %vm577_vm0, %v12111_v31  ;;  %8086 = vst.msk [vmem:[%s11451_s10 + $0x1d0] sm:$0xff] %vm577_vm0, %v7958_v50  ;;  %v7571_v45 = vadd.f32 %v7339_v18, %v6713_v0  ;;  %9233 = vmatmul.msk.bf16.gmra.mxu2 %vm577_vm0, %v5232_v30  ;;  %v9544_v30 = vld [vmem:[%s9773_s29 + $0x37a] sm:$0xff] }
 0x777   : > { %9437 = vmatmul.msk.bf16.gmra.mxu3 %vm577_vm0, %v6090_v43  ;;  %9641 = vmatmul.msk.bf16.gmra.mxu0 %vm577_vm0, %v12169_v49 }
 0x778   : > { %v7701_v51 = vmul.f32 %v12124_v15, %v7571_v45 }
 0x779   : > { %v5626_v31 = vpop.f32.mrf.mxu2 }
 0x77a   : > { %v6484_v17 = vpop.f32.mrf.mxu3  ;;  %v7831_v25 = vadd.f32 %v12131_v8, %v7701_v51  ;;  %v5856_v10 = vadd.f32 %v5626_v31, %v4997_v53  ;;  %v5234_v51 = vpack.c.bf16 %v9136_v1, %v9135_v20  ;;  %v12217_v53 = vpack.c.bf16 %v9544_v30, %v9543_v19  ;;  %v9140_v19 = vld [vmem:[%s9773_s29 + $0x3a0] sm:$0xff] }
 0x77b   : > { %v4769_v21 = vpop.f32.mrf.mxu1  ;;  %v9343_v30 = vld [vmem:[%s9773_s29 + $0x399] sm:$0xff] }
 0x77c   : > { %v7959_v58 = vmax.f32 %v7831_v25, 0.0  ;;  %v6714_v61 = vadd.f32 %v6484_v17, %v5856_v10  ;;  %v7344_v16 = vpop.f32.mrf.mxu0  ;;  %v4998_v44 = vadd.f32 %v4769_v21, %v13185_v56 }
 0x77e   : > { %8087 = vst.msk [vmem:[%s11451_s10 + $0x1d8] sm:$0xff] %vm577_vm0, %v7959_v58  ;;  %v7572_v3 = vadd.f32 %v7342_v22, %v6714_v61  ;;  %v13188_v58 = vld [vmem:[#allocation87_spill] sm:$0xff] }
 0x780   : > { %v7702_v54 = vmul.f32 %v12124_v15, %v7572_v3 }
 0x781   : > { %v5628_v57 = vpop.f32.mrf.mxu2 }
 0x782   : > { %v6486_v47 = vpop.f32.mrf.mxu3  ;;  %v7832_v32 = vadd.f32 %v12131_v8, %v7702_v54  ;;  %v5857_v26 = vadd.f32 %v5628_v57, %v4998_v44  ;;  %v9137_v44 = vld [vmem:[%s9773_s29 + $0x380] sm:$0xff]  ;;  %v9342_v57 = vld [vmem:[%s9773_s29 + $0x389] sm:$0xff] }
 0x783   : > { %v4772_v14 = vpop.f32.mrf.mxu1 }
 0x784   : > { %v7960_v34 = vmax.f32 %v7832_v32, 0.0  ;;  %v6715_v55 = vadd.f32 %v6486_v47, %v5857_v26  ;;  %v7347_v29 = vpop.f32.mrf.mxu0  ;;  %v4999_v38 = vadd.f32 %v4772_v14, %v13186_v7  ;;  %v13189_v32 = vld [vmem:[#allocation90_spill] sm:$0xff]  ;;  %v6093_v7 = vpack.c.bf16 %v9342_v57, %v9341_v28 }
 0x785   : > { %v9545_v14 = vld [vmem:[%s9773_s29 + $0x382] sm:$0xff] }
 0x786   : > { %9030 = vmatmul.msk.bf16.gmra.mxu1 %vm577_vm0, %v12145_v9  ;;  %8088 = vst.msk [vmem:[%s11451_s10 + $0x1e0] sm:$0xff] %vm577_vm0, %v7960_v34  ;;  %v7573_v46 = vadd.f32 %v7344_v16, %v6715_v55  ;;  %9234 = vmatmul.msk.bf16.gmra.mxu2 %vm577_vm0, %v5233_v13  ;;  %v9546_v13 = vld [vmem:[%s9773_s29 + $0x38a] sm:$0xff] }
 0x787   : > { %9438 = vmatmul.msk.bf16.gmra.mxu3 %vm577_vm0, %v6091_v2  ;;  %9642 = vmatmul.msk.bf16.gmra.mxu0 %vm577_vm0, %v12193_v40 }
 0x788   : > { %v7703_v11 = vmul.f32 %v12124_v15, %v7573_v46 }
 0x789   : > { %v5631_v9 = vpop.f32.mrf.mxu2 }
 0x78a   : > { %v6489_v18 = vpop.f32.mrf.mxu3  ;;  %v7833_v41 = vadd.f32 %v12131_v8, %v7703_v11  ;;  %v5858_v35 = vadd.f32 %v5631_v9, %v4999_v38  ;;  %v5235_v11 = vpack.c.bf16 %v9138_v27, %v9137_v44  ;;  %v12241_v38 = vpack.c.bf16 %v9546_v13, %v9545_v14  ;;  %v9142_v14 = vld [vmem:[%s9773_s29 + $0x3b0] sm:$0xff] }
 0x78b   : > { %v4774_v59 = vpop.f32.mrf.mxu1  ;;  %v9345_v13 = vld [vmem:[%s9773_s29 + $0x3a9] sm:$0xff] }
 0x78c   : > { %v7961_v37 = vmax.f32 %v7833_v41, 0.0  ;;  %v6716_v42 = vadd.f32 %v6489_v18, %v5858_v35  ;;  %v7349_v5 = vpop.f32.mrf.mxu0  ;;  %v5000_v12 = vadd.f32 %v4774_v59, %v13187_v60 }
 0x78e   : > { %8089 = vst.msk [vmem:[%s11451_s10 + $0x1e8] sm:$0xff] %vm577_vm0, %v7961_v37  ;;  %v7574_v39 = vadd.f32 %v7347_v29, %v6716_v42  ;;  %v13190_v37 = vld [vmem:[#allocation2_spill] sm:$0xff] }
 0x790   : > { %v7704_v36 = vmul.f32 %v12124_v15, %v7574_v39 }
 0x791   : > { %v5633_v43 = vpop.f32.mrf.mxu2 }
 0x792   : > { %v6491_v50 = vpop.f32.mrf.mxu3  ;;  %v7834_v0 = vadd.f32 %v12131_v8, %v7704_v36  ;;  %v5859_v22 = vadd.f32 %v5633_v43, %v5000_v12  ;;  %v9139_v12 = vld [vmem:[%s9773_s29 + $0x398] sm:$0xff]  ;;  %v9344_v43 = vld [vmem:[%s9773_s29 + $0x3a1] sm:$0xff] }
 0x793   : > { %v4777_v45 = vpop.f32.mrf.mxu1 }
 0x794   : > { %v7962_v31 = vmax.f32 %v7834_v0, 0.0  ;;  %v6717_v17 = vadd.f32 %v6491_v50, %v5859_v22  ;;  %v7352_v25 = vpop.f32.mrf.mxu0  ;;  %v5001_v61 = vadd.f32 %v4777_v45, %v13188_v58  ;;  %v13191_v0 = vld [vmem:[#allocation4_spill] sm:$0xff]  ;;  %v9547_v45 = vld [vmem:[%s9773_s29 + $0x39a] sm:$0xff]  ;;  %v6094_v58 = vpack.c.bf16 %v9344_v43, %v9343_v30 }
 0x796   : > { %9031 = vmatmul.msk.bf16.gmra.mxu1 %vm577_vm0, %v12169_v49  ;;  %8090 = vst.msk [vmem:[%s11451_s10 + $0x1f0] sm:$0xff] %vm577_vm0, %v7962_v31  ;;  %v7575_v10 = vadd.f32 %v7349_v5, %v6717_v17  ;;  %9235 = vmatmul.msk.bf16.gmra.mxu2 %vm577_vm0, %v5234_v51  ;;  %v9548_v51 = vld [vmem:[%s9773_s29 + $0x3a2] sm:$0xff] }
 0x797   : > { %9439 = vmatmul.msk.bf16.gmra.mxu3 %vm577_vm0, %v6092_v62  ;;  %9643 = vmatmul.msk.bf16.gmra.mxu0 %vm577_vm0, %v12217_v53 }
 0x798   : > { %v7705_v21 = vmul.f32 %v12124_v15, %v7575_v10 }
 0x799   : > { %v5636_v49 = vpop.f32.mrf.mxu2 }
 0x79a   : > { %v6494_v16 = vpop.f32.mrf.mxu3  ;;  %v7835_v3 = vadd.f32 %v12131_v8, %v7705_v21  ;;  %v5860_v63 = vadd.f32 %v5636_v49, %v5001_v61  ;;  %v5236_v21 = vpack.c.bf16 %v9140_v19, %v9139_v12  ;;  %v12265_v61 = vpack.c.bf16 %v9548_v51, %v9547_v45  ;;  %v9144_v45 = vld [vmem:[%s9773_s29 + $0x3c8] sm:$0xff] }
 0x79b   : > { %v4779_v23 = vpop.f32.mrf.mxu1  ;;  %v9347_v51 = vld [vmem:[%s9773_s29 + $0x3c1] sm:$0xff] }
 0x79c   : > { %v7963_v24 = vmax.f32 %v7835_v3, 0.0  ;;  %v6718_v33 = vadd.f32 %v6494_v16, %v5860_v63  ;;  %v7354_v54 = vpop.f32.mrf.mxu0  ;;  %v5002_v26 = vadd.f32 %v4779_v23, %v13189_v32 }
 0x79e   : > { %8091 = vst.msk [vmem:[%s11451_s10 + $0x1f8] sm:$0xff] %vm577_vm0, %v7963_v24  ;;  %v7576_v56 = vadd.f32 %v7352_v25, %v6718_v33  ;;  %v13192_v24 = vld [vmem:[#allocation6_spill] sm:$0xff] }
 0x7a0   : > { %v7706_v47 = vmul.f32 %v12124_v15, %v7576_v56 }
 0x7a1   : > { %v5638_v2 = vpop.f32.mrf.mxu2 }
 0x7a2   : > { %v6496_v34 = vpop.f32.mrf.mxu3  ;;  %v7836_v55 = vadd.f32 %v12131_v8, %v7706_v47  ;;  %v5861_v29 = vadd.f32 %v5638_v2, %v5002_v26  ;;  %v9141_v26 = vld [vmem:[%s9773_s29 + $0x3a8] sm:$0xff]  ;;  %v9346_v2 = vld [vmem:[%s9773_s29 + $0x3b1] sm:$0xff] }
 0x7a3   : > { %v4782_v46 = vpop.f32.mrf.mxu1 }
 0x7a4   : > { %v7964_v9 = vmax.f32 %v7836_v55, 0.0  ;;  %v6719_v18 = vadd.f32 %v6496_v34, %v5861_v29  ;;  %v7357_v41 = vpop.f32.mrf.mxu0  ;;  %v5003_v42 = vadd.f32 %v4782_v46, %v13190_v37  ;;  %v13193_v55 = vld [vmem:[#allocation8_spill] sm:$0xff]  ;;  %v6095_v37 = vpack.c.bf16 %v9346_v2, %v9345_v13 }
 0x7a5   : > { %v9549_v46 = vld [vmem:[%s9773_s29 + $0x3aa] sm:$0xff] }
 0x7a6   : > { %9032 = vmatmul.msk.bf16.gmra.mxu1 %vm577_vm0, %v12193_v40  ;;  %8092 = vst.msk [vmem:[%s11451_s10 + $0x200] sm:$0xff] %vm577_vm0, %v7964_v9  ;;  %v7577_v35 = vadd.f32 %v7354_v54, %v6719_v18  ;;  %9236 = vmatmul.msk.bf16.gmra.mxu2 %vm577_vm0, %v5235_v11  ;;  %v9550_v11 = vld [vmem:[%s9773_s29 + $0x3b2] sm:$0xff] }
 0x7a7   : > { %9440 = vmatmul.msk.bf16.gmra.mxu3 %vm577_vm0, %v6093_v7  ;;  %9644 = vmatmul.msk.bf16.gmra.mxu0 %vm577_vm0, %v12241_v38 }
 0x7a8   : > { %v7707_v59 = vmul.f32 %v12124_v15, %v7577_v35 }
 0x7a9   : > { %v5641_v40 = vpop.f32.mrf.mxu2 }
 0x7aa   : > { %v6499_v5 = vpop.f32.mrf.mxu3  ;;  %v7837_v39 = vadd.f32 %v12131_v8, %v7707_v59  ;;  %v5862_v20 = vadd.f32 %v5641_v40, %v5003_v42  ;;  %v5237_v59 = vpack.c.bf16 %v9142_v14, %v9141_v26  ;;  %v12289_v42 = vpack.c.bf16 %v9550_v11, %v9549_v46  ;;  %v9146_v46 = vld [vmem:[%s9773_s29 + $0x3d8] sm:$0xff] }
 0x7ab   : > { %v4784_v1 = vpop.f32.mrf.mxu1  ;;  %v9349_v11 = vld [vmem:[%s9773_s29 + $0x3d1] sm:$0xff] }
 0x7ac   : > { %v7965_v52 = vmax.f32 %v7837_v39, 0.0  ;;  %v6720_v4 = vadd.f32 %v6499_v5, %v5862_v20  ;;  %v7359_v36 = vpop.f32.mrf.mxu0  ;;  %v5004_v22 = vadd.f32 %v4784_v1, %v13191_v0 }
 0x7ae   : > { %8093 = vst.msk [vmem:[%s11451_s10 + $0x208] sm:$0xff] %vm577_vm0, %v7965_v52  ;;  %v7578_v60 = vadd.f32 %v7357_v41, %v6720_v4  ;;  %v13194_v52 = vld [vmem:[#allocation10_spill] sm:$0xff] }
 0x7b0   : > { %v7708_v50 = vmul.f32 %v12124_v15, %v7578_v60 }
 0x7b1   : > { %v5643_v62 = vpop.f32.mrf.mxu2 }
 0x7b2   : > { %v6501_v31 = vpop.f32.mrf.mxu3  ;;  %v7838_v17 = vadd.f32 %v12131_v8, %v7708_v50  ;;  %v5863_v25 = vadd.f32 %v5643_v62, %v5004_v22  ;;  %v9143_v22 = vld [vmem:[%s9773_s29 + $0x3c0] sm:$0xff]  ;;  %v9348_v62 = vld [vmem:[%s9773_s29 + $0x3c9] sm:$0xff] }
 0x7b3   : > { %v4787_v10 = vpop.f32.mrf.mxu1 }
 0x7b4   : > { %v7966_v49 = vmax.f32 %v7838_v17, 0.0  ;;  %v6721_v16 = vadd.f32 %v6501_v31, %v5863_v25  ;;  %v7362_v3 = vpop.f32.mrf.mxu0  ;;  %v5005_v33 = vadd.f32 %v4787_v10, %v13192_v24  ;;  %v13195_v17 = vld [vmem:[#allocation13_spill] sm:$0xff]  ;;  %v9551_v10 = vld [vmem:[%s9773_s29 + $0x3c2] sm:$0xff]  ;;  %v6096_v24 = vpack.c.bf16 %v9348_v62, %v9347_v51 }
 0x7b6   : > { %9033 = vmatmul.msk.bf16.gmra.mxu1 %vm577_vm0, %v12217_v53  ;;  %8094 = vst.msk [vmem:[%s11451_s10 + $0x210] sm:$0xff] %vm577_vm0, %v7966_v49  ;;  %v7579_v63 = vadd.f32 %v7359_v36, %v6721_v16  ;;  %9237 = vmatmul.msk.bf16.gmra.mxu2 %vm577_vm0, %v5236_v21  ;;  %v9552_v21 = vld [vmem:[%s9773_s29 + $0x3ca] sm:$0xff] }
 0x7b7   : > { %9441 = vmatmul.msk.bf16.gmra.mxu3 %vm577_vm0, %v6094_v58  ;;  %9645 = vmatmul.msk.bf16.gmra.mxu0 %vm577_vm0, %v12265_v61 }
 0x7b8   : > { %v7709_v23 = vmul.f32 %v12124_v15, %v7579_v63 }
 0x7b9   : > { %v5646_v53 = vpop.f32.mrf.mxu2 }
 0x7ba   : > { %v6504_v54 = vpop.f32.mrf.mxu3  ;;  %v7839_v56 = vadd.f32 %v12131_v8, %v7709_v23  ;;  %v5864_v44 = vadd.f32 %v5646_v53, %v5005_v33  ;;  %v5238_v23 = vpack.c.bf16 %v9144_v45, %v9143_v22  ;;  %v12313_v33 = vpack.c.bf16 %v9552_v21, %v9551_v10  ;;  %v9148_v10 = vld [vmem:[%s9773_s29 + $0x3f0] sm:$0xff] }
 0x7bb   : > { %v4789_v27 = vpop.f32.mrf.mxu1  ;;  %v9351_v21 = vld [vmem:[%s9773_s29 + $0x3e9] sm:$0xff] }
 0x7bc   : > { %v7967_v28 = vmax.f32 %v7839_v56, 0.0  ;;  %v6722_v57 = vadd.f32 %v6504_v54, %v5864_v44  ;;  %v7364_v47 = vpop.f32.mrf.mxu0  ;;  %v5006_v29 = vadd.f32 %v4789_v27, %v13193_v55 }
 0x7be   : > { %8095 = vst.msk [vmem:[%s11451_s10 + $0x218] sm:$0xff] %vm577_vm0, %v7967_v28  ;;  %v7580_v32 = vadd.f32 %v7362_v3, %v6722_v57  ;;  %v13196_v28 = vld [vmem:[#allocation16_spill] sm:$0xff] }
 0x7c0   : > { %v7710_v34 = vmul.f32 %v12124_v15, %v7580_v32 }
 0x7c1   : > { %v5648_v7 = vpop.f32.mrf.mxu2 }
 0x7c2   : > { %v6506_v9 = vpop.f32.mrf.mxu3  ;;  %v7840_v18 = vadd.f32 %v12131_v8, %v7710_v34  ;;  %v5865_v41 = vadd.f32 %v5648_v7, %v5006_v29  ;;  %v9145_v29 = vld [vmem:[%s9773_s29 + $0x3d0] sm:$0xff]  ;;  %v9350_v7 = vld [vmem:[%s9773_s29 + $0x3d9] sm:$0xff] }
 0x7c3   : > { %v4792_v35 = vpop.f32.mrf.mxu1 }
 0x7c4   : > { %v7968_v40 = vmax.f32 %v7840_v18, 0.0  ;;  %v6723_v5 = vadd.f32 %v6506_v9, %v5865_v41  ;;  %v7367_v39 = vpop.f32.mrf.mxu0  ;;  %v5007_v4 = vadd.f32 %v4792_v35, %v13194_v52  ;;  %v13197_v18 = vld [vmem:[#allocation19_spill] sm:$0xff]  ;;  %v9553_v35 = vld [vmem:[%s9773_s29 + $0x3d2] sm:$0xff]  ;;  %v6097_v52 = vpack.c.bf16 %v9350_v7, %v9349_v11 }
 0x7c6   : > { %9034 = vmatmul.msk.bf16.gmra.mxu1 %vm577_vm0, %v12241_v38  ;;  %8096 = vst.msk [vmem:[%s11451_s10 + $0x220] sm:$0xff] %vm577_vm0, %v7968_v40  ;;  %v7581_v20 = vadd.f32 %v7364_v47, %v6723_v5  ;;  %9238 = vmatmul.msk.bf16.gmra.mxu2 %vm577_vm0, %v5237_v59  ;;  %v9554_v59 = vld [vmem:[%s9773_s29 + $0x3da] sm:$0xff] }
 0x7c7   : > { %9442 = vmatmul.msk.bf16.gmra.mxu3 %vm577_vm0, %v6095_v37  ;;  %9646 = vmatmul.msk.bf16.gmra.mxu0 %vm577_vm0, %v12289_v42 }
 0x7c8   : > { %v7711_v1 = vmul.f32 %v12124_v15, %v7581_v20 }
 0x7c9   : > { %v5651_v38 = vpop.f32.mrf.mxu2 }
 0x7ca   : > { %v6509_v36 = vpop.f32.mrf.mxu3  ;;  %v7841_v60 = vadd.f32 %v12131_v8, %v7711_v1  ;;  %v5866_v12 = vadd.f32 %v5651_v38, %v5007_v4  ;;  %v5239_v1 = vpack.c.bf16 %v9146_v46, %v9145_v29  ;;  %v12337_v4 = vpack.c.bf16 %v9554_v59, %v9553_v35  ;;  %v9150_v35 = vld [vmem:[%s9773_s29 + $0x400] sm:$0xff] }
 0x7cb   : > { %v4794_v19 = vpop.f32.mrf.mxu1  ;;  %v9353_v59 = vld [vmem:[%s9773_s29 + $0x3f9] sm:$0xff] }
 0x7cc   : > { %v7969_v30 = vmax.f32 %v7841_v60, 0.0  ;;  %v6724_v43 = vadd.f32 %v6509_v36, %v5866_v12  ;;  %v7369_v50 = vpop.f32.mrf.mxu0  ;;  %v5008_v25 = vadd.f32 %v4794_v19, %v13195_v17 }
 0x7ce   : > { %8097 = vst.msk [vmem:[%s11451_s10 + $0x228] sm:$0xff] %vm577_vm0, %v7969_v30  ;;  %v7582_v0 = vadd.f32 %v7367_v39, %v6724_v43  ;;  %v13198_v30 = vld [vmem:[#allocation22_spill] sm:$0xff] }
 0x7d0   : > { %v7712_v31 = vmul.f32 %v12124_v15, %v7582_v0 }
 0x7d1   : > { %v5653_v58 = vpop.f32.mrf.mxu2 }
 0x7d2   : > { %v6511_v49 = vpop.f32.mrf.mxu3  ;;  %v7842_v16 = vadd.f32 %v12131_v8, %v7712_v31  ;;  %v5867_v3 = vadd.f32 %v5653_v58, %v5008_v25  ;;  %v9147_v25 = vld [vmem:[%s9773_s29 + $0x3e8] sm:$0xff]  ;;  %v9352_v58 = vld [vmem:[%s9773_s29 + $0x3f1] sm:$0xff] }
 0x7d3   : > { %v4797_v63 = vpop.f32.mrf.mxu1 }
 0x7d4   : > { %v7970_v53 = vmax.f32 %v7842_v16, 0.0  ;;  %v6725_v54 = vadd.f32 %v6511_v49, %v5867_v3  ;;  %v7372_v56 = vpop.f32.mrf.mxu0  ;;  %v5009_v57 = vadd.f32 %v4797_v63, %v13196_v28  ;;  %v13199_v16 = vld [vmem:[#allocation25_spill] sm:$0xff]  ;;  %v9555_v63 = vld [vmem:[%s9773_s29 + $0x3ea] sm:$0xff]  ;;  %v6098_v28 = vpack.c.bf16 %v9352_v58, %v9351_v21 }
 0x7d6   : > { %9035 = vmatmul.msk.bf16.gmra.mxu1 %vm577_vm0, %v12265_v61  ;;  %8098 = vst.msk [vmem:[%s11451_s10 + $0x230] sm:$0xff] %vm577_vm0, %v7970_v53  ;;  %v7583_v44 = vadd.f32 %v7369_v50, %v6725_v54  ;;  %9239 = vmatmul.msk.bf16.gmra.mxu2 %vm577_vm0, %v5238_v23  ;;  %v9556_v23 = vld [vmem:[%s9773_s29 + $0x3f2] sm:$0xff] }
 0x7d7   : > { %9443 = vmatmul.msk.bf16.gmra.mxu3 %vm577_vm0, %v6096_v24  ;;  %9647 = vmatmul.msk.bf16.gmra.mxu0 %vm577_vm0, %v12313_v33 }
 0x7d8   : > { %v7713_v27 = vmul.f32 %v12124_v15, %v7583_v44 }
 0x7d9   : > { %v5656_v61 = vpop.f32.mrf.mxu2 }
 0x7da   : > { %v6514_v47 = vpop.f32.mrf.mxu3  ;;  %v7843_v32 = vadd.f32 %v12131_v8, %v7713_v27  ;;  %v5868_v26 = vadd.f32 %v5656_v61, %v5009_v57  ;;  %v5240_v27 = vpack.c.bf16 %v9148_v10, %v9147_v25  ;;  %v12361_v57 = vpack.c.bf16 %v9556_v23, %v9555_v63  ;;  %v9152_v63 = vld [vmem:[%s9773_s29 + $0x418] sm:$0xff] }
 0x7db   : > { %v4799_v14 = vpop.f32.mrf.mxu1  ;;  %v9355_v23 = vld [vmem:[%s9773_s29 + $0x411] sm:$0xff] }
 0x7dc   : > { %v7971_v13 = vmax.f32 %v7843_v32, 0.0  ;;  %v6726_v2 = vadd.f32 %v6514_v47, %v5868_v26  ;;  %v7374_v34 = vpop.f32.mrf.mxu0  ;;  %v5010_v41 = vadd.f32 %v4799_v14, %v13197_v18 }
 0x7de   : > { %8099 = vst.msk [vmem:[%s11451_s10 + $0x238] sm:$0xff] %vm577_vm0, %v7971_v13  ;;  %v7584_v55 = vadd.f32 %v7372_v56, %v6726_v2  ;;  %v13200_v13 = vld [vmem:[#allocation28_spill] sm:$0xff] }
 0x7e0   : > { %v7714_v9 = vmul.f32 %v12124_v15, %v7584_v55 }
 0x7e1   : > { %v5658_v37 = vpop.f32.mrf.mxu2 }
 0x7e2   : > { %v6516_v40 = vpop.f32.mrf.mxu3  ;;  %v7844_v5 = vadd.f32 %v12131_v8, %v7714_v9  ;;  %v5869_v39 = vadd.f32 %v5658_v37, %v5010_v41  ;;  %v9149_v41 = vld [vmem:[%s9773_s29 + $0x3f8] sm:$0xff]  ;;  %v9354_v37 = vld [vmem:[%s9773_s29 + $0x401] sm:$0xff] }
 0x7e3   : > { %v4802_v20 = vpop.f32.mrf.mxu1 }
 0x7e4   : > { %v7972_v38 = vmax.f32 %v7844_v5, 0.0  ;;  %v6727_v36 = vadd.f32 %v6516_v40, %v5869_v39  ;;  %v7377_v60 = vpop.f32.mrf.mxu0  ;;  %v5011_v43 = vadd.f32 %v4802_v20, %v13198_v30  ;;  %v13201_v5 = vld [vmem:[#allocation31_spill] sm:$0xff]  ;;  %v9557_v20 = vld [vmem:[%s9773_s29 + $0x3fa] sm:$0xff]  ;;  %v6099_v30 = vpack.c.bf16 %v9354_v37, %v9353_v59 }
 0x7e6   : > { %9036 = vmatmul.msk.bf16.gmra.mxu1 %vm577_vm0, %v12289_v42  ;;  %8100 = vst.msk [vmem:[%s11451_s10 + $0x240] sm:$0xff] %vm577_vm0, %v7972_v38  ;;  %v7585_v12 = vadd.f32 %v7374_v34, %v6727_v36  ;;  %9240 = vmatmul.msk.bf16.gmra.mxu2 %vm577_vm0, %v5239_v1  ;;  %v9558_v1 = vld [vmem:[%s9773_s29 + $0x402] sm:$0xff] }
 0x7e7   : > { %9444 = vmatmul.msk.bf16.gmra.mxu3 %vm577_vm0, %v6097_v52  ;;  %9648 = vmatmul.msk.bf16.gmra.mxu0 %vm577_vm0, %v12337_v4 }
 0x7e8   : > { %v7715_v19 = vmul.f32 %v12124_v15, %v7585_v12 }
 0x7e9   : > { %v5661_v42 = vpop.f32.mrf.mxu2 }
 0x7ea   : > { %v6519_v50 = vpop.f32.mrf.mxu3  ;;  %v7845_v0 = vadd.f32 %v12131_v8, %v7715_v19  ;;  %v5870_v22 = vadd.f32 %v5661_v42, %v5011_v43  ;;  %v5241_v19 = vpack.c.bf16 %v9150_v35, %v9149_v41  ;;  %v12385_v43 = vpack.c.bf16 %v9558_v1, %v9557_v20  ;;  %v9154_v20 = vld [vmem:[%s9773_s29 + $0x428] sm:$0xff] }
 0x7eb   : > { %v4804_v45 = vpop.f32.mrf.mxu1  ;;  %v9357_v1 = vld [vmem:[%s9773_s29 + $0x421] sm:$0xff] }
 0x7ec   : > { %v7973_v51 = vmax.f32 %v7845_v0, 0.0  ;;  %v6728_v62 = vadd.f32 %v6519_v50, %v5870_v22  ;;  %v7379_v31 = vpop.f32.mrf.mxu0  ;;  %v5012_v3 = vadd.f32 %v4804_v45, %v13199_v16 }
 0x7ee   : > { %8101 = vst.msk [vmem:[%s11451_s10 + $0x248] sm:$0xff] %vm577_vm0, %v7973_v51  ;;  %v7586_v17 = vadd.f32 %v7377_v60, %v6728_v62  ;;  %v13202_v51 = vld [vmem:[#allocation34_spill] sm:$0xff] }
 0x7f0   : > { %v7716_v49 = vmul.f32 %v12124_v15, %v7586_v17 }
 0x7f1   : > { %v5663_v24 = vpop.f32.mrf.mxu2 }
 0x7f2   : > { %v6521_v53 = vpop.f32.mrf.mxu3  ;;  %v7846_v54 = vadd.f32 %v12131_v8, %v7716_v49  ;;  %v5871_v56 = vadd.f32 %v5663_v24, %v5012_v3  ;;  %v9151_v3 = vld [vmem:[%s9773_s29 + $0x410] sm:$0xff]  ;;  %v9356_v24 = vld [vmem:[%s9773_s29 + $0x419] sm:$0xff] }
 0x7f3   : > { %v4807_v44 = vpop.f32.mrf.mxu1 }
 0x7f4   : > { %v7974_v61 = vmax.f32 %v7846_v54, 0.0  ;;  %v6729_v47 = vadd.f32 %v6521_v53, %v5871_v56  ;;  %v7382_v32 = vpop.f32.mrf.mxu0  ;;  %v5013_v2 = vadd.f32 %v4807_v44, %v13200_v13  ;;  %v13203_v54 = vld [vmem:[#allocation37_spill] sm:$0xff]  ;;  %v6100_v13 = vpack.c.bf16 %v9356_v24, %v9355_v23 }
 0x7f5   : > { %v9559_v44 = vld [vmem:[%s9773_s29 + $0x412] sm:$0xff] }
 0x7f6   : > { %9037 = vmatmul.msk.bf16.gmra.mxu1 %vm577_vm0, %v12313_v33  ;;  %8102 = vst.msk [vmem:[%s11451_s10 + $0x250] sm:$0xff] %vm577_vm0, %v7974_v61  ;;  %v7587_v26 = vadd.f32 %v7379_v31, %v6729_v47  ;;  %9241 = vmatmul.msk.bf16.gmra.mxu2 %vm577_vm0, %v5240_v27  ;;  %v9560_v27 = vld [vmem:[%s9773_s29 + $0x41a] sm:$0xff] }
 0x7f7   : > { %9445 = vmatmul.msk.bf16.gmra.mxu3 %vm577_vm0, %v6098_v28  ;;  %9649 = vmatmul.msk.bf16.gmra.mxu0 %vm577_vm0, %v12361_v57 }
 0x7f8   : > { %v7717_v14 = vmul.f32 %v12124_v15, %v7587_v26 }
 0x7f9   : > { %v5666_v33 = vpop.f32.mrf.mxu2 }
 0x7fa   : > { %v6524_v34 = vpop.f32.mrf.mxu3  ;;  %v7847_v55 = vadd.f32 %v12131_v8, %v7717_v14  ;;  %v5872_v29 = vadd.f32 %v5666_v33, %v5013_v2  ;;  %v5242_v14 = vpack.c.bf16 %v9152_v63, %v9151_v3  ;;  %v12409_v2 = vpack.c.bf16 %v9560_v27, %v9559_v44  ;;  %v9156_v44 = vld [vmem:[%s9773_s29 + $0x440] sm:$0xff] }
 0x7fb   : > { %v4809_v46 = vpop.f32.mrf.mxu1  ;;  %v9359_v27 = vld [vmem:[%s9773_s29 + $0x439] sm:$0xff] }
 0x7fc   : > { %v7975_v11 = vmax.f32 %v7847_v55, 0.0  ;;  %v6730_v7 = vadd.f32 %v6524_v34, %v5872_v29  ;;  %v7384_v9 = vpop.f32.mrf.mxu0  ;;  %v5014_v39 = vadd.f32 %v4809_v46, %v13201_v5 }
 0x7fe   : > { %8103 = vst.msk [vmem:[%s11451_s10 + $0x258] sm:$0xff] %vm577_vm0, %v7975_v11  ;;  %v7588_v18 = vadd.f32 %v7382_v32, %v6730_v7  ;;  %v13204_v11 = vld [vmem:[#allocation40_spill] sm:$0xff] }
 0x800   : > { %v7718_v40 = vmul.f32 %v12124_v15, %v7588_v18 }
 0x801   : > { %v5668_v52 = vpop.f32.mrf.mxu2 }
 0x802   : > { %v6526_v38 = vpop.f32.mrf.mxu3  ;;  %v7848_v36 = vadd.f32 %v12131_v8, %v7718_v40  ;;  %v5873_v60 = vadd.f32 %v5668_v52, %v5014_v39  ;;  %v9153_v39 = vld [vmem:[%s9773_s29 + $0x420] sm:$0xff]  ;;  %v9358_v52 = vld [vmem:[%s9773_s29 + $0x429] sm:$0xff] }
 0x803   : > { %v4812_v12 = vpop.f32.mrf.mxu1 }
 0x804   : > { %v7976_v42 = vmax.f32 %v7848_v36, 0.0  ;;  %v6731_v50 = vadd.f32 %v6526_v38, %v5873_v60  ;;  %v7387_v0 = vpop.f32.mrf.mxu0  ;;  %v5015_v62 = vadd.f32 %v4812_v12, %v13202_v51  ;;  %v13205_v36 = vld [vmem:[#allocation43_spill] sm:$0xff]  ;;  %v6101_v51 = vpack.c.bf16 %v9358_v52, %v9357_v1 }
 0x805   : > { %v9561_v12 = vld [vmem:[%s9773_s29 + $0x422] sm:$0xff] }
 0x806   : > { %9038 = vmatmul.msk.bf16.gmra.mxu1 %vm577_vm0, %v12337_v4  ;;  %8104 = vst.msk [vmem:[%s11451_s10 + $0x260] sm:$0xff] %vm577_vm0, %v7976_v42  ;;  %v7589_v22 = vadd.f32 %v7384_v9, %v6731_v50  ;;  %9242 = vmatmul.msk.bf16.gmra.mxu2 %vm577_vm0, %v5241_v19  ;;  %v9562_v19 = vld [vmem:[%s9773_s29 + $0x42a] sm:$0xff] }
 0x807   : > { %9446 = vmatmul.msk.bf16.gmra.mxu3 %vm577_vm0, %v6099_v30  ;;  %9650 = vmatmul.msk.bf16.gmra.mxu0 %vm577_vm0, %v12385_v43 }
 0x808   : > { %v7719_v45 = vmul.f32 %v12124_v15, %v7589_v22 }
 0x809   : > { %v5671_v4 = vpop.f32.mrf.mxu2 }
 0x80a   : > { %v6529_v31 = vpop.f32.mrf.mxu3  ;;  %v7849_v17 = vadd.f32 %v12131_v8, %v7719_v45  ;;  %v5874_v25 = vadd.f32 %v5671_v4, %v5015_v62  ;;  %v5243_v45 = vpack.c.bf16 %v9154_v20, %v9153_v39  ;;  %v12433_v62 = vpack.c.bf16 %v9562_v19, %v9561_v12  ;;  %v9158_v12 = vld [vmem:[%s9773_s29 + $0x450] sm:$0xff] }
 0x80b   : > { %v4814_v10 = vpop.f32.mrf.mxu1  ;;  %v9361_v19 = vld [vmem:[%s9773_s29 + $0x449] sm:$0xff] }
 0x80c   : > { %v7977_v21 = vmax.f32 %v7849_v17, 0.0  ;;  %v6732_v58 = vadd.f32 %v6529_v31, %v5874_v25  ;;  %v7389_v49 = vpop.f32.mrf.mxu0  ;;  %v5016_v56 = vadd.f32 %v4814_v10, %v13203_v54 }
 0x80e   : > { %8105 = vst.msk [vmem:[%s11451_s10 + $0x268] sm:$0xff] %vm577_vm0, %v7977_v21  ;;  %v7590_v16 = vadd.f32 %v7387_v0, %v6732_v58  ;;  %v13206_v21 = vld [vmem:[#allocation46_spill] sm:$0xff] }
 0x810   : > { %v7720_v53 = vmul.f32 %v12124_v15, %v7590_v16 }
 0x811   : > { %v5673_v28 = vpop.f32.mrf.mxu2 }
 0x812   : > { %v6531_v61 = vpop.f32.mrf.mxu3  ;;  %v7850_v47 = vadd.f32 %v12131_v8, %v7720_v53  ;;  %v5875_v32 = vadd.f32 %v5673_v28, %v5016_v56  ;;  %v9155_v56 = vld [vmem:[%s9773_s29 + $0x438] sm:$0xff]  ;;  %v9360_v28 = vld [vmem:[%s9773_s29 + $0x441] sm:$0xff] }
 0x813   : > { %v4817_v26 = vpop.f32.mrf.mxu1 }
 0x814   : > { %v7978_v33 = vmax.f32 %v7850_v47, 0.0  ;;  %v6733_v34 = vadd.f32 %v6531_v61, %v5875_v32  ;;  %v7392_v55 = vpop.f32.mrf.mxu0  ;;  %v5017_v7 = vadd.f32 %v4817_v26, %v13204_v11  ;;  %v13207_v47 = vld [vmem:[#allocation49_spill] sm:$0xff]  ;;  %v6102_v11 = vpack.c.bf16 %v9360_v28, %v9359_v27 }
 0x815   : > { %v9563_v26 = vld [vmem:[%s9773_s29 + $0x43a] sm:$0xff] }
 0x816   : > { %9039 = vmatmul.msk.bf16.gmra.mxu1 %vm577_vm0, %v12361_v57  ;;  %8106 = vst.msk [vmem:[%s11451_s10 + $0x270] sm:$0xff] %vm577_vm0, %v7978_v33  ;;  %v7591_v29 = vadd.f32 %v7389_v49, %v6733_v34  ;;  %9243 = vmatmul.msk.bf16.gmra.mxu2 %vm577_vm0, %v5242_v14  ;;  %v9564_v14 = vld [vmem:[%s9773_s29 + $0x442] sm:$0xff] }
 0x817   : > { %9447 = vmatmul.msk.bf16.gmra.mxu3 %vm577_vm0, %v6100_v13  ;;  %9651 = vmatmul.msk.bf16.gmra.mxu0 %vm577_vm0, %v12409_v2 }
 0x818   : > { %v7721_v46 = vmul.f32 %v12124_v15, %v7591_v29 }
 0x819   : > { %v5676_v57 = vpop.f32.mrf.mxu2 }
 0x81a   : > { %v6534_v9 = vpop.f32.mrf.mxu3  ;;  %v7851_v18 = vadd.f32 %v12131_v8, %v7721_v46  ;;  %v5876_v41 = vadd.f32 %v5676_v57, %v5017_v7  ;;  %v5244_v46 = vpack.c.bf16 %v9156_v44, %v9155_v56  ;;  %v12457_v7 = vpack.c.bf16 %v9564_v14, %v9563_v26  ;;  %v9160_v26 = vld [vmem:[%s9773_s29 + $0x468] sm:$0xff] }
 0x81b   : > { %v4819_v35 = vpop.f32.mrf.mxu1  ;;  %v9363_v14 = vld [vmem:[%s9773_s29 + $0x461] sm:$0xff] }
 0x81c   : > { %v7979_v59 = vmax.f32 %v7851_v18, 0.0  ;;  %v6734_v37 = vadd.f32 %v6534_v9, %v5876_v41  ;;  %v7394_v40 = vpop.f32.mrf.mxu0  ;;  %v5018_v60 = vadd.f32 %v4819_v35, %v13205_v36  ;;  %v13208_v41 = vld [vmem:[#allocation52_spill] sm:$0xff] }
 0x81e   : > { %8107 = vst.msk [vmem:[%s11451_s10 + $0x278] sm:$0xff] %vm577_vm0, %v7979_v59  ;;  %v7592_v5 = vadd.f32 %v7392_v55, %v6734_v37 }
 0x820   : > { %v7722_v38 = vmul.f32 %v12124_v15, %v7592_v5 }
 0x821   : > { %v5678_v30 = vpop.f32.mrf.mxu2 }
 0x822   : > { %v6536_v42 = vpop.f32.mrf.mxu3  ;;  %v7852_v50 = vadd.f32 %v12131_v8, %v7722_v38  ;;  %v5877_v0 = vadd.f32 %v5678_v30, %v5018_v60  ;;  %v9157_v60 = vld [vmem:[%s9773_s29 + $0x448] sm:$0xff]  ;;  %v9362_v30 = vld [vmem:[%s9773_s29 + $0x451] sm:$0xff] }
 0x823   : > { %v4822_v22 = vpop.f32.mrf.mxu1 }
 0x824   : > { %v7980_v4 = vmax.f32 %v7852_v50, 0.0  ;;  %v6735_v31 = vadd.f32 %v6536_v42, %v5877_v0  ;;  %v7397_v17 = vpop.f32.mrf.mxu0  ;;  %v5019_v58 = vadd.f32 %v4822_v22, %v13206_v21  ;;  %v13209_v50 = vld [vmem:[#allocation55_spill] sm:$0xff]  ;;  %v6103_v21 = vpack.c.bf16 %v9362_v30, %v9361_v19 }
 0x825   : > { %v9565_v22 = vld [vmem:[%s9773_s29 + $0x44a] sm:$0xff] }
 0x826   : > { %9040 = vmatmul.msk.bf16.gmra.mxu1 %vm577_vm0, %v12385_v43  ;;  %8108 = vst.msk [vmem:[%s11451_s10 + $0x280] sm:$0xff] %vm577_vm0, %v7980_v4  ;;  %v7593_v25 = vadd.f32 %v7394_v40, %v6735_v31  ;;  %9244 = vmatmul.msk.bf16.gmra.mxu2 %vm577_vm0, %v5243_v45  ;;  %v12477_v40 = vld [vmem:[%s12892_s2 + $0x1] ss:$0 sm:$0xff]  ;;  %v9566_v45 = vld [vmem:[%s9773_s29 + $0x452] sm:$0xff] }
 0x827   : > { %9448 = vmatmul.msk.bf16.gmra.mxu3 %vm577_vm0, %v6101_v51  ;;  %9652 = vmatmul.msk.bf16.gmra.mxu0 %vm577_vm0, %v12433_v62 }
 0x828   : > { %v7723_v10 = vmul.f32 %v12124_v15, %v7593_v25 }
 0x829   : > { %v5681_v43 = vpop.f32.mrf.mxu2 }
 0x82a   : > { %v6539_v49 = vpop.f32.mrf.mxu3  ;;  %v7853_v16 = vadd.f32 %v12131_v8, %v7723_v10  ;;  %v5878_v3 = vadd.f32 %v5681_v43, %v5019_v58  ;;  %v5245_v10 = vpack.c.bf16 %v9158_v12, %v9157_v60  ;;  %v12491_v58 = vpack.c.bf16 %v9566_v45, %v9565_v22  ;;  %v9162_v22 = vld [vmem:[%s9773_s29 + $0x478] sm:$0xff] }
 0x82b   : > { %v4824_v63 = vpop.f32.mrf.mxu1  ;;  %v9365_v45 = vld [vmem:[%s9773_s29 + $0x471] sm:$0xff] }
 0x82c   : > { %v7981_v23 = vmax.f32 %v7853_v16, 0.0  ;;  %v6736_v24 = vadd.f32 %v6539_v49, %v5878_v3  ;;  %v7399_v53 = vpop.f32.mrf.mxu0  ;;  %v5020_v32 = vadd.f32 %v4824_v63, %v13207_v47 }
 0x82e   : > { %8109 = vst.msk [vmem:[%s11451_s10 + $0x288] sm:$0xff] %vm577_vm0, %v7981_v23  ;;  %v7594_v54 = vadd.f32 %v7397_v17, %v6736_v24  ;;  %v13210_v23 = vld [vmem:[#allocation58_spill] sm:$0xff] }
 0x830   : > { %v7724_v61 = vmul.f32 %v12124_v15, %v7594_v54 }
 0x831   : > { %v5683_v13 = vpop.f32.mrf.mxu2 }
 0x832   : > { %v6541_v33 = vpop.f32.mrf.mxu3  ;;  %v7854_v34 = vadd.f32 %v12131_v8, %v7724_v61  ;;  %v5879_v55 = vadd.f32 %v5683_v13, %v5020_v32  ;;  %v12470_v8 = vld [vmem:[%s12892_s2] ss:$0 sm:$0xff]  ;;  %v9364_v13 = vld [vmem:[%s9773_s29 + $0x469] sm:$0xff] }
 0x833   : > { %v4827_v29 = vpop.f32.mrf.mxu1  ;;  %v9159_v32 = vld [vmem:[%s9773_s29 + $0x460] sm:$0xff] }
 0x834   : > { %v7982_v57 = vmax.f32 %v7854_v34, 0.0  ;;  %v6737_v9 = vadd.f32 %v6541_v33, %v5879_v55  ;;  %v7402_v18 = vpop.f32.mrf.mxu0  ;;  %v5021_v35 = vadd.f32 %v4827_v29, %v13208_v41  ;;  %v13211_v34 = vld [vmem:[#allocation61_spill] sm:$0xff]  ;;  %v9567_v29 = vld [vmem:[%s9773_s29 + $0x462] sm:$0xff]  ;;  %v6104_v41 = vpack.c.bf16 %v9364_v13, %v9363_v14 }
 0x836   : > { %9041 = vmatmul.msk.bf16.gmra.mxu1 %vm577_vm0, %v12409_v2  ;;  %8110 = vst.msk [vmem:[%s11451_s10 + $0x290] sm:$0xff] %vm577_vm0, %v7982_v57  ;;  %v7595_v15 = vadd.f32 %v7399_v53, %v6737_v9  ;;  %9245 = vmatmul.msk.bf16.gmra.mxu2 %vm577_vm0, %v5244_v46  ;;  %v9568_v46 = vld [vmem:[%s9773_s29 + $0x46a] sm:$0xff] }
 0x837   : > { %9449 = vmatmul.msk.bf16.gmra.mxu3 %vm577_vm0, %v6102_v11  ;;  %9653 = vmatmul.msk.bf16.gmra.mxu0 %vm577_vm0, %v12457_v7 }
 0x838   : > { %v7725_v2 = vmul.f32 %v12470_v8, %v7595_v15 }
 0x839   : > { %v5686_v59 = vpop.f32.mrf.mxu2 }
 0x83a   : > { %v6544_v37 = vpop.f32.mrf.mxu3  ;;  %v7855_v5 = vadd.f32 %v12477_v40, %v7725_v2  ;;  %v5880_v39 = vadd.f32 %v5686_v59, %v5021_v35  ;;  %v5246_v2 = vpack.c.bf16 %v9160_v26, %v9159_v32  ;;  %v12515_v35 = vpack.c.bf16 %v9568_v46, %v9567_v29  ;;  %v9164_v29 = vld [vmem:[%s9773_s29 + $0x490] sm:$0xff] }
 0x83b   : > { %v4829_v20 = vpop.f32.mrf.mxu1  ;;  %v9367_v46 = vld [vmem:[%s9773_s29 + $0x489] sm:$0xff] }
 0x83c   : > { %v7983_v1 = vmax.f32 %v7855_v5, 0.0  ;;  %v6738_v52 = vadd.f32 %v6544_v37, %v5880_v39  ;;  %v7404_v38 = vpop.f32.mrf.mxu0  ;;  %v5022_v0 = vadd.f32 %v4829_v20, %v13209_v50 }
 0x83e   : > { %8111 = vst.msk [vmem:[%s11451_s10 + $0x298] sm:$0xff] %vm577_vm0, %v7983_v1  ;;  %v7596_v36 = vadd.f32 %v7402_v18, %v6738_v52  ;;  %v13212_v1 = vld [vmem:[#allocation64_spill] sm:$0xff] }
 0x840   : > { %v7726_v42 = vmul.f32 %v12470_v8, %v7596_v36 }
 0x841   : > { %v5688_v51 = vpop.f32.mrf.mxu2 }
 0x842   : > { %v6546_v4 = vpop.f32.mrf.mxu3  ;;  %v7856_v31 = vadd.f32 %v12477_v40, %v7726_v42  ;;  %v5881_v17 = vadd.f32 %v5688_v51, %v5022_v0  ;;  %v9161_v0 = vld [vmem:[%s9773_s29 + $0x470] sm:$0xff]  ;;  %v9366_v51 = vld [vmem:[%s9773_s29 + $0x479] sm:$0xff] }
 0x843   : > { %v4832_v25 = vpop.f32.mrf.mxu1 }
 0x844   : > { %v7984_v43 = vmax.f32 %v7856_v31, 0.0  ;;  %v6739_v49 = vadd.f32 %v6546_v4, %v5881_v17  ;;  %v7407_v16 = vpop.f32.mrf.mxu0  ;;  %v5023_v24 = vadd.f32 %v4832_v25, %v13210_v23  ;;  %v13213_v31 = vld [vmem:[#allocation67_spill] sm:$0xff]  ;;  %v9569_v25 = vld [vmem:[%s9773_s29 + $0x472] sm:$0xff]  ;;  %v6105_v23 = vpack.c.bf16 %v9366_v51, %v9365_v45 }
 0x846   : > { %9042 = vmatmul.msk.bf16.gmra.mxu1 %vm577_vm0, %v12433_v62  ;;  %8112 = vst.msk [vmem:[%s11451_s10 + $0x2a0] sm:$0xff] %vm577_vm0, %v7984_v43  ;;  %v7597_v3 = vadd.f32 %v7404_v38, %v6739_v49  ;;  %9246 = vmatmul.msk.bf16.gmra.mxu2 %vm577_vm0, %v5245_v10  ;;  %v9570_v10 = vld [vmem:[%s9773_s29 + $0x47a] sm:$0xff] }
 0x847   : > { %9450 = vmatmul.msk.bf16.gmra.mxu3 %vm577_vm0, %v6103_v21  ;;  %9654 = vmatmul.msk.bf16.gmra.mxu0 %vm577_vm0, %v12491_v58 }
 0x848   : > { %v7727_v63 = vmul.f32 %v12470_v8, %v7597_v3 }
 0x849   : > { %v5691_v62 = vpop.f32.mrf.mxu2 }
 0x84a   : > { %v6549_v53 = vpop.f32.mrf.mxu3  ;;  %v7857_v54 = vadd.f32 %v12477_v40, %v7727_v63  ;;  %v5882_v56 = vadd.f32 %v5691_v62, %v5023_v24  ;;  %v5247_v63 = vpack.c.bf16 %v9162_v22, %v9161_v0  ;;  %v12539_v24 = vpack.c.bf16 %v9570_v10, %v9569_v25  ;;  %v9166_v25 = vld [vmem:[%s9773_s29 + $0x4a0] sm:$0xff] }
 0x84b   : > { %v4834_v44 = vpop.f32.mrf.mxu1  ;;  %v9369_v10 = vld [vmem:[%s9773_s29 + $0x499] sm:$0xff] }
 0x84c   : > { %v7985_v27 = vmax.f32 %v7857_v54, 0.0  ;;  %v6740_v28 = vadd.f32 %v6549_v53, %v5882_v56  ;;  %v7409_v61 = vpop.f32.mrf.mxu0  ;;  %v5024_v55 = vadd.f32 %v4834_v44, %v13211_v34 }
 0x84e   : > { %8113 = vst.msk [vmem:[%s11451_s10 + $0x2a8] sm:$0xff] %vm577_vm0, %v7985_v27  ;;  %v7598_v47 = vadd.f32 %v7407_v16, %v6740_v28  ;;  %v13214_v27 = vld [vmem:[#allocation70_spill] sm:$0xff] }
 0x850   : > { %v7728_v33 = vmul.f32 %v12470_v8, %v7598_v47 }
 0x851   : > { %v5693_v11 = vpop.f32.mrf.mxu2 }
 0x852   : > { %v6551_v57 = vpop.f32.mrf.mxu3  ;;  %v7858_v9 = vadd.f32 %v12477_v40, %v7728_v33  ;;  %v5883_v18 = vadd.f32 %v5693_v11, %v5024_v55  ;;  %v9163_v55 = vld [vmem:[%s9773_s29 + $0x488] sm:$0xff]  ;;  %v9368_v11 = vld [vmem:[%s9773_s29 + $0x491] sm:$0xff] }
 0x853   : > { %v4837_v15 = vpop.f32.mrf.mxu1 }
 0x854   : > { %v7986_v59 = vmax.f32 %v7858_v9, 0.0  ;;  %v6741_v37 = vadd.f32 %v6551_v57, %v5883_v18  ;;  %v7412_v5 = vpop.f32.mrf.mxu0  ;;  %v5025_v52 = vadd.f32 %v4837_v15, %v13212_v1  ;;  %v13215_v9 = vld [vmem:[#allocation73_spill] sm:$0xff]  ;;  %v9571_v15 = vld [vmem:[%s9773_s29 + $0x48a] sm:$0xff]  ;;  %v6106_v1 = vpack.c.bf16 %v9368_v11, %v9367_v46 }
 0x856   : > { %9043 = vmatmul.msk.bf16.gmra.mxu1 %vm577_vm0, %v12457_v7  ;;  %8114 = vst.msk [vmem:[%s11451_s10 + $0x2b0] sm:$0xff] %vm577_vm0, %v7986_v59  ;;  %v7599_v39 = vadd.f32 %v7409_v61, %v6741_v37  ;;  %9247 = vmatmul.msk.bf16.gmra.mxu2 %vm577_vm0, %v5246_v2  ;;  %v9572_v2 = vld [vmem:[%s9773_s29 + $0x492] sm:$0xff] }
 0x857   : > { %9451 = vmatmul.msk.bf16.gmra.mxu3 %vm577_vm0, %v6104_v41  ;;  %9655 = vmatmul.msk.bf16.gmra.mxu0 %vm577_vm0, %v12515_v35 }
 0x858   : > { %v7729_v20 = vmul.f32 %v12470_v8, %v7599_v39 }
 0x859   : > { %v5696_v7 = vpop.f32.mrf.mxu2 }
 0x85a   : > { %v6554_v38 = vpop.f32.mrf.mxu3  ;;  %v7859_v36 = vadd.f32 %v12477_v40, %v7729_v20  ;;  %v5884_v60 = vadd.f32 %v5696_v7, %v5025_v52  ;;  %v5248_v20 = vpack.c.bf16 %v9164_v29, %v9163_v55  ;;  %v12563_v52 = vpack.c.bf16 %v9572_v2, %v9571_v15  ;;  %v9168_v15 = vld [vmem:[%s9773_s29 + $0x4b8] sm:$0xff] }
 0x85b   : > { %v4839_v12 = vpop.f32.mrf.mxu1  ;;  %v9371_v2 = vld [vmem:[%s9773_s29 + $0x4b1] sm:$0xff] }
 0x85c   : > { %v7987_v19 = vmax.f32 %v7859_v36, 0.0  ;;  %v6742_v30 = vadd.f32 %v6554_v38, %v5884_v60  ;;  %v7414_v42 = vpop.f32.mrf.mxu0  ;;  %v5026_v17 = vadd.f32 %v4839_v12, %v13213_v31 }
 0x85e   : > { %8115 = vst.msk [vmem:[%s11451_s10 + $0x2b8] sm:$0xff] %vm577_vm0, %v7987_v19  ;;  %v7600_v50 = vadd.f32 %v7412_v5, %v6742_v30  ;;  %v13216_v19 = vld [vmem:[#allocation76_spill] sm:$0xff] }
 0x860   : > { %v7730_v4 = vmul.f32 %v12470_v8, %v7600_v50 }
 0x861   : > { %v5698_v21 = vpop.f32.mrf.mxu2 }
 0x862   : > { %v6556_v43 = vpop.f32.mrf.mxu3  ;;  %v7860_v49 = vadd.f32 %v12477_v40, %v7730_v4  ;;  %v5885_v16 = vadd.f32 %v5698_v21, %v5026_v17  ;;  %v9165_v17 = vld [vmem:[%s9773_s29 + $0x498] sm:$0xff]  ;;  %v9370_v21 = vld [vmem:[%s9773_s29 + $0x4a1] sm:$0xff] }
 0x863   : > { %v4842_v3 = vpop.f32.mrf.mxu1 }
 0x864   : > { %v7988_v62 = vmax.f32 %v7860_v49, 0.0  ;;  %v6743_v53 = vadd.f32 %v6556_v43, %v5885_v16  ;;  %v7417_v54 = vpop.f32.mrf.mxu0  ;;  %v5027_v28 = vadd.f32 %v4842_v3, %v13214_v27  ;;  %v13217_v49 = vld [vmem:[#allocation79_spill] sm:$0xff]  ;;  %v9573_v3 = vld [vmem:[%s9773_s29 + $0x49a] sm:$0xff]  ;;  %v6107_v27 = vpack.c.bf16 %v9370_v21, %v9369_v10 }
 0x866   : > { %9044 = vmatmul.msk.bf16.gmra.mxu1 %vm577_vm0, %v12491_v58  ;;  %8116 = vst.msk [vmem:[%s11451_s10 + $0x2c0] sm:$0xff] %vm577_vm0, %v7988_v62  ;;  %v7601_v56 = vadd.f32 %v7414_v42, %v6743_v53  ;;  %9248 = vmatmul.msk.bf16.gmra.mxu2 %vm577_vm0, %v5247_v63  ;;  %v9574_v63 = vld [vmem:[%s9773_s29 + $0x4a2] sm:$0xff] }
 0x867   : > { %9452 = vmatmul.msk.bf16.gmra.mxu3 %vm577_vm0, %v6105_v23  ;;  %9656 = vmatmul.msk.bf16.gmra.mxu0 %vm577_vm0, %v12539_v24 }
 0x868   : > { %v7731_v44 = vmul.f32 %v12470_v8, %v7601_v56 }
 0x869   : > { %v5701_v58 = vpop.f32.mrf.mxu2 }
 0x86a   : > { %v6559_v61 = vpop.f32.mrf.mxu3  ;;  %v7861_v47 = vadd.f32 %v12477_v40, %v7731_v44  ;;  %v5886_v32 = vadd.f32 %v5701_v58, %v5027_v28  ;;  %v5249_v44 = vpack.c.bf16 %v9166_v25, %v9165_v17  ;;  %v12587_v28 = vpack.c.bf16 %v9574_v63, %v9573_v3  ;;  %v9170_v3 = vld [vmem:[%s9773_s29 + $0x4c8] sm:$0xff] }
 0x86b   : > { %v4844_v26 = vpop.f32.mrf.mxu1  ;;  %v9373_v63 = vld [vmem:[%s9773_s29 + $0x4c1] sm:$0xff] }
 0x86c   : > { %v7989_v14 = vmax.f32 %v7861_v47, 0.0  ;;  %v6744_v13 = vadd.f32 %v6559_v61, %v5886_v32  ;;  %v7419_v33 = vpop.f32.mrf.mxu0  ;;  %v5028_v18 = vadd.f32 %v4844_v26, %v13215_v9 }
 0x86e   : > { %8117 = vst.msk [vmem:[%s11451_s10 + $0x2c8] sm:$0xff] %vm577_vm0, %v7989_v14  ;;  %v7602_v34 = vadd.f32 %v7417_v54, %v6744_v13  ;;  %v13218_v14 = vld [vmem:[#allocation82_spill] sm:$0xff] }
 0x870   : > { %v7732_v57 = vmul.f32 %v12470_v8, %v7602_v34 }
 0x871   : > { %v5703_v41 = vpop.f32.mrf.mxu2 }
 0x872   : > { %v6561_v59 = vpop.f32.mrf.mxu3  ;;  %v7862_v37 = vadd.f32 %v12477_v40, %v7732_v57  ;;  %v5887_v5 = vadd.f32 %v5703_v41, %v5028_v18  ;;  %v9167_v18 = vld [vmem:[%s9773_s29 + $0x4b0] sm:$0xff]  ;;  %v9372_v41 = vld [vmem:[%s9773_s29 + $0x4b9] sm:$0xff] }
 0x873   : > { %v4847_v39 = vpop.f32.mrf.mxu1 }
 0x874   : > { %v7990_v7 = vmax.f32 %v7862_v37, 0.0  ;;  %v6745_v38 = vadd.f32 %v6561_v59, %v5887_v5  ;;  %v7422_v36 = vpop.f32.mrf.mxu0  ;;  %v5029_v30 = vadd.f32 %v4847_v39, %v13216_v19  ;;  %v13219_v37 = vld [vmem:[#allocation85_spill] sm:$0xff]  ;;  %v6108_v19 = vpack.c.bf16 %v9372_v41, %v9371_v2 }
 0x875   : > { %v9575_v39 = vld [vmem:[%s9773_s29 + $0x4b2] sm:$0xff] }
 0x876   : > { %9045 = vmatmul.msk.bf16.gmra.mxu1 %vm577_vm0, %v12515_v35  ;;  %8118 = vst.msk [vmem:[%s11451_s10 + $0x2d0] sm:$0xff] %vm577_vm0, %v7990_v7  ;;  %v7603_v60 = vadd.f32 %v7419_v33, %v6745_v38  ;;  %9249 = vmatmul.msk.bf16.gmra.mxu2 %vm577_vm0, %v5248_v20  ;;  %v9576_v20 = vld [vmem:[%s9773_s29 + $0x4ba] sm:$0xff] }
 0x877   : > { %9453 = vmatmul.msk.bf16.gmra.mxu3 %vm577_vm0, %v6106_v1  ;;  %9657 = vmatmul.msk.bf16.gmra.mxu0 %vm577_vm0, %v12563_v52 }
 0x878   : > { %v7733_v12 = vmul.f32 %v12470_v8, %v7603_v60 }
 0x879   : > { %v5706_v35 = vpop.f32.mrf.mxu2 }
 0x87a   : > { %v6564_v42 = vpop.f32.mrf.mxu3  ;;  %v7863_v50 = vadd.f32 %v12477_v40, %v7733_v12  ;;  %v5888_v0 = vadd.f32 %v5706_v35, %v5029_v30  ;;  %v5250_v12 = vpack.c.bf16 %v9168_v15, %v9167_v18  ;;  %v12611_v30 = vpack.c.bf16 %v9576_v20, %v9575_v39  ;;  %v9172_v39 = vld [vmem:[%s9773_s29 + $0x4e0] sm:$0xff] }
 0x87b   : > { %v4849_v22 = vpop.f32.mrf.mxu1  ;;  %v9375_v20 = vld [vmem:[%s9773_s29 + $0x4d9] sm:$0xff] }
 0x87c   : > { %v7991_v45 = vmax.f32 %v7863_v50, 0.0  ;;  %v6746_v51 = vadd.f32 %v6564_v42, %v5888_v0  ;;  %v7424_v4 = vpop.f32.mrf.mxu0  ;;  %v5030_v16 = vadd.f32 %v4849_v22, %v13217_v49 }
 0x87e   : > { %8119 = vst.msk [vmem:[%s11451_s10 + $0x2d8] sm:$0xff] %vm577_vm0, %v7991_v45  ;;  %v7604_v31 = vadd.f32 %v7422_v36, %v6746_v51  ;;  %v13220_v45 = vld [vmem:[#allocation88_spill] sm:$0xff] }
 0x880   : > { %v7734_v43 = vmul.f32 %v12470_v8, %v7604_v31 }
 0x881   : > { %v5708_v23 = vpop.f32.mrf.mxu2 }
 0x882   : > { %v6566_v62 = vpop.f32.mrf.mxu3  ;;  %v7864_v53 = vadd.f32 %v12477_v40, %v7734_v43  ;;  %v5889_v54 = vadd.f32 %v5708_v23, %v5030_v16  ;;  %v9169_v16 = vld [vmem:[%s9773_s29 + $0x4c0] sm:$0xff]  ;;  %v9374_v23 = vld [vmem:[%s9773_s29 + $0x4c9] sm:$0xff] }
 0x883   : > { %v4852_v56 = vpop.f32.mrf.mxu1 }
 0x884   : > { %v7992_v58 = vmax.f32 %v7864_v53, 0.0  ;;  %v6747_v61 = vadd.f32 %v6566_v62, %v5889_v54  ;;  %v7427_v47 = vpop.f32.mrf.mxu0  ;;  %v5031_v13 = vadd.f32 %v4852_v56, %v13218_v14  ;;  %v13221_v53 = vld [vmem:[#allocation91_spill] sm:$0xff]  ;;  %v6109_v14 = vpack.c.bf16 %v9374_v23, %v9373_v63 }
 0x885   : > { %v9577_v56 = vld [vmem:[%s9773_s29 + $0x4c2] sm:$0xff] }
 0x886   : > { %9046 = vmatmul.msk.bf16.gmra.mxu1 %vm577_vm0, %v12539_v24  ;;  %8120 = vst.msk [vmem:[%s11451_s10 + $0x2e0] sm:$0xff] %vm577_vm0, %v7992_v58  ;;  %v7605_v32 = vadd.f32 %v7424_v4, %v6747_v61  ;;  %9250 = vmatmul.msk.bf16.gmra.mxu2 %vm577_vm0, %v5249_v44  ;;  %v9578_v44 = vld [vmem:[%s9773_s29 + $0x4ca] sm:$0xff] }
 0x887   : > { %9454 = vmatmul.msk.bf16.gmra.mxu3 %vm577_vm0, %v6107_v27  ;;  %9658 = vmatmul.msk.bf16.gmra.mxu0 %vm577_vm0, %v12587_v28 }
 0x888   : > { %v7735_v26 = vmul.f32 %v12470_v8, %v7605_v32 }
 0x889   : > { %v5711_v24 = vpop.f32.mrf.mxu2 }
 0x88a   : > { %v6569_v33 = vpop.f32.mrf.mxu3  ;;  %v7865_v34 = vadd.f32 %v12477_v40, %v7735_v26  ;;  %v5890_v55 = vadd.f32 %v5711_v24, %v5031_v13  ;;  %v5251_v26 = vpack.c.bf16 %v9170_v3, %v9169_v16  ;;  %v12635_v13 = vpack.c.bf16 %v9578_v44, %v9577_v56  ;;  %v9174_v56 = vld [vmem:[%s9773_s29 + $0x4f0] sm:$0xff] }
 0x88b   : > { %v4854_v29 = vpop.f32.mrf.mxu1  ;;  %v9377_v44 = vld [vmem:[%s9773_s29 + $0x4e9] sm:$0xff] }
 0x88c   : > { %v7993_v46 = vmax.f32 %v7865_v34, 0.0  ;;  %v6748_v11 = vadd.f32 %v6569_v33, %v5890_v55  ;;  %v7429_v57 = vpop.f32.mrf.mxu0  ;;  %v5032_v5 = vadd.f32 %v4854_v29, %v13219_v37 }
 0x88e   : > { %8121 = vst.msk [vmem:[%s11451_s10 + $0x2e8] sm:$0xff] %vm577_vm0, %v7993_v46  ;;  %v7606_v9 = vadd.f32 %v7427_v47, %v6748_v11  ;;  %v13222_v46 = vld [vmem:[#allocation3_spill] sm:$0xff] }
 0x890   : > { %v7736_v59 = vmul.f32 %v12470_v8, %v7606_v9 }
 0x891   : > { %v5713_v1 = vpop.f32.mrf.mxu2 }
 0x892   : > { %v6571_v7 = vpop.f32.mrf.mxu3  ;;  %v7866_v38 = vadd.f32 %v12477_v40, %v7736_v59  ;;  %v5891_v36 = vadd.f32 %v5713_v1, %v5032_v5  ;;  %v9171_v5 = vld [vmem:[%s9773_s29 + $0x4d8] sm:$0xff]  ;;  %v9376_v1 = vld [vmem:[%s9773_s29 + $0x4e1] sm:$0xff] }
 0x893   : > { %v4857_v60 = vpop.f32.mrf.mxu1 }
 0x894   : > { %v7994_v35 = vmax.f32 %v7866_v38, 0.0  ;;  %v6749_v42 = vadd.f32 %v6571_v7, %v5891_v36  ;;  %v7432_v50 = vpop.f32.mrf.mxu0  ;;  %v5033_v51 = vadd.f32 %v4857_v60, %v13220_v45  ;;  %v13223_v38 = vld [vmem:[#allocation5_spill] sm:$0xff]  ;;  %v6110_v45 = vpack.c.bf16 %v9376_v1, %v9375_v20 }
 0x895   : > { %v9579_v60 = vld [vmem:[%s9773_s29 + $0x4da] sm:$0xff] }
 0x896   : > { %9047 = vmatmul.msk.bf16.gmra.mxu1 %vm577_vm0, %v12563_v52  ;;  %8122 = vst.msk [vmem:[%s11451_s10 + $0x2f0] sm:$0xff] %vm577_vm0, %v7994_v35  ;;  %v7607_v0 = vadd.f32 %v7429_v57, %v6749_v42  ;;  %9251 = vmatmul.msk.bf16.gmra.mxu2 %vm577_vm0, %v5250_v12  ;;  %v9580_v12 = vld [vmem:[%s9773_s29 + $0x4e2] sm:$0xff] }
 0x897   : > { %9455 = vmatmul.msk.bf16.gmra.mxu3 %vm577_vm0, %v6108_v19  ;;  %9659 = vmatmul.msk.bf16.gmra.mxu0 %vm577_vm0, %v12611_v30 }
 0x898   : > { %v7737_v22 = vmul.f32 %v12470_v8, %v7607_v0 }
 0x899   : > { %v5716_v52 = vpop.f32.mrf.mxu2 }
 0x89a   : > { %v6574_v4 = vpop.f32.mrf.mxu3  ;;  %v7867_v31 = vadd.f32 %v12477_v40, %v7737_v22  ;;  %v5892_v17 = vadd.f32 %v5716_v52, %v5033_v51  ;;  %v5252_v22 = vpack.c.bf16 %v9172_v39, %v9171_v5  ;;  %v12659_v51 = vpack.c.bf16 %v9580_v12, %v9579_v60  ;;  %v9176_v60 = vld [vmem:[%s9773_s29 + $0x508] sm:$0xff] }
 0x89b   : > { %v4859_v25 = vpop.f32.mrf.mxu1  ;;  %v9379_v12 = vld [vmem:[%s9773_s29 + $0x501] sm:$0xff] }
 0x89c   : > { %v7995_v10 = vmax.f32 %v7867_v31, 0.0  ;;  %v6750_v21 = vadd.f32 %v6574_v4, %v5892_v17  ;;  %v7434_v43 = vpop.f32.mrf.mxu0  ;;  %v5034_v54 = vadd.f32 %v4859_v25, %v13221_v53 }
 0x89e   : > { %8123 = vst.msk [vmem:[%s11451_s10 + $0x2f8] sm:$0xff] %vm577_vm0, %v7995_v10  ;;  %v7608_v49 = vadd.f32 %v7432_v50, %v6750_v21  ;;  %v13224_v10 = vld [vmem:[#allocation7_spill] sm:$0xff] }
 0x8a0   : > { %v7738_v62 = vmul.f32 %v12470_v8, %v7608_v49 }
 0x8a1   : > { %v5718_v27 = vpop.f32.mrf.mxu2 }
 0x8a2   : > { %v6576_v58 = vpop.f32.mrf.mxu3  ;;  %v7868_v61 = vadd.f32 %v12477_v40, %v7738_v62  ;;  %v5893_v47 = vadd.f32 %v5718_v27, %v5034_v54  ;;  %v9173_v54 = vld [vmem:[%s9773_s29 + $0x4e8] sm:$0xff]  ;;  %v9378_v27 = vld [vmem:[%s9773_s29 + $0x4f1] sm:$0xff] }
 0x8a3   : > { %v4862_v32 = vpop.f32.mrf.mxu1 }
 0x8a4   : > { %v7996_v24 = vmax.f32 %v7868_v61, 0.0  ;;  %v6751_v33 = vadd.f32 %v6576_v58, %v5893_v47  ;;  %v7437_v34 = vpop.f32.mrf.mxu0  ;;  %v5035_v11 = vadd.f32 %v4862_v32, %v13222_v46  ;;  %v13225_v61 = vld [vmem:[#allocation9_spill] sm:$0xff]  ;;  %v9581_v32 = vld [vmem:[%s9773_s29 + $0x4ea] sm:$0xff]  ;;  %v6111_v46 = vpack.c.bf16 %v9378_v27, %v9377_v44 }
 0x8a6   : > { %9048 = vmatmul.msk.bf16.gmra.mxu1 %vm577_vm0, %v12587_v28  ;;  %8124 = vst.msk [vmem:[%s11451_s10 + $0x300] sm:$0xff] %vm577_vm0, %v7996_v24  ;;  %v7609_v55 = vadd.f32 %v7434_v43, %v6751_v33  ;;  %9252 = vmatmul.msk.bf16.gmra.mxu2 %vm577_vm0, %v5251_v26  ;;  %v9582_v26 = vld [vmem:[%s9773_s29 + $0x4f2] sm:$0xff] }
 0x8a7   : > { %9456 = vmatmul.msk.bf16.gmra.mxu3 %vm577_vm0, %v6109_v14  ;;  %9660 = vmatmul.msk.bf16.gmra.mxu0 %vm577_vm0, %v12635_v13 }
 0x8a8   : > { %v7739_v29 = vmul.f32 %v12470_v8, %v7609_v55 }
 0x8a9   : > { %v5721_v28 = vpop.f32.mrf.mxu2 }
 0x8aa   : > { %v6579_v57 = vpop.f32.mrf.mxu3  ;;  %v7869_v9 = vadd.f32 %v12477_v40, %v7739_v29  ;;  %v5894_v18 = vadd.f32 %v5721_v28, %v5035_v11  ;;  %v5253_v29 = vpack.c.bf16 %v9174_v56, %v9173_v54  ;;  %v12683_v11 = vpack.c.bf16 %v9582_v26, %v9581_v32  ;;  %v9178_v32 = vld [vmem:[%s9773_s29 + $0x518] sm:$0xff] }
 0x8ab   : > { %v4864_v15 = vpop.f32.mrf.mxu1  ;;  %v9381_v26 = vld [vmem:[%s9773_s29 + $0x511] sm:$0xff] }
 0x8ac   : > { %v7997_v2 = vmax.f32 %v7869_v9, 0.0  ;;  %v6752_v41 = vadd.f32 %v6579_v57, %v5894_v18  ;;  %v7439_v59 = vpop.f32.mrf.mxu0  ;;  %v5036_v36 = vadd.f32 %v4864_v15, %v13223_v38 }
 0x8ae   : > { %8125 = vst.msk [vmem:[%s11451_s10 + $0x308] sm:$0xff] %vm577_vm0, %v7997_v2  ;;  %v7610_v37 = vadd.f32 %v7437_v34, %v6752_v41  ;;  %v13226_v2 = vld [vmem:[#allocation11_spill] sm:$0xff] }
 0x8b0   : > { %v7740_v7 = vmul.f32 %v12470_v8, %v7610_v37 }
 0x8b1   : > { %v5723_v19 = vpop.f32.mrf.mxu2 }
 0x8b2   : > { %v6581_v35 = vpop.f32.mrf.mxu3  ;;  %v7870_v42 = vadd.f32 %v12477_v40, %v7740_v7  ;;  %v5895_v50 = vadd.f32 %v5723_v19, %v5036_v36  ;;  %v9175_v36 = vld [vmem:[%s9773_s29 + $0x500] sm:$0xff]  ;;  %v9380_v19 = vld [vmem:[%s9773_s29 + $0x509] sm:$0xff] }
 0x8b3   : > { %v4867_v0 = vpop.f32.mrf.mxu1 }
 0x8b4   : > { %v7998_v52 = vmax.f32 %v7870_v42, 0.0  ;;  %v6753_v4 = vadd.f32 %v6581_v35, %v5895_v50  ;;  %v7442_v31 = vpop.f32.mrf.mxu0  ;;  %v5037_v21 = vadd.f32 %v4867_v0, %v13224_v10  ;;  %v13227_v42 = vld [vmem:[#allocation14_spill] sm:$0xff]  ;;  %v6112_v10 = vpack.c.bf16 %v9380_v19, %v9379_v12 }
 0x8b5   : > { %v9583_v0 = vld [vmem:[%s9773_s29 + $0x502] sm:$0xff] }
 0x8b6   : > { %9049 = vmatmul.msk.bf16.gmra.mxu1 %vm577_vm0, %v12611_v30  ;;  %8126 = vst.msk [vmem:[%s11451_s10 + $0x310] sm:$0xff] %vm577_vm0, %v7998_v52  ;;  %v7611_v17 = vadd.f32 %v7439_v59, %v6753_v4  ;;  %9253 = vmatmul.msk.bf16.gmra.mxu2 %vm577_vm0, %v5252_v22  ;;  %v9584_v22 = vld [vmem:[%s9773_s29 + $0x50a] sm:$0xff] }
 0x8b7   : > { %9457 = vmatmul.msk.bf16.gmra.mxu3 %vm577_vm0, %v6110_v45  ;;  %9661 = vmatmul.msk.bf16.gmra.mxu0 %vm577_vm0, %v12659_v51 }
 0x8b8   : > { %v7741_v25 = vmul.f32 %v12470_v8, %v7611_v17 }
 0x8b9   : > { %v5726_v30 = vpop.f32.mrf.mxu2 }
 0x8ba   : > { %v6584_v43 = vpop.f32.mrf.mxu3  ;;  %v7871_v49 = vadd.f32 %v12477_v40, %v7741_v25  ;;  %v5896_v16 = vadd.f32 %v5726_v30, %v5037_v21  ;;  %v5254_v25 = vpack.c.bf16 %v9176_v60, %v9175_v36  ;;  %v12707_v21 = vpack.c.bf16 %v9584_v22, %v9583_v0  ;;  %v9180_v0 = vld [vmem:[%s9773_s29 + $0x530] sm:$0xff] }
 0x8bb   : > { %v4869_v3 = vpop.f32.mrf.mxu1  ;;  %v9383_v22 = vld [vmem:[%s9773_s29 + $0x529] sm:$0xff] }
 0x8bc   : > { %v7999_v63 = vmax.f32 %v7871_v49, 0.0  ;;  %v6754_v23 = vadd.f32 %v6584_v43, %v5896_v16  ;;  %v7444_v62 = vpop.f32.mrf.mxu0  ;;  %v5038_v47 = vadd.f32 %v4869_v3, %v13225_v61 }
 0x8be   : > { %8127 = vst.msk [vmem:[%s11451_s10 + $0x318] sm:$0xff] %vm577_vm0, %v7999_v63  ;;  %v7612_v53 = vadd.f32 %v7442_v31, %v6754_v23  ;;  %v13228_v63 = vld [vmem:[#allocation17_spill] sm:$0xff] }
 0x8c0   : > { %v7742_v58 = vmul.f32 %v12470_v8, %v7612_v53 }
 0x8c1   : > { %v5728_v14 = vpop.f32.mrf.mxu2 }
 0x8c2   : > { %v6586_v24 = vpop.f32.mrf.mxu3  ;;  %v7872_v33 = vadd.f32 %v12477_v40, %v7742_v58  ;;  %v5897_v34 = vadd.f32 %v5728_v14, %v5038_v47  ;;  %v9177_v47 = vld [vmem:[%s9773_s29 + $0x510] sm:$0xff]  ;;  %v9382_v14 = vld [vmem:[%s9773_s29 + $0x519] sm:$0xff] }
 0x8c3   : > { %v4872_v55 = vpop.f32.mrf.mxu1 }
 0x8c4   : > { %v8000_v28 = vmax.f32 %v7872_v33, 0.0  ;;  %v6755_v57 = vadd.f32 %v6586_v24, %v5897_v34  ;;  %v7447_v9 = vpop.f32.mrf.mxu0  ;;  %v5039_v41 = vadd.f32 %v4872_v55, %v13226_v2  ;;  %v13229_v33 = vld [vmem:[#allocation20_spill] sm:$0xff]  ;;  %v6113_v2 = vpack.c.bf16 %v9382_v14, %v9381_v26 }
 0x8c5   : > { %v9585_v55 = vld [vmem:[%s9773_s29 + $0x512] sm:$0xff] }
 0x8c6   : > { %9050 = vmatmul.msk.bf16.gmra.mxu1 %vm577_vm0, %v12635_v13  ;;  %8128 = vst.msk [vmem:[%s11451_s10 + $0x320] sm:$0xff] %vm577_vm0, %v8000_v28  ;;  %v7613_v18 = vadd.f32 %v7444_v62, %v6755_v57  ;;  %9254 = vmatmul.msk.bf16.gmra.mxu2 %vm577_vm0, %v5253_v29  ;;  %v9586_v29 = vld [vmem:[%s9773_s29 + $0x51a] sm:$0xff] }
 0x8c7   : > { %9458 = vmatmul.msk.bf16.gmra.mxu3 %vm577_vm0, %v6111_v46  ;;  %9662 = vmatmul.msk.bf16.gmra.mxu0 %vm577_vm0, %v12683_v11 }
 0x8c8   : > { %v7743_v15 = vmul.f32 %v12470_v8, %v7613_v18 }
 0x8c9   : > { %v5731_v13 = vpop.f32.mrf.mxu2 }
 0x8ca   : > { %v6589_v59 = vpop.f32.mrf.mxu3  ;;  %v7873_v37 = vadd.f32 %v12477_v40, %v7743_v15  ;;  %v5898_v5 = vadd.f32 %v5731_v13, %v5039_v41  ;;  %v5255_v15 = vpack.c.bf16 %v9178_v32, %v9177_v47  ;;  %v12731_v41 = vpack.c.bf16 %v9586_v29, %v9585_v55  ;;  %v9182_v55 = vld [vmem:[%s9773_s29 + $0x540] sm:$0xff] }
 0x8cb   : > { %v4874_v39 = vpop.f32.mrf.mxu1  ;;  %v9385_v29 = vld [vmem:[%s9773_s29 + $0x539] sm:$0xff] }
 0x8cc   : > { %v8001_v20 = vmax.f32 %v7873_v37, 0.0  ;;  %v6756_v1 = vadd.f32 %v6589_v59, %v5898_v5  ;;  %v7449_v7 = vpop.f32.mrf.mxu0  ;;  %v5040_v50 = vadd.f32 %v4874_v39, %v13227_v42 }
 0x8ce   : > { %8129 = vst.msk [vmem:[%s11451_s10 + $0x328] sm:$0xff] %vm577_vm0, %v8001_v20  ;;  %v7614_v38 = vadd.f32 %v7447_v9, %v6756_v1  ;;  %v13230_v20 = vld [vmem:[#allocation23_spill] sm:$0xff] }
 0x8d0   : > { %v7744_v35 = vmul.f32 %v12470_v8, %v7614_v38 }
 0x8d1   : > { %v5733_v45 = vpop.f32.mrf.mxu2 }
 0x8d2   : > { %v6591_v52 = vpop.f32.mrf.mxu3  ;;  %v7874_v4 = vadd.f32 %v12477_v40, %v7744_v35  ;;  %v5899_v31 = vadd.f32 %v5733_v45, %v5040_v50  ;;  %v9179_v50 = vld [vmem:[%s9773_s29 + $0x528] sm:$0xff]  ;;  %v9384_v45 = vld [vmem:[%s9773_s29 + $0x531] sm:$0xff] }
 0x8d3   : > { %v4877_v17 = vpop.f32.mrf.mxu1 }
 0x8d4   : > { %v8002_v30 = vmax.f32 %v7874_v4, 0.0  ;;  %v6757_v43 = vadd.f32 %v6591_v52, %v5899_v31  ;;  %v7452_v49 = vpop.f32.mrf.mxu0  ;;  %v5041_v23 = vadd.f32 %v4877_v17, %v13228_v63  ;;  %v13231_v4 = vld [vmem:[#allocation26_spill] sm:$0xff]  ;;  %v9587_v17 = vld [vmem:[%s9773_s29 + $0x52a] sm:$0xff]  ;;  %v6114_v63 = vpack.c.bf16 %v9384_v45, %v9383_v22 }
 0x8d6   : > { %9051 = vmatmul.msk.bf16.gmra.mxu1 %vm577_vm0, %v12659_v51  ;;  %8130 = vst.msk [vmem:[%s11451_s10 + $0x330] sm:$0xff] %vm577_vm0, %v8002_v30  ;;  %v7615_v16 = vadd.f32 %v7449_v7, %v6757_v43  ;;  %9255 = vmatmul.msk.bf16.gmra.mxu2 %vm577_vm0, %v5254_v25  ;;  %v9588_v25 = vld [vmem:[%s9773_s29 + $0x532] sm:$0xff] }
 0x8d7   : > { %9459 = vmatmul.msk.bf16.gmra.mxu3 %vm577_vm0, %v6112_v10  ;;  %9663 = vmatmul.msk.bf16.gmra.mxu0 %vm577_vm0, %v12707_v21 }
 0x8d8   : > { %v7745_v3 = vmul.f32 %v12470_v8, %v7615_v16 }
 0x8d9   : > { %v5736_v51 = vpop.f32.mrf.mxu2 }
 0x8da   : > { %v6594_v62 = vpop.f32.mrf.mxu3  ;;  %v7875_v53 = vadd.f32 %v12477_v40, %v7745_v3  ;;  %v5900_v54 = vadd.f32 %v5736_v51, %v5041_v23  ;;  %v5256_v3 = vpack.c.bf16 %v9180_v0, %v9179_v50  ;;  %v6972_v23 = vpack.c.bf16 %v9588_v25, %v9587_v17  ;;  %v13235_v17 = vld [vmem:[#allocation38_spill] sm:$0xff] }
 0x8db   : > { %v4879_v56 = vpop.f32.mrf.mxu1 }
 0x8dc   : > { %v8003_v44 = vmax.f32 %v7875_v53, 0.0  ;;  %v6758_v27 = vadd.f32 %v6594_v62, %v5900_v54  ;;  %v7454_v58 = vpop.f32.mrf.mxu0  ;;  %v5042_v34 = vadd.f32 %v4879_v56, %v13229_v33 }
 0x8de   : > { %8131 = vst.msk [vmem:[%s11451_s10 + $0x338] sm:$0xff] %vm577_vm0, %v8003_v44  ;;  %v7616_v61 = vadd.f32 %v7452_v49, %v6758_v27  ;;  %v13232_v44 = vld [vmem:[#allocation29_spill] sm:$0xff] }
 0x8e0   : > { %v7746_v24 = vmul.f32 %v12470_v8, %v7616_v61 }
 0x8e1   : > { %v5738_v46 = vpop.f32.mrf.mxu2 }
 0x8e2   : > { %v6596_v28 = vpop.f32.mrf.mxu3  ;;  %v7876_v57 = vadd.f32 %v12477_v40, %v7746_v24  ;;  %v5901_v9 = vadd.f32 %v5738_v46, %v5042_v34  ;;  %v9181_v34 = vld [vmem:[%s9773_s29 + $0x538] sm:$0xff]  ;;  %v9386_v46 = vld [vmem:[%s9773_s29 + $0x541] sm:$0xff] }
 0x8e3   : > { %v4882_v18 = vpop.f32.mrf.mxu1 }
 0x8e4   : > { %v8004_v13 = vmax.f32 %v7876_v57, 0.0  ;;  %v6759_v59 = vadd.f32 %v6596_v28, %v5901_v9  ;;  %v7457_v37 = vpop.f32.mrf.mxu0  ;;  %v5043_v1 = vadd.f32 %v4882_v18, %v13230_v20  ;;  %v13233_v57 = vld [vmem:[#allocation32_spill] sm:$0xff]  ;;  %v9589_v18 = vld [vmem:[%s9773_s29 + $0x53a] sm:$0xff]  ;;  %v6115_v20 = vpack.c.bf16 %v9386_v46, %v9385_v29 }
 0x8e6   : > { %9052 = vmatmul.msk.bf16.gmra.mxu1 %vm577_vm0, %v12683_v11  ;;  %8132 = vst.msk [vmem:[%s11451_s10 + $0x340] sm:$0xff] %vm577_vm0, %v8004_v13  ;;  %v7617_v5 = vadd.f32 %v7454_v58, %v6759_v59  ;;  %9256 = vmatmul.msk.bf16.gmra.mxu2 %vm577_vm0, %v5255_v15  ;;  %v9590_v15 = vld [vmem:[%s9773_s29 + $0x542] sm:$0xff] }
 0x8e7   : > { %9460 = vmatmul.msk.bf16.gmra.mxu3 %vm577_vm0, %v6113_v2  ;;  %9664 = vmatmul.msk.bf16.gmra.mxu0 %vm577_vm0, %v12731_v41 }
 0x8e8   : > { %v7747_v39 = vmul.f32 %v12470_v8, %v7617_v5 }
 0x8e9   : > { %v5741_v11 = vpop.f32.mrf.mxu2 }
 0x8ea   : > { %v6599_v7 = vpop.f32.mrf.mxu3  ;;  %v7877_v38 = vadd.f32 %v12477_v40, %v7747_v39  ;;  %v5902_v36 = vadd.f32 %v5741_v11, %v5043_v1  ;;  %v5257_v39 = vpack.c.bf16 %v9182_v55, %v9181_v34  ;;  %v6973_v1 = vpack.c.bf16 %v9590_v15, %v9589_v18  ;;  %v12808_v55 = vld [vmem:[%s12892_s2 + $0x1] ss:$0 sm:$0xff] }
 0x8eb   : > { %v4884_v60 = vpop.f32.mrf.mxu1 }
 0x8ec   : > { %v8005_v12 = vmax.f32 %v7877_v38, 0.0  ;;  %v6760_v19 = vadd.f32 %v6599_v7, %v5902_v36  ;;  %v7459_v35 = vpop.f32.mrf.mxu0  ;;  %v5044_v31 = vadd.f32 %v4884_v60, %v13231_v4 }
 0x8ee   : > { %8133 = vst.msk [vmem:[%s11451_s10 + $0x348] sm:$0xff] %vm577_vm0, %v8005_v12  ;;  %v7618_v42 = vadd.f32 %v7457_v37, %v6760_v19  ;;  %v13234_v12 = vld [vmem:[#allocation35_spill] sm:$0xff] }
 0x8f0   : > { %v7748_v52 = vmul.f32 %v12470_v8, %v7618_v42 }
 0x8f1   : > { %v5743_v10 = vpop.f32.mrf.mxu2 }
 0x8f2   : > { %v6601_v30 = vpop.f32.mrf.mxu3  ;;  %v7878_v43 = vadd.f32 %v12477_v40, %v7748_v52  ;;  %v5903_v49 = vadd.f32 %v5743_v10, %v5044_v31 }
 0x8f3   : > { %v4887_v16 = vpop.f32.mrf.mxu1 }
 0x8f4   : > { %v8006_v51 = vmax.f32 %v7878_v43, 0.0  ;;  %v6761_v62 = vadd.f32 %v6601_v30, %v5903_v49  ;;  %v7462_v53 = vpop.f32.mrf.mxu0  ;;  %v5045_v27 = vadd.f32 %v4887_v16, %v13232_v44 }
 0x8f6   : > { %9053 = vmatmul.msk.bf16.gmra.mxu1 %vm577_vm0, %v12707_v21  ;;  %8134 = vst.msk [vmem:[%s11451_s10 + $0x350] sm:$0xff] %vm577_vm0, %v8006_v51  ;;  %v7619_v54 = vadd.f32 %v7459_v35, %v6761_v62  ;;  %9257 = vmatmul.msk.bf16.gmra.mxu2 %vm577_vm0, %v5256_v3 }
 0x8f7   : > { %9461 = vmatmul.msk.bf16.gmra.mxu3 %vm577_vm0, %v6114_v63  ;;  %9665 = vmatmul.msk.bf16.gmra.mxu0 %vm577_vm0, %v6972_v23 }
 0x8f8   : > { %v7749_v56 = vmul.f32 %v12470_v8, %v7619_v54 }
 0x8f9   : > { %v5746_v58 = vpop.f32.mrf.mxu2 }
 0x8fa   : > { %v6604_v21 = vpop.f32.mrf.mxu3  ;;  %v7879_v61 = vadd.f32 %v12477_v40, %v7749_v56  ;;  %v5904_v47 = vadd.f32 %v5746_v58, %v5045_v27 }
 0x8fb   : > { %v4889_v32 = vpop.f32.mrf.mxu1 }
 0x8fc   : > { %v8007_v26 = vmax.f32 %v7879_v61, 0.0  ;;  %v6762_v14 = vadd.f32 %v6604_v21, %v5904_v47  ;;  %v7464_v24 = vpop.f32.mrf.mxu0  ;;  %v5046_v9 = vadd.f32 %v4889_v32, %v13233_v57 }
 0x8fe   : > { %8135 = vst.msk [vmem:[%s11451_s10 + $0x358] sm:$0xff] %vm577_vm0, %v8007_v26  ;;  %v7620_v33 = vadd.f32 %v7462_v53, %v6762_v14  ;;  %v13236_v53 = vld [vmem:[#allocation41_spill] sm:$0xff]  ;;  %v12801_v14 = vld [vmem:[%s12892_s2] ss:$0 sm:$0xff] }
 0x900   : > { %v7750_v28 = vmul.f32 %v12470_v8, %v7620_v33 }
 0x901   : > { %v5748_v2 = vpop.f32.mrf.mxu2 }
 0x902   : > { %v6606_v13 = vpop.f32.mrf.mxu3  ;;  %v7880_v59 = vadd.f32 %v12477_v40, %v7750_v28  ;;  %v5905_v37 = vadd.f32 %v5748_v2, %v5046_v9 }
 0x903   : > { %v4892_v5 = vpop.f32.mrf.mxu1 }
 0x904   : > { %v8008_v11 = vmax.f32 %v7880_v59, 0.0  ;;  %v6763_v7 = vadd.f32 %v6606_v13, %v5905_v37  ;;  %v7467_v38 = vpop.f32.mrf.mxu0  ;;  %v5047_v19 = vadd.f32 %v4892_v5, %v13234_v12  ;;  %v13238_v13 = vld [vmem:[#allocation47_spill] sm:$0xff]  ;;  %v13239_v12 = vld [vmem:[#allocation50_spill] sm:$0xff] }
 0x906   : > { %9054 = vmatmul.msk.bf16.gmra.mxu1 %vm577_vm0, %v12731_v41  ;;  %8136 = vst.msk [vmem:[%s11451_s10 + $0x360] sm:$0xff] %vm577_vm0, %v8008_v11  ;;  %v7621_v36 = vadd.f32 %v7464_v24, %v6763_v7  ;;  %9258 = vmatmul.msk.bf16.gmra.mxu2 %vm577_vm0, %v5257_v39  ;;  %v13237_v24 = vld [vmem:[#allocation44_spill] sm:$0xff] }
 0x907   : > { %9462 = vmatmul.msk.bf16.gmra.mxu3 %vm577_vm0, %v6115_v20  ;;  %9666 = vmatmul.msk.bf16.gmra.mxu0 %vm577_vm0, %v6973_v1 }
 0x908   : > { %v7751_v60 = vmul.f32 %v12470_v8, %v7621_v36 }
 0x909   : > { %v5751_v35 = vpop.f32.mrf.mxu2 }
 0x90a   : > { %v6609_v42 = vpop.f32.mrf.mxu3  ;;  %v7881_v50 = vadd.f32 %v12477_v40, %v7751_v60  ;;  %v5906_v0 = vadd.f32 %v5751_v35, %v5047_v19 }
 0x90b   : > { %v4894_v41 = vpop.f32.mrf.mxu1 }
 0x90c   : > { %v8009_v22 = vmax.f32 %v7881_v50, 0.0  ;;  %v6764_v45 = vadd.f32 %v6609_v42, %v5906_v0  ;;  %v7469_v52 = vpop.f32.mrf.mxu0  ;;  %v5048_v25 = vadd.f32 %v4894_v41, %v13235_v17  ;;  %v13240_v17 = vld [vmem:[#allocation53_spill] sm:$0xff] }
 0x90e   : > { %8137 = vst.msk [vmem:[%s11451_s10 + $0x368] sm:$0xff] %vm577_vm0, %v8009_v22  ;;  %v7622_v4 = vadd.f32 %v7467_v38, %v6764_v45 }
 0x910   : > { %v7752_v31 = vmul.f32 %v12470_v8, %v7622_v4 }
 0x911   : > { %v5753_v10 = vpop.f32.mrf.mxu2 }
 0x912   : > { %v6611_v30 = vpop.f32.mrf.mxu3  ;;  %v7882_v43 = vadd.f32 %v12477_v40, %v7752_v31  ;;  %v5907_v49 = vadd.f32 %v5753_v10, %v5048_v25 }
 0x913   : > { %v4897_v16 = vpop.f32.mrf.mxu1 }
 0x914   : > { %v8010_v3 = vmax.f32 %v7882_v43, 0.0  ;;  %v6765_v63 = vadd.f32 %v6611_v30, %v5907_v49  ;;  %v7472_v23 = vpop.f32.mrf.mxu0  ;;  %v5049_v54 = vadd.f32 %v4897_v16, %v13236_v53  ;;  %v13241_v53 = vld [vmem:[#allocation56_spill] sm:$0xff] }
 0x916   : > { %8138 = vst.msk [vmem:[%s11451_s10 + $0x370] sm:$0xff] %vm577_vm0, %v8010_v3  ;;  %v7623_v51 = vadd.f32 %v7469_v52, %v6765_v63 }
 0x918   : > { %v7753_v62 = vmul.f32 %v12470_v8, %v7623_v51 }
 0x919   : > { %v5756_v56 = vpop.f32.mrf.mxu2 }
 0x91a   : > { %v6614_v44 = vpop.f32.mrf.mxu3  ;;  %v7883_v27 = vadd.f32 %v12477_v40, %v7753_v62  ;;  %v5908_v58 = vadd.f32 %v5756_v56, %v5049_v54 }
 0x91b   : > { %v4899_v21 = vpop.f32.mrf.mxu1 }
 0x91c   : > { %v8011_v61 = vmax.f32 %v7883_v27, 0.0  ;;  %v6766_v47 = vadd.f32 %v6614_v44, %v5908_v58  ;;  %v7474_v32 = vpop.f32.mrf.mxu0  ;;  %v5050_v33 = vadd.f32 %v4899_v21, %v13237_v24  ;;  %v13242_v24 = vld [vmem:[#allocation59_spill] sm:$0xff] }
 0x91e   : > { %8139 = vst.msk [vmem:[%s11451_s10 + $0x378] sm:$0xff] %vm577_vm0, %v8011_v61  ;;  %v7624_v26 = vadd.f32 %v7472_v23, %v6766_v47 }
 0x920   : > { %v7754_v8 = vmul.f32 %v12801_v14, %v7624_v26 }
 0x921   : > { %v5758_v34 = vpop.f32.mrf.mxu2 }
 0x922   : > { %v6616_v40 = vpop.f32.mrf.mxu3  ;;  %v7884_v29 = vadd.f32 %v12808_v55, %v7754_v8  ;;  %v5909_v46 = vadd.f32 %v5758_v34, %v5050_v33 }
 0x923   : > { %v4902_v28 = vpop.f32.mrf.mxu1 }
 0x924   : > { %v8012_v57 = vmax.f32 %v7884_v29, 0.0  ;;  %v6767_v9 = vadd.f32 %v6616_v40, %v5909_v46  ;;  %v7477_v18 = vpop.f32.mrf.mxu0  ;;  %v5051_v59 = vadd.f32 %v4902_v28, %v13238_v13  ;;  %v13243_v13 = vld [vmem:[#allocation62_spill] sm:$0xff] }
 0x926   : > { %8140 = vst.msk [vmem:[%s11451_s10 + $0x380] sm:$0xff] %vm577_vm0, %v8012_v57  ;;  %v7625_v15 = vadd.f32 %v7474_v32, %v6767_v9 }
 0x928   : > { %v7755_v2 = vmul.f32 %v12801_v14, %v7625_v15 }
 0x929   : > { %v5761_v37 = vpop.f32.mrf.mxu2 }
 0x92a   : > { %v6619_v5 = vpop.f32.mrf.mxu3  ;;  %v7885_v39 = vadd.f32 %v12808_v55, %v7755_v2  ;;  %v5910_v20 = vadd.f32 %v5761_v37, %v5051_v59 }
 0x92b   : > { %v4904_v1 = vpop.f32.mrf.mxu1 }
 0x92c   : > { %v8013_v11 = vmax.f32 %v7885_v39, 0.0  ;;  %v6768_v7 = vadd.f32 %v6619_v5, %v5910_v20  ;;  %v7479_v38 = vpop.f32.mrf.mxu0  ;;  %v5052_v19 = vadd.f32 %v4904_v1, %v13239_v12  ;;  %v13244_v12 = vld [vmem:[#allocation65_spill] sm:$0xff] }
 0x92e   : > { %8141 = vst.msk [vmem:[%s11451_s10 + $0x388] sm:$0xff] %vm577_vm0, %v8013_v11  ;;  %v7626_v36 = vadd.f32 %v7477_v18, %v6768_v7 }
 0x930   : > { %v7756_v60 = vmul.f32 %v12801_v14, %v7626_v36 }
 0x931   : > { %v5763_v35 = vpop.f32.mrf.mxu2 }
 0x932   : > { %v6621_v42 = vpop.f32.mrf.mxu3  ;;  %v7886_v50 = vadd.f32 %v12808_v55, %v7756_v60  ;;  %v5911_v0 = vadd.f32 %v5763_v35, %v5052_v19 }
 0x933   : > { %v4907_v41 = vpop.f32.mrf.mxu1 }
 0x934   : > { %v8014_v22 = vmax.f32 %v7886_v50, 0.0  ;;  %v6769_v45 = vadd.f32 %v6621_v42, %v5911_v0  ;;  %v7482_v52 = vpop.f32.mrf.mxu0  ;;  %v5053_v25 = vadd.f32 %v4907_v41, %v13240_v17  ;;  %v13245_v17 = vld [vmem:[#allocation68_spill] sm:$0xff] }
 0x936   : > { %8142 = vst.msk [vmem:[%s11451_s10 + $0x390] sm:$0xff] %vm577_vm0, %v8014_v22  ;;  %v7627_v4 = vadd.f32 %v7479_v38, %v6769_v45 }
 0x938   : > { %v7757_v31 = vmul.f32 %v12801_v14, %v7627_v4 }
 0x939   : > { %v5766_v10 = vpop.f32.mrf.mxu2 }
 0x93a   : > { %v6624_v30 = vpop.f32.mrf.mxu3  ;;  %v7887_v43 = vadd.f32 %v12808_v55, %v7757_v31  ;;  %v5912_v49 = vadd.f32 %v5766_v10, %v5053_v25 }
 0x93b   : > { %v4909_v16 = vpop.f32.mrf.mxu1 }
 0x93c   : > { %v8015_v3 = vmax.f32 %v7887_v43, 0.0  ;;  %v6770_v63 = vadd.f32 %v6624_v30, %v5912_v49  ;;  %v7484_v23 = vpop.f32.mrf.mxu0  ;;  %v5054_v54 = vadd.f32 %v4909_v16, %v13241_v53  ;;  %v13246_v53 = vld [vmem:[#allocation71_spill] sm:$0xff] }
 0x93e   : > { %8143 = vst.msk [vmem:[%s11451_s10 + $0x398] sm:$0xff] %vm577_vm0, %v8015_v3  ;;  %v7628_v51 = vadd.f32 %v7482_v52, %v6770_v63 }
 0x940   : > { %v7758_v62 = vmul.f32 %v12801_v14, %v7628_v51 }
 0x941   : > { %v5768_v56 = vpop.f32.mrf.mxu2 }
 0x942   : > { %v6626_v44 = vpop.f32.mrf.mxu3  ;;  %v7888_v27 = vadd.f32 %v12808_v55, %v7758_v62  ;;  %v5913_v58 = vadd.f32 %v5768_v56, %v5054_v54 }
 0x943   : > { %v4912_v21 = vpop.f32.mrf.mxu1 }
 0x944   : > { %v8016_v61 = vmax.f32 %v7888_v27, 0.0  ;;  %v6771_v47 = vadd.f32 %v6626_v44, %v5913_v58  ;;  %v7487_v32 = vpop.f32.mrf.mxu0  ;;  %v5055_v33 = vadd.f32 %v4912_v21, %v13242_v24  ;;  %v13247_v24 = vld [vmem:[#allocation74_spill] sm:$0xff] }
 0x946   : > { %8144 = vst.msk [vmem:[%s11451_s10 + $0x3a0] sm:$0xff] %vm577_vm0, %v8016_v61  ;;  %v7629_v26 = vadd.f32 %v7484_v23, %v6771_v47 }
 0x948   : > { %v7759_v8 = vmul.f32 %v12801_v14, %v7629_v26 }
 0x949   : > { %v5771_v34 = vpop.f32.mrf.mxu2 }
 0x94a   : > { %v6629_v40 = vpop.f32.mrf.mxu3  ;;  %v7889_v29 = vadd.f32 %v12808_v55, %v7759_v8  ;;  %v5914_v46 = vadd.f32 %v5771_v34, %v5055_v33 }
 0x94b   : > { %v4914_v28 = vpop.f32.mrf.mxu1 }
 0x94c   : > { %v8017_v57 = vmax.f32 %v7889_v29, 0.0  ;;  %v6772_v9 = vadd.f32 %v6629_v40, %v5914_v46  ;;  %v7489_v18 = vpop.f32.mrf.mxu0  ;;  %v5056_v59 = vadd.f32 %v4914_v28, %v13243_v13  ;;  %v13248_v13 = vld [vmem:[#allocation77_spill] sm:$0xff] }
 0x94e   : > { %8145 = vst.msk [vmem:[%s11451_s10 + $0x3a8] sm:$0xff] %vm577_vm0, %v8017_v57  ;;  %v7630_v15 = vadd.f32 %v7487_v32, %v6772_v9 }
 0x950   : > { %v7760_v2 = vmul.f32 %v12801_v14, %v7630_v15 }
 0x951   : > { %v5773_v37 = vpop.f32.mrf.mxu2 }
 0x952   : > { %v6631_v5 = vpop.f32.mrf.mxu3  ;;  %v7890_v39 = vadd.f32 %v12808_v55, %v7760_v2  ;;  %v5915_v20 = vadd.f32 %v5773_v37, %v5056_v59 }
 0x953   : > { %v4917_v1 = vpop.f32.mrf.mxu1 }
 0x954   : > { %v8018_v11 = vmax.f32 %v7890_v39, 0.0  ;;  %v6773_v7 = vadd.f32 %v6631_v5, %v5915_v20  ;;  %v7492_v38 = vpop.f32.mrf.mxu0  ;;  %v5057_v19 = vadd.f32 %v4917_v1, %v13244_v12 }
 0x956   : > { %8146 = vst.msk [vmem:[%s11451_s10 + $0x3b0] sm:$0xff] %vm577_vm0, %v8018_v11  ;;  %v7631_v36 = vadd.f32 %v7489_v18, %v6773_v7 }
 0x958   : > { %v7761_v60 = vmul.f32 %v12801_v14, %v7631_v36 }
 0x959   : > { %v5776_v35 = vpop.f32.mrf.mxu2 }
 0x95a   : > { %v6634_v42 = vpop.f32.mrf.mxu3  ;;  %v7891_v50 = vadd.f32 %v12808_v55, %v7761_v60  ;;  %v5916_v0 = vadd.f32 %v5776_v35, %v5057_v19  ;;  %v13249_v60 = vld [vmem:[#allocation80_spill] sm:$0xff] }
 0x95b   : > { %v4919_v41 = vpop.f32.mrf.mxu1 }
 0x95c   : > { %v8019_v22 = vmax.f32 %v7891_v50, 0.0  ;;  %v6774_v45 = vadd.f32 %v6634_v42, %v5916_v0  ;;  %v7494_v52 = vpop.f32.mrf.mxu0  ;;  %v5058_v25 = vadd.f32 %v4919_v41, %v13245_v17 }
 0x95e   : > { %8147 = vst.msk [vmem:[%s11451_s10 + $0x3b8] sm:$0xff] %vm577_vm0, %v8019_v22  ;;  %v7632_v4 = vadd.f32 %v7492_v38, %v6774_v45 }
 0x960   : > { %v7762_v31 = vmul.f32 %v12801_v14, %v7632_v4 }
 0x961   : > { %v5778_v10 = vpop.f32.mrf.mxu2 }
 0x962   : > { %v6636_v30 = vpop.f32.mrf.mxu3  ;;  %v7892_v43 = vadd.f32 %v12808_v55, %v7762_v31  ;;  %v5917_v49 = vadd.f32 %v5778_v10, %v5058_v25 }
 0x963   : > { %v4922_v16 = vpop.f32.mrf.mxu1 }
 0x964   : > { %v8020_v3 = vmax.f32 %v7892_v43, 0.0  ;;  %v6775_v63 = vadd.f32 %v6636_v30, %v5917_v49  ;;  %v7497_v23 = vpop.f32.mrf.mxu0  ;;  %v5059_v54 = vadd.f32 %v4922_v16, %v13246_v53 }
 0x966   : > { %8148 = vst.msk [vmem:[%s11451_s10 + $0x3c0] sm:$0xff] %vm577_vm0, %v8020_v3  ;;  %v7633_v51 = vadd.f32 %v7494_v52, %v6775_v63 }
 0x968   : > { %v7763_v62 = vmul.f32 %v12801_v14, %v7633_v51 }
 0x969   : > { %v5781_v56 = vpop.f32.mrf.mxu2 }
 0x96a   : > { %v6639_v44 = vpop.f32.mrf.mxu3  ;;  %v7893_v27 = vadd.f32 %v12808_v55, %v7763_v62  ;;  %v5918_v58 = vadd.f32 %v5781_v56, %v5059_v54 }
 0x96b   : > { %v4924_v21 = vpop.f32.mrf.mxu1 }
 0x96c   : > { %v8021_v61 = vmax.f32 %v7893_v27, 0.0  ;;  %v6776_v47 = vadd.f32 %v6639_v44, %v5918_v58  ;;  %v7499_v32 = vpop.f32.mrf.mxu0  ;;  %v5060_v33 = vadd.f32 %v4924_v21, %v13247_v24 }
 0x96e   : > { %8149 = vst.msk [vmem:[%s11451_s10 + $0x3c8] sm:$0xff] %vm577_vm0, %v8021_v61  ;;  %v7634_v26 = vadd.f32 %v7497_v23, %v6776_v47 }
 0x970   : > { %v7764_v8 = vmul.f32 %v12801_v14, %v7634_v26 }
 0x971   : > { %v5783_v34 = vpop.f32.mrf.mxu2 }
 0x972   : > { %v6641_v40 = vpop.f32.mrf.mxu3  ;;  %v7894_v29 = vadd.f32 %v12808_v55, %v7764_v8  ;;  %v5919_v46 = vadd.f32 %v5783_v34, %v5060_v33 }
 0x973   : > { %v4927_v28 = vpop.f32.mrf.mxu1 }
 0x974   : > { %v8022_v57 = vmax.f32 %v7894_v29, 0.0  ;;  %v6777_v9 = vadd.f32 %v6641_v40, %v5919_v46  ;;  %v7502_v15 = vpop.f32.mrf.mxu0  ;;  %v5061_v59 = vadd.f32 %v4927_v28, %v13248_v13 }
 0x976   : > { %8150 = vst.msk [vmem:[%s11451_s10 + $0x3d0] sm:$0xff] %vm577_vm0, %v8022_v57  ;;  %v7635_v18 = vadd.f32 %v7499_v32, %v6777_v9 }
 0x978   : > { %v7765_v2 = vmul.f32 %v12801_v14, %v7635_v18 }
 0x979   : > { %v5786_v37 = vpop.f32.mrf.mxu2 }
 0x97a   : > { %v6644_v5 = vpop.f32.mrf.mxu3  ;;  %v7895_v39 = vadd.f32 %v12808_v55, %v7765_v2  ;;  %v5920_v20 = vadd.f32 %v5786_v37, %v5061_v59 }
 0x97b   : > { %v4929_v1 = vpop.f32.mrf.mxu1 }
 0x97c   : > { %v8023_v11 = vmax.f32 %v7895_v39, 0.0  ;;  %v6778_v7 = vadd.f32 %v6644_v5, %v5920_v20  ;;  %v5062_v12 = vadd.f32 %v4929_v1, %v13249_v60  ;;  %v7504_v19 = vpop.f32.mrf.mxu0 }
 0x97e   : > { %8151 = vst.msk [vmem:[%s11451_s10 + $0x3d8] sm:$0xff] %vm577_vm0, %v8023_v11  ;;  %v7636_v38 = vadd.f32 %v7502_v15, %v6778_v7 }
 0x980   : > { %v7766_v36 = vmul.f32 %v12801_v14, %v7636_v38 }
 0x981   : > { %v5788_v35 = vpop.f32.mrf.mxu2 }
 0x982   : > { %v6646_v42 = vpop.f32.mrf.mxu3  ;;  %v7896_v50 = vadd.f32 %v12808_v55, %v7766_v36  ;;  %v5921_v0 = vadd.f32 %v5788_v35, %v5062_v12 }
 0x983   : > { %v4932_v41 = vpop.f32.mrf.mxu1 }
 0x984   : > { %v8024_v22 = vmax.f32 %v7896_v50, 0.0  ;;  %v6779_v45 = vadd.f32 %v6646_v42, %v5921_v0  ;;  %v5063_v31 = vadd.f32 %v4932_v41, %v11410_v6  ;;  %v7507_v43 = vpop.f32.mrf.mxu0 }
 0x986   : > { %8152 = vst.msk [vmem:[%s11451_s10 + $0x3e0] sm:$0xff] %vm577_vm0, %v8024_v22  ;;  %v7637_v52 = vadd.f32 %v7504_v19, %v6779_v45 }
 0x988   : > { %v7767_v4 = vmul.f32 %v12801_v14, %v7637_v52 }
 0x989   : > { %v5791_v17 = vpop.f32.mrf.mxu2 }
 0x98a   : > { %v6649_v25 = vpop.f32.mrf.mxu3  ;;  %v7897_v10 = vadd.f32 %v12808_v55, %v7767_v4  ;;  %v5922_v30 = vadd.f32 %v5791_v17, %v5063_v31 }
 0x98b   : > { %v4934_v3 = vpop.f32.mrf.mxu1 }
 0x98c   : > { %v8025_v49 = vmax.f32 %v7897_v10, 0.0  ;;  %v6780_v16 = vadd.f32 %v6649_v25, %v5922_v30  ;;  %v5064_v51 = vadd.f32 %v4934_v3, %v11423_v48  ;;  %v7509_v27 = vpop.f32.mrf.mxu0 }
 0x98e   : > { %8153 = vst.msk [vmem:[%s11451_s10 + $0x3e8] sm:$0xff] %vm577_vm0, %v8025_v49  ;;  %v7638_v63 = vadd.f32 %v7507_v43, %v6780_v16 }
 0x990   : > { %v7768_v23 = vmul.f32 %v12801_v14, %v7638_v63 }
 0x991   : > { %v5793_v62 = vpop.f32.mrf.mxu2 }
 0x992   : > { %v7898_v6 = vadd.f32 %v12808_v55, %v7768_v23  ;;  %v5923_v53 = vadd.f32 %v5793_v62, %v5064_v51  ;;  %v6651_v54 = vpop.f32.mrf.mxu3 }
 0x994   : > { %v8026_v56 = vmax.f32 %v7898_v6, 0.0  ;;  %v6781_v44 = vadd.f32 %v6651_v54, %v5923_v53 }
 0x996   : > { %8154 = vst.msk [vmem:[%s11451_s10 + $0x3f0] sm:$0xff] %vm577_vm0, %v8026_v56  ;;  %v7639_v58 = vadd.f32 %v7509_v27, %v6781_v44 }
 0x998   : > { %v7769_v21 = vmul.f32 %v12801_v14, %v7639_v58 }
 0x99a   : > { %v7899_v61 = vadd.f32 %v12808_v55, %v7769_v21 }
 0x99c   : > { %v8027_v47 = vmax.f32 %v7899_v61, 0.0 }
 0x99e   : > { %8155 = vst.msk [vmem:[%s11451_s10 + $0x3f8] sm:$0xff] %vm577_vm0, %v8027_v47 }
 0x99f PF: > { %s13_s12 = sadd.s32 1, %s9719_s12  }
 0x9a0   : > { %p10_p4 = scmp.ge.s32.totalorder %s13_s12, 4  }
 0x9a2   :  { %12 = sbr.rel (!%p10_p4) target bundleno = 1 (0x1), region = 72 }

</bundles_post_ra>
